<compile_context>
chip_gen: v5e
topology: v5e:2x2
jax: 0.10.0
libtpu: 0.0.40
codegen_flags: <defaults>
</compile_context>

<pallas_src>
import functools
import math

import jax
import jax.numpy as jnp
from jax import lax
from jax.experimental import pallas as pl
from jax.experimental.pallas import tpu as pltpu

# ----------------------------- configuration -------------------------------
B = 2
IMG_C, IMG_HW, PATCH = 3, 32, 16
NUM_PATCHES = (IMG_HW // PATCH) ** 2          # 4
SEQ = NUM_PATCHES + 1                         # 5 (CLS + patches)
SEQ_PAD = ((SEQ + 7) // 8) * 8                # 8: sublane-aligned sequence
VIS_WIDTH = 128                               # 768 at reference scale
HEADS = 4
HEAD_DIM = VIS_WIDTH // HEADS                 # 32
LAYERS = 3                                    # 12 at reference scale
EMBED_DIM = 128                               # 512 at reference scale
TXT_WIDTH = 128                               # 512 at reference scale
N_CLASSES = 4
N_TEMPLATES = 2
MLP_HIDDEN = 512                              # hard-coded in the reference MLP
LN_EPS = 1e-5


# --------------------------- in-kernel helpers ------------------------------
def _ln_rows(x, g, b):
    """LayerNorm over the last axis in f32. g/b broadcast rows."""
    mu = jnp.mean(x, axis=-1, keepdims=True)
    xc = x - mu
    var = jnp.mean(xc * xc, axis=-1, keepdims=True)
    return xc * lax.rsqrt(var + LN_EPS) * g + b


# ------------------------------ stem kernel ---------------------------------
def _stem_kernel(tok_ref, w_ref, pos_ref, g_ref, b_ref, o_ref, *, batch, seq_pad):
    # tok: [B*S_pad, C*p*p] (CLS slot + pad rows are zero; CLS embedding folded
    # into pos row 0 -- valid because conv1 is bias-free), w: [C*p*p, d] bf16,
    # pos: [S_pad, d], out: [B*S_pad, d].
    d = o_ref.shape[-1]
    t = jnp.dot(tok_ref[...].astype(jnp.bfloat16), w_ref[...],
                preferred_element_type=jnp.float32)                  # [R, d]
    t = (t.reshape(batch, seq_pad, d) + pos_ref[...]).reshape(batch * seq_pad, d)
    o_ref[...] = _ln_rows(t, g_ref[...], b_ref[...])                 # ln_pre


def pallas_stem(tok, conv_w, pos, gamma, beta, batch):
    rows = batch * SEQ_PAD
    return pl.pallas_call(
        functools.partial(_stem_kernel, batch=batch, seq_pad=SEQ_PAD),
        out_shape=jax.ShapeDtypeStruct((rows, VIS_WIDTH), jnp.float32),
    )(tok, conv_w, pos, gamma, beta)


# ---------------- full visual transformer: one grid=(LAYERS,) call ----------
def _transformer_kernel(x0_ref, g1_ref, b1_ref, wqkv_ref, bqkv_ref,
                        wo_ref, bo_ref, g2_ref, b2_ref,
                        wfc_ref, bfc_ref, wpr_ref, bpr_ref,
                        cls_ref, acc_ref, *, heads, batch, seq_pad, seq_valid):
    l = pl.program_id(0)

    @pl.when(l == 0)
    def _():
        acc_ref[...] = x0_ref[...]          # residual stream stays in VMEM

    R, d = acc_ref.shape
    hd = d // heads
    scale = 1.0 / math.sqrt(hd)

    x = acc_ref[...]                                                  # [R, d] f32

    # ---- multi-head self-attention branch (fused QKV + fused out-proj) ----
    h = _ln_rows(x, g1_ref[...], b1_ref[...]).astype(jnp.bfloat16)
    qkv = jnp.dot(h, wqkv_ref[...], preferred_element_type=jnp.float32) + bqkv_ref[...]

    # additive mask for padded key positions (queries on pad rows are never read)
    kidx = lax.broadcasted_iota(jnp.int32, (1, 1, seq_pad), 2)
    kmask = jnp.where(kidx < seq_valid, 0.0, -1e30).astype(jnp.float32)

    heads_out = []
    for hh in range(heads):                       # only tiny score/PV work per head
        base = hh * hd
        qh = qkv[:, base:base + hd].reshape(batch, seq_pad, hd)
        kh = qkv[:, d + base:d + base + hd].reshape(batch, seq_pad, hd)
        vh = qkv[:, 2 * d + base:2 * d + base + hd].reshape(batch, seq_pad, hd)
        s = jnp.einsum('bqc,bkc->bqk', qh, kh,
                       preferred_element_type=jnp.float32) * scale + kmask
        s = s - jnp.max(s, axis=-1, keepdims=True)
        prob = jnp.exp(s)
        prob = prob * pl.reciprocal(jnp.sum(prob, axis=-1, keepdims=True),
                                    approx=True)                     # EUP
        heads_out.append(jnp.einsum('bqk,bkc->bqc', prob, vh,
                                    preferred_element_type=jnp.float32))
    o = jnp.concatenate(heads_out, axis=-1).reshape(R, d).astype(jnp.bfloat16)
    x = x + jnp.dot(o, wo_ref[...], preferred_element_type=jnp.float32) + bo_ref[...]

    # ---- MLP branch ----
    h2 = _ln_rows(x, g2_ref[...], b2_ref[...]).astype(jnp.bfloat16)
    m = jnp.dot(h2, wfc_ref[...], preferred_element_type=jnp.float32) + bfc_ref[...]
    m = m * jax.nn.sigmoid(1.702 * m)                                 # QuickGELU (f32)
    x = x + jnp.dot(m.astype(jnp.bfloat16), wpr_ref[...],
                    preferred_element_type=jnp.float32) + bpr_ref[...]

    acc_ref[...] = x
    # per-layer CLS rows (row 0 of every batch group) -> [B, d] block of [L, B, d]
    cls_ref[...] = x.reshape(batch, seq_pad, d)[:, 0, :]


def pallas_transformer(x0, blk, batch):
    R, d = x0.shape
    names = ["ln1_g", "ln1_b", "w_qkv", "b_qkv", "w_o", "b_o",
             "ln2_g", "ln2_b", "w_fc", "b_fc", "w_pr", "b_pr"]
    args = [blk[n] for n in names]
    in_specs = [pl.BlockSpec((R, d), lambda l: (0, 0))]
    for a in args:   # stacked [L, ...] weights; leading layer dim squeezed away
        in_specs.append(pl.BlockSpec((None,) + a.shape[1:], lambda l: (l, 0, 0)))
    return pl.pallas_call(
        functools.partial(_transformer_kernel, heads=HEADS, batch=batch,
                          seq_pad=SEQ_PAD, seq_valid=SEQ),
        out_shape=jax.ShapeDtypeStruct((LAYERS, batch, d), jnp.float32),
        grid_spec=pltpu.PrefetchScalarGridSpec(
            num_scalar_prefetch=0,
            grid=(LAYERS,),
            in_specs=in_specs,
            out_specs=pl.BlockSpec((None, batch, d), lambda l: (l, 0, 0)),
            scratch_shapes=[pltpu.VMEM((R, d), jnp.float32)]),
        compiler_params=pltpu.CompilerParams(
            dimension_semantics=("arbitrary",),          # layers are sequential
            vmem_limit_bytes=48 * 1024 * 1024),          # reference-scale headroom
    )(x0, *args)


# --- fused ln_post + generate_weights + layer-wise proj + norm + logits ------
def _head_kernel(feats_ref, g_ref, b_ref, fproj_ref,
                 w1a, b1a, w1b, b1b, w1c, b1c,
                 w2a, b2a, w2b, b2b, w2c, b2c,
                 visp_ref, txtp_ref, text_ref, ls_ref, o_ref,
                 *, layers, n_classes, n_templates):
    L, Bsz, d = feats_ref.shape
    E = visp_ref.shape[-1]
    g = g_ref[...].reshape(1, 1, d)
    bia = b_ref[...].reshape(1, 1, d)
    xln = _ln_rows(feats_ref[...], g, bia)                            # [L, B, d]

    # generate_weights from the LAST layer's ln_post'd CLS (reuse xln), all f32
    imgf = jnp.dot(xln[L - 1], fproj_ref[...], preferred_element_type=jnp.float32)

    def mlp(hh, wa, ba, wb, bb, wc, bc):                  # Linear/ReLU x2 + Linear
        hh = jnp.maximum(jnp.dot(hh, wa[...], preferred_element_type=jnp.float32) + ba[...], 0.0)
        hh = jnp.maximum(jnp.dot(hh, wb[...], preferred_element_type=jnp.float32) + bb[...], 0.0)
        return jnp.dot(hh, wc[...], preferred_element_type=jnp.float32) + bc[...]

    w1 = jnp.mean(mlp(imgf, w1a, b1a, w1b, b1b, w1c, b1c), axis=0, keepdims=True)  # [1, L]
    w2 = jnp.mean(mlp(imgf, w2a, b2a, w2b, b2b, w2c, b2c), axis=0, keepdims=True)  # [1, L]

    # CLIPALL layer-wise projections, weighted-summed over layers (w stays in VMEM)
    img_emb = jnp.zeros((Bsz, E), jnp.float32)
    txt_emb = jnp.zeros((n_classes * n_templates, E), jnp.float32)
    for l in range(layers):
        img_emb = img_emb + w1[:, l:l + 1] * jnp.dot(
            xln[l].astype(jnp.bfloat16), visp_ref[l],
            preferred_element_type=jnp.float32)
        txt_emb = txt_emb + w2[:, l:l + 1] * jnp.dot(
            text_ref[l].astype(jnp.bfloat16), txtp_ref[l],
            preferred_element_type=jnp.float32)
    # template mean BEFORE normalisation, exactly as the CLIPALL reference does
    txt_emb = jnp.mean(txt_emb.reshape(n_classes, n_templates, E), axis=1)

    img_emb = img_emb * lax.rsqrt(jnp.sum(img_emb * img_emb, axis=-1, keepdims=True) + 1e-12)
    txt_emb = txt_emb * lax.rsqrt(jnp.sum(txt_emb * txt_emb, axis=-1, keepdims=True) + 1e-12)
    scale = jnp.exp(ls_ref[...])                                      # (1, 1)
    o_ref[...] = scale * lax.dot_general(
        img_emb, txt_emb, (((1,), (1,)), ((), ())),
        preferred_element_type=jnp.float32)


def pallas_head(feats, p, batch):
    m1, m2 = p["mlp1"], p["mlp2"]
    return pl.pallas_call(
        functools.partial(_head_kernel, layers=LAYERS,
                          n_classes=N_CLASSES, n_templates=N_TEMPLATES),
        out_shape=jax.ShapeDtypeStruct((batch, N_CLASSES), jnp.float32),
    )(feats, p["ln_post_g"], p["ln_post_b"], p["frozen_image_projection"],
      m1["w_in"], m1["b_in"], m1["w_h"], m1["b_h"], m1["w_out"], m1["b_out"],
      m2["w_in"], m2["b_in"], m2["w_h"], m2["b_h"], m2["w_out"], m2["b_out"],
      p["vis_proj"], p["txt_proj"], p["text_feats"],
      jnp.reshape(p["logit_scale"], (1, 1)).astype(jnp.float32))


# ------------------------------ parameter init ------------------------------
def init_params(key):
    ks = iter(jax.random.split(key, 32))
    f32 = jnp.float32

    def nrm(shape, scale=0.02):
        return scale * jax.random.normal(next(ks), shape, f32)

    def xavier(shape):
        bound = math.sqrt(6.0 / (shape[0] + shape[1]))
        return jax.random.uniform(next(ks), shape, f32, -bound, bound)

    def bf16(a):
        return a.astype(jnp.bfloat16)

    p = {}
    # visual stem (conv1 = bias-free Conv2d(3, width, patch, stride=patch) as matmul)
    conv_w = nrm((VIS_WIDTH, IMG_C, PATCH, PATCH))
    p["conv1_w"] = bf16(conv_w.reshape(VIS_WIDTH, -1).T)              # [C*p*p, d]
    p["class_embedding"] = nrm((VIS_WIDTH,))
    p["positional_embedding"] = nrm((SEQ, VIS_WIDTH))
    p["ln_pre_g"] = jnp.ones((1, VIS_WIDTH), f32)
    p["ln_pre_b"] = jnp.zeros((1, VIS_WIDTH), f32)
    p["ln_post_g"] = jnp.ones((1, VIS_WIDTH), f32)
    p["ln_post_b"] = jnp.zeros((1, VIS_WIDTH), f32)

    hid4 = 4 * VIS_WIDTH
    # per-layer weights stacked on a leading layer axis (auto-pipelined by BlockSpec)
    p["blk"] = dict(
        ln1_g=jnp.ones((LAYERS, 1, VIS_WIDTH), f32),
        ln1_b=jnp.zeros((LAYERS, 1, VIS_WIDTH), f32),
        w_qkv=bf16(nrm((LAYERS, VIS_WIDTH, 3 * VIS_WIDTH))),          # fused QKV
        b_qkv=jnp.zeros((LAYERS, 1, 3 * VIS_WIDTH), f32),
        w_o=bf16(nrm((LAYERS, VIS_WIDTH, VIS_WIDTH))),
        b_o=jnp.zeros((LAYERS, 1, VIS_WIDTH), f32),
        ln2_g=jnp.ones((LAYERS, 1, VIS_WIDTH), f32),
        ln2_b=jnp.zeros((LAYERS, 1, VIS_WIDTH), f32),
        w_fc=bf16(nrm((LAYERS, VIS_WIDTH, hid4))),
        b_fc=jnp.zeros((LAYERS, 1, hid4), f32),
        w_pr=bf16(nrm((LAYERS, hid4, VIS_WIDTH))),
        b_pr=jnp.zeros((LAYERS, 1, VIS_WIDTH), f32),
    )

    # per-layer projections (last visual layer == frozen CLIP proj, as in reference)
    sv, st = VIS_WIDTH ** -0.5, TXT_WIDTH ** -0.5
    frozen = sv * jax.random.normal(next(ks), (VIS_WIDTH, EMBED_DIM), f32)
    vis_rest = sv * jax.random.normal(next(ks), (LAYERS - 1, VIS_WIDTH, EMBED_DIM), f32)
    p["vis_proj"] = bf16(jnp.concatenate([vis_rest, frozen[None]], axis=0))
    p["txt_proj"] = bf16(st * jax.random.normal(next(ks), (LAYERS, TXT_WIDTH, EMBED_DIM), f32))
    p["frozen_image_projection"] = frozen                              # f32 (reference)

    # weight-generating MLPs: xavier_uniform weights, bias = 0.01, dropout=eval identity
    def mlp_params():
        return dict(
            w_in=xavier((EMBED_DIM, MLP_HIDDEN)), b_in=jnp.full((1, MLP_HIDDEN), 0.01, f32),
            w_h=xavier((MLP_HIDDEN, MLP_HIDDEN)), b_h=jnp.full((1, MLP_HIDDEN), 0.01, f32),
            w_out=xavier((MLP_HIDDEN, LAYERS)), b_out=jnp.full((1, LAYERS), 0.01, f32),
        )
    p["mlp1"] = mlp_params()
    p["mlp2"] = mlp_params()

    # frozen per-layer / per-(class, template) text features (synthetic, ln_final'd)
    p["text_feats"] = jax.random.normal(
        next(ks), (LAYERS, N_CLASSES * N_TEMPLATES, TXT_WIDTH), f32)

    p["logit_scale"] = jnp.asarray(math.log(1.0 / 0.07), f32)
    return p


# ------------------------------- forward ------------------------------------
def _extract_patches(image):
    Bsz, C, H, W = image.shape
    gh, gw = H // PATCH, W // PATCH
    x = image.reshape(Bsz, C, gh, PATCH, gw, PATCH)
    x = jnp.transpose(x, (0, 2, 4, 1, 3, 5))
    return x.reshape(Bsz, gh * gw, C * PATCH * PATCH)


@jax.jit
def custom_clip_forward(image, p):
    Bsz = image.shape[0]
    cpp = IMG_C * PATCH * PATCH

    # token rows: [CLS slot (zero), patches, zero pad rows] per batch element
    patches = _extract_patches(image)                                  # [B, np, cpp]
    tok = jnp.zeros((Bsz, SEQ_PAD, cpp), jnp.float32)
    tok = tok.at[:, 1:1 + NUM_PATCHES].set(patches).reshape(Bsz * SEQ_PAD, cpp)
    pos = jnp.zeros((SEQ_PAD, VIS_WIDTH), jnp.float32)
    pos = pos.at[:SEQ].set(p["positional_embedding"])
    pos = pos.at[0].add(p["class_embedding"])          # fold CLS emb (conv bias-free)

    x0 = pallas_stem(tok, p["conv1_w"], pos, p["ln_pre_g"], p["ln_pre_b"], Bsz)
    feats = pallas_transformer(x0, p["blk"], Bsz)                      # [L, B, d]
    return pallas_head(feats, p, Bsz)                                  # [B, C]


# ---------------------------------- main -------------------------------------
if __name__ == "__main__":
    key = jax.random.PRNGKey(0)
    pkey, ikey = jax.random.split(key)
    params = init_params(pkey)
    image = jax.random.normal(ikey, (B, IMG_C, IMG_HW, IMG_HW), dtype=jnp.float32)

    logits = custom_clip_forward(image, params)
    jax.block_until_ready(logits)
    assert logits.shape == (B, N_CLASSES)
    assert bool(jnp.all(jnp.isfinite(logits)))
    print("KERNEL_OK")
</pallas_src>

<mosaic_0001>
module attributes {stable_mosaic.version = 11 : i64} {
  func.func @_head_kernel(%arg0: memref<3x2x128xf32, #tpu.memory_space<vmem>>, %arg1: memref<1x128xf32, #tpu.memory_space<vmem>>, %arg2: memref<1x128xf32, #tpu.memory_space<vmem>>, %arg3: memref<128x128xf32, #tpu.memory_space<vmem>>, %arg4: memref<128x512xf32, #tpu.memory_space<vmem>>, %arg5: memref<1x512xf32, #tpu.memory_space<vmem>>, %arg6: memref<512x512xf32, #tpu.memory_space<vmem>>, %arg7: memref<1x512xf32, #tpu.memory_space<vmem>>, %arg8: memref<512x3xf32, #tpu.memory_space<vmem>>, %arg9: memref<1x3xf32, #tpu.memory_space<vmem>>, %arg10: memref<128x512xf32, #tpu.memory_space<vmem>>, %arg11: memref<1x512xf32, #tpu.memory_space<vmem>>, %arg12: memref<512x512xf32, #tpu.memory_space<vmem>>, %arg13: memref<1x512xf32, #tpu.memory_space<vmem>>, %arg14: memref<512x3xf32, #tpu.memory_space<vmem>>, %arg15: memref<1x3xf32, #tpu.memory_space<vmem>>, %arg16: memref<3x128x128xbf16, #tpu.memory_space<vmem>>, %arg17: memref<3x128x128xbf16, #tpu.memory_space<vmem>>, %arg18: memref<3x8x128xf32, #tpu.memory_space<vmem>>, %arg19: memref<1x1xf32, #tpu.memory_space<vmem>>, %arg20: memref<2x4xf32, #tpu.memory_space<vmem>>) attributes {dimension_semantics = [], scalar_prefetch = 0 : i64, scratch_operands = 0 : i64, tpu.core_type = #tpu.core_type<tc>} {
    %c0 = arith.constant 0 : index
    %c0_0 = arith.constant 0 : index
    %0 = vector.load %arg1[%c0, %c0_0] : memref<1x128xf32, #tpu.memory_space<vmem>>, vector<1x128xf32>
    %1 = vector.shape_cast %0 : vector<1x128xf32> to vector<1x1x128xf32>
    %c0_1 = arith.constant 0 : index
    %c0_2 = arith.constant 0 : index
    %2 = vector.load %arg2[%c0_1, %c0_2] : memref<1x128xf32, #tpu.memory_space<vmem>>, vector<1x128xf32>
    %3 = vector.shape_cast %2 : vector<1x128xf32> to vector<1x1x128xf32>
    %c0_3 = arith.constant 0 : index
    %c0_4 = arith.constant 0 : index
    %c0_5 = arith.constant 0 : index
    %4 = vector.load %arg0[%c0_3, %c0_4, %c0_5] : memref<3x2x128xf32, #tpu.memory_space<vmem>>, vector<3x2x128xf32>
    %cst = arith.constant dense<0.000000e+00> : vector<3x2xf32>
    %5 = vector.multi_reduction <add>, %4, %cst [2] : vector<3x2x128xf32> to vector<3x2xf32>
    %6 = vector.shape_cast %5 : vector<3x2xf32> to vector<3x2x1xf32>
    %cst_6 = arith.constant 1.280000e+02 : f32
    %7 = vector.broadcast %cst_6 : f32 to vector<3x2x1xf32>
    %8 = arith.divf %6, %7 : vector<3x2x1xf32>
    %9 = vector.broadcast %8 : vector<3x2x1xf32> to vector<3x2x128xf32>
    %10 = arith.subf %4, %9 : vector<3x2x128xf32>
    %11 = arith.mulf %10, %10 : vector<3x2x128xf32>
    %cst_7 = arith.constant dense<0.000000e+00> : vector<3x2xf32>
    %12 = vector.multi_reduction <add>, %11, %cst_7 [2] : vector<3x2x128xf32> to vector<3x2xf32>
    %13 = vector.shape_cast %12 : vector<3x2xf32> to vector<3x2x1xf32>
    %cst_8 = arith.constant 1.280000e+02 : f32
    %14 = vector.broadcast %cst_8 : f32 to vector<3x2x1xf32>
    %15 = arith.divf %13, %14 : vector<3x2x1xf32>
    %cst_9 = arith.constant 9.99999974E-6 : f32
    %16 = vector.broadcast %cst_9 : f32 to vector<3x2x1xf32>
    %17 = arith.addf %15, %16 : vector<3x2x1xf32>
    %18 = math.rsqrt %17 : vector<3x2x1xf32>
    %19 = vector.broadcast %18 : vector<3x2x1xf32> to vector<3x2x128xf32>
    %20 = arith.mulf %10, %19 : vector<3x2x128xf32>
    %21 = vector.broadcast %1 : vector<1x1x128xf32> to vector<3x2x128xf32>
    %22 = arith.mulf %20, %21 : vector<3x2x128xf32>
    %23 = vector.broadcast %3 : vector<1x1x128xf32> to vector<3x2x128xf32>
    %24 = arith.addf %22, %23 : vector<3x2x128xf32>
    %25 = vector.extract_strided_slice %24 {offsets = [2, 0, 0], sizes = [1, 2, 128], strides = [1, 1, 1]} : vector<3x2x128xf32> to vector<1x2x128xf32>
    %26 = vector.shape_cast %25 : vector<1x2x128xf32> to vector<2x128xf32>
    %c0_10 = arith.constant 0 : index
    %c0_11 = arith.constant 0 : index
    %27 = vector.load %arg3[%c0_10, %c0_11] : memref<128x128xf32, #tpu.memory_space<vmem>>, vector<128x128xf32>
    %cst_12 = arith.constant dense<0.000000e+00> : vector<2x128xf32>
    %28 = tpu.matmul %26, %27, %cst_12 {dimension_numbers = #tpu.dot_dimension_numbers<[1], [0], [0], [1], [0, 0, 1, 1], [], []>} : vector<2x128xf32>, vector<128x128xf32>, vector<2x128xf32> -> vector<2x128xf32>
    %c0_13 = arith.constant 0 : index
    %c0_14 = arith.constant 0 : index
    %29 = vector.load %arg4[%c0_13, %c0_14] : memref<128x512xf32, #tpu.memory_space<vmem>>, vector<128x512xf32>
    %cst_15 = arith.constant dense<0.000000e+00> : vector<2x512xf32>
    %30 = tpu.matmul %28, %29, %cst_15 {dimension_numbers = #tpu.dot_dimension_numbers<[1], [0], [0], [1], [0, 0, 1, 1], [], []>} : vector<2x128xf32>, vector<128x512xf32>, vector<2x512xf32> -> vector<2x512xf32>
    %c0_16 = arith.constant 0 : index
    %c0_17 = arith.constant 0 : index
    %31 = vector.load %arg5[%c0_16, %c0_17] : memref<1x512xf32, #tpu.memory_space<vmem>>, vector<1x512xf32>
    %32 = vector.broadcast %31 : vector<1x512xf32> to vector<2x512xf32>
    %33 = arith.addf %30, %32 : vector<2x512xf32>
    %cst_18 = arith.constant 0.000000e+00 : f32
    %34 = vector.broadcast %cst_18 : f32 to vector<2x512xf32>
    %35 = arith.maximumf %33, %34 : vector<2x512xf32>
    %c0_19 = arith.constant 0 : index
    %c0_20 = arith.constant 0 : index
    %36 = vector.load %arg6[%c0_19, %c0_20] : memref<512x512xf32, #tpu.memory_space<vmem>>, vector<512x512xf32>
    %cst_21 = arith.constant dense<0.000000e+00> : vector<2x512xf32>
    %37 = tpu.matmul %35, %36, %cst_21 {dimension_numbers = #tpu.dot_dimension_numbers<[1], [0], [0], [1], [0, 0, 1, 1], [], []>} : vector<2x512xf32>, vector<512x512xf32>, vector<2x512xf32> -> vector<2x512xf32>
    %c0_22 = arith.constant 0 : index
    %c0_23 = arith.constant 0 : index
    %38 = vector.load %arg7[%c0_22, %c0_23] : memref<1x512xf32, #tpu.memory_space<vmem>>, vector<1x512xf32>
    %39 = vector.broadcast %38 : vector<1x512xf32> to vector<2x512xf32>
    %40 = arith.addf %37, %39 : vector<2x512xf32>
    %cst_24 = arith.constant 0.000000e+00 : f32
    %41 = vector.broadcast %cst_24 : f32 to vector<2x512xf32>
    %42 = arith.maximumf %40, %41 : vector<2x512xf32>
    %c0_25 = arith.constant 0 : index
    %c0_26 = arith.constant 0 : index
    %43 = vector.load %arg8[%c0_25, %c0_26] : memref<512x3xf32, #tpu.memory_space<vmem>>, vector<512x3xf32>
    %cst_27 = arith.constant dense<0.000000e+00> : vector<2x3xf32>
    %44 = tpu.matmul %42, %43, %cst_27 {dimension_numbers = #tpu.dot_dimension_numbers<[1], [0], [0], [1], [0, 0, 1, 1], [], []>} : vector<2x512xf32>, vector<512x3xf32>, vector<2x3xf32> -> vector<2x3xf32>
    %c0_28 = arith.constant 0 : index
    %c0_29 = arith.constant 0 : index
    %45 = vector.load %arg9[%c0_28, %c0_29] : memref<1x3xf32, #tpu.memory_space<vmem>>, vector<1x3xf32>
    %46 = vector.broadcast %45 : vector<1x3xf32> to vector<2x3xf32>
    %47 = arith.addf %44, %46 : vector<2x3xf32>
    %cst_30 = arith.constant dense<0.000000e+00> : vector<3xf32>
    %48 = vector.multi_reduction <add>, %47, %cst_30 [0] : vector<2x3xf32> to vector<3xf32>
    %49 = vector.shape_cast %48 : vector<3xf32> to vector<1x3xf32>
    %cst_31 = arith.constant 2.000000e+00 : f32
    %50 = vector.broadcast %cst_31 : f32 to vector<1x3xf32>
    %51 = arith.divf %49, %50 : vector<1x3xf32>
    %c0_32 = arith.constant 0 : index
    %c0_33 = arith.constant 0 : index
    %52 = vector.load %arg10[%c0_32, %c0_33] : memref<128x512xf32, #tpu.memory_space<vmem>>, vector<128x512xf32>
    %cst_34 = arith.constant dense<0.000000e+00> : vector<2x512xf32>
    %53 = tpu.matmul %28, %52, %cst_34 {dimension_numbers = #tpu.dot_dimension_numbers<[1], [0], [0], [1], [0, 0, 1, 1], [], []>} : vector<2x128xf32>, vector<128x512xf32>, vector<2x512xf32> -> vector<2x512xf32>
    %c0_35 = arith.constant 0 : index
    %c0_36 = arith.constant 0 : index
    %54 = vector.load %arg11[%c0_35, %c0_36] : memref<1x512xf32, #tpu.memory_space<vmem>>, vector<1x512xf32>
    %55 = vector.broadcast %54 : vector<1x512xf32> to vector<2x512xf32>
    %56 = arith.addf %53, %55 : vector<2x512xf32>
    %cst_37 = arith.constant 0.000000e+00 : f32
    %57 = vector.broadcast %cst_37 : f32 to vector<2x512xf32>
    %58 = arith.maximumf %56, %57 : vector<2x512xf32>
    %c0_38 = arith.constant 0 : index
    %c0_39 = arith.constant 0 : index
    %59 = vector.load %arg12[%c0_38, %c0_39] : memref<512x512xf32, #tpu.memory_space<vmem>>, vector<512x512xf32>
    %cst_40 = arith.constant dense<0.000000e+00> : vector<2x512xf32>
    %60 = tpu.matmul %58, %59, %cst_40 {dimension_numbers = #tpu.dot_dimension_numbers<[1], [0], [0], [1], [0, 0, 1, 1], [], []>} : vector<2x512xf32>, vector<512x512xf32>, vector<2x512xf32> -> vector<2x512xf32>
    %c0_41 = arith.constant 0 : index
    %c0_42 = arith.constant 0 : index
    %61 = vector.load %arg13[%c0_41, %c0_42] : memref<1x512xf32, #tpu.memory_space<vmem>>, vector<1x512xf32>
    %62 = vector.broadcast %61 : vector<1x512xf32> to vector<2x512xf32>
    %63 = arith.addf %60, %62 : vector<2x512xf32>
    %cst_43 = arith.constant 0.000000e+00 : f32
    %64 = vector.broadcast %cst_43 : f32 to vector<2x512xf32>
    %65 = arith.maximumf %63, %64 : vector<2x512xf32>
    %c0_44 = arith.constant 0 : index
    %c0_45 = arith.constant 0 : index
    %66 = vector.load %arg14[%c0_44, %c0_45] : memref<512x3xf32, #tpu.memory_space<vmem>>, vector<512x3xf32>
    %cst_46 = arith.constant dense<0.000000e+00> : vector<2x3xf32>
    %67 = tpu.matmul %65, %66, %cst_46 {dimension_numbers = #tpu.dot_dimension_numbers<[1], [0], [0], [1], [0, 0, 1, 1], [], []>} : vector<2x512xf32>, vector<512x3xf32>, vector<2x3xf32> -> vector<2x3xf32>
    %c0_47 = arith.constant 0 : index
    %c0_48 = arith.constant 0 : index
    %68 = vector.load %arg15[%c0_47, %c0_48] : memref<1x3xf32, #tpu.memory_space<vmem>>, vector<1x3xf32>
    %69 = vector.broadcast %68 : vector<1x3xf32> to vector<2x3xf32>
    %70 = arith.addf %67, %69 : vector<2x3xf32>
    %cst_49 = arith.constant dense<0.000000e+00> : vector<3xf32>
    %71 = vector.multi_reduction <add>, %70, %cst_49 [0] : vector<2x3xf32> to vector<3xf32>
    %72 = vector.shape_cast %71 : vector<3xf32> to vector<1x3xf32>
    %cst_50 = arith.constant 2.000000e+00 : f32
    %73 = vector.broadcast %cst_50 : f32 to vector<1x3xf32>
    %74 = arith.divf %72, %73 : vector<1x3xf32>
    %cst_51 = arith.constant 0.000000e+00 : f32
    %75 = vector.broadcast %cst_51 : f32 to vector<2x128xf32>
    %cst_52 = arith.constant 0.000000e+00 : f32
    %76 = vector.broadcast %cst_52 : f32 to vector<8x128xf32>
    %77 = vector.extract_strided_slice %51 {offsets = [0, 0], sizes = [1, 1], strides = [1, 1]} : vector<1x3xf32> to vector<1x1xf32>
    %78 = vector.extract_strided_slice %24 {offsets = [0, 0, 0], sizes = [1, 2, 128], strides = [1, 1, 1]} : vector<3x2x128xf32> to vector<1x2x128xf32>
    %79 = vector.shape_cast %78 : vector<1x2x128xf32> to vector<2x128xf32>
    %80 = arith.truncf %79 : vector<2x128xf32> to vector<2x128xbf16>
    %c0_53 = arith.constant 0 : index
    %c0_54 = arith.constant 0 : index
    %c0_55 = arith.constant 0 : index
    %81 = vector.load %arg16[%c0_53, %c0_54, %c0_55] : memref<3x128x128xbf16, #tpu.memory_space<vmem>>, vector<1x128x128xbf16>
    %82 = vector.shape_cast %81 : vector<1x128x128xbf16> to vector<128x128xbf16>
    %cst_56 = arith.constant dense<0.000000e+00> : vector<2x128xf32>
    %83 = tpu.matmul %80, %82, %cst_56 {dimension_numbers = #tpu.dot_dimension_numbers<[1], [0], [0], [1], [0, 0, 1, 1], [], []>} : vector<2x128xbf16>, vector<128x128xbf16>, vector<2x128xf32> -> vector<2x128xf32>
    %84 = vector.broadcast %77 : vector<1x1xf32> to vector<2x128xf32>
    %85 = arith.mulf %84, %83 : vector<2x128xf32>
    %86 = arith.addf %75, %85 : vector<2x128xf32>
    %87 = vector.extract_strided_slice %74 {offsets = [0, 0], sizes = [1, 1], strides = [1, 1]} : vector<1x3xf32> to vector<1x1xf32>
    %c0_57 = arith.constant 0 : index
    %c0_58 = arith.constant 0 : index
    %c0_59 = arith.constant 0 : index
    %88 = vector.load %arg18[%c0_57, %c0_58, %c0_59] : memref<3x8x128xf32, #tpu.memory_space<vmem>>, vector<1x8x128xf32>
    %89 = vector.shape_cast %88 : vector<1x8x128xf32> to vector<8x128xf32>
    %90 = arith.truncf %89 : vector<8x128xf32> to vector<8x128xbf16>
    %c0_60 = arith.constant 0 : index
    %c0_61 = arith.constant 0 : index
    %c0_62 = arith.constant 0 : index
    %91 = vector.load %arg17[%c0_60, %c0_61, %c0_62] : memref<3x128x128xbf16, #tpu.memory_space<vmem>>, vector<1x128x128xbf16>
    %92 = vector.shape_cast %91 : vector<1x128x128xbf16> to vector<128x128xbf16>
    %cst_63 = arith.constant dense<0.000000e+00> : vector<8x128xf32>
    %93 = tpu.matmul %90, %92, %cst_63 {dimension_numbers = #tpu.dot_dimension_numbers<[1], [0], [0], [1], [0, 0, 1, 1], [], []>} : vector<8x128xbf16>, vector<128x128xbf16>, vector<8x128xf32> -> vector<8x128xf32>
    %94 = vector.broadcast %87 : vector<1x1xf32> to vector<8x128xf32>
    %95 = arith.mulf %94, %93 : vector<8x128xf32>
    %96 = arith.addf %76, %95 : vector<8x128xf32>
    %97 = vector.extract_strided_slice %51 {offsets = [0, 1], sizes = [1, 1], strides = [1, 1]} : vector<1x3xf32> to vector<1x1xf32>
    %98 = vector.extract_strided_slice %24 {offsets = [1, 0, 0], sizes = [1, 2, 128], strides = [1, 1, 1]} : vector<3x2x128xf32> to vector<1x2x128xf32>
    %99 = vector.shape_cast %98 : vector<1x2x128xf32> to vector<2x128xf32>
    %100 = arith.truncf %99 : vector<2x128xf32> to vector<2x128xbf16>
    %c1 = arith.constant 1 : index
    %c0_64 = arith.constant 0 : index
    %c0_65 = arith.constant 0 : index
    %101 = vector.load %arg16[%c1, %c0_64, %c0_65] : memref<3x128x128xbf16, #tpu.memory_space<vmem>>, vector<1x128x128xbf16>
    %102 = vector.shape_cast %101 : vector<1x128x128xbf16> to vector<128x128xbf16>
    %cst_66 = arith.constant dense<0.000000e+00> : vector<2x128xf32>
    %103 = tpu.matmul %100, %102, %cst_66 {dimension_numbers = #tpu.dot_dimension_numbers<[1], [0], [0], [1], [0, 0, 1, 1], [], []>} : vector<2x128xbf16>, vector<128x128xbf16>, vector<2x128xf32> -> vector<2x128xf32>
    %104 = vector.broadcast %97 : vector<1x1xf32> to vector<2x128xf32>
    %105 = arith.mulf %104, %103 : vector<2x128xf32>
    %106 = arith.addf %86, %105 : vector<2x128xf32>
    %107 = vector.extract_strided_slice %74 {offsets = [0, 1], sizes = [1, 1], strides = [1, 1]} : vector<1x3xf32> to vector<1x1xf32>
    %c1_67 = arith.constant 1 : index
    %c0_68 = arith.constant 0 : index
    %c0_69 = arith.constant 0 : index
    %108 = vector.load %arg18[%c1_67, %c0_68, %c0_69] : memref<3x8x128xf32, #tpu.memory_space<vmem>>, vector<1x8x128xf32>
    %109 = vector.shape_cast %108 : vector<1x8x128xf32> to vector<8x128xf32>
    %110 = arith.truncf %109 : vector<8x128xf32> to vector<8x128xbf16>
    %c1_70 = arith.constant 1 : index
    %c0_71 = arith.constant 0 : index
    %c0_72 = arith.constant 0 : index
    %111 = vector.load %arg17[%c1_70, %c0_71, %c0_72] : memref<3x128x128xbf16, #tpu.memory_space<vmem>>, vector<1x128x128xbf16>
    %112 = vector.shape_cast %111 : vector<1x128x128xbf16> to vector<128x128xbf16>
    %cst_73 = arith.constant dense<0.000000e+00> : vector<8x128xf32>
    %113 = tpu.matmul %110, %112, %cst_73 {dimension_numbers = #tpu.dot_dimension_numbers<[1], [0], [0], [1], [0, 0, 1, 1], [], []>} : vector<8x128xbf16>, vector<128x128xbf16>, vector<8x128xf32> -> vector<8x128xf32>
    %114 = vector.broadcast %107 : vector<1x1xf32> to vector<8x128xf32>
    %115 = arith.mulf %114, %113 : vector<8x128xf32>
    %116 = arith.addf %96, %115 : vector<8x128xf32>
    %117 = vector.extract_strided_slice %51 {offsets = [0, 2], sizes = [1, 1], strides = [1, 1]} : vector<1x3xf32> to vector<1x1xf32>
    %118 = vector.extract_strided_slice %24 {offsets = [2, 0, 0], sizes = [1, 2, 128], strides = [1, 1, 1]} : vector<3x2x128xf32> to vector<1x2x128xf32>
    %119 = vector.shape_cast %118 : vector<1x2x128xf32> to vector<2x128xf32>
    %120 = arith.truncf %119 : vector<2x128xf32> to vector<2x128xbf16>
    %c2 = arith.constant 2 : index
    %c0_74 = arith.constant 0 : index
    %c0_75 = arith.constant 0 : index
    %121 = vector.load %arg16[%c2, %c0_74, %c0_75] : memref<3x128x128xbf16, #tpu.memory_space<vmem>>, vector<1x128x128xbf16>
    %122 = vector.shape_cast %121 : vector<1x128x128xbf16> to vector<128x128xbf16>
    %cst_76 = arith.constant dense<0.000000e+00> : vector<2x128xf32>
    %123 = tpu.matmul %120, %122, %cst_76 {dimension_numbers = #tpu.dot_dimension_numbers<[1], [0], [0], [1], [0, 0, 1, 1], [], []>} : vector<2x128xbf16>, vector<128x128xbf16>, vector<2x128xf32> -> vector<2x128xf32>
    %124 = vector.broadcast %117 : vector<1x1xf32> to vector<2x128xf32>
    %125 = arith.mulf %124, %123 : vector<2x128xf32>
    %126 = arith.addf %106, %125 : vector<2x128xf32>
    %127 = vector.extract_strided_slice %74 {offsets = [0, 2], sizes = [1, 1], strides = [1, 1]} : vector<1x3xf32> to vector<1x1xf32>
    %c2_77 = arith.constant 2 : index
    %c0_78 = arith.constant 0 : index
    %c0_79 = arith.constant 0 : index
    %128 = vector.load %arg18[%c2_77, %c0_78, %c0_79] : memref<3x8x128xf32, #tpu.memory_space<vmem>>, vector<1x8x128xf32>
    %129 = vector.shape_cast %128 : vector<1x8x128xf32> to vector<8x128xf32>
    %130 = arith.truncf %129 : vector<8x128xf32> to vector<8x128xbf16>
    %c2_80 = arith.constant 2 : index
    %c0_81 = arith.constant 0 : index
    %c0_82 = arith.constant 0 : index
    %131 = vector.load %arg17[%c2_80, %c0_81, %c0_82] : memref<3x128x128xbf16, #tpu.memory_space<vmem>>, vector<1x128x128xbf16>
    %132 = vector.shape_cast %131 : vector<1x128x128xbf16> to vector<128x128xbf16>
    %cst_83 = arith.constant dense<0.000000e+00> : vector<8x128xf32>
    %133 = tpu.matmul %130, %132, %cst_83 {dimension_numbers = #tpu.dot_dimension_numbers<[1], [0], [0], [1], [0, 0, 1, 1], [], []>} : vector<8x128xbf16>, vector<128x128xbf16>, vector<8x128xf32> -> vector<8x128xf32>
    %134 = vector.broadcast %127 : vector<1x1xf32> to vector<8x128xf32>
    %135 = arith.mulf %134, %133 : vector<8x128xf32>
    %136 = arith.addf %116, %135 : vector<8x128xf32>
    %137 = vector.shape_cast %136 : vector<8x128xf32> to vector<4x2x128xf32>
    %cst_84 = arith.constant dense<0.000000e+00> : vector<4x128xf32>
    %138 = vector.multi_reduction <add>, %137, %cst_84 [1] : vector<4x2x128xf32> to vector<4x128xf32>
    %cst_85 = arith.constant 2.000000e+00 : f32
    %139 = vector.broadcast %cst_85 : f32 to vector<4x128xf32>
    %140 = arith.divf %138, %139 : vector<4x128xf32>
    %141 = arith.mulf %126, %126 : vector<2x128xf32>
    %cst_86 = arith.constant dense<0.000000e+00> : vector<2xf32>
    %142 = vector.multi_reduction <add>, %141, %cst_86 [1] : vector<2x128xf32> to vector<2xf32>
    %143 = vector.shape_cast %142 : vector<2xf32> to vector<2x1xf32>
    %cst_87 = arith.constant 9.99999996E-13 : f32
    %144 = vector.broadcast %cst_87 : f32 to vector<2x1xf32>
    %145 = arith.addf %143, %144 : vector<2x1xf32>
    %146 = math.rsqrt %145 : vector<2x1xf32>
    %147 = vector.broadcast %146 : vector<2x1xf32> to vector<2x128xf32>
    %148 = arith.mulf %126, %147 : vector<2x128xf32>
    %149 = arith.mulf %140, %140 : vector<4x128xf32>
    %cst_88 = arith.constant dense<0.000000e+00> : vector<4xf32>
    %150 = vector.multi_reduction <add>, %149, %cst_88 [1] : vector<4x128xf32> to vector<4xf32>
    %151 = vector.shape_cast %150 : vector<4xf32> to vector<4x1xf32>
    %cst_89 = arith.constant 9.99999996E-13 : f32
    %152 = vector.broadcast %cst_89 : f32 to vector<4x1xf32>
    %153 = arith.addf %151, %152 : vector<4x1xf32>
    %154 = math.rsqrt %153 : vector<4x1xf32>
    %155 = vector.broadcast %154 : vector<4x1xf32> to vector<4x128xf32>
    %156 = arith.mulf %140, %155 : vector<4x128xf32>
    %c0_90 = arith.constant 0 : index
    %c0_91 = arith.constant 0 : index
    %157 = vector.load %arg19[%c0_90, %c0_91] : memref<1x1xf32, #tpu.memory_space<vmem>>, vector<1x1xf32>
    %158 = math.exp %157 : vector<1x1xf32>
    %cst_92 = arith.constant dense<0.000000e+00> : vector<2x4xf32>
    %159 = tpu.matmul %148, %156, %cst_92 {dimension_numbers = #tpu.dot_dimension_numbers<[1], [1], [0], [0], [0, 0, 1, 0], [], []>} : vector<2x128xf32>, vector<4x128xf32>, vector<2x4xf32> -> vector<2x4xf32>
    %160 = vector.broadcast %158 : vector<1x1xf32> to vector<2x4xf32>
    %161 = arith.mulf %160, %159 : vector<2x4xf32>
    %c0_93 = arith.constant 0 : index
    %c0_94 = arith.constant 0 : index
    %162 = vector.load %arg20[%c0_93, %c0_94] : memref<2x4xf32, #tpu.memory_space<vmem>>, vector<2x4xf32>
    tpu.vector_store %arg20[%c0_93, %c0_94], %161 {strides = array<i32>} : memref<2x4xf32, #tpu.memory_space<vmem>>, vector<2x4xf32>,
    return
  }
}

module attributes {stable_mosaic.version = 11 : i64} {
  func.func @_stem_kernel(%arg0: memref<16x768xf32, #tpu.memory_space<vmem>>, %arg1: memref<768x128xbf16, #tpu.memory_space<vmem>>, %arg2: memref<8x128xf32, #tpu.memory_space<vmem>>, %arg3: memref<1x128xf32, #tpu.memory_space<vmem>>, %arg4: memref<1x128xf32, #tpu.memory_space<vmem>>, %arg5: memref<16x128xf32, #tpu.memory_space<vmem>>) attributes {dimension_semantics = [], scalar_prefetch = 0 : i64, scratch_operands = 0 : i64, tpu.core_type = #tpu.core_type<tc>} {
    %c0 = arith.constant 0 : index
    %c0_0 = arith.constant 0 : index
    %0 = vector.load %arg0[%c0, %c0_0] : memref<16x768xf32, #tpu.memory_space<vmem>>, vector<16x768xf32>
    %1 = arith.truncf %0 : vector<16x768xf32> to vector<16x768xbf16>
    %c0_1 = arith.constant 0 : index
    %c0_2 = arith.constant 0 : index
    %2 = vector.load %arg1[%c0_1, %c0_2] : memref<768x128xbf16, #tpu.memory_space<vmem>>, vector<768x128xbf16>
    %cst = arith.constant dense<0.000000e+00> : vector<16x128xf32>
    %3 = tpu.matmul %1, %2, %cst {dimension_numbers = #tpu.dot_dimension_numbers<[1], [0], [0], [1], [0, 0, 1, 1], [], []>} : vector<16x768xbf16>, vector<768x128xbf16>, vector<16x128xf32> -> vector<16x128xf32>
    %4 = vector.shape_cast %3 : vector<16x128xf32> to vector<2x8x128xf32>
    %c0_3 = arith.constant 0 : index
    %c0_4 = arith.constant 0 : index
    %5 = vector.load %arg2[%c0_3, %c0_4] : memref<8x128xf32, #tpu.memory_space<vmem>>, vector<8x128xf32>
    %6 = vector.shape_cast %5 : vector<8x128xf32> to vector<1x8x128xf32>
    %7 = vector.broadcast %6 : vector<1x8x128xf32> to vector<2x8x128xf32>
    %8 = arith.addf %4, %7 : vector<2x8x128xf32>
    %9 = vector.shape_cast %8 : vector<2x8x128xf32> to vector<16x128xf32>
    %c0_5 = arith.constant 0 : index
    %c0_6 = arith.constant 0 : index
    %10 = vector.load %arg3[%c0_5, %c0_6] : memref<1x128xf32, #tpu.memory_space<vmem>>, vector<1x128xf32>
    %c0_7 = arith.constant 0 : index
    %c0_8 = arith.constant 0 : index
    %11 = vector.load %arg4[%c0_7, %c0_8] : memref<1x128xf32, #tpu.memory_space<vmem>>, vector<1x128xf32>
    %cst_9 = arith.constant dense<0.000000e+00> : vector<16xf32>
    %12 = vector.multi_reduction <add>, %9, %cst_9 [1] : vector<16x128xf32> to vector<16xf32>
    %13 = vector.shape_cast %12 : vector<16xf32> to vector<16x1xf32>
    %cst_10 = arith.constant 1.280000e+02 : f32
    %14 = vector.broadcast %cst_10 : f32 to vector<16x1xf32>
    %15 = arith.divf %13, %14 : vector<16x1xf32>
    %16 = vector.broadcast %15 : vector<16x1xf32> to vector<16x128xf32>
    %17 = arith.subf %9, %16 : vector<16x128xf32>
    %18 = arith.mulf %17, %17 : vector<16x128xf32>
    %cst_11 = arith.constant dense<0.000000e+00> : vector<16xf32>
    %19 = vector.multi_reduction <add>, %18, %cst_11 [1] : vector<16x128xf32> to vector<16xf32>
    %20 = vector.shape_cast %19 : vector<16xf32> to vector<16x1xf32>
    %cst_12 = arith.constant 1.280000e+02 : f32
    %21 = vector.broadcast %cst_12 : f32 to vector<16x1xf32>
    %22 = arith.divf %20, %21 : vector<16x1xf32>
    %cst_13 = arith.constant 9.99999974E-6 : f32
    %23 = vector.broadcast %cst_13 : f32 to vector<16x1xf32>
    %24 = arith.addf %22, %23 : vector<16x1xf32>
    %25 = math.rsqrt %24 : vector<16x1xf32>
    %26 = vector.broadcast %25 : vector<16x1xf32> to vector<16x128xf32>
    %27 = arith.mulf %17, %26 : vector<16x128xf32>
    %28 = vector.broadcast %10 : vector<1x128xf32> to vector<16x128xf32>
    %29 = arith.mulf %27, %28 : vector<16x128xf32>
    %30 = vector.broadcast %11 : vector<1x128xf32> to vector<16x128xf32>
    %31 = arith.addf %29, %30 : vector<16x128xf32>
    %c0_14 = arith.constant 0 : index
    %c0_15 = arith.constant 0 : index
    %32 = vector.load %arg5[%c0_14, %c0_15] : memref<16x128xf32, #tpu.memory_space<vmem>>, vector<16x128xf32>
    tpu.vector_store %arg5[%c0_14, %c0_15], %31 {strides = array<i32>} : memref<16x128xf32, #tpu.memory_space<vmem>>, vector<16x128xf32>,
    return
  }
}

module attributes {stable_mosaic.version = 11 : i64} {
  func.func @_transformer_kernel(%arg0: i32, %arg1: memref<16x128xf32, #tpu.memory_space<vmem>>, %arg2: memref<1x1x128xf32, #tpu.memory_space<vmem>>, %arg3: memref<1x1x128xf32, #tpu.memory_space<vmem>>, %arg4: memref<1x128x384xbf16, #tpu.memory_space<vmem>>, %arg5: memref<1x1x384xf32, #tpu.memory_space<vmem>>, %arg6: memref<1x128x128xbf16, #tpu.memory_space<vmem>>, %arg7: memref<1x1x128xf32, #tpu.memory_space<vmem>>, %arg8: memref<1x1x128xf32, #tpu.memory_space<vmem>>, %arg9: memref<1x1x128xf32, #tpu.memory_space<vmem>>, %arg10: memref<1x128x512xbf16, #tpu.memory_space<vmem>>, %arg11: memref<1x1x512xf32, #tpu.memory_space<vmem>>, %arg12: memref<1x512x128xbf16, #tpu.memory_space<vmem>>, %arg13: memref<1x1x128xf32, #tpu.memory_space<vmem>>, %arg14: memref<1x2x128xf32, #tpu.memory_space<vmem>>, %arg15: memref<16x128xf32, #tpu.memory_space<vmem>>) attributes {dimension_semantics = [#tpu.dimension_semantics<arbitrary>], iteration_bounds = array<i64: 3>, scalar_prefetch = 0 : i64, scratch_operands = 1 : i64, tpu.core_type = #tpu.core_type<tc>, window_params = [{pipeline_mode = #tpu.pipeline_mode<synchronous>, transform_indices = @transform_0, window_bounds = array<i64: 16, 128>}, {transform_indices = @transform_1, window_bounds = array<i64: 1, 1, 128>}, {transform_indices = @transform_2, window_bounds = array<i64: 1, 1, 128>}, {transform_indices = @transform_3, window_bounds = array<i64: 1, 128, 384>}, {transform_indices = @transform_4, window_bounds = array<i64: 1, 1, 384>}, {transform_indices = @transform_5, window_bounds = array<i64: 1, 128, 128>}, {transform_indices = @transform_6, window_bounds = array<i64: 1, 1, 128>}, {transform_indices = @transform_7, window_bounds = array<i64: 1, 1, 128>}, {transform_indices = @transform_8, window_bounds = array<i64: 1, 1, 128>}, {transform_indices = @transform_9, window_bounds = array<i64: 1, 128, 512>}, {transform_indices = @transform_10, window_bounds = array<i64: 1, 1, 512>}, {transform_indices = @transform_11, window_bounds = array<i64: 1, 512, 128>}, {transform_indices = @transform_12, window_bounds = array<i64: 1, 1, 128>}, {transform_indices = @transform_13, window_bounds = array<i64: 1, 2, 128>}]} {
    %c0_i32 = arith.constant 0 : i32
    %0 = arith.cmpi eq, %arg0, %c0_i32 : i32
    %1 = arith.extui %0 : i1 to i32
    %c0_i32_0 = arith.constant 0 : i32
    %2 = arith.cmpi ne, %1, %c0_i32_0 : i32
    scf.if %2 {
      %c0_80 = arith.constant 0 : index
      %c0_81 = arith.constant 0 : index
      %197 = vector.load %arg1[%c0_80, %c0_81] : memref<16x128xf32, #tpu.memory_space<vmem>>, vector<16x128xf32>
      %c0_82 = arith.constant 0 : index
      %c0_83 = arith.constant 0 : index
      %198 = vector.load %arg15[%c0_82, %c0_83] : memref<16x128xf32, #tpu.memory_space<vmem>>, vector<16x128xf32>
      tpu.vector_store %arg15[%c0_82, %c0_83], %197 {strides = array<i32>} : memref<16x128xf32, #tpu.memory_space<vmem>>, vector<16x128xf32>,
    } else {
    }
    %c0 = arith.constant 0 : index
    %c0_1 = arith.constant 0 : index
    %3 = vector.load %arg15[%c0, %c0_1] : memref<16x128xf32, #tpu.memory_space<vmem>>, vector<16x128xf32>
    %c0_2 = arith.constant 0 : index
    %c0_3 = arith.constant 0 : index
    %c0_4 = arith.constant 0 : index
    %4 = vector.load %arg2[%c0_2, %c0_3, %c0_4] : memref<1x1x128xf32, #tpu.memory_space<vmem>>, vector<1x1x128xf32>
    %5 = vector.shape_cast %4 : vector<1x1x128xf32> to vector<1x128xf32>
    %c0_5 = arith.constant 0 : index
    %c0_6 = arith.constant 0 : index
    %c0_7 = arith.constant 0 : index
    %6 = vector.load %arg3[%c0_5, %c0_6, %c0_7] : memref<1x1x128xf32, #tpu.memory_space<vmem>>, vector<1x1x128xf32>
    %7 = vector.shape_cast %6 : vector<1x1x128xf32> to vector<1x128xf32>
    %cst = arith.constant dense<0.000000e+00> : vector<16xf32>
    %8 = vector.multi_reduction <add>, %3, %cst [1] : vector<16x128xf32> to vector<16xf32>
    %9 = vector.shape_cast %8 : vector<16xf32> to vector<16x1xf32>
    %cst_8 = arith.constant 1.280000e+02 : f32
    %10 = vector.broadcast %cst_8 : f32 to vector<16x1xf32>
    %11 = arith.divf %9, %10 : vector<16x1xf32>
    %12 = vector.broadcast %11 : vector<16x1xf32> to vector<16x128xf32>
    %13 = arith.subf %3, %12 : vector<16x128xf32>
    %14 = arith.mulf %13, %13 : vector<16x128xf32>
    %cst_9 = arith.constant dense<0.000000e+00> : vector<16xf32>
    %15 = vector.multi_reduction <add>, %14, %cst_9 [1] : vector<16x128xf32> to vector<16xf32>
    %16 = vector.shape_cast %15 : vector<16xf32> to vector<16x1xf32>
    %cst_10 = arith.constant 1.280000e+02 : f32
    %17 = vector.broadcast %cst_10 : f32 to vector<16x1xf32>
    %18 = arith.divf %16, %17 : vector<16x1xf32>
    %cst_11 = arith.constant 9.99999974E-6 : f32
    %19 = vector.broadcast %cst_11 : f32 to vector<16x1xf32>
    %20 = arith.addf %18, %19 : vector<16x1xf32>
    %21 = math.rsqrt %20 : vector<16x1xf32>
    %22 = vector.broadcast %21 : vector<16x1xf32> to vector<16x128xf32>
    %23 = arith.mulf %13, %22 : vector<16x128xf32>
    %24 = vector.broadcast %5 : vector<1x128xf32> to vector<16x128xf32>
    %25 = arith.mulf %23, %24 : vector<16x128xf32>
    %26 = vector.broadcast %7 : vector<1x128xf32> to vector<16x128xf32>
    %27 = arith.addf %25, %26 : vector<16x128xf32>
    %28 = arith.truncf %27 : vector<16x128xf32> to vector<16x128xbf16>
    %c0_12 = arith.constant 0 : index
    %c0_13 = arith.constant 0 : index
    %c0_14 = arith.constant 0 : index
    %29 = vector.load %arg4[%c0_12, %c0_13, %c0_14] : memref<1x128x384xbf16, #tpu.memory_space<vmem>>, vector<1x128x384xbf16>
    %30 = vector.shape_cast %29 : vector<1x128x384xbf16> to vector<128x384xbf16>
    %cst_15 = arith.constant dense<0.000000e+00> : vector<16x384xf32>
    %31 = tpu.matmul %28, %30, %cst_15 {dimension_numbers = #tpu.dot_dimension_numbers<[1], [0], [0], [1], [0, 0, 1, 1], [], []>} : vector<16x128xbf16>, vector<128x384xbf16>, vector<16x384xf32> -> vector<16x384xf32>
    %c0_16 = arith.constant 0 : index
    %c0_17 = arith.constant 0 : index
    %c0_18 = arith.constant 0 : index
    %32 = vector.load %arg5[%c0_16, %c0_17, %c0_18] : memref<1x1x384xf32, #tpu.memory_space<vmem>>, vector<1x1x384xf32>
    %33 = vector.shape_cast %32 : vector<1x1x384xf32> to vector<1x384xf32>
    %34 = vector.broadcast %33 : vector<1x384xf32> to vector<16x384xf32>
    %35 = arith.addf %31, %34 : vector<16x384xf32>
    %36 = tpu.iota {dimensions = array<i32: 2>} : vector<1x1x8xi32>
    %c5_i32 = arith.constant 5 : i32
    %37 = vector.broadcast %c5_i32 : i32 to vector<1x1x8xi32>
    %38 = arith.cmpi slt, %36, %37 : vector<1x1x8xi32>
    %cst_19 = arith.constant 0.000000e+00 : f32
    %cst_20 = arith.constant -1.000000e+30 : f32
    %39 = vector.broadcast %cst_19 : f32 to vector<1x1x8xf32>
    %40 = vector.broadcast %cst_20 : f32 to vector<1x1x8xf32>
    %41 = arith.select %38, %39, %40 : vector<1x1x8xi1>, vector<1x1x8xf32>
    %42 = vector.extract_strided_slice %35 {offsets = [0, 0], sizes = [16, 32], strides = [1, 1]} : vector<16x384xf32> to vector<16x32xf32>
    %43 = vector.shape_cast %42 : vector<16x32xf32> to vector<2x8x32xf32>
    %44 = vector.extract_strided_slice %35 {offsets = [0, 128], sizes = [16, 32], strides = [1, 1]} : vector<16x384xf32> to vector<16x32xf32>
    %45 = vector.shape_cast %44 : vector<16x32xf32> to vector<2x8x32xf32>
    %46 = vector.extract_strided_slice %35 {offsets = [0, 256], sizes = [16, 32], strides = [1, 1]} : vector<16x384xf32> to vector<16x32xf32>
    %47 = vector.shape_cast %46 : vector<16x32xf32> to vector<2x8x32xf32>
    "tpu.trace_start"() <{level = 10 : i32, message = "bqc,bkc->bqk"}> : () -> ()
    %cst_21 = arith.constant dense<0.000000e+00> : vector<2x8x8xf32>
    %48 = tpu.matmul %43, %45, %cst_21 {dimension_numbers = #tpu.dot_dimension_numbers<[2], [2], [1], [1], [0, 0, 0, 1, 1, 1], [0], [0]>} : vector<2x8x32xf32>, vector<2x8x32xf32>, vector<2x8x8xf32> -> vector<2x8x8xf32>
    "tpu.trace_stop"() : () -> ()
    %cst_22 = arith.constant 0.176776692 : f32
    %49 = vector.broadcast %cst_22 : f32 to vector<2x8x8xf32>
    %50 = arith.mulf %48, %49 : vector<2x8x8xf32>
    %51 = vector.broadcast %41 : vector<1x1x8xf32> to vector<2x8x8xf32>
    %52 = arith.addf %50, %51 : vector<2x8x8xf32>
    %cst_23 = arith.constant dense<0xFF800000> : vector<2x8xf32>
    %53 = vector.multi_reduction <maximumf>, %52, %cst_23 [2] : vector<2x8x8xf32> to vector<2x8xf32>
    %54 = vector.shape_cast %53 : vector<2x8xf32> to vector<2x8x1xf32>
    %55 = vector.broadcast %54 : vector<2x8x1xf32> to vector<2x8x8xf32>
    %56 = arith.subf %52, %55 : vector<2x8x8xf32>
    %57 = math.exp %56 : vector<2x8x8xf32>
    %cst_24 = arith.constant dense<0.000000e+00> : vector<2x8xf32>
    %58 = vector.multi_reduction <add>, %57, %cst_24 [2] : vector<2x8x8xf32> to vector<2x8xf32>
    %59 = vector.shape_cast %58 : vector<2x8xf32> to vector<2x8x1xf32>
    %60 = tpu.reciprocal %59 {approx = true} : vector<2x8x1xf32> -> vector<2x8x1xf32>
    %61 = vector.broadcast %60 : vector<2x8x1xf32> to vector<2x8x8xf32>
    %62 = arith.mulf %57, %61 : vector<2x8x8xf32>
    "tpu.trace_start"() <{level = 10 : i32, message = "bqk,bkc->bqc"}> : () -> ()
    %cst_25 = arith.constant dense<0.000000e+00> : vector<2x8x32xf32>
    %63 = tpu.matmul %62, %47, %cst_25 {dimension_numbers = #tpu.dot_dimension_numbers<[2], [1], [1], [2], [0, 0, 0, 1, 1, 2], [0], [0]>} : vector<2x8x8xf32>, vector<2x8x32xf32>, vector<2x8x32xf32> -> vector<2x8x32xf32>
    "tpu.trace_stop"() : () -> ()
    %64 = vector.extract_strided_slice %35 {offsets = [0, 32], sizes = [16, 32], strides = [1, 1]} : vector<16x384xf32> to vector<16x32xf32>
    %65 = vector.shape_cast %64 : vector<16x32xf32> to vector<2x8x32xf32>
    %66 = vector.extract_strided_slice %35 {offsets = [0, 160], sizes = [16, 32], strides = [1, 1]} : vector<16x384xf32> to vector<16x32xf32>
    %67 = vector.shape_cast %66 : vector<16x32xf32> to vector<2x8x32xf32>
    %68 = vector.extract_strided_slice %35 {offsets = [0, 288], sizes = [16, 32], strides = [1, 1]} : vector<16x384xf32> to vector<16x32xf32>
    %69 = vector.shape_cast %68 : vector<16x32xf32> to vector<2x8x32xf32>
    "tpu.trace_start"() <{level = 10 : i32, message = "bqc,bkc->bqk"}> : () -> ()
    %cst_26 = arith.constant dense<0.000000e+00> : vector<2x8x8xf32>
    %70 = tpu.matmul %65, %67, %cst_26 {dimension_numbers = #tpu.dot_dimension_numbers<[2], [2], [1], [1], [0, 0, 0, 1, 1, 1], [0], [0]>} : vector<2x8x32xf32>, vector<2x8x32xf32>, vector<2x8x8xf32> -> vector<2x8x8xf32>
    "tpu.trace_stop"() : () -> ()
    %cst_27 = arith.constant 0.176776692 : f32
    %71 = vector.broadcast %cst_27 : f32 to vector<2x8x8xf32>
    %72 = arith.mulf %70, %71 : vector<2x8x8xf32>
    %73 = vector.broadcast %41 : vector<1x1x8xf32> to vector<2x8x8xf32>
    %74 = arith.addf %72, %73 : vector<2x8x8xf32>
    %cst_28 = arith.constant dense<0xFF800000> : vector<2x8xf32>
    %75 = vector.multi_reduction <maximumf>, %74, %cst_28 [2] : vector<2x8x8xf32> to vector<2x8xf32>
    %76 = vector.shape_cast %75 : vector<2x8xf32> to vector<2x8x1xf32>
    %77 = vector.broadcast %76 : vector<2x8x1xf32> to vector<2x8x8xf32>
    %78 = arith.subf %74, %77 : vector<2x8x8xf32>
    %79 = math.exp %78 : vector<2x8x8xf32>
    %cst_29 = arith.constant dense<0.000000e+00> : vector<2x8xf32>
    %80 = vector.multi_reduction <add>, %79, %cst_29 [2] : vector<2x8x8xf32> to vector<2x8xf32>
    %81 = vector.shape_cast %80 : vector<2x8xf32> to vector<2x8x1xf32>
    %82 = tpu.reciprocal %81 {approx = true} : vector<2x8x1xf32> -> vector<2x8x1xf32>
    %83 = vector.broadcast %82 : vector<2x8x1xf32> to vector<2x8x8xf32>
    %84 = arith.mulf %79, %83 : vector<2x8x8xf32>
    "tpu.trace_start"() <{level = 10 : i32, message = "bqk,bkc->bqc"}> : () -> ()
    %cst_30 = arith.constant dense<0.000000e+00> : vector<2x8x32xf32>
    %85 = tpu.matmul %84, %69, %cst_30 {dimension_numbers = #tpu.dot_dimension_numbers<[2], [1], [1], [2], [0, 0, 0, 1, 1, 2], [0], [0]>} : vector<2x8x8xf32>, vector<2x8x32xf32>, vector<2x8x32xf32> -> vector<2x8x32xf32>
    "tpu.trace_stop"() : () -> ()
    %86 = vector.extract_strided_slice %35 {offsets = [0, 64], sizes = [16, 32], strides = [1, 1]} : vector<16x384xf32> to vector<16x32xf32>
    %87 = vector.shape_cast %86 : vector<16x32xf32> to vector<2x8x32xf32>
    %88 = vector.extract_strided_slice %35 {offsets = [0, 192], sizes = [16, 32], strides = [1, 1]} : vector<16x384xf32> to vector<16x32xf32>
    %89 = vector.shape_cast %88 : vector<16x32xf32> to vector<2x8x32xf32>
    %90 = vector.extract_strided_slice %35 {offsets = [0, 320], sizes = [16, 32], strides = [1, 1]} : vector<16x384xf32> to vector<16x32xf32>
    %91 = vector.shape_cast %90 : vector<16x32xf32> to vector<2x8x32xf32>
    "tpu.trace_start"() <{level = 10 : i32, message = "bqc,bkc->bqk"}> : () -> ()
    %cst_31 = arith.constant dense<0.000000e+00> : vector<2x8x8xf32>
    %92 = tpu.matmul %87, %89, %cst_31 {dimension_numbers = #tpu.dot_dimension_numbers<[2], [2], [1], [1], [0, 0, 0, 1, 1, 1], [0], [0]>} : vector<2x8x32xf32>, vector<2x8x32xf32>, vector<2x8x8xf32> -> vector<2x8x8xf32>
    "tpu.trace_stop"() : () -> ()
    %cst_32 = arith.constant 0.176776692 : f32
    %93 = vector.broadcast %cst_32 : f32 to vector<2x8x8xf32>
    %94 = arith.mulf %92, %93 : vector<2x8x8xf32>
    %95 = vector.broadcast %41 : vector<1x1x8xf32> to vector<2x8x8xf32>
    %96 = arith.addf %94, %95 : vector<2x8x8xf32>
    %cst_33 = arith.constant dense<0xFF800000> : vector<2x8xf32>
    %97 = vector.multi_reduction <maximumf>, %96, %cst_33 [2] : vector<2x8x8xf32> to vector<2x8xf32>
    %98 = vector.shape_cast %97 : vector<2x8xf32> to vector<2x8x1xf32>
    %99 = vector.broadcast %98 : vector<2x8x1xf32> to vector<2x8x8xf32>
    %100 = arith.subf %96, %99 : vector<2x8x8xf32>
    %101 = math.exp %100 : vector<2x8x8xf32>
    %cst_34 = arith.constant dense<0.000000e+00> : vector<2x8xf32>
    %102 = vector.multi_reduction <add>, %101, %cst_34 [2] : vector<2x8x8xf32> to vector<2x8xf32>
    %103 = vector.shape_cast %102 : vector<2x8xf32> to vector<2x8x1xf32>
    %104 = tpu.reciprocal %103 {approx = true} : vector<2x8x1xf32> -> vector<2x8x1xf32>
    %105 = vector.broadcast %104 : vector<2x8x1xf32> to vector<2x8x8xf32>
    %106 = arith.mulf %101, %105 : vector<2x8x8xf32>
    "tpu.trace_start"() <{level = 10 : i32, message = "bqk,bkc->bqc"}> : () -> ()
    %cst_35 = arith.constant dense<0.000000e+00> : vector<2x8x32xf32>
    %107 = tpu.matmul %106, %91, %cst_35 {dimension_numbers = #tpu.dot_dimension_numbers<[2], [1], [1], [2], [0, 0, 0, 1, 1, 2], [0], [0]>} : vector<2x8x8xf32>, vector<2x8x32xf32>, vector<2x8x32xf32> -> vector<2x8x32xf32>
    "tpu.trace_stop"() : () -> ()
    %108 = vector.extract_strided_slice %35 {offsets = [0, 96], sizes = [16, 32], strides = [1, 1]} : vector<16x384xf32> to vector<16x32xf32>
    %109 = vector.shape_cast %108 : vector<16x32xf32> to vector<2x8x32xf32>
    %110 = vector.extract_strided_slice %35 {offsets = [0, 224], sizes = [16, 32], strides = [1, 1]} : vector<16x384xf32> to vector<16x32xf32>
    %111 = vector.shape_cast %110 : vector<16x32xf32> to vector<2x8x32xf32>
    %112 = vector.extract_strided_slice %35 {offsets = [0, 352], sizes = [16, 32], strides = [1, 1]} : vector<16x384xf32> to vector<16x32xf32>
    %113 = vector.shape_cast %112 : vector<16x32xf32> to vector<2x8x32xf32>
    "tpu.trace_start"() <{level = 10 : i32, message = "bqc,bkc->bqk"}> : () -> ()
    %cst_36 = arith.constant dense<0.000000e+00> : vector<2x8x8xf32>
    %114 = tpu.matmul %109, %111, %cst_36 {dimension_numbers = #tpu.dot_dimension_numbers<[2], [2], [1], [1], [0, 0, 0, 1, 1, 1], [0], [0]>} : vector<2x8x32xf32>, vector<2x8x32xf32>, vector<2x8x8xf32> -> vector<2x8x8xf32>
    "tpu.trace_stop"() : () -> ()
    %cst_37 = arith.constant 0.176776692 : f32
    %115 = vector.broadcast %cst_37 : f32 to vector<2x8x8xf32>
    %116 = arith.mulf %114, %115 : vector<2x8x8xf32>
    %117 = vector.broadcast %41 : vector<1x1x8xf32> to vector<2x8x8xf32>
    %118 = arith.addf %116, %117 : vector<2x8x8xf32>
    %cst_38 = arith.constant dense<0xFF800000> : vector<2x8xf32>
    %119 = vector.multi_reduction <maximumf>, %118, %cst_38 [2] : vector<2x8x8xf32> to vector<2x8xf32>
    %120 = vector.shape_cast %119 : vector<2x8xf32> to vector<2x8x1xf32>
    %121 = vector.broadcast %120 : vector<2x8x1xf32> to vector<2x8x8xf32>
    %122 = arith.subf %118, %121 : vector<2x8x8xf32>
    %123 = math.exp %122 : vector<2x8x8xf32>
    %cst_39 = arith.constant dense<0.000000e+00> : vector<2x8xf32>
    %124 = vector.multi_reduction <add>, %123, %cst_39 [2] : vector<2x8x8xf32> to vector<2x8xf32>
    %125 = vector.shape_cast %124 : vector<2x8xf32> to vector<2x8x1xf32>
    %126 = tpu.reciprocal %125 {approx = true} : vector<2x8x1xf32> -> vector<2x8x1xf32>
    %127 = vector.broadcast %126 : vector<2x8x1xf32> to vector<2x8x8xf32>
    %128 = arith.mulf %123, %127 : vector<2x8x8xf32>
    "tpu.trace_start"() <{level = 10 : i32, message = "bqk,bkc->bqc"}> : () -> ()
    %cst_40 = arith.constant dense<0.000000e+00> : vector<2x8x32xf32>
    %129 = tpu.matmul %128, %113, %cst_40 {dimension_numbers = #tpu.dot_dimension_numbers<[2], [1], [1], [2], [0, 0, 0, 1, 1, 2], [0], [0]>} : vector<2x8x8xf32>, vector<2x8x32xf32>, vector<2x8x32xf32> -> vector<2x8x32xf32>
    "tpu.trace_stop"() : () -> ()
    %130 = tpu.concatenate %63, %85, %107, %129 in 2 : vector<2x8x32xf32>, vector<2x8x32xf32>, vector<2x8x32xf32>, vector<2x8x32xf32> -> vector<2x8x128xf32>
    %131 = vector.shape_cast %130 : vector<2x8x128xf32> to vector<16x128xf32>
    %132 = arith.truncf %131 : vector<16x128xf32> to vector<16x128xbf16>
    %c0_41 = arith.constant 0 : index
    %c0_42 = arith.constant 0 : index
    %c0_43 = arith.constant 0 : index
    %133 = vector.load %arg6[%c0_41, %c0_42, %c0_43] : memref<1x128x128xbf16, #tpu.memory_space<vmem>>, vector<1x128x128xbf16>
    %134 = vector.shape_cast %133 : vector<1x128x128xbf16> to vector<128x128xbf16>
    %cst_44 = arith.constant dense<0.000000e+00> : vector<16x128xf32>
    %135 = tpu.matmul %132, %134, %cst_44 {dimension_numbers = #tpu.dot_dimension_numbers<[1], [0], [0], [1], [0, 0, 1, 1], [], []>} : vector<16x128xbf16>, vector<128x128xbf16>, vector<16x128xf32> -> vector<16x128xf32>
    %136 = arith.addf %3, %135 : vector<16x128xf32>
    %c0_45 = arith.constant 0 : index
    %c0_46 = arith.constant 0 : index
    %c0_47 = arith.constant 0 : index
    %137 = vector.load %arg7[%c0_45, %c0_46, %c0_47] : memref<1x1x128xf32, #tpu.memory_space<vmem>>, vector<1x1x128xf32>
    %138 = vector.shape_cast %137 : vector<1x1x128xf32> to vector<1x128xf32>
    %139 = vector.broadcast %138 : vector<1x128xf32> to vector<16x128xf32>
    %140 = arith.addf %136, %139 : vector<16x128xf32>
    %c0_48 = arith.constant 0 : index
    %c0_49 = arith.constant 0 : index
    %c0_50 = arith.constant 0 : index
    %141 = vector.load %arg8[%c0_48, %c0_49, %c0_50] : memref<1x1x128xf32, #tpu.memory_space<vmem>>, vector<1x1x128xf32>
    %142 = vector.shape_cast %141 : vector<1x1x128xf32> to vector<1x128xf32>
    %c0_51 = arith.constant 0 : index
    %c0_52 = arith.constant 0 : index
    %c0_53 = arith.constant 0 : index
    %143 = vector.load %arg9[%c0_51, %c0_52, %c0_53] : memref<1x1x128xf32, #tpu.memory_space<vmem>>, vector<1x1x128xf32>
    %144 = vector.shape_cast %143 : vector<1x1x128xf32> to vector<1x128xf32>
    %cst_54 = arith.constant dense<0.000000e+00> : vector<16xf32>
    %145 = vector.multi_reduction <add>, %140, %cst_54 [1] : vector<16x128xf32> to vector<16xf32>
    %146 = vector.shape_cast %145 : vector<16xf32> to vector<16x1xf32>
    %cst_55 = arith.constant 1.280000e+02 : f32
    %147 = vector.broadcast %cst_55 : f32 to vector<16x1xf32>
    %148 = arith.divf %146, %147 : vector<16x1xf32>
    %149 = vector.broadcast %148 : vector<16x1xf32> to vector<16x128xf32>
    %150 = arith.subf %140, %149 : vector<16x128xf32>
    %151 = arith.mulf %150, %150 : vector<16x128xf32>
    %cst_56 = arith.constant dense<0.000000e+00> : vector<16xf32>
    %152 = vector.multi_reduction <add>, %151, %cst_56 [1] : vector<16x128xf32> to vector<16xf32>
    %153 = vector.shape_cast %152 : vector<16xf32> to vector<16x1xf32>
    %cst_57 = arith.constant 1.280000e+02 : f32
    %154 = vector.broadcast %cst_57 : f32 to vector<16x1xf32>
    %155 = arith.divf %153, %154 : vector<16x1xf32>
    %cst_58 = arith.constant 9.99999974E-6 : f32
    %156 = vector.broadcast %cst_58 : f32 to vector<16x1xf32>
    %157 = arith.addf %155, %156 : vector<16x1xf32>
    %158 = math.rsqrt %157 : vector<16x1xf32>
    %159 = vector.broadcast %158 : vector<16x1xf32> to vector<16x128xf32>
    %160 = arith.mulf %150, %159 : vector<16x128xf32>
    %161 = vector.broadcast %142 : vector<1x128xf32> to vector<16x128xf32>
    %162 = arith.mulf %160, %161 : vector<16x128xf32>
    %163 = vector.broadcast %144 : vector<1x128xf32> to vector<16x128xf32>
    %164 = arith.addf %162, %163 : vector<16x128xf32>
    %165 = arith.truncf %164 : vector<16x128xf32> to vector<16x128xbf16>
    %c0_59 = arith.constant 0 : index
    %c0_60 = arith.constant 0 : index
    %c0_61 = arith.constant 0 : index
    %166 = vector.load %arg10[%c0_59, %c0_60, %c0_61] : memref<1x128x512xbf16, #tpu.memory_space<vmem>>, vector<1x128x512xbf16>
    %167 = vector.shape_cast %166 : vector<1x128x512xbf16> to vector<128x512xbf16>
    %cst_62 = arith.constant dense<0.000000e+00> : vector<16x512xf32>
    %168 = tpu.matmul %165, %167, %cst_62 {dimension_numbers = #tpu.dot_dimension_numbers<[1], [0], [0], [1], [0, 0, 1, 1], [], []>} : vector<16x128xbf16>, vector<128x512xbf16>, vector<16x512xf32> -> vector<16x512xf32>
    %c0_63 = arith.constant 0 : index
    %c0_64 = arith.constant 0 : index
    %c0_65 = arith.constant 0 : index
    %169 = vector.load %arg11[%c0_63, %c0_64, %c0_65] : memref<1x1x512xf32, #tpu.memory_space<vmem>>, vector<1x1x512xf32>
    %170 = vector.shape_cast %169 : vector<1x1x512xf32> to vector<1x512xf32>
    %171 = vector.broadcast %170 : vector<1x512xf32> to vector<16x512xf32>
    %172 = arith.addf %168, %171 : vector<16x512xf32>
    %cst_66 = arith.constant 1.702000e+00 : f32
    %173 = vector.broadcast %cst_66 : f32 to vector<16x512xf32>
    %174 = arith.mulf %173, %172 : vector<16x512xf32>
    %175 = arith.negf %174 : vector<16x512xf32>
    %176 = math.exp %175 : vector<16x512xf32>
    %cst_67 = arith.constant 1.000000e+00 : f32
    %177 = vector.broadcast %cst_67 : f32 to vector<16x512xf32>
    %178 = arith.addf %177, %176 : vector<16x512xf32>
    %179 = arith.divf %177, %178 : vector<16x512xf32>
    %180 = arith.mulf %172, %179 : vector<16x512xf32>
    %181 = arith.truncf %180 : vector<16x512xf32> to vector<16x512xbf16>
    %c0_68 = arith.constant 0 : index
    %c0_69 = arith.constant 0 : index
    %c0_70 = arith.constant 0 : index
    %182 = vector.load %arg12[%c0_68, %c0_69, %c0_70] : memref<1x512x128xbf16, #tpu.memory_space<vmem>>, vector<1x512x128xbf16>
    %183 = vector.shape_cast %182 : vector<1x512x128xbf16> to vector<512x128xbf16>
    %cst_71 = arith.constant dense<0.000000e+00> : vector<16x128xf32>
    %184 = tpu.matmul %181, %183, %cst_71 {dimension_numbers = #tpu.dot_dimension_numbers<[1], [0], [0], [1], [0, 0, 1, 1], [], []>} : vector<16x512xbf16>, vector<512x128xbf16>, vector<16x128xf32> -> vector<16x128xf32>
    %185 = arith.addf %140, %184 : vector<16x128xf32>
    %c0_72 = arith.constant 0 : index
    %c0_73 = arith.constant 0 : index
    %c0_74 = arith.constant 0 : index
    %186 = vector.load %arg13[%c0_72, %c0_73, %c0_74] : memref<1x1x128xf32, #tpu.memory_space<vmem>>, vector<1x1x128xf32>
    %187 = vector.shape_cast %186 : vector<1x1x128xf32> to vector<1x128xf32>
    %188 = vector.broadcast %187 : vector<1x128xf32> to vector<16x128xf32>
    %189 = arith.addf %185, %188 : vector<16x128xf32>
    %c0_75 = arith.constant 0 : index
    %c0_76 = arith.constant 0 : index
    %190 = vector.load %arg15[%c0_75, %c0_76] : memref<16x128xf32, #tpu.memory_space<vmem>>, vector<16x128xf32>
    tpu.vector_store %arg15[%c0_75, %c0_76], %189 {strides = array<i32>} : memref<16x128xf32, #tpu.memory_space<vmem>>, vector<16x128xf32>,
    %191 = vector.shape_cast %189 : vector<16x128xf32> to vector<2x8x128xf32>
    %192 = vector.extract_strided_slice %191 {offsets = [0, 0, 0], sizes = [2, 1, 128], strides = [1, 1, 1]} : vector<2x8x128xf32> to vector<2x1x128xf32>
    %193 = vector.shape_cast %192 : vector<2x1x128xf32> to vector<2x128xf32>
    %c0_77 = arith.constant 0 : index
    %c0_78 = arith.constant 0 : index
    %c0_79 = arith.constant 0 : index
    %194 = vector.load %arg14[%c0_77, %c0_78, %c0_79] : memref<1x2x128xf32, #tpu.memory_space<vmem>>, vector<1x2x128xf32>
    %195 = vector.shape_cast %194 : vector<1x2x128xf32> to vector<2x128xf32>
    %196 = vector.shape_cast %193 : vector<2x128xf32> to vector<1x2x128xf32>
    tpu.vector_store %arg14[%c0_77, %c0_78, %c0_79], %196 {strides = array<i32>} : memref<1x2x128xf32, #tpu.memory_space<vmem>>, vector<1x2x128xf32>,
    return
  }
  func.func @transform_0(%arg0: i32) -> (i32, i32) {
    %c0_i32 = arith.constant 0 : i32
    %c0_i32_0 = arith.constant 0 : i32
    %c0_i32_1 = arith.constant 0 : i32
    return %c0_i32, %c0_i32_0 : i32, i32
  }
  func.func @transform_1(%arg0: i32) -> (i32, i32, i32) {
    %c0_i32 = arith.constant 0 : i32
    %c0_i32_0 = arith.constant 0 : i32
    %c0_i32_1 = arith.constant 0 : i32
    return %arg0, %c0_i32, %c0_i32_0 : i32, i32, i32
  }
  func.func @transform_2(%arg0: i32) -> (i32, i32, i32) {
    %c0_i32 = arith.constant 0 : i32
    %c0_i32_0 = arith.constant 0 : i32
    %c0_i32_1 = arith.constant 0 : i32
    return %arg0, %c0_i32, %c0_i32_0 : i32, i32, i32
  }
  func.func @transform_3(%arg0: i32) -> (i32, i32, i32) {
    %c0_i32 = arith.constant 0 : i32
    %c0_i32_0 = arith.constant 0 : i32
    %c0_i32_1 = arith.constant 0 : i32
    return %arg0, %c0_i32, %c0_i32_0 : i32, i32, i32
  }
  func.func @transform_4(%arg0: i32) -> (i32, i32, i32) {
    %c0_i32 = arith.constant 0 : i32
    %c0_i32_0 = arith.constant 0 : i32
    %c0_i32_1 = arith.constant 0 : i32
    return %arg0, %c0_i32, %c0_i32_0 : i32, i32, i32
  }
  func.func @transform_5(%arg0: i32) -> (i32, i32, i32) {
    %c0_i32 = arith.constant 0 : i32
    %c0_i32_0 = arith.constant 0 : i32
    %c0_i32_1 = arith.constant 0 : i32
    return %arg0, %c0_i32, %c0_i32_0 : i32, i32, i32
  }
  func.func @transform_6(%arg0: i32) -> (i32, i32, i32) {
    %c0_i32 = arith.constant 0 : i32
    %c0_i32_0 = arith.constant 0 : i32
    %c0_i32_1 = arith.constant 0 : i32
    return %arg0, %c0_i32, %c0_i32_0 : i32, i32, i32
  }
  func.func @transform_7(%arg0: i32) -> (i32, i32, i32) {
    %c0_i32 = arith.constant 0 : i32
    %c0_i32_0 = arith.constant 0 : i32
    %c0_i32_1 = arith.constant 0 : i32
    return %arg0, %c0_i32, %c0_i32_0 : i32, i32, i32
  }
  func.func @transform_8(%arg0: i32) -> (i32, i32, i32) {
    %c0_i32 = arith.constant 0 : i32
    %c0_i32_0 = arith.constant 0 : i32
    %c0_i32_1 = arith.constant 0 : i32
    return %arg0, %c0_i32, %c0_i32_0 : i32, i32, i32
  }
  func.func @transform_9(%arg0: i32) -> (i32, i32, i32) {
    %c0_i32 = arith.constant 0 : i32
    %c0_i32_0 = arith.constant 0 : i32
    %c0_i32_1 = arith.constant 0 : i32
    return %arg0, %c0_i32, %c0_i32_0 : i32, i32, i32
  }
  func.func @transform_10(%arg0: i32) -> (i32, i32, i32) {
    %c0_i32 = arith.constant 0 : i32
    %c0_i32_0 = arith.constant 0 : i32
    %c0_i32_1 = arith.constant 0 : i32
    return %arg0, %c0_i32, %c0_i32_0 : i32, i32, i32
  }
  func.func @transform_11(%arg0: i32) -> (i32, i32, i32) {
    %c0_i32 = arith.constant 0 : i32
    %c0_i32_0 = arith.constant 0 : i32
    %c0_i32_1 = arith.constant 0 : i32
    return %arg0, %c0_i32, %c0_i32_0 : i32, i32, i32
  }
  func.func @transform_12(%arg0: i32) -> (i32, i32, i32) {
    %c0_i32 = arith.constant 0 : i32
    %c0_i32_0 = arith.constant 0 : i32
    %c0_i32_1 = arith.constant 0 : i32
    return %arg0, %c0_i32, %c0_i32_0 : i32, i32, i32
  }
  func.func @transform_13(%arg0: i32) -> (i32, i32, i32) {
    %c0_i32 = arith.constant 0 : i32
    %c0_i32_0 = arith.constant 0 : i32
    %c0_i32_1 = arith.constant 0 : i32
    return %arg0, %c0_i32, %c0_i32_0 : i32, i32, i32
  }
}

</mosaic_0001>

<bundles_post_ra>
// kernel: custom_clip_forward.3
= control target key start
LH: loop header
LB: loop body
LE: loop exit
PB: predicated region body
PF: predicated region fallthrough
CT: control target
= control target key end

     0   :  { %s1049_s1 = inlined_call_operand.vmem [shape: bf16[768,128], index: 1, kind: input, shape index: {}]   ;;  %s1050_s0 = inlined_call_operand.vmem [shape: f32[16,768], index: 0, kind: input, shape index: {}]   ;;  %s1051_s2 = inlined_call_operand.vmem [shape: f32[8,128], index: 2, kind: input, shape index: {}]   ;;  %s1052_s3 = inlined_call_operand.vmem [shape: f32[1,128], index: 3, kind: input, shape index: {}]   ;;  %s1053_s4 = inlined_call_operand.vmem [shape: f32[1,128], index: 4, kind: input, shape index: {}]   ;;  %s1054_s5 = inlined_call_operand.vmem [shape: f32[16,128], index: 5, kind: output, shape index: {}]  }
   0x1   :  { %v773_v0 = vld [vmem:[%s1049_s1 + $0x38] sm:$0xff]  ;;  %v772_v4 = vld [vmem:[%s1049_s1 + $0x30] sm:$0xff]  ;;  %v771_v8 = vld [vmem:[%s1049_s1 + $0x28] sm:$0xff] }
   0x2   :  { %v781_v1 = vld [vmem:[%s1049_s1 + $0x78] sm:$0xff]  ;;  %422 = vmatpush.bf16.msra.mxu0 %v773_v0  ;;  %v780_v5 = vld [vmem:[%s1049_s1 + $0x70] sm:$0xff]  ;;  %v779_v9 = vld [vmem:[%s1049_s1 + $0x68] sm:$0xff] }
   0x3   :  { %v789_v2 = vld [vmem:[%s1049_s1 + $0xb8] sm:$0xff]  ;;  %436 = vmatpush.bf16.msra.mxu1 %v781_v1  ;;  %v788_v6 = vld [vmem:[%s1049_s1 + $0xb0] sm:$0xff]  ;;  %v787_v10 = vld [vmem:[%s1049_s1 + $0xa8] sm:$0xff] }
   0x4   :  { %v797_v3 = vld [vmem:[%s1049_s1 + $0xf8] sm:$0xff]  ;;  %450 = vmatpush.bf16.msra.mxu2 %v789_v2  ;;  %v796_v7 = vld [vmem:[%s1049_s1 + $0xf0] sm:$0xff]  ;;  %v795_v11 = vld [vmem:[%s1049_s1 + $0xe8] sm:$0xff] }
   0x5   :  { %464 = vmatpush.bf16.msra.mxu3 %v797_v3  ;;  %v770_v12 = vld [vmem:[%s1049_s1 + $0x20] sm:$0xff]  ;;  %v769_v16 = vld [vmem:[%s1049_s1 + $0x18] sm:$0xff]  ;;  %v768_v20 = vld [vmem:[%s1049_s1 + $0x10] sm:$0xff] }
   0x6   :  { %423 = vmatpush.bf16.msra.mxu0 %v772_v4  ;;  %v778_v13 = vld [vmem:[%s1049_s1 + $0x60] sm:$0xff]  ;;  %v777_v17 = vld [vmem:[%s1049_s1 + $0x58] sm:$0xff]  ;;  %v776_v21 = vld [vmem:[%s1049_s1 + $0x50] sm:$0xff] }
   0x7   :  { %437 = vmatpush.bf16.msra.mxu1 %v780_v5  ;;  %v786_v14 = vld [vmem:[%s1049_s1 + $0xa0] sm:$0xff]  ;;  %v785_v18 = vld [vmem:[%s1049_s1 + $0x98] sm:$0xff]  ;;  %v784_v22 = vld [vmem:[%s1049_s1 + $0x90] sm:$0xff] }
   0x8   :  { %451 = vmatpush.bf16.msra.mxu2 %v788_v6  ;;  %v794_v15 = vld [vmem:[%s1049_s1 + $0xe0] sm:$0xff]  ;;  %v793_v19 = vld [vmem:[%s1049_s1 + $0xd8] sm:$0xff]  ;;  %v792_v23 = vld [vmem:[%s1049_s1 + $0xd0] sm:$0xff] }
   0x9   :  { %465 = vmatpush.bf16.msra.mxu3 %v796_v7  ;;  %v767_v24 = vld [vmem:[%s1049_s1 + $0x8] sm:$0xff]  ;;  %v766_v28 = vld [vmem:[%s1049_s1] sm:$0xff]  ;;  %v805_v31 = vld [vmem:[%s1049_s1 + $0x138] sm:$0xff] }
   0xa   :  { %424 = vmatpush.bf16.msra.mxu0 %v771_v8  ;;  %v775_v25 = vld [vmem:[%s1049_s1 + $0x48] sm:$0xff]  ;;  %v774_v29 = vld [vmem:[%s1049_s1 + $0x40] sm:$0xff]  ;;  %v26_v33 = vld [vmem:[%s1050_s0 + $0x30] sm:$0xff] }
   0xb   :  { %438 = vmatpush.bf16.msra.mxu1 %v779_v9  ;;  %v783_v26 = vld [vmem:[%s1049_s1 + $0x88] sm:$0xff]  ;;  %v782_v30 = vld [vmem:[%s1049_s1 + $0x80] sm:$0xff]  ;;  %v27_v35 = vld [vmem:[%s1050_s0 + $0x38] sm:$0xff] }
   0xc   :  { %452 = vmatpush.bf16.msra.mxu2 %v787_v10  ;;  %v791_v27 = vld [vmem:[%s1049_s1 + $0xc8] sm:$0xff]  ;;  %v20_v32 = vld [vmem:[%s1050_s0] sm:$0xff]  ;;  %v813_v36 = vld [vmem:[%s1049_s1 + $0x178] sm:$0xff] }
   0xd   :  { %466 = vmatpush.bf16.msra.mxu3 %v795_v11  ;;  %v21_v34 = vld [vmem:[%s1050_s0 + $0x8] sm:$0xff]  ;;  %v22_v37 = vld [vmem:[%s1050_s0 + $0x10] sm:$0xff]  ;;  %v28_v38 = vld [vmem:[%s1050_s0 + $0x40] sm:$0xff]  ;;  %v32_v42 = vpack.c.bf16 %v26_v33, %v20_v32 }
   0xe   :  { %425 = vmatpush.bf16.msra.mxu0 %v770_v12  ;;  %v790_v39 = vld [vmem:[%s1049_s1 + $0xc0] sm:$0xff]  ;;  %v23_v40 = vld [vmem:[%s1050_s0 + $0x18] sm:$0xff]  ;;  %v29_v41 = vld [vmem:[%s1050_s0 + $0x48] sm:$0xff]  ;;  %v33_v43 = vpack.c.bf16 %v27_v35, %v21_v34  ;;  %v34_v44 = vpack.c.bf16 %v28_v38, %v22_v37 }
   0xf   :  { %439 = vmatpush.bf16.msra.mxu1 %v778_v13  ;;  %v804_v45 = vld [vmem:[%s1049_s1 + $0x130] sm:$0xff]  ;;  %v35_v46 = vpack.c.bf16 %v29_v41, %v23_v40  ;;  %v803_v48 = vld [vmem:[%s1049_s1 + $0x128] sm:$0xff]  ;;  %v802_v50 = vld [vmem:[%s1049_s1 + $0x120] sm:$0xff] }
  0x10   :  { %453 = vmatpush.bf16.msra.mxu2 %v786_v14  ;;  %v812_v47 = vld [vmem:[%s1049_s1 + $0x170] sm:$0xff]  ;;  %v811_v49 = vld [vmem:[%s1049_s1 + $0x168] sm:$0xff]  ;;  %v810_v51 = vld [vmem:[%s1049_s1 + $0x160] sm:$0xff] }
  0x11   :  { %467 = vmatpush.bf16.msra.mxu3 %v794_v15  ;;  %v801_v52 = vld [vmem:[%s1049_s1 + $0x118] sm:$0xff]  ;;  %v800_v54 = vld [vmem:[%s1049_s1 + $0x110] sm:$0xff]  ;;  %v799_v56 = vld [vmem:[%s1049_s1 + $0x108] sm:$0xff] }
  0x12   :  { %426 = vmatpush.bf16.msra.mxu0 %v769_v16  ;;  %v809_v53 = vld [vmem:[%s1049_s1 + $0x158] sm:$0xff]  ;;  %v808_v55 = vld [vmem:[%s1049_s1 + $0x150] sm:$0xff]  ;;  %v807_v57 = vld [vmem:[%s1049_s1 + $0x148] sm:$0xff] }
  0x13   :  { %440 = vmatpush.bf16.msra.mxu1 %v777_v17  ;;  %v798_v58 = vld [vmem:[%s1049_s1 + $0x100] sm:$0xff]  ;;  %v30_v60 = vld [vmem:[%s1050_s0 + $0x50] sm:$0xff]  ;;  %v25_v62 = vld [vmem:[%s1050_s0 + $0x28] sm:$0xff] }
  0x14   :  { %454 = vmatpush.bf16.msra.mxu2 %v785_v18  ;;  %v24_v59 = vld [vmem:[%s1050_s0 + $0x20] sm:$0xff]  ;;  %v31_v63 = vld [vmem:[%s1050_s0 + $0x58] sm:$0xff] }
  0x15   :  { %468 = vmatpush.bf16.msra.mxu3 %v793_v19  ;;  %v806_v61 = vld [vmem:[%s1049_s1 + $0x140] sm:$0xff]  ;;  %v36_v0 = vpack.c.bf16 %v30_v60, %v24_v59  ;;  %v37_v1 = vpack.c.bf16 %v31_v63, %v25_v62 }
  0x16   :  { %427 = vmatpush.bf16.msra.mxu0 %v768_v20  ;;  %v506_v16 = vld [vmem:[%s1051_s2] sm:$0xff] }
  0x17   :  { %441 = vmatpush.bf16.msra.mxu1 %v776_v21  ;;  %v816_v59 = vld [vmem:[%s1053_s4] ss:$0 sm:$0xff] }
  0x18   :  { %455 = vmatpush.bf16.msra.mxu2 %v784_v22 }
  0x19   :  { %469 = vmatpush.bf16.msra.mxu3 %v792_v23 }
  0x1a   :  { %428 = vmatpush.bf16.msra.mxu0 %v767_v24 }
  0x1b   :  { %442 = vmatpush.bf16.msra.mxu1 %v775_v25 }
  0x1c   :  { %456 = vmatpush.bf16.msra.mxu2 %v783_v26 }
  0x1d   :  { %470 = vmatpush.bf16.msra.mxu3 %v791_v27  ;;  %v823_v27 = vmov 128.0  }
  0x1e   :  { %429 = vmatpush.bf16.msra.mxu0 %v766_v28  ;;  %817 = vrcp.f32 %v823_v27 }
  0x1f   :  { %443 = vmatpush.bf16.msra.mxu1 %v774_v29 }
  0x20   :  { %457 = vmatpush.bf16.msra.mxu2 %v782_v30 }
  0x21   :  { %471 = vmatpush.bf16.msra.mxu3 %v790_v39  ;;  %430 = vmatmul.bf16.vlgmr.msra.gmra.mxu0 %v32_v42 }
  0x22   :  { %478 = vmatpush.bf16.msrb.mxu0 %v805_v31  ;;  %444 = vmatmul.bf16.vlgmr.msra.gmra.mxu1 %v33_v43 }
  0x23   :  { %492 = vmatpush.bf16.msrb.mxu1 %v813_v36  ;;  %458 = vmatmul.bf16.vlgmr.msra.gmra.mxu2 %v34_v44 }
  0x24   :  { %472 = vmatmul.bf16.vlgmr.msra.gmra.mxu3 %v35_v46  ;;  %v818_v28 = vpop.eup %817 }
  0x25   :  { %v516_v29 = vmul.f32 128.0, %v818_v28  ;;  %vm520_vm0 = vweird.f32 %v818_v28 }
  0x26   :  { %479 = vmatpush.bf16.msrb.mxu0 %v804_v45 }
  0x27   :  { %493 = vmatpush.bf16.msrb.mxu1 %v812_v47  ;;  %v517_v30 = vsub.f32 1.0, %v516_v29 }
  0x29   :  { %v518_v31 = vmul.f32 %v818_v28, %v517_v30 }
  0x2a   :  { %480 = vmatpush.bf16.msrb.mxu0 %v803_v48 }
  0x2b   :  { %494 = vmatpush.bf16.msrb.mxu1 %v811_v49  ;;  %v519_v32 = vadd.f32 %v818_v28, %v518_v31 }
  0x2d   :  { %v521_v33 = vsel %vm520_vm0, %v818_v28, %v519_v32 }
  0x2e   :  { %481 = vmatpush.bf16.msrb.mxu0 %v802_v50 }
  0x2f   :  { %495 = vmatpush.bf16.msrb.mxu1 %v810_v51 }
  0x32   :  { %482 = vmatpush.bf16.msrb.mxu0 %v801_v52 }
  0x33   :  { %496 = vmatpush.bf16.msrb.mxu1 %v809_v53 }
  0x36   :  { %483 = vmatpush.bf16.msrb.mxu0 %v800_v54 }
  0x37   :  { %497 = vmatpush.bf16.msrb.mxu1 %v808_v55 }
  0x3a   :  { %484 = vmatpush.bf16.msrb.mxu0 %v799_v56  ;;  %v815_v56 = vld [vmem:[%s1052_s3] ss:$0 sm:$0xff] }
  0x3b   :  { %498 = vmatpush.bf16.msrb.mxu1 %v807_v57 }
  0x3e   :  { %485 = vmatpush.bf16.msrb.mxu0 %v798_v58 }
  0x3f   :  { %499 = vmatpush.bf16.msrb.mxu1 %v806_v61 }
  0x41   :  { %486 = vmatmul.bf16.vlgmr.msrb.gmra.mxu0 %v36_v0 }
  0x42   :  { %500 = vmatmul.bf16.vlgmr.msrb.gmra.mxu1 %v37_v1 }
  0x9e   :  { %v431_v2 = vpop.f32.mrf.mxu0 }
  0x9f   :  { %v445_v3 = vpop.f32.mrf.mxu1 }
  0xa0   :  { %v446_v5 = vadd.f32 %v445_v3, %v431_v2 }
  0xa6   :  { %v459_v4 = vpop.f32.mrf.mxu2  ;;  %v433_v6 = vpop.f32.mrf.mxu0 }
  0xa7   :  { %v447_v7 = vpop.f32.mrf.mxu1  ;;  %v473_v8 = vpop.f32.mrf.mxu3  ;;  %v460_v9 = vadd.f32 %v459_v4, %v446_v5 }
  0xa8   :  { %v448_v11 = vadd.f32 %v447_v7, %v433_v6 }
  0xa9   :  { %v474_v10 = vadd.f32 %v473_v8, %v460_v9 }
  0xae   :  { %v461_v12 = vpop.f32.mrf.mxu2 }
  0xaf   :  { %v462_v17 = vadd.f32 %v461_v12, %v448_v11  ;;  %v475_v19 = vpop.f32.mrf.mxu3 }
  0xb1   :  { %v476_v21 = vadd.f32 %v475_v19, %v462_v17 }
  0xbe   :  { %v487_v13 = vpop.f32.mrf.mxu0 }
  0xbf   :  { %v488_v14 = vadd.f32 %v487_v13, %v474_v10  ;;  %v501_v15 = vpop.f32.mrf.mxu1 }
  0xc1   :  { %v502_v18 = vadd.f32 %v501_v15, %v488_v14 }
  0xc3   :  { %v507_v20 = vadd.f32 %v506_v16, %v502_v18 }
  0xc5   :  { %511 = vadd.xlane.f32.xlu0 %v507_v20 }
  0xc6   :  { %v489_v22 = vpop.f32.mrf.mxu0 }
  0xc7   :  { %v490_v23 = vadd.f32 %v489_v22, %v476_v21  ;;  %v503_v24 = vpop.f32.mrf.mxu1 }
  0xc9   :  { %v504_v25 = vadd.f32 %v503_v24, %v490_v23 }
  0xcb   :  { %v508_v26 = vadd.f32 %v506_v16, %v504_v25 }
  0xcd   :  { %513 = vadd.xlane.f32.xlu0 %v508_v26 }
 0x138   :  { %v512_v34 = vpop.xlane.xlu0 %511 }
 0x139   :  { %v522_v35 = vmul.f32 %v521_v33, %v512_v34 }
 0x13b   :  { %v524_v36 = vsub.f32 %v507_v20, %v522_v35 }
 0x13d   :  { %v526_v37 = vmul.f32 %v524_v36, %v524_v36 }
 0x13f   :  { %528 = vadd.xlane.f32.xlu1 %v526_v37 }
 0x140   :  { %v514_v38 = vpop.xlane.xlu0 %513 }
 0x141   :  { %v523_v39 = vmul.f32 %v521_v33, %v514_v38 }
 0x143   :  { %v525_v40 = vsub.f32 %v508_v26, %v523_v39 }
 0x145   :  { %v527_v41 = vmul.f32 %v525_v40, %v525_v40 }
 0x147   :  { %530 = vadd.xlane.f32.xlu1 %v527_v41 }
 0x1b2   :  { %v529_v42 = vpop.xlane.xlu1 %528 }
 0x1b3   :  { %v532_v43 = vmul.f32 %v529_v42, %v521_v33 }
 0x1b5   :  { %v534_v44 = vadd.f32 1e-05, %v532_v43 }
 0x1b7   :  { %819 = vrsqrt.f32 %v534_v44  ;;  %vm542_vm2 = vweird.f32 %v534_v44 }
 0x1ba   :  { %v531_v45 = vpop.xlane.xlu1 %530 }
 0x1bb   :  { %v533_v46 = vmul.f32 %v531_v45, %v521_v33 }
 0x1bd   :  { %v820_v47 = vpop.eup %819  ;;  %v535_v48 = vadd.f32 1e-05, %v533_v46 }
 0x1be   :  { %v537_v49 = vmul.f32 %v820_v47, %v534_v44  ;;  %vm543_vm1 = vweird.f32 %v820_v47 }
 0x1bf   :  { %821 = vrsqrt.f32 %v535_v48  ;;  %vm544_vm3 = vmor %vm542_vm2, %vm543_vm1  ;;  %vm552_vm5 = vweird.f32 %v535_v48 }
 0x1c0   :  { %v538_v50 = vmul.f32 %v820_v47, %v537_v49 }
 0x1c2   :  { %v539_v51 = vmul.f32 0.5, %v538_v50 }
 0x1c4   :  { %v540_v52 = vsub.f32 1.5, %v539_v51 }
 0x1c5   :  { %v822_v53 = vpop.eup %821 }
 0x1c6   :  { %v541_v54 = vmul.f32 %v820_v47, %v540_v52  ;;  %v547_v55 = vmul.f32 %v822_v53, %v535_v48  ;;  %vm553_vm4 = vweird.f32 %v822_v53 }
 0x1c7   :  { %vm554_vm6 = vmor %vm552_vm5, %vm553_vm4 }
 0x1c8   :  { %v545_v57 = vsel %vm544_vm3, %v820_v47, %v541_v54  ;;  %v548_v58 = vmul.f32 %v822_v53, %v547_v55 }
 0x1c9   :  { %v556_v60 = vmul.f32 %v545_v57, %v524_v36 }
 0x1ca   :  { %v549_v61 = vmul.f32 0.5, %v548_v58 }
 0x1cb   :  { %v561_v62 = vmul.f32 %v815_v56, %v556_v60 }
 0x1cc   :  { %v550_v63 = vsub.f32 1.5, %v549_v61 }
 0x1cd   :  { %v566_v0 = vadd.f32 %v816_v59, %v561_v62 }
 0x1ce   :  { %v551_v1 = vmul.f32 %v822_v53, %v550_v63 }
 0x1cf   :  { %568 = vst [vmem:[%s1054_s5] sm:$0xff] %v566_v0 }
 0x1d0   :  { %v555_v2 = vsel %vm554_vm6, %v822_v53, %v551_v1 }
 0x1d1   :  { %v557_v3 = vmul.f32 %v555_v2, %v525_v40 }
 0x1d3   :  { %v562_v4 = vmul.f32 %v815_v56, %v557_v3 }
 0x1d5   :  { %v567_v5 = vadd.f32 %v816_v59, %v562_v4 }
 0x1d7   :  { %569 = vst [vmem:[%s1054_s5 + $0x8] sm:$0xff] %v567_v5 }

// kernel: custom_clip_forward.4
= control target key start
LH: loop header
LB: loop body
LE: loop exit
PB: predicated region body
PF: predicated region fallthrough
CT: control target
= control target key end

     0   :  { %s4724_s0 = inlined_call_operand.vmem [shape: f32[16,128], index: 0, kind: input, shape index: {}]   ;;  %s4725_s1 = inlined_call_operand.vmem [shape: f32[3,1,128], index: 1, kind: input, shape index: {}]   ;;  %s4726_s2 = inlined_call_operand.hbm [shape: f32[3,1,128], index: 2, kind: input, shape index: {}]   ;;  %s4727_s3 = inlined_call_operand.hbm [shape: bf16[3,128,384], index: 3, kind: input, shape index: {}]   ;;  %s4728_s4 = inlined_call_operand.hbm [shape: f32[3,1,384], index: 4, kind: input, shape index: {}]   ;;  %s4729_s5 = inlined_call_operand.hbm [shape: bf16[3,128,128], index: 5, kind: input, shape index: {}]   ;;  %s4730_s6 = inlined_call_operand.hbm [shape: f32[3,1,128], index: 6, kind: input, shape index: {}]   ;;  %s4731_s7 = inlined_call_operand.hbm [shape: f32[3,1,128], index: 7, kind: input, shape index: {}]   ;;  %s4732_s8 = inlined_call_operand.hbm [shape: f32[3,1,128], index: 8, kind: input, shape index: {}]   ;;  %s4733_s9 = inlined_call_operand.vmem [shape: bf16[3,128,512], index: 9, kind: input, shape index: {}]   ;;  %s4734_s10 = inlined_call_operand.hbm [shape: f32[3,1,512], index: 10, kind: input, shape index: {}]   ;;  %s4735_s11 = inlined_call_operand.vmem [shape: bf16[3,512,128], index: 11, kind: input, shape index: {}]   ;;  %s4736_s12 = inlined_call_operand.hbm [shape: f32[3,1,128], index: 12, kind: input, shape index: {}]   ;;  %s4737_s13 = inlined_call_operand.vmem [shape: f32[3,2,128], index: 13, kind: output, shape index: {}]  }
   0x1   :  { %4747 = sst [smem:[#allocation26_spill]] %s4724_s0 }
   0x2   :  { %4748 = sst [smem:[#allocation27_spill]] %s4725_s1 }
   0x3   :  { %4749 = sst [smem:[#allocation28_spill]] %s4726_s2 }
   0x4   :  { %4750 = sst [smem:[#allocation29_spill]] %s4727_s3 }
   0x5   :  { %4751 = sst [smem:[#allocation30_spill]] %s4728_s4 }
   0x6   :  { %4752 = sst [smem:[#allocation31_spill]] %s4729_s5 }
   0x7   :  { %4753 = sst [smem:[#allocation32_spill]] %s4733_s9 }
   0x8   :  { %4754 = sst [smem:[#allocation33_spill]] %s4735_s11 }
   0x9   :  { %4755 = sst [smem:[#allocation34_spill]] %s4737_s13 }
   0xa   :  { %18 = vsyncpa [#allocation4], 0 }
   0xb   :  { %20 = vsyncpa [#allocation4 + $0x1], 0 }
   0xc   :  { %21 = vsyncpa [#allocation6], 0 }
   0xd   :  { %23 = vsyncpa [#allocation6 + $0x1], 0 }
   0xe   :  { %24 = vsyncpa [#allocation9], 0 }
   0xf   :  { %26 = vsyncpa [#allocation9 + $0x1], 0 }
  0x10   :  { %27 = vsyncpa [#allocation12], 0 }
  0x11   :  { %29 = vsyncpa [#allocation12 + $0x1], 0 }
  0x12   :  { %30 = vsyncpa [#allocation15], 0 }
  0x13   :  { %32 = vsyncpa [#allocation15 + $0x1], 0  ;;  %s3923_s25 = smov 0   ;;  %s3925_s26 = smov 0  }
  0x14   :  { %s3927_s27 = smov 0   ;;  %s3929_s28 = smov 0  }
  0x15 LB: > { %4756 = sst [smem:[#allocation22_spill]] %s3838_s27  ;;  %s3942_s29 = sadd.s32 4294967295, %s3842_s28   ;;  %s3842_s28 = sphi %s3929_s28, %s4794_s28   ;;  %s3838_s27 = sphi %s3927_s27, %s4796_s27   ;;  %s3834_s26 = sphi %s3925_s26, %s4798_s26   ;;  %s3830_s25 = sphi %s3923_s25, %s4797_s25  }
  0x16   : > { %4757 = sst [smem:[#allocation23_spill]] %s3942_s29  ;;  %s3945_s30 = sadd.s32 1, %s3842_s28  }
  0x17   : > { %4758 = sst [smem:[#allocation24_spill]] %s3945_s30  ;;  %s89_s14 = ssub.s32 %s3842_s28, %s3945_s30 }
  0x18   : > { %s92_s15 = sadd.s32 1, %s3838_s27  ;;  %p90_p0 = scmp.eq.s32.totalorder %s89_s14, 0 }
  0x19   : > { %p99_p1 = scmp.ne.s32.totalorder %s3838_s27, %s3834_s26  ;;  %p100_p2 = scmp.eq.s32.totalorder %s3842_s28, 0 }
  0x1a   : > { %p105_p3 = scmp.ne.s32.totalorder %s3834_s26, %s3830_s25  ;;  %p106_p5 = scmp.eq.s32.totalorder %s3942_s29, 0 }
  0x1b   : > { %s3955_s16 = scalar_select %p90_p0, %s3838_s27, %s92_s15  }
  0x1c   : > { %p101_p4 = por %p100_p2, %p99_p1  ;;  %p3380_p6 = scmp.lt.s32.totalorder %s3842_s28, 3 }
  0x1d   : > { %4759 = sst [smem:[#allocation25_spill]] %s3955_s16  ;;  %p3959_p7 = por %p106_p5, %p105_p3 }
  0x1e   : > { %s3964_s18 = sand.u32 1, %s3838_s27   ;;  %p3966_p8 = pnand %p3380_p6, %p101_p4 }
  0x1f   : > { %s3971_s20 = sand.u32 1, %s3842_s28   ;;  %s3328_s21 = smul.u32 192, %s3964_s18 }
  0x20   : > { %s3329_s22 = smul.u32 192, %s3842_s28  ;;  %s4762_s3 = sld [smem:[#allocation29_spill]] }
  0x21   : > { %s445_s14 = scalar_lea.vmem [#allocation5], %s3328_s21  ;;  %p3981_p10 = pneg %p3966_p8 }
  0x22   : > { %s453_s15 = sshll.u32 %s445_s14, 4  ;;  %s454_s15 = int_to_ptr.vmem [resolvable:$true] %s453_s15 }
  0x26   : > { %s450_s25 = scalar_lea.hbm %s4762_s3, %s3329_s22  ;;  %s3529_s23 = scalar_lea.hbm %s4762_s3, 576 }
  0x27   : > { %s451_s16 = sshll.u32 %s450_s25, 4  ;;  %s452_s16 = int_to_ptr.hbm [resolvable:$true] %s451_s16 }
  0x28   : > { %s3522_s30 = sshra.s32 %s452_s16, 4  ;;  %s3523_s30 = int_to_ptr.hbm [resolvable:$true] %s3522_s30 }
  0x29   : > { %s3524_s0 = scalar_lea.hbm %s3523_s30, 192  ;;  %p3530_p13 = scmp.lt.s32.totalorder %s3523_s30, %s4762_s3 }
  0x2a   : > { %p3525_p9 = scmp.ne.s32.totalorder %s3523_s30, %s3524_s0  ;;  %p3531_p0 = scmp.lt.s32.totalorder %s3529_s23, %s3524_s0 }
  0x2c   : > { %p3527_p11 = pnand %p3981_p10, %p3525_p9  ;;  %p3532_p1 = por %p3531_p0, %p3530_p13 }
  0x2e   : > { %p3528_p12 = pneg %p3527_p11 }
  0x30   : > { %p3533_p2 = pnand %p3532_p1, %p3528_p12 }
  0x32   : > { %3536 = shalt.err (!%p3533_p2)
}
  0x33   : > { %s3844_s14 = smov 192   ;;  %s3845_s27 = smov 12  }
  0x34   : > { %s4764_s22 = scalar_lea.sflag [#allocation6], %s3971_s20  ;;  %p2802_p3 = scmp.ge.s32.totalorder %s3842_s28, 1 }
  0x35   : > { %3358 = dma.hbm_to_vmem [thread:$0]  (!%p3966_p8), %s452_s16, 3072, %s454_s15, %s4764_s22, %s3844_s14, %s3844_s14, %s3845_s27  }
  0x36   : > { %p605_p4 = scmp.lt.s32.totalorder %s3842_s28, 4  ;;  %s2797_s30 = sshll.u32 %s3964_s18, 6 }
  0x37   : > { %s3229_s21 = sshll.u32 %s3842_s28, 6  ;;  %s486_s23 = scalar_lea.vmem [#allocation8], %s2797_s30 }
  0x38   : > { %p4000_p5 = pnand %p2802_p3, %p605_p4  ;;  %s494_s24 = sshll.u32 %s486_s23, 4  ;;  %s495_s24 = int_to_ptr.vmem [resolvable:$true] %s494_s24 }
  0x39   : > { %s4766_s5 = sld [smem:[#allocation31_spill]]  ;;  %s4746_s1 = scalar_lea.sflag [#allocation9], %s3971_s20 }
  0x3f   : > { %s491_s11 = scalar_lea.hbm %s4766_s5, %s3229_s21  ;;  %s3559_s22 = scalar_lea.hbm %s4766_s5, 192 }
  0x40   : > { %s492_s9 = sshll.u32 %s491_s11, 4  ;;  %s493_s9 = int_to_ptr.hbm [resolvable:$true] %s492_s9 }
  0x41   : > { %s3552_s27 = sshra.s32 %s493_s9, 4  ;;  %s3553_s27 = int_to_ptr.hbm [resolvable:$true] %s3552_s27 }
  0x42   : > { %s3554_s16 = scalar_lea.hbm %s3553_s27, 64  ;;  %p3560_p12 = scmp.lt.s32.totalorder %s3553_s27, %s4766_s5 }
  0x43   : > { %p3555_p6 = scmp.ne.s32.totalorder %s3553_s27, %s3554_s16  ;;  %p3561_p13 = scmp.lt.s32.totalorder %s3559_s22, %s3554_s16 }
  0x45   : > { %p3557_p9 = pnand %p3555_p6, %p3981_p10  ;;  %p3562_p0 = por %p3561_p13, %p3560_p12 }
  0x47   : > { %p3558_p11 = pneg %p3557_p9 }
  0x49   : > { %p3563_p1 = pnand %p3562_p0, %p3558_p11 }
  0x4b   : > { %3566 = shalt.err (!%p3563_p1)
}
  0x4c   : > { %s3846_s3 = smov 64   ;;  %s3847_s11 = smov 4  }
  0x4d   : > { %3364 = dma.hbm_to_vmem [thread:$0]  (!%p3966_p8), %s493_s9, 1024, %s495_s24, %s4746_s1, %s3846_s3, %s3846_s3, %s3847_s11  }
  0x4e   : > { %s527_s15 = scalar_lea.hbm %s4731_s7, %s3842_s28  ;;  %s524_s27 = scalar_lea.vmem [#allocation11], %s3964_s18 }
  0x4f   : > { %s531_s16 = sshll.u32 %s524_s27, 4  ;;  %s529_s14 = sshll.u32 %s527_s15, 4  ;;  %s532_s16 = int_to_ptr.vmem [resolvable:$true] %s531_s16  ;;  %s530_s14 = int_to_ptr.hbm [resolvable:$true] %s529_s14 }
  0x50   : > { %s4744_s22 = scalar_lea.sflag [#allocation12], %s3971_s20  ;;  %s3582_s30 = sshra.s32 %s530_s14, 4  ;;  %s3583_s30 = int_to_ptr.hbm [resolvable:$true] %s3582_s30 }
  0x51   : > { %s3584_s23 = scalar_lea.hbm %s3583_s30, 1  ;;  %s3589_s9 = scalar_lea.hbm %s4731_s7, 3 }
  0x52   : > { %p3585_p2 = scmp.ne.s32.totalorder %s3583_s30, %s3584_s23  ;;  %p3590_p6 = scmp.lt.s32.totalorder %s3583_s30, %s4731_s7 }
  0x53   : > { %p3591_p9 = scmp.lt.s32.totalorder %s3589_s9, %s3584_s23 }
  0x54   : > { %p3587_p3 = pnand %p3585_p2, %p3981_p10 }
  0x55   : > { %p3592_p11 = por %p3591_p9, %p3590_p6 }
  0x56   : > { %p3588_p4 = pneg %p3587_p3 }
  0x58   : > { %p3593_p12 = pnand %p3592_p11, %p3588_p4 }
  0x5a   : > { %3596 = shalt.err (!%p3593_p12)
}
  0x5b   : > { %3370 = dma.hbm_to_vmem [thread:$0]  (!%p3966_p8), %s530_s14, 16, %s532_s16, %s4744_s22  }
  0x5c   : > { %s2800_s11 = sshll.u32 %s3964_s18, 2  ;;  %s2801_s5 = sshll.u32 %s3842_s28, 2 }
  0x5d   : > { %s571_s25 = scalar_lea.hbm %s4734_s10, %s2801_s5  ;;  %s567_s27 = scalar_lea.vmem [#allocation14], %s2800_s11 }
  0x5e   : > { %s573_s15 = sshll.u32 %s571_s25, 4  ;;  %s575_s30 = sshll.u32 %s567_s27, 4  ;;  %s574_s15 = int_to_ptr.hbm [resolvable:$true] %s573_s15  ;;  %s576_s30 = int_to_ptr.vmem [resolvable:$true] %s575_s30 }
  0x5f   : > { %s4745_s23 = scalar_lea.sflag [#allocation15], %s3971_s20  ;;  %s3612_s9 = sshra.s32 %s574_s15, 4  ;;  %s3613_s9 = int_to_ptr.hbm [resolvable:$true] %s3612_s9 }
  0x60   : > { %s3614_s24 = scalar_lea.hbm %s3613_s9, 4  ;;  %s3619_s3 = scalar_lea.hbm %s4734_s10, 12 }
  0x61   : > { %p3615_p13 = scmp.ne.s32.totalorder %s3613_s9, %s3614_s24  ;;  %p3620_p2 = scmp.lt.s32.totalorder %s3613_s9, %s4734_s10 }
  0x62   : > { %p3621_p3 = scmp.lt.s32.totalorder %s3619_s3, %s3614_s24 }
  0x63   : > { %p3617_p0 = pnand %p3615_p13, %p3981_p10 }
  0x64   : > { %p3622_p4 = por %p3621_p3, %p3620_p2 }
  0x65   : > { %p3618_p1 = pneg %p3617_p0 }
  0x67   : > { %p3623_p6 = pnand %p3622_p4, %p3618_p1 }
  0x69   : > { %3626 = shalt.err (!%p3623_p6)
}
  0x6a   : > { %3376 = dma.hbm_to_vmem [thread:$0]  (!%p3966_p8), %s574_s15, 64, %s576_s30, %s4745_s23  }
  0x6b   : > { %s4767_s2 = sld [smem:[#allocation28_spill]]  ;;  %s427_s22 = scalar_lea.vmem [#allocation3], %s3964_s18 }
  0x6c   : > { %s434_s25 = sshll.u32 %s427_s22, 4  ;;  %s3330_s9 = smul.u32 3, %s3964_s18  ;;  %s435_s25 = int_to_ptr.vmem [resolvable:$true] %s434_s25 }
  0x6d   : > { %s425_s24 = scalar_lea.sflag [#allocation4], %s3964_s18 }
  0x71   : > { %s430_s21 = scalar_lea.hbm %s4767_s2, %s3842_s28  ;;  %s3649_s30 = scalar_lea.hbm %s4767_s2, 3 }
  0x72   : > { %s432_s27 = sshll.u32 %s430_s21, 4  ;;  %s433_s27 = int_to_ptr.hbm [resolvable:$true] %s432_s27 }
  0x73   : > { %s3642_s16 = sshra.s32 %s433_s27, 4  ;;  %s3643_s16 = int_to_ptr.hbm [resolvable:$true] %s3642_s16 }
  0x74   : > { %s3644_s14 = scalar_lea.hbm %s3643_s16, 1  ;;  %p3650_p13 = scmp.lt.s32.totalorder %s3643_s16, %s4767_s2 }
  0x75   : > { %p3645_p9 = scmp.ne.s32.totalorder %s3643_s16, %s3644_s14  ;;  %p3651_p0 = scmp.lt.s32.totalorder %s3649_s30, %s3644_s14 }
  0x77   : > { %p3647_p11 = pnand %p3645_p9, %p3981_p10  ;;  %p3652_p1 = por %p3651_p0, %p3650_p13 }
  0x79   : > { %p3648_p12 = pneg %p3647_p11 }
  0x7b   : > { %p3653_p2 = pnand %p3652_p1, %p3648_p12 }
  0x7d   : > { %3656 = shalt.err (!%p3653_p2)
}
  0x7e   : > { %3355 = dma.hbm_to_vmem [thread:$0]  (!%p3966_p8), %s433_s27, 16, %s435_s25, %s425_s24  }
  0x7f   : > { %s3331_s5 = smul.u32 3, %s3842_s28  ;;  %s467_s21 = scalar_lea.vmem [#allocation7], %s3330_s9 }
  0x80   : > { %s475_s22 = sshll.u32 %s467_s21, 4  ;;  %s4768_s4 = sld [smem:[#allocation30_spill]]  ;;  %s476_s22 = int_to_ptr.vmem [resolvable:$true] %s475_s22 }
  0x81   : > { %s510_s30 = scalar_lea.hbm %s4730_s6, %s3842_s28 }
  0x82   : > { %s4082_s11 = sshll.u32 %s510_s30, 4  ;;  %s513_s11 = int_to_ptr.hbm [resolvable:$true] %s4082_s11 }
  0x86   : > { %s471_s15 = scalar_lea.hbm %s4768_s4, %s3331_s5  ;;  %s3679_s23 = scalar_lea.hbm %s4768_s4, 9 }
  0x87   : > { %s473_s29 = sshll.u32 %s471_s15, 4  ;;  %s474_s29 = int_to_ptr.hbm [resolvable:$true] %s473_s29 }
  0x88   : > { %s3672_s1 = sshra.s32 %s474_s29, 4  ;;  %s3673_s1 = int_to_ptr.hbm [resolvable:$true] %s3672_s1 }
  0x89   : > { %s3674_s2 = scalar_lea.hbm %s3673_s1, 3  ;;  %p3680_p9 = scmp.lt.s32.totalorder %s3673_s1, %s4768_s4 }
  0x8a   : > { %p3675_p3 = scmp.ne.s32.totalorder %s3673_s1, %s3674_s2  ;;  %p3681_p11 = scmp.lt.s32.totalorder %s3679_s23, %s3674_s2 }
  0x8c   : > { %p3677_p4 = pnand %p3675_p3, %p3981_p10  ;;  %p3682_p12 = por %p3681_p11, %p3680_p9 }
  0x8e   : > { %p3678_p6 = pneg %p3677_p4 }
  0x90   : > { %p3683_p13 = pnand %p3682_p12, %p3678_p6 }
  0x92   : > { %3686 = shalt.err (!%p3683_p13)
}
  0x93   : > { %s4769_s5 = scalar_lea.sflag [#allocation6], %s3971_s20  ;;  %s507_s21 = scalar_lea.vmem [#allocation10], %s3964_s18 }
  0x94   : > { %3361 = dma.hbm_to_vmem [thread:$0]  (!%p3966_p8), %s474_s29, 48, %s476_s22, %s4769_s5  }
  0x95   : > { %s514_s3 = sshll.u32 %s507_s21, 4  ;;  %s3702_s15 = sshra.s32 %s513_s11, 4  ;;  %s515_s3 = int_to_ptr.vmem [resolvable:$true] %s514_s3  ;;  %s3703_s15 = int_to_ptr.hbm [resolvable:$true] %s3702_s15 }
  0x96   : > { %s3704_s16 = scalar_lea.hbm %s3703_s15, 1  ;;  %s3709_s14 = scalar_lea.hbm %s4730_s6, 3 }
  0x97   : > { %p3705_p0 = scmp.ne.s32.totalorder %s3703_s15, %s3704_s16  ;;  %p3710_p3 = scmp.lt.s32.totalorder %s3703_s15, %s4730_s6 }
  0x98   : > { %p3711_p4 = scmp.lt.s32.totalorder %s3709_s14, %s3704_s16 }
  0x99   : > { %p3707_p1 = pnand %p3705_p0, %p3981_p10 }
  0x9a   : > { %p3712_p6 = por %p3711_p4, %p3710_p3 }
  0x9b   : > { %p3708_p2 = pneg %p3707_p1 }
  0x9d   : > { %p3713_p9 = pnand %p3712_p6, %p3708_p2 }
  0x9f   : > { %3716 = shalt.err (!%p3713_p9)
}
  0xa0   : > { %s4770_s22 = scalar_lea.sflag [#allocation9], %s3971_s20  ;;  %s544_s23 = scalar_lea.hbm %s4732_s8, %s3842_s28 }
  0xa1   : > { %3367 = dma.hbm_to_vmem [thread:$0]  (!%p3966_p8), %s513_s11, 16, %s515_s3, %s4770_s22  }
  0xa2   : > { %s541_s9 = scalar_lea.vmem [#allocation13], %s3964_s18  ;;  %s546_s5 = sshll.u32 %s544_s23, 4  ;;  %s547_s5 = int_to_ptr.hbm [resolvable:$true] %s546_s5 }
  0xa3   : > { %s548_s24 = sshll.u32 %s541_s9, 4  ;;  %s3732_s21 = sshra.s32 %s547_s5, 4  ;;  %s549_s24 = int_to_ptr.vmem [resolvable:$true] %s548_s24  ;;  %s3733_s21 = int_to_ptr.hbm [resolvable:$true] %s3732_s21 }
  0xa4   : > { %s3734_s15 = scalar_lea.hbm %s3733_s21, 1  ;;  %s3739_s11 = scalar_lea.hbm %s4732_s8, 3 }
  0xa5   : > { %p3735_p11 = scmp.ne.s32.totalorder %s3733_s21, %s3734_s15  ;;  %p3740_p0 = scmp.lt.s32.totalorder %s3733_s21, %s4732_s8 }
  0xa6   : > { %p3741_p1 = scmp.lt.s32.totalorder %s3739_s11, %s3734_s15 }
  0xa7   : > { %p3737_p12 = pnand %p3735_p11, %p3981_p10 }
  0xa8   : > { %p3742_p2 = por %p3741_p1, %p3740_p0 }
  0xa9   : > { %p3738_p13 = pneg %p3737_p12 }
  0xab   : > { %p3743_p3 = pnand %p3742_p2, %p3738_p13 }
  0xad   : > { %3746 = shalt.err (!%p3743_p3)
}
  0xae   : > { %s4771_s14 = scalar_lea.sflag [#allocation12], %s3971_s20  ;;  %s596_s22 = scalar_lea.hbm %s4736_s12, %s3842_s28 }
  0xaf   : > { %3373 = dma.hbm_to_vmem [thread:$0]  (!%p3966_p8), %s547_s5, 16, %s549_s24, %s4771_s14  }
  0xb0   : > { %s593_s29 = scalar_lea.vmem [#allocation16], %s3964_s18  ;;  %s598_s23 = sshll.u32 %s596_s22, 4  ;;  %s599_s23 = int_to_ptr.hbm [resolvable:$true] %s598_s23 }
  0xb1   : > { %s600_s27 = sshll.u32 %s593_s29, 4  ;;  %s3762_s9 = sshra.s32 %s599_s23, 4  ;;  %s601_s27 = int_to_ptr.vmem [resolvable:$true] %s600_s27  ;;  %s3763_s9 = int_to_ptr.hbm [resolvable:$true] %s3762_s9 }
  0xb2   : > { %s3764_s21 = scalar_lea.hbm %s3763_s9, 1  ;;  %s3769_s24 = scalar_lea.hbm %s4736_s12, 3 }
  0xb3   : > { %p3765_p4 = scmp.ne.s32.totalorder %s3763_s9, %s3764_s21  ;;  %p3770_p11 = scmp.lt.s32.totalorder %s3763_s9, %s4736_s12 }
  0xb4   : > { %p3771_p12 = scmp.lt.s32.totalorder %s3769_s24, %s3764_s21 }
  0xb5   : > { %p3767_p6 = pnand %p3765_p4, %p3981_p10 }
  0xb6   : > { %p3772_p13 = por %p3771_p12, %p3770_p11 }
  0xb7   : > { %p3768_p9 = pneg %p3767_p6 }
  0xb9   : > { %p3773_p0 = pnand %p3772_p13, %p3768_p9 }
  0xbb   : > { %3776 = shalt.err (!%p3773_p0)
}
  0xbc   : > { %s4772_s28 = scalar_lea.sflag [#allocation15], %s3971_s20  ;;  %609 = sbr.rel (%p4000_p5) target bundleno = 2878 (0xb3e), region = 72 }
  0xbd   : > { %3379 = dma.hbm_to_vmem [thread:$0]  (!%p3966_p8), %s599_s23, 16, %s601_s27, %s4772_s28  }
  0xbe   : > { %s4147_s13 = sand.u32 (!%p4000_p5), 1, %s3834_s26  }
  0xbf   : > { %s612_s18 = scalar_lea.sflag (!%p4000_p5), [#allocation4], %s4147_s13 }
  0xc1   : > { %3809 = dma.done.wait (%p3959_p7), %s612_s18, 16  }
  0xc2   : > { %3811 = vsyncadd (%p3959_p7), %s612_s18, 4294967280  ;;  %s4773_s19 = sld [smem:[#allocation23_spill]]  ;;  %s3332_s3 = smul.u32 192, %s4147_s13 }
  0xc4   : > { %s4157_s2 = scalar_lea.vmem [#allocation5], %s3332_s3 }
  0xc8   : > { %s620_s20 = sand.u32 1, %s4773_s19  }
  0xc9   : > { %s621_s0 = scalar_lea.sflag [#allocation6], %s620_s20 }
  0xca   : > { %3813 = dma.done.wait (%p3959_p7), %s621_s0, 3120  }
  0xcb   : > { %3815 = vsyncadd (%p3959_p7), %s621_s0, 4294964176  ;;  %s3333_s14 = smul.u32 3, %s4147_s13  ;;  %s2803_s30 = sshll.u32 %s4147_s13, 6 }
  0xcc   : > { %s641_s22 = scalar_lea.sflag [#allocation9], %s620_s20  ;;  %s4167_s29 = scalar_lea.vmem [#allocation8], %s2803_s30 }
  0xcd   : > { %s4165_s25 = scalar_lea.vmem [#allocation7], %s3333_s14 }
  0xce   : > { %3817 = dma.done.wait (%p3959_p7), %s641_s22, 1040  }
  0xcf   : > { %3819 = vsyncadd (%p3959_p7), %s641_s22, 4294966256  ;;  %s660_s23 = scalar_lea.sflag [#allocation12], %s620_s20 }
  0xd0   : > { %3821 = dma.done.wait (%p3959_p7), %s660_s23, 32  }
  0xd1   : > { %3823 = vsyncadd (%p3959_p7), %s660_s23, 4294967264  ;;  %s2804_s21 = sshll.u32 %s4147_s13, 2  ;;  %s678_s16 = scalar_lea.sflag [#allocation15], %s620_s20 }
  0xd2   : > { %s4181_s24 = scalar_lea.vmem [#allocation14], %s2804_s21 }
  0xd3   : > { %3825 = dma.done.wait (%p3959_p7), %s678_s16, 80  }
  0xd4   : > { %3827 = vsyncadd (%p3959_p7), %s678_s16, 4294967216  ;;  %p781_p8 = scmp.lt.s32.totalorder %s4773_s19, 2  ;;  %s4774_s18 = sld [smem:[#allocation27_spill]] }
  0xd5   : > { %s4775_s30 = sld [smem:[#allocation32_spill]]  ;;  %s690_s1 = scalar_lea.vmem [#allocation16], %s4147_s13 }
  0xd6   : > { %s4189_s5 = scalar_select %p781_p8, %s4773_s19, 2 }
  0xd7   : > { %s4776_s21 = sld [smem:[#allocation33_spill]]  ;;  %p2810_p7 = scmp.ne.s32.totalorder %s4773_s19, 0 }
  0xd8   : > { %s3230_s3 = sshll.u32 %s4189_s5, 8  ;;  %s2809_s15 = sshll.u32 %s4189_s5, 1 }
  0xd9   : > { %s4777_s11 = sld [smem:[#allocation34_spill]] }
  0xda   : > { %s783_s20 = scalar_lea.vmem %s4774_s18, %s4189_s5  ;;  %s4778_s0 = sld [smem:[#allocation26_spill]] (!%p2810_p7) }
  0xdb   : > { %s4199_s22 = scalar_lea.vmem %s4775_s30, %s3230_s3  ;;  %801 = sbr.rel (%p2810_p7) target bundleno = 227 (0xe3), region = 112 }
  0xdd   : > { %s4204_s16 = scalar_lea.vmem %s4776_s21, %s3230_s3 }
  0xdf   : > { %s4210_s4 = scalar_lea.vmem %s4777_s11, %s2809_s15 }
  0xe0   : > { %v802_v0 = vld [vmem:[%s4778_s0] sm:$0xff]  ;;  %v803_v1 = vld [vmem:[%s4778_s0 + $0x8] sm:$0xff] }
  0xe1   : > { %804 = vst [vmem:[#allocation2] sm:$0xff] %v802_v0 }
  0xe2   : > { %805 = vst [vmem:[#allocation2 + $0x8] sm:$0xff] %v803_v1 }
  0xe3 PF: > { %v3848_v4 = vmov 128.0   ;;  %v2897_v19 = vld [vmem:[%s4157_s2 + $0xa8] sm:$0xf]  ;;  %v3254_v20 = vld [vmem:[%s4157_s2 + $0xb0] sm:$0xf0]  ;;  %s4780_s27 = scalar_lea.vmem [#allocation3], %s4147_s13 }
  0xe4   : > { %3448 = vrcp.f32 %v3848_v4  ;;  %v3253_v21 = vld [vmem:[%s4157_s2 + $0xac] sm:$0xf]  ;;  %v2898_v22 = vor.u32 %v3254_v20, %v2897_v19  ;;  %v2899_v23 = vld [vmem:[%s4157_s2 + $0xb4] sm:$0xf0]  ;;  %v2905_v24 = vld [vmem:[%s4157_s2 + $0xb0] sm:$0xf] }
  0xe5   : > { %v3255_v25 = vld [vmem:[%s4157_s2 + $0xb8] sm:$0xf0]  ;;  %v2902_v26 = vor.u32 %v3253_v21, %v2899_v23  ;;  %v2885_v28 = vld [vmem:[%s4157_s2 + $0x90] sm:$0xf]  ;;  %v3250_v30 = vld [vmem:[%s4157_s2 + $0x94] sm:$0xf] }
  0xe6   : > { %v2906_v27 = vor.u32 %v3255_v25, %v2905_v24  ;;  %1036 = vmatpush.bf16.msra.mxu0 %v2898_v22  ;;  %v3251_v29 = vld [vmem:[%s4157_s2 + $0x98] sm:$0xf0]  ;;  %v2887_v32 = vld [vmem:[%s4157_s2 + $0x9c] sm:$0xf0]  ;;  %v2893_v33 = vld [vmem:[%s4157_s2 + $0x98] sm:$0xf] }
  0xe7   : > { %1050 = vmatpush.bf16.msra.mxu1 %v2902_v26  ;;  %v2886_v31 = vor.u32 %v3251_v29, %v2885_v28  ;;  %v3252_v34 = vld [vmem:[%s4157_s2 + $0xa0] sm:$0xf0]  ;;  %v2890_v35 = vor.u32 %v3250_v30, %v2887_v32  ;;  %v2873_v37 = vld [vmem:[%s4157_s2 + $0x78] sm:$0xf]  ;;  %v3247_v39 = vld [vmem:[%s4157_s2 + $0x7c] sm:$0xf] }
  0xe8   : > { %v4220_v2 = vld [vmem:[#allocation2] sm:$0xff]  ;;  %1064 = vmatpush.bf16.msra.mxu2 %v2906_v27  ;;  %v2894_v36 = vor.u32 %v3252_v34, %v2893_v33  ;;  %v3248_v38 = vld [vmem:[%s4157_s2 + $0x80] sm:$0xf0]  ;;  %v2875_v41 = vld [vmem:[%s4157_s2 + $0x84] sm:$0xf0]  ;;  %vm1082_vm7 = vcmask 261120  }
  0xe9   : > { %810 = vadd.xlane.f32.xlu0 %v4220_v2  ;;  %v4223_v3 = vld [vmem:[#allocation2 + $0x8] sm:$0xff]  ;;  %v2874_v40 = vor.u32 %v3248_v38, %v2873_v37  ;;  %v2881_v42 = vld [vmem:[%s4157_s2 + $0x80] sm:$0xf]  ;;  %v3249_v43 = vld [vmem:[%s4157_s2 + $0x88] sm:$0xf0]  ;;  %v2878_v44 = vor.u32 %v3247_v39, %v2875_v41  ;;  %s3849_s9 = smov 96  }
  0xea   : > { %v3449_v5 = vpop.eup %3448  ;;  %1037 = vmatpush.bf16.msra.mxu0 %v2886_v31  ;;  %v2882_v45 = vor.u32 %v3249_v43, %v2881_v42  ;;  %v2861_v46 = vld [vmem:[%s4157_s2 + $0x60] sm:$0xf]  ;;  %v3245_v47 = vld [vmem:[%s4157_s2 + $0x68] sm:$0xf0]  ;;  %v3244_v48 = vld [vmem:[%s4157_s2 + $0x64] sm:$0xf] }
  0xeb   : > { %v815_v6 = vmul.f32 128.0, %v3449_v5  ;;  %vm819_vm0 = vweird.f32 %v3449_v5  ;;  %1051 = vmatpush.bf16.msra.mxu1 %v2890_v35  ;;  %v2862_v49 = vor.u32 %v3245_v47, %v2861_v46  ;;  %v2863_v50 = vld [vmem:[%s4157_s2 + $0x6c] sm:$0xf0]  ;;  %v2869_v51 = vld [vmem:[%s4157_s2 + $0x68] sm:$0xf]  ;;  %vm1139_vm9 = vcmask 64512  }
  0xec   : > { %1065 = vmatpush.bf16.msra.mxu2 %v2894_v36  ;;  %v3246_v52 = vld [vmem:[%s4157_s2 + $0x70] sm:$0xf0]  ;;  %v2866_v53 = vor.u32 %v3244_v48, %v2863_v50  ;;  %v2849_v55 = vld [vmem:[%s4157_s2 + $0x48] sm:$0xf]  ;;  %v3241_v57 = vld [vmem:[%s4157_s2 + $0x4c] sm:$0xf] }
  0xed   : > { %v816_v7 = vsub.f32 1.0, %v815_v6  ;;  %v2870_v54 = vor.u32 %v3246_v52, %v2869_v51  ;;  %v3242_v56 = vld [vmem:[%s4157_s2 + $0x50] sm:$0xf0]  ;;  %v2851_v59 = vld [vmem:[%s4157_s2 + $0x54] sm:$0xf0]  ;;  %s3852_s15 = smov 32  }
  0xee   : > { %1038 = vmatpush.bf16.msra.mxu0 %v2874_v40  ;;  %v2850_v58 = vor.u32 %v3242_v56, %v2849_v55  ;;  %v2857_v60 = vld [vmem:[%s4157_s2 + $0x50] sm:$0xf]  ;;  %v3243_v61 = vld [vmem:[%s4157_s2 + $0x58] sm:$0xf0]  ;;  %v2854_v62 = vor.u32 %v3241_v57, %v2851_v59  ;;  %v3238_v4 = vld [vmem:[%s4157_s2 + $0x34] sm:$0xf] }
  0xef   : > { %v817_v8 = vmul.f32 %v3449_v5, %v816_v7  ;;  %1052 = vmatpush.bf16.msra.mxu1 %v2878_v44  ;;  %v2858_v63 = vor.u32 %v3243_v61, %v2857_v60  ;;  %v2837_v0 = vld [vmem:[%s4157_s2 + $0x30] sm:$0xf]  ;;  %v3239_v1 = vld [vmem:[%s4157_s2 + $0x38] sm:$0xf0]  ;;  %v2839_v6 = vld [vmem:[%s4157_s2 + $0x3c] sm:$0xf0] }
  0xf0   : > { %1066 = vmatpush.bf16.msra.mxu2 %v2882_v45  ;;  %v2845_v7 = vld [vmem:[%s4157_s2 + $0x38] sm:$0xf]  ;;  %v2833_v19 = vld [vmem:[%s4157_s2 + $0x20] sm:$0xf]  ;;  %v3237_v20 = vld [vmem:[%s4157_s2 + $0x28] sm:$0xf0] }
  0xf1   : > { %812 = vadd.xlane.f32.xlu0 %v4223_v3  ;;  %v818_v9 = vadd.f32 %v3449_v5, %v817_v8  ;;  %v3240_v8 = vld [vmem:[%s4157_s2 + $0x40] sm:$0xf0]  ;;  %v2834_v22 = vor.u32 %v3237_v20, %v2833_v19  ;;  %v2813_v23 = vld [vmem:[%s4157_s2] sm:$0xf]  ;;  %v3233_v24 = vld [vmem:[%s4157_s2 + $0x8] sm:$0xf0] }
  0xf2   : > { %1039 = vmatpush.bf16.msra.mxu0 %v2862_v49  ;;  %v3232_v25 = vld [vmem:[%s4157_s2 + $0x4] sm:$0xf]  ;;  %v2814_v27 = vor.u32 %v3233_v24, %v2813_v23  ;;  %v2815_v28 = vld [vmem:[%s4157_s2 + $0xc] sm:$0xf0]  ;;  %v2821_v29 = vld [vmem:[%s4157_s2 + $0x8] sm:$0xf] }
  0xf3   : > { %v4226_v10 = vsel %vm819_vm0, %v3449_v5, %v818_v9  ;;  %1053 = vmatpush.bf16.msra.mxu1 %v2866_v53  ;;  %v2838_v5 = vor.u32 %v3239_v1, %v2837_v0  ;;  %v2842_v9 = vor.u32 %v3238_v4, %v2839_v6  ;;  %v3234_v30 = vld [vmem:[%s4157_s2 + $0x10] sm:$0xf0]  ;;  %v2818_v32 = vor.u32 %v3232_v25, %v2815_v28  ;;  %v3442_v51 = vld [vmem:[%s783_s20] ss:$0 sm:$0xff]  ;;  %s4782_s5 = scalar_lea.vmem [#allocation11], %s4147_s13  ;;  %s4783_s20 = scalar_lea.vmem [#allocation13], %s4147_s13 }
  0xf4   : > { %1067 = vmatpush.bf16.msra.mxu2 %v2870_v54  ;;  %v2822_v33 = vor.u32 %v3234_v30, %v2821_v29  ;;  %v3443_v56 = vld [vmem:[%s4780_s27] ss:$0 sm:$0xff]  ;;  %v3850_v19 = vmov -1e+30   ;;  %vm1638_vm10 = vcmask 523264   ;;  %vm1641_vm11 = vcmask 785408  }
  0xf6   : > { %1040 = vmatpush.bf16.msra.mxu0 %v2850_v58 }
  0xf7   : > { %1054 = vmatpush.bf16.msra.mxu1 %v2854_v62 }
  0xf8   : > { %1068 = vmatpush.bf16.msra.mxu2 %v2858_v63 }
  0xfa   : > { %1041 = vmatpush.bf16.msra.mxu0 %v2838_v5 }
  0xfb   : > { %1055 = vmatpush.bf16.msra.mxu1 %v2842_v9 }
 0x15c   : > { %v811_v11 = vpop.xlane.xlu0 %810 }
 0x15d   : > { %v821_v12 = vmul.f32 %v4226_v10, %v811_v11  ;;  %v2846_v11 = vor.u32 %v3240_v8, %v2845_v7 }
 0x15f   : > { %v4230_v13 = vsub.f32 %v4220_v2, %v821_v12  ;;  %1069 = vmatpush.bf16.msra.mxu2 %v2846_v11  ;;  %v2825_v12 = vld [vmem:[%s4157_s2 + $0x18] sm:$0xf] }
 0x161   : > { %v825_v14 = vmul.f32 %v4230_v13, %v4230_v13 }
 0x163   : > { %827 = vadd.xlane.f32.xlu1 %v825_v14  ;;  %v3236_v14 = vld [vmem:[%s4157_s2 + $0x20] sm:$0xf0]  ;;  %1070 = vmatpush.bf16.msra.mxu2 %v2834_v22 }
 0x164   : > { %v813_v15 = vpop.xlane.xlu0 %812 }
 0x165   : > { %v822_v16 = vmul.f32 %v4226_v10, %v813_v15  ;;  %v3235_v15 = vld [vmem:[%s4157_s2 + $0x1c] sm:$0xf] }
 0x167   : > { %v4236_v17 = vsub.f32 %v4223_v3, %v822_v16  ;;  %v2826_v16 = vor.u32 %v3236_v14, %v2825_v12  ;;  %1071 = vmatpush.bf16.msra.mxu2 %v2822_v33 }
 0x169   : > { %v826_v18 = vmul.f32 %v4236_v17, %v4236_v17  ;;  %1042 = vmatpush.bf16.msra.mxu0 %v2826_v16 }
 0x16b   : > { %829 = vadd.xlane.f32.xlu1 %v826_v18  ;;  %v2827_v18 = vld [vmem:[%s4157_s2 + $0x24] sm:$0xf0] }
 0x16c   : > { %v2830_v21 = vor.u32 %v3235_v15, %v2827_v18  ;;  %v1078_v15 = vlaneseq }
 0x16d   : > { %1043 = vmatpush.bf16.msra.mxu0 %v2814_v27 }
 0x16e   : > { %1056 = vmatpush.bf16.msra.mxu1 %v2830_v21  ;;  %v1079_v16 = vand.u32 127, %v1078_v15 }
 0x170   : > { %vm1080_vm8 = vcmp.lt.s32.totalorder %v1079_v16, 5 }
 0x171   : > { %v4321_v20 = vsel %vm1080_vm8, 0.0, %v3850_v19 }
 0x172   : > { %1057 = vmatpush.bf16.msra.mxu1 %v2818_v32 }
 0x1d6   : > { %v828_v26 = vpop.xlane.xlu1 %827 }
 0x1d7   : > { %v831_v31 = vmul.f32 %v828_v26, %v4226_v10 }
 0x1d9   : > { %v833_v34 = vadd.f32 1e-05, %v831_v31 }
 0x1db   : > { %3450 = vrsqrt.f32 %v833_v34  ;;  %vm841_vm2 = vweird.f32 %v833_v34 }
 0x1de   : > { %v830_v35 = vpop.xlane.xlu1 %829 }
 0x1df   : > { %v832_v36 = vmul.f32 %v830_v35, %v4226_v10 }
 0x1e1   : > { %v3451_v37 = vpop.eup %3450  ;;  %v834_v38 = vadd.f32 1e-05, %v832_v36 }
 0x1e2   : > { %v836_v39 = vmul.f32 %v3451_v37, %v833_v34  ;;  %vm842_vm1 = vweird.f32 %v3451_v37 }
 0x1e3   : > { %3452 = vrsqrt.f32 %v834_v38  ;;  %vm843_vm3 = vmor %vm841_vm2, %vm842_vm1  ;;  %vm851_vm5 = vweird.f32 %v834_v38 }
 0x1e4   : > { %v837_v40 = vmul.f32 %v3451_v37, %v836_v39 }
 0x1e6   : > { %v838_v41 = vmul.f32 0.5, %v837_v40 }
 0x1e8   : > { %v839_v42 = vsub.f32 1.5, %v838_v41 }
 0x1e9   : > { %v3453_v43 = vpop.eup %3452 }
 0x1ea   : > { %v840_v44 = vmul.f32 %v3451_v37, %v839_v42  ;;  %v846_v45 = vmul.f32 %v3453_v43, %v834_v38  ;;  %vm852_vm4 = vweird.f32 %v3453_v43 }
 0x1eb   : > { %vm853_vm6 = vmor %vm851_vm5, %vm852_vm4 }
 0x1ec   : > { %v847_v46 = vmul.f32 %v3453_v43, %v846_v45  ;;  %v844_v47 = vsel %vm843_vm3, %v3451_v37, %v840_v44 }
 0x1ed   : > { %v855_v50 = vmul.f32 %v844_v47, %v4230_v13  ;;  %v900_v13 = vld [vmem:[%s4165_s25] sm:$0x7]  ;;  %s3851_s25 = smov 64  }
 0x1ee   : > { %v848_v48 = vmul.f32 0.5, %v847_v46  ;;  %v902_v61 = vperm.slane %v900_v13, 0  ;;  %v903_v62 = vperm.slane %v900_v13, 1 }
 0x1ef   : > { %v860_v55 = vmul.f32 %v3442_v51, %v855_v50 }
 0x1f0   : > { %v849_v49 = vsub.f32 1.5, %v848_v48 }
 0x1f1   : > { %v865_v58 = vadd.f32 %v3443_v56, %v860_v55 }
 0x1f2   : > { %v850_v52 = vmul.f32 %v3453_v43, %v849_v49 }
 0x1f4   : > { %v854_v53 = vsel %vm853_vm6, %v3453_v43, %v850_v52 }
 0x1f5   : > { %v856_v54 = vmul.f32 %v854_v53, %v4236_v17  ;;  %v904_v17 = vperm.slane %v900_v13, 2 }
 0x1f7   : > { %v861_v57 = vmul.f32 %v3442_v51, %v856_v54 }
 0x1f9   : > { %v866_v59 = vadd.f32 %v3443_v56, %v861_v57 }
 0x1fb   : > { %v867_v60 = vpack.c.bf16 %v866_v59, %v865_v58 }
 0x1fd   : > { %1044 = vmatmul.bf16.vlgmr.msra.gmra.mxu0 %v867_v60  ;;  %1058 = vmatmul.bf16.vlgmr.msra.gmra.mxu1 %v867_v60 }
 0x1fe   : > { %1072 = vmatmul.bf16.vlgmr.msra.gmra.mxu2 %v867_v60 }
 0x27a   : > { %v1045_v63 = vpop.f32.mrf.mxu0  ;;  %v1059_v0 = vpop.f32.mrf.mxu1 }
 0x27b   : > { %v4300_v1 = vadd.f32 %v1045_v63, %v902_v61  ;;  %v4302_v4 = vadd.f32 %v1059_v0, %v903_v62 }
 0x27d   : > { %2907 = vmatpush.xpose.msk.msra.mxu3 %vm1082_vm7, %v4302_v4  ;;  %1208 = vrot.lane.b32.xlu0 %v4300_v1, %s3849_s9 }
 0x280   : > { %2908 = vmatmul.msk.f32.vlgmr.msra.gmra.mxu3 %vm1082_vm7, %v4300_v1 }
 0x281   : > { %v1073_v5 = vpop.f32.mrf.mxu2 }
 0x282   : > { %v1061_v6 = vpop.f32.mrf.mxu1  ;;  %v1047_v7 = vpop.f32.mrf.mxu0  ;;  %v4310_v9 = vadd.f32 %v1073_v5, %v904_v17 }
 0x283   : > { %v1062_v8 = vadd.f32 %v1061_v6, %v903_v62  ;;  %v4313_v11 = vadd.f32 %v1047_v7, %v902_v61 }
 0x285   : > { %2909 = vmatpush.xpose.msk.msrb.mxu3 %vm1082_vm7, %v1062_v8 }
 0x288   : > { %2910 = vmatmul.msk.f32.vlgmr.msrb.gmra.mxu3 %vm1082_vm7, %v4313_v11 }
 0x289   : > { %1180 = vmatpush.msra.mxu3 %v4310_v9  ;;  %v1075_v12 = vpop.f32.mrf.mxu2 }
 0x28a   : > { %v4318_v14 = vadd.f32 %v1075_v12, %v904_v17 }
 0x28c   : > { %1203 = vmatpush.msrb.mxu3 %v4318_v14 }
 0x2ef   : > { %v1209_v38 = vpop.permute.xlu0 %1208 }
 0x303   : > { %v1106_v18 = vpop.f32.mrf.mxu3 }
 0x304   : > { %v1135_v21 = vmul.f32 0.17677669, %v1106_v18 }
 0x306   : > { %v1137_v22 = vadd.f32 %v1135_v21, %v4321_v20 }
 0x308   : > { %v1140_v23 = vsel %vm1139_vm9, %v1137_v22, -inf }
 0x309   : > { %1141 = vmax.xlane.f32.xlu2 %v1140_v23 }
 0x30b   : > { %v1132_v24 = vpop.f32.mrf.mxu3 }
 0x30c   : > { %v1136_v25 = vmul.f32 0.17677669, %v1132_v24 }
 0x30e   : > { %v1138_v26 = vadd.f32 %v1136_v25, %v4321_v20 }
 0x310   : > { %v1143_v27 = vsel %vm1139_vm9, %v1138_v26, -inf }
 0x311   : > { %1144 = vmax.xlane.f32.xlu2 %v1143_v27 }
 0x329   : > { %1210 = vrot.lane.b32.xlu2 %v4302_v4, %s3849_s9 }
 0x331   : > { %1236 = vrot.lane.b32.xlu2 %v4313_v11, %s3849_s9 }
 0x339   : > { %1344 = vrot.lane.b32.xlu2 %v4300_v1, %s3851_s25 }
 0x341   : > { %1374 = vrot.lane.b32.xlu2 %v1062_v8, %s3851_s25 }
 0x349   : > { %1508 = vrot.lane.b32.xlu2 %v1062_v8, %s3852_s15 }
 0x37c   : > { %v1142_v28 = vpop.xlane.xlu2 %1141 }
 0x37d   : > { %v1146_v29 = vsub.f32 %v1137_v22, %v1142_v28 }
 0x37f   : > { %v1148_v30 = vmul.f32 1.442695, %v1146_v29 }
 0x381   : > { %3454 = vpow2.f32 %v1148_v30 }
 0x384   : > { %v1145_v31 = vpop.xlane.xlu2 %1144 }
 0x385   : > { %v1147_v32 = vsub.f32 %v1138_v26, %v1145_v31 }
 0x387   : > { %v3455_v33 = vpop.eup %3454  ;;  %v1150_v34 = vmul.f32 1.442695, %v1147_v32 }
 0x388   : > { %v1152_v35 = vsel %vm1139_vm9, %v3455_v33, 0.0 }
 0x389   : > { %3456 = vpow2.f32 %v1150_v34  ;;  %1153 = vadd.xlane.f32.xlu0 %v1152_v35 }
 0x38c   : > { %v1211_v40 = vpop.permute.xlu2 %1210 }
 0x38f   : > { %v3457_v36 = vpop.eup %3456 }
 0x390   : > { %v1155_v37 = vsel %vm1139_vm9, %v3457_v36, 0.0 }
 0x391   : > { %1156 = vadd.xlane.f32.xlu1 %v1155_v37 }
 0x394   : > { %v1237_v44 = vpop.permute.xlu2 %1236 }
 0x39c   : > { %v1345_v47 = vpop.permute.xlu2 %1344 }
 0x39d   : > { %1346 = vrot.lane.b32.xlu0 %v4302_v4, %s3851_s25 }
 0x3a4   : > { %v1375_v50 = vpop.permute.xlu2 %1374 }
 0x3aa   : > { %1238 = vrot.lane.b32.xlu1 %v1062_v8, %s3849_s9 }
 0x3ac   : > { %v1509_v51 = vpop.permute.xlu2 %1508 }
 0x3fc   : > { %v1154_v39 = vpop.xlane.xlu0 %1153 }
 0x3fd   : > { %3458 = vrcp.f32 %v1154_v39 }
 0x403   : > { %v3459_v41 = vpop.eup %3458 }
 0x404   : > { %v1160_v42 = vmul.f32 %v3459_v41, %v3455_v33  ;;  %v1157_v43 = vpop.xlane.xlu1 %1156 }
 0x405   : > { %3460 = vrcp.f32 %v1157_v43 }
 0x406   : > { %2911 = vmatmul.msk.f32.vlgmr.msra.gmra.mxu3 %vm1139_vm9, %v1160_v42 }
 0x407   : > { %2913 = vmatpush.xpose.msk.msra.mxu3 %vm1082_vm7, %v1211_v40 }
 0x40b   : > { %v3461_v45 = vpop.eup %3460 }
 0x40c   : > { %v1161_v46 = vmul.f32 %v3461_v45, %v3457_v36 }
 0x40e   : > { %2912 = vmatmul.msk.f32.vlgmr.msrb.gmra.mxu3 %vm1139_vm9, %v1161_v46 }
 0x40f   : > { %v1347_v49 = vpop.permute.xlu0 %1346 }
 0x416   : > { %2914 = vmatmul.msk.f32.vlgmr.msra.gmra.mxu3 %vm1082_vm7, %v1209_v38 }
 0x41c   : > { %v1239_v48 = vpop.permute.xlu1 %1238 }
 0x41d   : > { %2915 = vmatpush.xpose.msk.msrb.mxu3 %vm1082_vm7, %v1239_v48 }
 0x420   : > { %2916 = vmatmul.msk.f32.vlgmr.msrb.gmra.mxu3 %vm1082_vm7, %v1237_v44 }
 0x421   : > { %2919 = vmatpush.xpose.msk.msra.mxu3 %vm1082_vm7, %v1347_v49 }
 0x425   : > { %2921 = vmatpush.xpose.msk.msrb.mxu3 %vm1082_vm7, %v1375_v50 }
 0x428   : > { %2920 = vmatmul.msk.f32.vlgmr.msra.gmra.mxu3 %vm1082_vm7, %v1345_v47 }
 0x429   : > { %2927 = vmatpush.xpose.msk.msra.mxu3 %vm1082_vm7, %v1509_v51 }
 0x489   : > { %v4350_v52 = vpop.f32.mrf.mxu3 }
 0x491   : > { %v4352_v53 = vpop.f32.mrf.mxu3 }
 0x499   : > { %v1233_v54 = vpop.f32.mrf.mxu3 }
 0x49a   : > { %v1264_v55 = vmul.f32 0.17677669, %v1233_v54 }
 0x49c   : > { %v1266_v56 = vadd.f32 %v1264_v55, %v4321_v20 }
 0x49e   : > { %v1268_v57 = vsel %vm1139_vm9, %v1266_v56, -inf }
 0x49f   : > { %1269 = vmax.xlane.f32.xlu1 %v1268_v57 }
 0x4a3   : > { %v1261_v58 = vpop.f32.mrf.mxu3 }
 0x4a4   : > { %v1265_v62 = vmul.f32 0.17677669, %v1261_v58 }
 0x4a6   : > { %v1267_v63 = vadd.f32 %v1265_v62, %v4321_v20 }
 0x4a8   : > { %v1271_v0 = vsel %vm1139_vm9, %v1267_v63, -inf }
 0x4ab   : > { %v1369_v59 = vpop.f32.mrf.mxu3 }
 0x4ac   : > { %v1400_v60 = vmul.f32 0.17677669, %v1369_v59 }
 0x4ae   : > { %v1402_v13 = vadd.f32 %v1400_v60, %v4321_v20 }
 0x4b0   : > { %v1404_v61 = vsel %vm1139_vm9, %v1402_v13, -inf }
 0x4b1   : > { %1405 = vmax.xlane.f32.xlu0 %v1404_v61 }
 0x4b8   : > { %1372 = vrot.lane.b32.xlu1 %v4313_v11, %s3851_s25 }
 0x4c5   : > { %1291 = vrot.lane.b32.xlu0 %v4310_v9, %s3849_s9 }
 0x4cd   : > { %1426 = vrot.lane.b32.xlu0 %v4310_v9, %s3851_s25 }
 0x4d5   : > { %1506 = vrot.lane.b32.xlu0 %v4313_v11, %s3852_s15 }
 0x4ff   : > { %1272 = vmax.xlane.f32.xlu0 %v1271_v0 }
 0x512   : > { %v1270_v17 = vpop.xlane.xlu1 %1269 }
 0x513   : > { %v1274_v5 = vsub.f32 %v1266_v56, %v1270_v17 }
 0x515   : > { %v1276_v6 = vmul.f32 1.442695, %v1274_v5 }
 0x517   : > { %3462 = vpow2.f32 %v1276_v6 }
 0x51d   : > { %v3463_v7 = vpop.eup %3462 }
 0x51e   : > { %v1280_v8 = vsel %vm1139_vm9, %v3463_v7, 0.0 }
 0x51f   : > { %1281 = vadd.xlane.f32.xlu2 %v1280_v8 }
 0x524   : > { %v1406_v12 = vpop.xlane.xlu0 %1405 }
 0x525   : > { %v1410_v15 = vsub.f32 %v1402_v13, %v1406_v12 }
 0x527   : > { %v1412_v16 = vmul.f32 1.442695, %v1410_v15 }
 0x529   : > { %3464 = vpow2.f32 %v1412_v16 }
 0x52a   : > { %v1373_v18 = vpop.permute.xlu1 %1372 }
 0x52b   : > { %2922 = vmatmul.msk.f32.vlgmr.msrb.gmra.mxu3 %vm1082_vm7, %v1373_v18 }
 0x52f   : > { %v3465_v11 = vpop.eup %3464 }
 0x530   : > { %v1416_v19 = vsel %vm1139_vm9, %v3465_v11, 0.0 }
 0x531   : > { %1417 = vadd.xlane.f32.xlu1 %v1416_v19 }
 0x537   : > { %1478 = vrot.lane.b32.xlu2 %v4300_v1, %s3852_s15  ;;  %v1292_v21 = vpop.permute.xlu0 %1291 }
 0x538   : > { %1312 = vmatpush.msrb.mxu0 %v1292_v21 }
 0x53f   : > { %v1427_v22 = vpop.permute.xlu0 %1426 }
 0x540   : > { %1447 = vmatpush.msra.mxu0 %v1427_v22 }
 0x547   : > { %v1507_v23 = vpop.permute.xlu0 %1506 }
 0x548   : > { %2928 = vmatmul.msk.f32.vlgmr.msra.gmra.mxu3 %vm1082_vm7, %v1507_v23 }
 0x54a   : > { %1480 = vrot.lane.b32.xlu1 %v4302_v4, %s3852_s15 }
 0x572   : > { %v1273_v28 = vpop.xlane.xlu0 %1272 }
 0x573   : > { %v1275_v1 = vsub.f32 %v1267_v63, %v1273_v28  ;;  %v3422_v63 = vpack.i.bf16 %v4318_v14, %v4310_v9  ;;  %v3262_v28 = vld [vmem:[%s4167_s29 + $0x30] sm:$0xff] }
 0x575   : > { %v1278_v31 = vmul.f32 1.442695, %v1275_v1  ;;  %v3261_v1 = vld [vmem:[%s4167_s29 + $0x28] sm:$0xff] }
 0x592   : > { %v1282_v24 = vpop.xlane.xlu2 %1281 }
 0x593   : > { %3466 = vrcp.f32 %v1282_v24 }
 0x599   : > { %v3467_v25 = vpop.eup %3466 }
 0x59a   : > { %v1288_v26 = vmul.f32 %v3467_v25, %v3463_v7  ;;  %v1479_v38 = vpop.permute.xlu2 %1478 }
 0x59c   : > { %2917 = vmatmul.msk.f32.vlgmr.msrb.gmra.mxu0 %vm1139_vm9, %v1288_v26 }
 0x5a4   : > { %v1418_v27 = vpop.xlane.xlu1 %1417 }
 0x5a5   : > { %3468 = vrcp.f32 %v1418_v27  ;;  %v3263_v27 = vld [vmem:[%s4167_s29 + $0x38] sm:$0xff] }
 0x5a6   : > { %3470 = vpow2.f32 %v1278_v31  ;;  %1709 = vmatpush.bf16.msrb.mxu2 %v3263_v27 }
 0x5aa   : > { %1710 = vmatpush.bf16.msrb.mxu2 %v3262_v28 }
 0x5ab   : > { %v3469_v29 = vpop.eup %3468 }
 0x5ac   : > { %v1424_v30 = vmul.f32 %v3469_v29, %v3465_v11  ;;  %v3471_v35 = vpop.eup %3470  ;;  %v3260_v29 = vld [vmem:[%s4167_s29 + $0x20] sm:$0xff] }
 0x5ad   : > { %v1283_v36 = vsel %vm1139_vm9, %v3471_v35, 0.0 }
 0x5ae   : > { %v1397_v32 = vpop.f32.mrf.mxu3  ;;  %2923 = vmatmul.msk.f32.vlgmr.msra.gmra.mxu0 %vm1139_vm9, %v1424_v30  ;;  %1711 = vmatpush.bf16.msrb.mxu2 %v3261_v1  ;;  %v3259_v30 = vld [vmem:[%s4167_s29 + $0x18] sm:$0xff]  ;;  %v3289_v1 = vld [vmem:[%s4199_s22 + $0xcc] sm:$0xf] }
 0x5af   : > { %v1401_v33 = vmul.f32 0.17677669, %v1397_v32 }
 0x5b1   : > { %v1403_v34 = vadd.f32 %v1401_v33, %v4321_v20 }
 0x5b2   : > { %1712 = vmatpush.bf16.msrb.mxu2 %v3260_v29  ;;  %v3071_v29 = vld [vmem:[%s4199_s22 + $0xd8] sm:$0xf0] }
 0x5b3   : > { %v1407_v4 = vsel %vm1139_vm9, %v1403_v34, -inf }
 0x5b4   : > { %1408 = vmax.xlane.f32.xlu1 %v1407_v4 }
 0x5b6   : > { %1713 = vmatpush.bf16.msrb.mxu2 %v3259_v30  ;;  %v3074_v30 = vor.u32 %v3289_v1, %v3071_v29 }
 0x5bc   : > { %v1481_v37 = vpop.permute.xlu1 %1480  ;;  %1284 = vadd.xlane.f32.xlu1 %v1283_v36  ;;  %v3257_v36 = vld [vmem:[%s4167_s29 + $0x8] sm:$0xff] }
 0x5bd   : > { %2925 = vmatpush.xpose.msk.msrb.mxu0 %vm1082_vm7, %v1481_v37  ;;  %v3256_v37 = vld [vmem:[%s4167_s29] sm:$0xff] }
 0x5c0   : > { %2926 = vmatmul.msk.f32.vlgmr.msrb.gmra.mxu0 %vm1082_vm7, %v1479_v38 }
 0x5cb   : > { %v1531_v39 = vpop.f32.mrf.mxu3 }
 0x5cc   : > { %v1535_v40 = vmul.f32 0.17677669, %v1531_v39 }
 0x5ce   : > { %v1537_v41 = vadd.f32 %v1535_v40, %v4321_v20 }
 0x5d0   : > { %v1541_v42 = vsel %vm1139_vm9, %v1537_v41, -inf }
 0x5d1   : > { %1542 = vmax.xlane.f32.xlu0 %v1541_v42 }
 0x5e5   : > { %1318 = vrot.lane.b32.xlu0 %v4318_v14, %s3849_s9 }
 0x619   : > { %v1314_v43 = vpop.f32.mrf.mxu0 }
 0x627   : > { %v1409_v45 = vpop.xlane.xlu1 %1408 }
 0x628   : > { %v1411_v46 = vsub.f32 %v1403_v34, %v1409_v45 }
 0x62a   : > { %v1414_v47 = vmul.f32 1.442695, %v1411_v46 }
 0x62b   : > { %v4387_v44 = vpop.f32.mrf.mxu0 }
 0x62c   : > { %3472 = vpow2.f32 %v1414_v47 }
 0x62f   : > { %v1285_v59 = vpop.xlane.xlu1 %1284 }
 0x632   : > { %v3473_v56 = vpop.eup %3472 }
 0x633   : > { %v1419_v58 = vsel %vm1139_vm9, %v3473_v56, 0.0 }
 0x63d   : > { %v1503_v48 = vpop.f32.mrf.mxu0 }
 0x63e   : > { %v1534_v49 = vmul.f32 0.17677669, %v1503_v48 }
 0x640   : > { %v1536_v50 = vadd.f32 %v1534_v49, %v4321_v20 }
 0x642   : > { %v1538_v51 = vsel %vm1139_vm9, %v1536_v50, -inf }
 0x643   : > { %1539 = vmax.xlane.f32.xlu2 %v1538_v51 }
 0x644   : > { %v1543_v54 = vpop.xlane.xlu0 %1542 }
 0x645   : > { %v1545_v55 = vsub.f32 %v1537_v41, %v1543_v54 }
 0x647   : > { %v1548_v57 = vmul.f32 1.442695, %v1545_v55 }
 0x649   : > { %3474 = vpow2.f32 %v1548_v57 }
 0x64a   : > { %3476 = vrcp.f32 %v1285_v59 }
 0x64b   : > { %1420 = vadd.xlane.f32.xlu2 %v1419_v58 }
 0x64f   : > { %v3475_v60 = vpop.eup %3474 }
 0x650   : > { %v1553_v13 = vsel %vm1139_vm9, %v3475_v60, 0.0  ;;  %v3477_v61 = vpop.eup %3476 }
 0x651   : > { %v1289_v62 = vmul.f32 %v3477_v61, %v3471_v35  ;;  %v3258_v35 = vld [vmem:[%s4167_s29 + $0x10] sm:$0xff]  ;;  %s4781_s29 = scalar_lea.vmem [#allocation10], %s4147_s13 }
 0x652   : > { %1714 = vmatpush.bf16.msrb.mxu2 %v3258_v35  ;;  %v3053_v35 = vld [vmem:[%s4199_s22 + $0xa8] sm:$0xf] }
 0x653   : > { %1554 = vadd.xlane.f32.xlu2 %v1553_v13 }
 0x656   : > { %1715 = vmatpush.bf16.msrb.mxu2 %v3257_v36  ;;  %v3287_v36 = vld [vmem:[%s4199_s22 + $0xb4] sm:$0xf0] }
 0x657   : > { %v1319_v20 = vpop.permute.xlu0 %1318 }
 0x658   : > { %1339 = vmatpush.msrb.mxu1 %v1319_v20 }
 0x659   : > { %2918 = vmatmul.msk.f32.vlgmr.msrb.gmra.mxu1 %vm1139_vm9, %v1289_v62 }
 0x65a   : > { %1716 = vmatpush.bf16.msrb.mxu2 %v3256_v37 }
 0x66b   : > { %3423 = vrot.lane.b32.xlu2 %v3422_v63, %s3852_s15 }
 0x6b6   : > { %v1540_v0 = vpop.xlane.xlu2 %1539 }
 0x6b7   : > { %v1544_v17 = vsub.f32 %v1536_v50, %v1540_v0 }
 0x6b9   : > { %v1546_v5 = vmul.f32 1.442695, %v1544_v17  ;;  %v3077_v17 = vld [vmem:[%s4199_s22 + $0xe0] sm:$0xf] }
 0x6bb   : > { %3478 = vpow2.f32 %v1546_v5  ;;  %v3294_v5 = vld [vmem:[%s4199_s22 + $0xec] sm:$0xf0] }
 0x6be   : > { %v1421_v6 = vpop.xlane.xlu2 %1420 }
 0x6c1   : > { %v3479_v7 = vpop.eup %3478 }
 0x6c2   : > { %v1550_v8 = vsel %vm1139_vm9, %v3479_v7, 0.0 }
 0x6c3   : > { %1551 = vadd.xlane.f32.xlu1 %v1550_v8  ;;  %v3079_v8 = vld [vmem:[%s4199_s22 + $0xf0] sm:$0xf0] }
 0x6c6   : > { %v1555_v12 = vpop.xlane.xlu2 %1554 }
 0x6ce   : > { %v3424_v15 = vpop.permute.xlu2 %3423 }
 0x6cf   : > { %v3425_v16 = vunpack.i.l.bf16 %v3424_v15  ;;  %v3426_v25 = vunpack.i.h.bf16 %v3424_v15  ;;  %v3295_v15 = vld [vmem:[%s4199_s22 + $0xf4] sm:$0xf0] }
 0x6d1   : > { %1581 = vmatpush.msra.mxu0 %v3425_v16 }
 0x6d6   : > { %v1341_v18 = vpop.f32.mrf.mxu1 }
 0x6d7   : > { %v3427_v11 = vpack.i.bf16 %v1341_v18, %v1314_v43 }
 0x6d9   : > { %3428 = vrot.lane.b32.xlu0 %v3427_v11, %s3852_s15  ;;  %v3293_v11 = vld [vmem:[%s4199_s22 + $0xec] sm:$0xf] }
 0x6dc   : > { %1452 = vrot.lane.b32.xlu1 %v4318_v14, %s3851_s25 }
 0x736   : > { %v1552_v9 = vpop.xlane.xlu1 %1551 }
 0x737   : > { %3480 = vrcp.f32 %v1552_v9  ;;  %v3087_v9 = vld [vmem:[%s4199_s22 + $0xf8] sm:$0xf0] }
 0x738   : > { %3482 = vrcp.f32 %v1421_v6  ;;  %v3292_v6 = vld [vmem:[%s4199_s22 + $0xe4] sm:$0xf] }
 0x739   : > { %3484 = vrcp.f32 %v1555_v12  ;;  %v3085_v12 = vld [vmem:[%s4199_s22 + $0xe8] sm:$0xf]  ;;  %v3082_v16 = vor.u32 %v3292_v6, %v3079_v8  ;;  %v3274_v6 = vld [vmem:[%s4199_s22 + $0x4c] sm:$0xf0] }
 0x73a   : > { %v3086_v18 = vor.u32 %v3295_v15, %v3085_v12  ;;  %v2999_v12 = vld [vmem:[%s4199_s22 + $0x50] sm:$0xf0]  ;;  %v3005_v15 = vld [vmem:[%s4199_s22 + $0x48] sm:$0xf] }
 0x73b   : > { %2000 = vmatpush.bf16.msrb.mxu0 %v3082_v16  ;;  %v3275_v16 = vld [vmem:[%s4199_s22 + $0x54] sm:$0xf0] }
 0x73d   : > { %v3481_v19 = vpop.eup %3480 }
 0x73e   : > { %v1558_v21 = vmul.f32 %v3481_v19, %v3479_v7  ;;  %v3483_v22 = vpop.eup %3482  ;;  %v3078_v7 = vor.u32 %v3294_v5, %v3077_v17  ;;  %v3090_v19 = vor.u32 %v3293_v11, %v3087_v9  ;;  %v2997_v5 = vld [vmem:[%s4199_s22 + $0x40] sm:$0xf]  ;;  %v3006_v11 = vor.u32 %v3275_v16, %v3005_v15  ;;  %v3273_v9 = vld [vmem:[%s4199_s22 + $0x4c] sm:$0xf] }
 0x73f   : > { %v1425_v23 = vmul.f32 %v3483_v22, %v3473_v56  ;;  %v3485_v14 = vpop.eup %3484  ;;  %v3444_v56 = vld [vmem:[%s4781_s29] ss:$0 sm:$0xff]  ;;  %v3290_v22 = vld [vmem:[%s4199_s22 + $0xcc] sm:$0xf0]  ;;  %v2998_v8 = vor.u32 %v3274_v6, %v2997_v5 }
 0x740   : > { %2929 = vmatmul.msk.f32.vlgmr.msra.gmra.mxu0 %vm1139_vm9, %v1558_v21  ;;  %v1559_v26 = vmul.f32 %v3485_v14, %v3475_v60  ;;  %1986 = vmatpush.bf16.msrb.mxu3 %v3078_v7  ;;  %v3061_v21 = vld [vmem:[%s4199_s22 + $0xc0] sm:$0xf]  ;;  %v3069_v14 = vld [vmem:[%s4199_s22 + $0xc8] sm:$0xf]  ;;  %v3272_v7 = vld [vmem:[%s4199_s22 + $0x44] sm:$0xf] }
 0x741   : > { %2028 = vmatpush.bf16.msra.mxu2 %v3090_v19  ;;  %v3007_v19 = vld [vmem:[%s4199_s22 + $0x58] sm:$0xf0]  ;;  %v3446_v5 = vld [vmem:[%s4783_s20] ss:$0 sm:$0xff] }
 0x745   : > { %2029 = vmatpush.bf16.msra.mxu2 %v3074_v30  ;;  %v3269_v30 = vld [vmem:[%s4199_s22 + $0x2c] sm:$0xf] }
 0x74b   : > { %v3429_v38 = vpop.permute.xlu0 %3428 }
 0x74c   : > { %v3431_v40 = vunpack.i.h.bf16 %v3429_v38  ;;  %v3430_v41 = vunpack.i.l.bf16 %v3429_v38  ;;  %v3054_v38 = vor.u32 %v3287_v36, %v3053_v35  ;;  %v3264_v35 = vld [vmem:[%s4199_s22 + $0x4] sm:$0xf]  ;;  %v2967_v36 = vld [vmem:[%s4199_s22 + $0x10] sm:$0xf0] }
 0x74e   : > { %v1453_v24 = vpop.permute.xlu1 %1452  ;;  %v1637_v45 = vsel %vm1082_vm7, %v4352_v53, %v3431_v40  ;;  %v1636_v46 = vsel %vm1082_vm7, %v4350_v52, %v3430_v41  ;;  %v3055_v40 = vld [vmem:[%s4199_s22 + $0xb8] sm:$0xf0] }
 0x74f   : > { %1473 = vmatpush.msra.mxu1 %v1453_v24  ;;  %v3062_v24 = vor.u32 %v3290_v22, %v3061_v21  ;;  %v3010_v21 = vor.u32 %v3273_v9, %v3007_v19  ;;  %v2981_v22 = vld [vmem:[%s4199_s22 + $0x20] sm:$0xf] }
 0x750   : > { %2924 = vmatmul.msk.f32.vlgmr.msra.gmra.mxu1 %vm1139_vm9, %v1425_v23  ;;  %v3288_v23 = vld [vmem:[%s4199_s22 + $0xc4] sm:$0xf] }
 0x751   : > { %1607 = vmatpush.msrb.mxu1 %v3426_v25  ;;  %v3063_v25 = vld [vmem:[%s4199_s22 + $0xd0] sm:$0xf0]  ;;  %1987 = vmatpush.bf16.msrb.mxu3 %v3062_v24  ;;  %v3268_v24 = vld [vmem:[%s4199_s22 + $0x24] sm:$0xf] }
 0x752   : > { %v3066_v27 = vor.u32 %v3288_v23, %v3063_v25  ;;  %v3270_v23 = vld [vmem:[%s4199_s22 + $0x2c] sm:$0xf0] }
 0x753   : > { %2014 = vmatpush.bf16.msra.mxu1 %v3086_v18  ;;  %v3002_v18 = vor.u32 %v3272_v7, %v2999_v12  ;;  %v2982_v25 = vor.u32 %v3270_v23, %v2981_v22 }
 0x754   : > { %2001 = vmatpush.bf16.msrb.mxu0 %v3066_v27  ;;  %v3271_v27 = vld [vmem:[%s4199_s22 + $0x34] sm:$0xf0] }
 0x758   : > { %2930 = vmatmul.msk.f32.vlgmr.msrb.gmra.mxu1 %vm1139_vm9, %v1559_v26  ;;  %v3291_v26 = vld [vmem:[%s4199_s22 + $0xd4] sm:$0xf0] }
 0x759   : > { %v3070_v28 = vor.u32 %v3291_v26, %v3069_v14  ;;  %v2983_v14 = vld [vmem:[%s4199_s22 + $0x30] sm:$0xf0]  ;;  %v2989_v26 = vld [vmem:[%s4199_s22 + $0x28] sm:$0xf] }
 0x75a   : > { %v2986_v1 = vor.u32 %v3268_v24, %v2983_v14  ;;  %v2990_v29 = vor.u32 %v3271_v27, %v2989_v26  ;;  %v3310_v24 = vld [vmem:[%s4204_s16 + $0x70] sm:$0xff] }
 0x75b   : > { %2015 = vmatpush.bf16.msra.mxu1 %v3070_v28 }
 0x75f   : > { %2016 = vmatpush.bf16.msra.mxu1 %v3054_v38  ;;  %v2970_v38 = vor.u32 %v3264_v35, %v2967_v36 }
 0x7bd   : > { %v1583_v33 = vpop.f32.mrf.mxu0 }
 0x7cd   : > { %v1475_v31 = vpop.f32.mrf.mxu1 }
 0x7ce   : > { %v3432_v32 = vpack.i.bf16 %v1475_v31, %v4387_v44  ;;  %v3045_v31 = vld [vmem:[%s4199_s22 + $0xa0] sm:$0xf] }
 0x7d0   : > { %3433 = vrot.lane.b32.xlu0 %v3432_v32, %s3851_s25  ;;  %v3286_v32 = vld [vmem:[%s4199_s22 + $0xac] sm:$0xf0] }
 0x7d5   : > { %v1609_v34 = vpop.f32.mrf.mxu1 }
 0x7d6   : > { %v3437_v4 = vpack.i.bf16 %v1609_v34, %v1583_v33  ;;  %v3284_v33 = vld [vmem:[%s4199_s22 + $0xa4] sm:$0xf]  ;;  %v3046_v34 = vor.u32 %v3286_v32, %v3045_v31  ;;  %v2991_v31 = vld [vmem:[%s4199_s22 + $0x38] sm:$0xf0]  ;;  %v2965_v32 = vld [vmem:[%s4199_s22] sm:$0xf] }
 0x7d8   : > { %3438 = vrot.lane.b32.xlu1 %v3437_v4, %s3849_s9  ;;  %v3047_v4 = vld [vmem:[%s4199_s22 + $0xb0] sm:$0xf0]  ;;  %1988 = vmatpush.bf16.msrb.mxu3 %v3046_v34  ;;  %v2994_v34 = vor.u32 %v3269_v30, %v2991_v31 }
 0x7d9   : > { %v3050_v37 = vor.u32 %v3284_v33, %v3047_v4  ;;  %v3266_v4 = vld [vmem:[%s4199_s22 + $0xc] sm:$0xf0] }
 0x7db   : > { %2002 = vmatpush.bf16.msrb.mxu0 %v3050_v37  ;;  %v2966_v37 = vor.u32 %v3266_v4, %v2965_v32 }
 0x842   : > { %v3434_v39 = vpop.permute.xlu0 %3433 }
 0x843   : > { %v3436_v42 = vunpack.i.h.bf16 %v3434_v39  ;;  %v3435_v43 = vunpack.i.l.bf16 %v3434_v39  ;;  %v3285_v39 = vld [vmem:[%s4199_s22 + $0xac] sm:$0xf] }
 0x844   : > { %v3058_v41 = vor.u32 %v3285_v39, %v3055_v40  ;;  %v2973_v39 = vld [vmem:[%s4199_s22 + $0x8] sm:$0xf]  ;;  %v3267_v40 = vld [vmem:[%s4199_s22 + $0x14] sm:$0xf0] }
 0x845   : > { %v1640_v49 = vsel %vm1638_vm10, %v1637_v45, %v3436_v42  ;;  %v1639_v50 = vsel %vm1638_vm10, %v1636_v46, %v3435_v43  ;;  %v3029_v42 = vld [vmem:[%s4199_s22 + $0x80] sm:$0xf]  ;;  %v3282_v43 = vld [vmem:[%s4199_s22 + $0x8c] sm:$0xf0]  ;;  %v3031_v46 = vld [vmem:[%s4199_s22 + $0x90] sm:$0xf0] }
 0x846   : > { %2030 = vmatpush.bf16.msra.mxu2 %v3058_v41  ;;  %v3030_v45 = vor.u32 %v3282_v43, %v3029_v42  ;;  %v3265_v41 = vld [vmem:[%s4199_s22 + $0xc] sm:$0xf]  ;;  %v2974_v43 = vor.u32 %v3267_v40, %v2973_v39  ;;  %v3302_v39 = vld [vmem:[%s4204_s16 + $0x30] sm:$0xff] }
 0x847   : > { %v3326_v40 = vld [vmem:[%s4204_s16 + $0xf0] sm:$0xff] }
 0x848   : > { %1989 = vmatpush.bf16.msrb.mxu3 %v3030_v45 }
 0x84a   : > { %v3439_v44 = vpop.permute.xlu1 %3438 }
 0x84b   : > { %v3441_v47 = vunpack.i.h.bf16 %v3439_v44  ;;  %v3440_v48 = vunpack.i.l.bf16 %v3439_v44  ;;  %v3280_v44 = vld [vmem:[%s4199_s22 + $0x84] sm:$0xf] }
 0x84d   : > { %v1642_v51 = vsel %vm1641_vm11, %v1639_v50, %v3440_v48  ;;  %v1643_v54 = vsel %vm1641_vm11, %v1640_v49, %v3441_v47  ;;  %v3037_v47 = vld [vmem:[%s4199_s22 + $0x88] sm:$0xf]  ;;  %v3283_v48 = vld [vmem:[%s4199_s22 + $0x94] sm:$0xf0]  ;;  %v3034_v49 = vor.u32 %v3280_v44, %v3031_v46  ;;  %v2975_v44 = vld [vmem:[%s4199_s22 + $0x18] sm:$0xf0] }
 0x84e   : > { %v1644_v55 = vpack.c.bf16 %v1643_v54, %v1642_v51  ;;  %v3038_v50 = vor.u32 %v3283_v48, %v3037_v47  ;;  %v3281_v51 = vld [vmem:[%s4199_s22 + $0x8c] sm:$0xf]  ;;  %v3039_v54 = vld [vmem:[%s4199_s22 + $0x98] sm:$0xf0]  ;;  %v2978_v45 = vor.u32 %v3265_v41, %v2975_v44 }
 0x84f   : > { %2003 = vmatpush.bf16.msrb.mxu0 %v3034_v49 }
 0x850   : > { %1717 = vmatmul.bf16.vlgmr.msrb.gmra.mxu2 %v1644_v55  ;;  %v3042_v55 = vor.u32 %v3281_v51, %v3039_v54  ;;  %2017 = vmatpush.bf16.msra.mxu1 %v3038_v50 }
 0x852   : > { %2031 = vmatpush.bf16.msra.mxu2 %v3042_v55 }
 0x8d3   : > { %v1718_v57 = vpop.f32.mrf.mxu2 }
 0x8d4   : > { %v1723_v58 = vadd.f32 %v1718_v57, %v4220_v2  ;;  %v3278_v57 = vld [vmem:[%s4199_s22 + $0x6c] sm:$0xf0] }
 0x8d6   : > { %v4422_v59 = vadd.f32 %v3444_v56, %v1723_v58  ;;  %v3276_v58 = vld [vmem:[%s4199_s22 + $0x64] sm:$0xf] }
 0x8d8   : > { %1733 = vadd.xlane.f32.xlu0 %v4422_v59 }
 0x8db   : > { %v1720_v52 = vpop.f32.mrf.mxu2 }
 0x8dc   : > { %v1724_v53 = vadd.f32 %v1720_v52, %v4223_v3 }
 0x8de   : > { %v4426_v60 = vadd.f32 %v3444_v56, %v1724_v53  ;;  %v3013_v56 = vld [vmem:[%s4199_s22 + $0x60] sm:$0xf]  ;;  %v3015_v53 = vld [vmem:[%s4199_s22 + $0x70] sm:$0xf0] }
 0x8df   : > { %v3014_v52 = vor.u32 %v3278_v57, %v3013_v56 }
 0x8e0   : > { %1735 = vadd.xlane.f32.xlu2 %v4426_v60 }
 0x8e1   : > { %1990 = vmatpush.bf16.msrb.mxu3 %v3014_v52 }
 0x8e5   : > { %1991 = vmatpush.bf16.msrb.mxu3 %v2998_v8 }
 0x8e9   : > { %1992 = vmatpush.bf16.msrb.mxu3 %v2982_v25  ;;  %v3318_v25 = vld [vmem:[%s4204_s16 + $0xb0] sm:$0xff] }
 0x8ed   : > { %1993 = vmatpush.bf16.msrb.mxu3 %v2966_v37 }
 0x94b   : > { %v1734_v13 = vpop.xlane.xlu0 %1733 }
 0x94c   : > { %v1737_v2 = vmul.f32 %v1734_v13, %v4226_v10  ;;  %v3021_v13 = vld [vmem:[%s4199_s22 + $0x68] sm:$0xf] }
 0x94e   : > { %v4431_v61 = vsub.f32 %v4422_v59, %v1737_v2  ;;  %v3279_v2 = vld [vmem:[%s4199_s22 + $0x74] sm:$0xf0] }
 0x950   : > { %v1741_v20 = vmul.f32 %v4431_v61, %v4431_v61 }
 0x952   : > { %1743 = vadd.xlane.f32.xlu1 %v1741_v20  ;;  %v3018_v20 = vor.u32 %v3276_v58, %v3015_v53 }
 0x953   : > { %v1736_v3 = vpop.xlane.xlu2 %1735 }
 0x954   : > { %v1738_v62 = vmul.f32 %v1736_v3, %v4226_v10  ;;  %v3022_v3 = vor.u32 %v3279_v2, %v3021_v13  ;;  %2004 = vmatpush.bf16.msrb.mxu0 %v3018_v20  ;;  %v3445_v20 = vld [vmem:[%s4782_s5] ss:$0 sm:$0xff] }
 0x956   : > { %v4437_v63 = vsub.f32 %v4426_v60, %v1738_v62  ;;  %v3277_v62 = vld [vmem:[%s4199_s22 + $0x6c] sm:$0xf]  ;;  %2018 = vmatpush.bf16.msra.mxu1 %v3022_v3 }
 0x958   : > { %v1742_v0 = vmul.f32 %v4437_v63, %v4437_v63  ;;  %2005 = vmatpush.bf16.msrb.mxu0 %v3002_v18  ;;  %v3319_v18 = vld [vmem:[%s4204_s16 + $0xb8] sm:$0xff] }
 0x95a   : > { %1745 = vadd.xlane.f32.xlu0 %v1742_v0  ;;  %v3023_v0 = vld [vmem:[%s4199_s22 + $0x78] sm:$0xf0]  ;;  %2019 = vmatpush.bf16.msra.mxu1 %v3006_v11 }
 0x95b   : > { %v3026_v17 = vor.u32 %v3277_v62, %v3023_v0 }
 0x95c   : > { %2006 = vmatpush.bf16.msrb.mxu0 %v2986_v1  ;;  %v3327_v1 = vld [vmem:[%s4204_s16 + $0xf8] sm:$0xff] }
 0x95d   : > { %2032 = vmatpush.bf16.msra.mxu2 %v3026_v17 }
 0x95e   : > { %2020 = vmatpush.bf16.msra.mxu1 %v2990_v29 }
 0x960   : > { %2007 = vmatpush.bf16.msrb.mxu0 %v2970_v38 }
 0x961   : > { %2033 = vmatpush.bf16.msra.mxu2 %v3010_v21 }
 0x962   : > { %2021 = vmatpush.bf16.msra.mxu1 %v2974_v43 }
 0x965   : > { %2034 = vmatpush.bf16.msra.mxu2 %v2994_v34  ;;  %v3317_v34 = vld [vmem:[%s4204_s16 + $0xa8] sm:$0xff] }
 0x966   : > { %2498 = vmatpush.bf16.msrb.mxu1 %v3319_v18  ;;  %v3305_v18 = vld [vmem:[%s4204_s16 + $0x48] sm:$0xff] }
 0x969   : > { %2035 = vmatpush.bf16.msra.mxu2 %v2978_v45  ;;  %v3308_v45 = vld [vmem:[%s4204_s16 + $0x60] sm:$0xff] }
 0x96a   : > { %2499 = vmatpush.bf16.msrb.mxu1 %v3318_v25 }
 0x96d   : > { %2512 = vmatpush.bf16.msrb.mxu2 %v3327_v1  ;;  %v3322_v1 = vld [vmem:[%s4204_s16 + $0xd0] sm:$0xff] }
 0x96e   : > { %2500 = vmatpush.bf16.msrb.mxu1 %v3317_v34 }
 0x971   : > { %2513 = vmatpush.bf16.msrb.mxu2 %v3326_v40  ;;  %v3321_v40 = vld [vmem:[%s4204_s16 + $0xc8] sm:$0xff] }
 0x9c5   : > { %v1744_v28 = vpop.xlane.xlu1 %1743 }
 0x9c6   : > { %v1747_v33 = vmul.f32 %v1744_v28, %v4226_v10  ;;  %v3303_v28 = vld [vmem:[%s4204_s16 + $0x38] sm:$0xff] }
 0x9c7   : > { %2470 = vmatpush.bf16.msra.mxu3 %v3303_v28 }
 0x9c8   : > { %v1749_v42 = vadd.f32 1e-05, %v1747_v33  ;;  %v3309_v33 = vld [vmem:[%s4204_s16 + $0x68] sm:$0xff] }
 0x9ca   : > { %3486 = vrsqrt.f32 %v1749_v42  ;;  %vm1757_vm13 = vweird.f32 %v1749_v42 }
 0x9cb   : > { %2471 = vmatpush.bf16.msra.mxu3 %v3302_v39  ;;  %v3297_v39 = vld [vmem:[%s4204_s16 + $0x8] sm:$0xff] }
 0x9cd   : > { %v1746_v46 = vpop.xlane.xlu0 %1745 }
 0x9ce   : > { %v1748_v47 = vmul.f32 %v1746_v46, %v4226_v10  ;;  %v3316_v46 = vld [vmem:[%s4204_s16 + $0xa0] sm:$0xff] }
 0x9cf   : > { %2501 = vmatpush.bf16.msrb.mxu1 %v3316_v46 }
 0x9d0   : > { %v3487_v48 = vpop.eup %3486  ;;  %v1750_v49 = vadd.f32 1e-05, %v1748_v47 }
 0x9d1   : > { %v1752_v50 = vmul.f32 %v3487_v48, %v1749_v42  ;;  %vm1758_vm12 = vweird.f32 %v3487_v48 }
 0x9d2   : > { %3488 = vrsqrt.f32 %v1750_v49  ;;  %vm1759_vm14 = vmor %vm1757_vm13, %vm1758_vm12  ;;  %vm1767_vm0 = vweird.f32 %v1750_v49 }
 0x9d3   : > { %v1753_v51 = vmul.f32 %v3487_v48, %v1752_v50  ;;  %v3301_v50 = vld [vmem:[%s4204_s16 + $0x28] sm:$0xff] }
 0x9d4   : > { %2472 = vmatpush.bf16.msra.mxu3 %v3301_v50  ;;  %v3296_v50 = vld [vmem:[%s4204_s16] sm:$0xff] }
 0x9d5   : > { %v1754_v54 = vmul.f32 0.5, %v1753_v51  ;;  %v3325_v51 = vld [vmem:[%s4204_s16 + $0xe8] sm:$0xff] }
 0x9d6   : > { %2514 = vmatpush.bf16.msrb.mxu2 %v3325_v51  ;;  %v3320_v51 = vld [vmem:[%s4204_s16 + $0xc0] sm:$0xff] }
 0x9d7   : > { %v1755_v55 = vsub.f32 1.5, %v1754_v54 }
 0x9d8   : > { %v3489_v56 = vpop.eup %3488 }
 0x9d9   : > { %v1756_v57 = vmul.f32 %v3487_v48, %v1755_v55  ;;  %v1762_v58 = vmul.f32 %v3489_v56, %v1750_v49  ;;  %vm1768_vm15 = vweird.f32 %v3489_v56 }
 0x9da   : > { %vm1769_vm1 = vmor %vm1767_vm0, %vm1768_vm15 }
 0x9db   : > { %v1763_v52 = vmul.f32 %v3489_v56, %v1762_v58  ;;  %v1760_v53 = vsel %vm1759_vm14, %v3487_v48, %v1756_v57 }
 0x9dc   : > { %v1771_v10 = vmul.f32 %v1760_v53, %v4431_v61  ;;  %v4514_v61 = vld [vmem:[%s4181_s24] sm:$0xf] }
 0x9dd   : > { %v1764_v13 = vmul.f32 0.5, %v1763_v52  ;;  %v1819_v15 = vperm.slane %v4514_v61, 1  ;;  %v1820_v16 = vperm.slane %v4514_v61, 2  ;;  %v1818_v23 = vperm.slane %v4514_v61, 0 }
 0x9de   : > { %v1776_v17 = vmul.f32 %v3445_v20, %v1771_v10  ;;  %v1821_v26 = vperm.slane %v4514_v61, 3  ;;  %v3300_v10 = vld [vmem:[%s4204_s16 + $0x20] sm:$0xff] }
 0x9df   : > { %v1765_v2 = vsub.f32 1.5, %v1764_v13  ;;  %v3307_v13 = vld [vmem:[%s4204_s16 + $0x58] sm:$0xff]  ;;  %2473 = vmatpush.bf16.msra.mxu3 %v3300_v10 }
 0x9e0   : > { %v1781_v7 = vadd.f32 %v3446_v5, %v1776_v17  ;;  %v3314_v17 = vld [vmem:[%s4204_s16 + $0x90] sm:$0xff] }
 0x9e1   : > { %v1766_v3 = vmul.f32 %v3489_v56, %v1765_v2  ;;  %v3315_v2 = vld [vmem:[%s4204_s16 + $0x98] sm:$0xff] }
 0x9e2   : > { %2502 = vmatpush.bf16.msrb.mxu1 %v3315_v2 }
 0x9e3   : > { %v1770_v62 = vsel %vm1769_vm1, %v3489_v56, %v1766_v3 }
 0x9e4   : > { %v1772_v0 = vmul.f32 %v1770_v62, %v4437_v63  ;;  %v3311_v63 = vld [vmem:[%s4204_s16 + $0x78] sm:$0xff] }
 0x9e5   : > { %2484 = vmatpush.bf16.msra.mxu0 %v3311_v63 }
 0x9e6   : > { %v1777_v6 = vmul.f32 %v3445_v20, %v1772_v0  ;;  %v3324_v20 = vld [vmem:[%s4204_s16 + $0xe0] sm:$0xff]  ;;  %v3306_v0 = vld [vmem:[%s4204_s16 + $0x50] sm:$0xff]  ;;  %2503 = vmatpush.bf16.msrb.mxu1 %v3314_v17 }
 0x9e7   : > { %2515 = vmatpush.bf16.msrb.mxu2 %v3324_v20 }
 0x9e8   : > { %v1782_v8 = vadd.f32 %v3446_v5, %v1777_v6 }
 0x9e9   : > { %2485 = vmatpush.bf16.msra.mxu0 %v3310_v24 }
 0x9ea   : > { %v1783_v12 = vpack.c.bf16 %v1782_v8, %v1781_v7  ;;  %v3299_v7 = vld [vmem:[%s4204_s16 + $0x18] sm:$0xff] }
 0x9eb   : > { %v3323_v8 = vld [vmem:[%s4204_s16 + $0xd8] sm:$0xff]  ;;  %2474 = vmatpush.bf16.msra.mxu3 %v3299_v7 }
 0x9ec   : > { %1994 = vmatmul.bf16.vlgmr.msrb.gmra.mxu3 %v1783_v12  ;;  %2008 = vmatmul.bf16.vlgmr.msrb.gmra.mxu0 %v1783_v12 }
 0x9ed   : > { %2022 = vmatmul.bf16.vlgmr.msra.gmra.mxu1 %v1783_v12  ;;  %2036 = vmatmul.bf16.vlgmr.msra.gmra.mxu2 %v1783_v12 }
 0x9ee   : > { %2486 = vmatpush.bf16.msra.mxu0 %v3309_v33  ;;  %2516 = vmatpush.bf16.msrb.mxu2 %v3323_v8  ;;  %v3312_v33 = vld [vmem:[%s4204_s16 + $0x80] sm:$0xff] }
 0x9f2   : > { %2487 = vmatpush.bf16.msra.mxu0 %v3308_v45  ;;  %2517 = vmatpush.bf16.msrb.mxu2 %v3322_v1 }
 0x9f6   : > { %2488 = vmatpush.bf16.msra.mxu0 %v3307_v13  ;;  %2518 = vmatpush.bf16.msrb.mxu2 %v3321_v40 }
 0x9fa   : > { %2489 = vmatpush.bf16.msra.mxu0 %v3306_v0  ;;  %2519 = vmatpush.bf16.msrb.mxu2 %v3320_v51 }
 0x9fe   : > { %2490 = vmatpush.bf16.msra.mxu0 %v3305_v18 }
 0xa69   : > { %v2009_v11 = vpop.f32.mrf.mxu0 }
 0xa6a   : > { %v4520_v9 = vadd.f32 %v2009_v11, %v1819_v15  ;;  %v2023_v19 = vpop.f32.mrf.mxu1  ;;  %v3313_v11 = vld [vmem:[%s4204_s16 + $0x88] sm:$0xff] }
 0xa6b   : > { %v4522_v21 = vadd.f32 %v2023_v19, %v1820_v16  ;;  %2504 = vmatpush.bf16.msrb.mxu1 %v3313_v11 }
 0xa6c   : > { %v3092_v22 = vmul.f32 -1.702, %v4520_v9 }
 0xa6d   : > { %v3093_v14 = vmul.f32 -1.702, %v4522_v21 }
 0xa6e   : > { %v2060_v27 = vmul.f32 1.442695, %v3092_v22 }
 0xa6f   : > { %v2062_v29 = vmul.f32 1.442695, %v3093_v14  ;;  %v1995_v30 = vpop.f32.mrf.mxu3  ;;  %2505 = vmatpush.bf16.msrb.mxu1 %v3312_v33 }
 0xa70   : > { %3490 = vpow2.f32 %v2060_v27  ;;  %v4532_v31 = vadd.f32 %v1995_v30, %v1818_v23  ;;  %v2037_v32 = vpop.f32.mrf.mxu2  ;;  %v3298_v27 = vld [vmem:[%s4204_s16 + $0x10] sm:$0xff] }
 0xa71   : > { %3492 = vpow2.f32 %v2062_v29  ;;  %v4538_v4 = vadd.f32 %v2037_v32, %v1821_v26  ;;  %v2011_v35 = vpop.f32.mrf.mxu0  ;;  %2475 = vmatpush.bf16.msra.mxu3 %v3298_v27  ;;  %v3304_v32 = vld [vmem:[%s4204_s16 + $0x40] sm:$0xff] }
 0xa72   : > { %v3091_v36 = vmul.f32 -1.702, %v4532_v31  ;;  %v4541_v37 = vadd.f32 %v2011_v35, %v1819_v15  ;;  %v2025_v38 = vpop.f32.mrf.mxu1  ;;  %2491 = vmatpush.bf16.msra.mxu0 %v3304_v32 }
 0xa73   : > { %v3094_v41 = vmul.f32 -1.702, %v4538_v4  ;;  %v4546_v42 = vadd.f32 %v2025_v38, %v1820_v16 }
 0xa74   : > { %v2058_v43 = vmul.f32 1.442695, %v3091_v36  ;;  %v3096_v44 = vmul.f32 -1.702, %v4541_v37 }
 0xa75   : > { %v3097_v47 = vmul.f32 -1.702, %v4546_v42  ;;  %v2064_v52 = vmul.f32 1.442695, %v3094_v41  ;;  %2476 = vmatpush.bf16.msra.mxu3 %v3297_v39 }
 0xa76   : > { %v3491_v48 = vpop.eup %3490  ;;  %3494 = vpow2.f32 %v2058_v43  ;;  %v2068_v49 = vmul.f32 1.442695, %v3096_v44 }
 0xa77   : > { %v3493_v54 = vpop.eup %3492  ;;  %v4554_v55 = vadd.f32 1.0, %v3491_v48  ;;  %v2070_v56 = vmul.f32 1.442695, %v3097_v47  ;;  %v1997_v57 = vpop.f32.mrf.mxu3 }
 0xa78   : > { %v4556_v58 = vadd.f32 1.0, %v3493_v54  ;;  %3496 = vpow2.f32 %v2068_v49  ;;  %v4558_v53 = vadd.f32 %v1997_v57, %v1818_v23  ;;  %v2039_v14 = vpop.f32.mrf.mxu2 }
 0xa79   : > { %3498 = vrcp.f32 %v4554_v55  ;;  %v4600_v36 = vadd.f32 %v2039_v14, %v1821_v26  ;;  %v2106_v38 = vand.u32 2147483647, %v4554_v55  ;;  %v2108_v41 = vand.u32 2147483648, %v4554_v55  ;;  %2477 = vmatpush.bf16.msra.mxu3 %v3296_v50 }
 0xa7a   : > { %3500 = vrcp.f32 %v4556_v58  ;;  %v3095_v3 = vmul.f32 -1.702, %v4558_v53  ;;  %v2121_v43 = vand.u32 2147483647, %v4556_v58  ;;  %v2123_v46 = vand.u32 2147483648, %v4556_v58 }
 0xa7b   : > { %3502 = vpow2.f32 %v2070_v56  ;;  %v3098_v47 = vmul.f32 -1.702, %v4600_v36  ;;  %vm2102_vm3 = vweird.f32 %v4554_v55  ;;  %vm4617_vm4 = vcmp.eq.f32.partialorder %v2106_v38, 8.507059e+37 }
 0xa7c   : > { %v3495_v62 = vpop.eup %3494  ;;  %3504 = vpow2.f32 %v2064_v52  ;;  %v2066_v15 = vmul.f32 1.442695, %v3095_v3  ;;  %vm2117_vm5 = vweird.f32 %v4556_v58  ;;  %v2109_v56 = vor.u32 1.1754944e-38, %v2108_v41 }
 0xa7d   : > { %v4569_v5 = vadd.f32 1.0, %v3495_v62  ;;  %vm4631_vm8 = vcmp.eq.f32.partialorder %v2121_v43, 8.507059e+37  ;;  %v2124_v3 = vor.u32 1.1754944e-38, %v2123_v46  ;;  %v2072_v17 = vmul.f32 1.442695, %v3098_v47 }
 0xa7e   : > { %v3497_v6 = vpop.eup %3496 }
 0xa7f   : > { %v4573_v12 = vpop.eup %3498  ;;  %3506 = vrcp.f32 %v4569_v5  ;;  %v4584_v25 = vadd.f32 1.0, %v3497_v6  ;;  %v2093_v41 = vand.u32 2147483648, %v4569_v5 }
 0xa80   : > { %v4576_v16 = vpop.eup %3500  ;;  %v2098_v63 = vmul.f32 %v4573_v12, %v4554_v55  ;;  %3508 = vpow2.f32 %v2066_v15  ;;  %vm2103_vm2 = vweird.f32 %v4573_v12 }
 0xa81   : > { %v3503_v19 = vpop.eup %3502  ;;  %v2113_v22 = vmul.f32 %v4576_v16, %v4556_v58  ;;  %3510 = vrcp.f32 %v4584_v25  ;;  %vm4626_vm6 = vmor %vm2102_vm3, %vm2103_vm2  ;;  %vm2118_vm7 = vweird.f32 %v4576_v16  ;;  %vm2162_vm9 = vweird.f32 %v4584_v25 }
 0xa82   : > { %v3505_v23 = vpop.eup %3504  ;;  %v2099_v24 = vsub.f32 1.0, %v2098_v63  ;;  %v4587_v28 = vadd.f32 1.0, %v3503_v19  ;;  %v2166_v6 = vand.u32 2147483647, %v4584_v25  ;;  %v2168_v7 = vand.u32 2147483648, %v4584_v25  ;;  %vm4655_vm10 = vmor %vm2117_vm5, %vm2118_vm7 }
 0xa83   : > { %v2114_v30 = vsub.f32 1.0, %v2113_v22  ;;  %v4596_v35 = vadd.f32 1.0, %v3505_v23  ;;  %vm2087_vm3 = vweird.f32 %v4569_v5  ;;  %v2094_v54 = vor.u32 1.1754944e-38, %v2093_v41 }
 0xa84   : > { %v2100_v29 = vmul.f32 %v4573_v12, %v2099_v24  ;;  %3512 = vrcp.f32 %v4587_v28  ;;  %v2181_v22 = vand.u32 2147483647, %v4587_v28  ;;  %v2183_v23 = vand.u32 2147483648, %v4587_v28 }
 0xa85   : > { %v4594_v34 = vpop.eup %3506  ;;  %v2115_v61 = vmul.f32 %v4576_v16, %v2114_v30  ;;  %3514 = vrcp.f32 %v4596_v35  ;;  %vm2167_vm15 = vcmp.eq.f32.partialorder %v2166_v6, 8.507059e+37  ;;  %vm2177_vm0 = vweird.f32 %v4587_v28 }
 0xa86   : > { %v2101_v44 = vadd.f32 %v4573_v12, %v2100_v29  ;;  %v2083_v26 = vmul.f32 %v4594_v34, %v4569_v5  ;;  %v3509_v45 = vpop.eup %3508  ;;  %vm2088_vm13 = vweird.f32 %v4594_v34  ;;  %v2184_v39 = vor.u32 1.1754944e-38, %v2183_v23 }
 0xa87   : > { %v3511_v48 = vpop.eup %3510  ;;  %v2116_v2 = vadd.f32 %v4576_v16, %v2115_v61  ;;  %v4640_v20 = vadd.f32 1.0, %v3509_v45  ;;  %vm2182_vm2 = vcmp.eq.f32.partialorder %v2181_v22, 8.507059e+37 }
 0xa88   : > { %v2158_v55 = vmul.f32 %v3511_v48, %v4584_v25  ;;  %v2105_v13 = vsel %vm4626_vm6, %v4573_v12, %v2101_v44  ;;  %v2084_v10 = vsub.f32 1.0, %v2083_v26  ;;  %vm2163_vm11 = vweird.f32 %v3511_v48 }
 0xa89   : > { %3516 = vrcp.f32 %v4640_v20  ;;  %v2110_v12 = vsel %vm4617_vm4, %v2109_v56, %v2105_v13  ;;  %v2120_v11 = vsel %vm4655_vm10, %v4576_v16, %v2116_v2  ;;  %vm2164_vm14 = vmor %vm2162_vm9, %vm2163_vm11  ;;  %v2169_v16 = vor.u32 1.1754944e-38, %v2168_v7 }
 0xa8a   : > { %v3513_v52 = vpop.eup %3512  ;;  %v2159_v62 = vsub.f32 1.0, %v2158_v55  ;;  %v2085_v19 = vmul.f32 %v4594_v34, %v2084_v10  ;;  %3518 = vpow2.f32 %v2072_v17  ;;  %v2203_v27 = vmul.f32 %v2110_v12, %v4520_v9  ;;  %vm4684_vm4 = vmor %vm2087_vm3, %vm2088_vm13 }
 0xa8b   : > { %v2173_v0 = vmul.f32 %v3513_v52, %v4587_v28  ;;  %v4647_v8 = vpop.eup %3514  ;;  %vm2178_vm12 = vweird.f32 %v3513_v52  ;;  %v2125_v32 = vsel %vm4631_vm8, %v2124_v3, %v2120_v11  ;;  %v2091_v28 = vand.u32 2147483647, %v4569_v5 }
 0xa8c   : > { %v2160_v63 = vmul.f32 %v3511_v48, %v2159_v62  ;;  %v2128_v58 = vmul.f32 %v4647_v8, %v4596_v35  ;;  %v2086_v33 = vadd.f32 %v4594_v34, %v2085_v19  ;;  %vm2179_vm1 = vmor %vm2177_vm0, %vm2178_vm12  ;;  %v2204_v61 = vmul.f32 %v2125_v32, %v4522_v21 }
 0xa8d   : > { %v2174_v18 = vsub.f32 1.0, %v2173_v0  ;;  %v2153_v5 = vand.u32 2147483648, %v4640_v20  ;;  %v2151_v51 = vand.u32 2147483647, %v4640_v20  ;;  %vm2092_vm6 = vcmp.eq.f32.partialorder %v2091_v28, 8.507059e+37 }
 0xa8e   : > { %v2161_v24 = vadd.f32 %v3511_v48, %v2160_v63  ;;  %v2090_v47 = vsel %vm4684_vm4, %v4594_v34, %v2086_v33  ;;  %vm2147_vm7 = vweird.f32 %v4640_v20  ;;  %vm2133_vm10 = vweird.f32 %v4647_v8  ;;  %v3447_v33 = vld [vmem:[%s690_s1] ss:$0 sm:$0xff] }
 0xa8f   : > { %v2175_v14 = vmul.f32 %v3513_v52, %v2174_v18  ;;  %v3517_v30 = vpop.eup %3516  ;;  %v2154_v34 = vor.u32 1.1754944e-38, %v2153_v5  ;;  %vm2152_vm9 = vcmp.eq.f32.partialorder %v2151_v51, 8.507059e+37  ;;  %v2138_v0 = vand.u32 2147483648, %v4596_v35 }
 0xa90   : > { %v2165_v1 = vsel %vm2164_vm14, %v3511_v48, %v2161_v24  ;;  %v2143_v9 = vmul.f32 %v3517_v30, %v4640_v20  ;;  %v3519_v44 = vpop.eup %3518  ;;  %v2129_v48 = vsub.f32 1.0, %v2128_v58  ;;  %vm2148_vm5 = vweird.f32 %v3517_v30 }
 0xa91   : > { %v2176_v29 = vadd.f32 %v3513_v52, %v2175_v14  ;;  %v2170_v38 = vsel %vm2167_vm15, %v2169_v16, %v2165_v1  ;;  %v2081_v49 = vadd.f32 1.0, %v3519_v44  ;;  %vm2149_vm8 = vmor %vm2147_vm7, %vm2148_vm5  ;;  %vm2132_vm11 = vweird.f32 %v4596_v35 }
 0xa92   : > { %v2207_v25 = vmul.f32 %v2170_v38, %v4541_v37  ;;  %v2144_v46 = vsub.f32 1.0, %v2143_v9  ;;  %v2130_v57 = vmul.f32 %v4647_v8, %v2129_v48  ;;  %v2136_v17 = vand.u32 2147483647, %v4596_v35  ;;  %vm2134_vm12 = vmor %vm2132_vm11, %vm2133_vm10 }
 0xa93   : > { %v2180_v40 = vsel %vm2179_vm1, %v3513_v52, %v2176_v29  ;;  %3520 = vrcp.f32 %v2081_v49  ;;  %v2198_v7 = vand.u32 2147483648, %v2081_v49  ;;  %v2196_v12 = vand.u32 2147483647, %v2081_v49 }
 0xa94   : > { %v2185_v43 = vsel %vm2182_vm2, %v2184_v39, %v2180_v40  ;;  %v2211_v37 = vpack.c.bf16 %v2207_v25, %v2203_v27  ;;  %v2145_v21 = vmul.f32 %v3517_v30, %v2144_v46  ;;  %v2131_v3 = vadd.f32 %v4647_v8, %v2130_v57 }
 0xa95   : > { %v2208_v45 = vmul.f32 %v2185_v43, %v4546_v42  ;;  %v2095_v42 = vsel %vm2092_vm6, %v2094_v54, %v2090_v47  ;;  %v2139_v15 = vor.u32 1.1754944e-38, %v2138_v0  ;;  %vm2137_vm14 = vcmp.eq.f32.partialorder %v2136_v17, 8.507059e+37 }
 0xa96   : > { %2492 = vmatmul.bf16.vlgmr.msra.gmra.mxu0 %v2211_v37  ;;  %v2146_v56 = vadd.f32 %v3517_v30, %v2145_v21  ;;  %v2202_v13 = vmul.f32 %v2095_v42, %v4532_v31  ;;  %v2135_v31 = vsel %vm2134_vm12, %v4647_v8, %v2131_v3  ;;  %vm2192_vm15 = vweird.f32 %v2081_v49 }
 0xa97   : > { %v2212_v50 = vpack.c.bf16 %v2208_v45, %v2204_v61  ;;  %v2140_v18 = vsel %vm2137_vm14, %v2139_v15, %v2135_v31  ;;  %v2199_v11 = vor.u32 1.1754944e-38, %v2198_v7  ;;  %vm2197_vm1 = vcmp.eq.f32.partialorder %v2196_v12, 8.507059e+37 }
 0xa98   : > { %v2150_v55 = vsel %vm2149_vm8, %v3517_v30, %v2146_v56  ;;  %v2205_v22 = vmul.f32 %v2140_v18, %v4538_v4  ;;  %vm2539_vm2 = vcmask 1041409  }
 0xa99   : > { %2506 = vmatmul.bf16.vlgmr.msrb.gmra.mxu1 %v2212_v50  ;;  %v2155_v52 = vsel %vm2152_vm9, %v2154_v34, %v2150_v55  ;;  %v3521_v10 = vpop.eup %3520 }
 0xa9a   : > { %v2206_v2 = vmul.f32 %v2155_v52, %v4558_v53  ;;  %v2188_v20 = vmul.f32 %v3521_v10, %v2081_v49  ;;  %vm2193_vm13 = vweird.f32 %v3521_v10 }
 0xa9b   : > { %vm2194_vm0 = vmor %vm2192_vm15, %vm2193_vm13 }
 0xa9c   : > { %v2210_v62 = vpack.c.bf16 %v2206_v2, %v2202_v13  ;;  %v2189_v6 = vsub.f32 1.0, %v2188_v20 }
 0xa9e   : > { %2478 = vmatmul.bf16.vlgmr.msra.gmra.mxu3 %v2210_v62  ;;  %v2190_v53 = vmul.f32 %v3521_v10, %v2189_v6 }
 0xaa0   : > { %v2191_v63 = vadd.f32 %v3521_v10, %v2190_v53 }
 0xaa2   : > { %v2195_v19 = vsel %vm2194_vm0, %v3521_v10, %v2191_v63 }
 0xaa3   : > { %v2200_v35 = vsel %vm2197_vm1, %v2199_v11, %v2195_v19 }
 0xaa4   : > { %v2209_v23 = vmul.f32 %v2200_v35, %v4600_v36 }
 0xaa6   : > { %v2213_v24 = vpack.c.bf16 %v2209_v23, %v2205_v22 }
 0xaa8   : > { %2520 = vmatmul.bf16.vlgmr.msrb.gmra.mxu2 %v2213_v24 }
 0xb13   : > { %v2493_v14 = vpop.f32.mrf.mxu0 }
 0xb16   : > { %v2507_v16 = vpop.f32.mrf.mxu1 }
 0xb1b   : > { %v2495_v29 = vpop.f32.mrf.mxu0 }
 0xb1e   : > { %v2509_v4 = vpop.f32.mrf.mxu1 }
 0xb21   : > { %v2479_v8 = vpop.f32.mrf.mxu3 }
 0xb22   : > { %v2494_v58 = vadd.f32 %v2493_v14, %v2479_v8 }
 0xb24   : > { %v2508_v27 = vadd.f32 %v2507_v16, %v2494_v58 }
 0xb29   : > { %v2481_v1 = vpop.f32.mrf.mxu3 }
 0xb2a   : > { %v2496_v38 = vadd.f32 %v2495_v29, %v2481_v1 }
 0xb2b   : > { %v2521_v30 = vpop.f32.mrf.mxu2 }
 0xb2c   : > { %v2522_v32 = vadd.f32 %v2521_v30, %v2508_v27  ;;  %v2510_v36 = vadd.f32 %v2509_v4, %v2496_v38 }
 0xb2e   : > { %v2526_v39 = vadd.f32 %v2522_v32, %v4422_v59 }
 0xb30   : > { %v2532_v25 = vadd.f32 %v3447_v33, %v2526_v39 }
 0xb32   : > { %2534 = vst [vmem:[#allocation2] sm:$0xff] %v2532_v25 }
 0xb33   : > { %v2523_v40 = vpop.f32.mrf.mxu2 }
 0xb34   : > { %v2524_v9 = vadd.f32 %v2523_v40, %v2510_v36 }
 0xb36   : > { %v2527_v28 = vadd.f32 %v2524_v9, %v4426_v60 }
 0xb38   : > { %v2533_v41 = vadd.f32 %v3447_v33, %v2527_v28 }
 0xb3a   : > { %2535 = vst [vmem:[#allocation2 + $0x8] sm:$0xff] %v2533_v41  ;;  %v2538_v43 = vrot.slane %v2533_v41, 7 }
 0xb3c   : > { %v2540_v44 = vsel %vm2539_vm2, %v2538_v43, %v2532_v25 }
 0xb3d   : > { %2542 = vst [vmem:[%s4210_s4] sm:$0x3] %v2540_v44 }
 0xb3e PF: > { %s4794_s28 = sld [smem:[#allocation24_spill]]  ;;  %s4797_s25 = smov %s3834_s26 }
 0xb3f   : > { %s4795_s13 = sld [smem:[#allocation22_spill]] }
 0xb40   : > { %s4796_s27 = sld [smem:[#allocation25_spill]] }
 0xb44   : > { %p35_p10 = scmp.ge.s32.totalorder %s4794_s28, 5  }
 0xb45   : > { %s4798_s26 = smov %s4795_s13 }
 0xb46   :  { %37 = sbr.rel (!%p35_p10) target bundleno = 21 (0x15), region = 221 }
 0xb4b   :  { %2562 = vsyncpa [#allocation4], 1 }
 0xb4c   :  { %2564 = vsyncpa [#allocation4 + $0x1], 1 }
 0xb4d   :  { %2565 = vsyncpa [#allocation6], 1 }
 0xb4e   :  { %2567 = vsyncpa [#allocation6 + $0x1], 1 }
 0xb4f   :  { %2568 = vsyncpa [#allocation9], 1 }
 0xb50   :  { %2570 = vsyncpa [#allocation9 + $0x1], 1 }
 0xb51   :  { %2571 = vsyncpa [#allocation12], 1 }
 0xb52   :  { %2573 = vsyncpa [#allocation12 + $0x1], 1 }
 0xb53   :  { %2574 = vsyncpa [#allocation15], 1 }
 0xb54   :  { %2576 = vsyncpa [#allocation15 + $0x1], 1 }

// kernel: custom_clip_forward.5
= control target key start
LH: loop header
LB: loop body
LE: loop exit
PB: predicated region body
PF: predicated region fallthrough
CT: control target
= control target key end

     0   :  { %s4372_s0 = inlined_call_operand.vmem [shape: f32[3,2,128], index: 0, kind: input, shape index: {}]   ;;  %s4373_s1 = inlined_call_operand.vmem [shape: f32[1,128], index: 1, kind: input, shape index: {}]   ;;  %s4374_s2 = inlined_call_operand.vmem [shape: f32[1,128], index: 2, kind: input, shape index: {}]   ;;  %s4375_s3 = inlined_call_operand.hbm [shape: f32[128,128], index: 3, kind: input, shape index: {}]   ;;  %s4376_s4 = inlined_call_operand.vmem [shape: f32[128,512], index: 4, kind: input, shape index: {}]   ;;  %s4377_s5 = inlined_call_operand.vmem [shape: f32[1,512], index: 5, kind: input, shape index: {}]   ;;  %s4378_s6 = inlined_call_operand.hbm [shape: f32[512,512], index: 6, kind: input, shape index: {}]   ;;  %s4379_s7 = inlined_call_operand.vmem [shape: f32[1,512], index: 7, kind: input, shape index: {}]   ;;  %s4380_s8 = inlined_call_operand.vmem [shape: f32[512,3], index: 8, kind: input, shape index: {}]   ;;  %s4381_s9 = inlined_call_operand.vmem [shape: f32[1,3], index: 9, kind: input, shape index: {}]   ;;  %s4382_s10 = inlined_call_operand.vmem [shape: f32[128,512], index: 10, kind: input, shape index: {}]   ;;  %s4383_s11 = inlined_call_operand.vmem [shape: f32[1,512], index: 11, kind: input, shape index: {}]   ;;  %s4384_s12 = inlined_call_operand.hbm [shape: f32[512,512], index: 12, kind: input, shape index: {}]   ;;  %s4385_s13 = inlined_call_operand.vmem [shape: f32[1,512], index: 13, kind: input, shape index: {}]   ;;  %s4386_s14 = inlined_call_operand.vmem [shape: f32[512,3], index: 14, kind: input, shape index: {}]   ;;  %s4387_s15 = inlined_call_operand.vmem [shape: f32[1,3], index: 15, kind: input, shape index: {}]   ;;  %s4388_s16 = inlined_call_operand.hbm [shape: bf16[3,128,128], index: 16, kind: input, shape index: {}]   ;;  %s4389_s17 = inlined_call_operand.hbm [shape: bf16[3,128,128], index: 17, kind: input, shape index: {}]   ;;  %s4390_s18 = inlined_call_operand.hbm [shape: f32[3,8,128], index: 18, kind: input, shape index: {}]   ;;  %s4391_s19 = inlined_call_operand.<no memory space> [shape: f32[1,1], index: 19, kind: input, shape index: {}]   ;;  %s4392_s20 = inlined_call_operand.hbm [shape: f32[2,4], index: 20, kind: output, shape index: {}]  }
   0x1   :  { %4397 = sst [smem:[#allocation20_spill]] %s4372_s0  ;;  %v25_v0 = vstv %s4391_s19 }
   0x2   :  { %4398 = sst [smem:[#allocation21_spill]] %s4373_s1  ;;  %26 = vst [vmem:[#allocation2] sm:$0x1] %v25_v0 }
   0x3   :  { %4399 = sst [smem:[#allocation22_spill]] %s4374_s2 }
   0x4   :  { %4400 = sst [smem:[#allocation23_spill]] %s4375_s3 }
   0x5   :  { %4401 = sst [smem:[#allocation24_spill]] %s4376_s4 }
   0x6   :  { %4402 = sst [smem:[#allocation25_spill]] %s4387_s15 }
   0x7   :  { %4403 = sst [smem:[#allocation26_spill]] %s4392_s20 }
   0x8   :  { %27 = vsyncpa [#allocation4], 0 }
   0x9   :  { %28 = vsyncpa [#allocation7], 0 }
   0xa   :  { %29 = vsyncpa [#allocation10], 0 }
   0xb   :  { %30 = vsyncpa [#allocation13], 0  ;;  %s59_s2 = sshll.u32 %s4378_s6, 4  ;;  %s60_s2 = int_to_ptr.hbm [resolvable:$true] %s59_s2 }
   0xc   :  { %31 = vsyncpa [#allocation5], 0  ;;  %s3244_s25 = smov [#allocation6]   ;;  %s101_s28 = sshll.u32 %s4388_s16, 4  ;;  %s102_s28 = int_to_ptr.hbm [resolvable:$true] %s101_s28 }
   0xd   :  { %s61_s3 = sshll.u32 %s3244_s25, 4  ;;  %s3245_s4 = smov 512   ;;  %s62_s3 = int_to_ptr.vmem [resolvable:$true] %s61_s3 }
   0xe   :  { %s3246_s19 = smov 32   ;;  %s3247_s29 = smov [#allocation9]  }
   0xf   :  { %67 = dma.hbm_to_vmem [thread:$0]  %s60_s2, 32768, %s62_s3, [#allocation7], %s3245_s4, %s3245_s4, %s3246_s19  }
  0x10   :  { %s103_s30 = sshll.u32 %s3247_s29, 4  ;;  %s3248_s0 = smov 64   ;;  %s104_s30 = int_to_ptr.vmem [resolvable:$true] %s103_s30 }
  0x11   :  { %s3249_s21 = smov 4   ;;  %s4404_s22 = sld [smem:[#allocation23_spill]] }
  0x12   :  { %109 = dma.hbm_to_vmem [thread:$0]  %s102_s28, 3072, %s104_s30, [#allocation10], %s3248_s0, %s3248_s0, %s3249_s21  }
  0x13   :  { %s3250_s24 = smov [#allocation3]   ;;  %s82_s27 = sshll.u32 %s4384_s12, 4  ;;  %s83_s27 = int_to_ptr.hbm [resolvable:$true] %s82_s27 }
  0x14   :  { %s44_s25 = sshll.u32 %s3250_s24, 4  ;;  %s3251_s2 = smov 128   ;;  %s45_s25 = int_to_ptr.vmem [resolvable:$true] %s44_s25 }
  0x15   :  { %s3252_s3 = smov 8   ;;  %s3253_s29 = smov [#allocation8]  }
  0x16   :  { %s84_s20 = sshll.u32 %s3253_s29, 4  ;;  %s114_s30 = sshll.u32 %s4389_s17, 4  ;;  %s85_s20 = int_to_ptr.vmem [resolvable:$true] %s84_s20  ;;  %s115_s30 = int_to_ptr.hbm [resolvable:$true] %s114_s30 }
  0x17   :  { %s42_s23 = sshll.u32 %s4404_s22, 4  ;;  %s127_s22 = sshll.u32 %s4390_s18, 4  ;;  %s43_s23 = int_to_ptr.hbm [resolvable:$true] %s42_s23  ;;  %s128_s22 = int_to_ptr.hbm [resolvable:$true] %s127_s22 }
  0x18   :  { %50 = dma.hbm_to_vmem [thread:$0]  %s43_s23, 2048, %s45_s25, [#allocation4], %s3251_s2, %s3251_s2, %s3252_s3  }
  0x19   :  { %90 = dma.hbm_to_vmem [thread:$0]  %s83_s27, 32768, %s85_s20, [#allocation7], %s3245_s4, %s3245_s4, %s3246_s19  }
  0x1a   :  { %s3254_s24 = smov [#allocation11]   ;;  %s3255_s12 = smov [#allocation12]  }
  0x1b   :  { %s116_s26 = sshll.u32 %s3254_s24, 4  ;;  %s129_s23 = sshll.u32 %s3255_s12, 4  ;;  %s117_s26 = int_to_ptr.vmem [resolvable:$true] %s116_s26  ;;  %s130_s23 = int_to_ptr.vmem [resolvable:$true] %s129_s23 }
  0x1c   :  { %122 = dma.hbm_to_vmem [thread:$0]  %s115_s30, 3072, %s117_s26, [#allocation10], %s3248_s0, %s3248_s0, %s3249_s21  }
  0x1d   :  { %135 = dma.hbm_to_vmem [thread:$0]  %s128_s22, 384, %s130_s23, [#allocation13], %s3251_s2, %s3251_s2, %s3252_s3  }
  0x1e   :  { %3234 = dma.done.wait [#allocation4], 2048  }
  0x1f   :  { %3235 = vsyncadd [#allocation4], 4294965248 }
  0x20   :  { %3236 = dma.done.wait [#allocation7], 65536  }
  0x21   :  { %3237 = vsyncadd [#allocation7], 4294901760 }
  0x22   :  { %3238 = dma.done.wait [#allocation10], 6144  }
  0x23   :  { %3239 = vsyncadd [#allocation10], 4294961152 }
  0x24   :  { %3240 = dma.done.wait [#allocation13], 384  }
  0x25   :  { %3241 = vsyncadd [#allocation13], 4294966912  ;;  %vm167_vm0 = vcmask 1041408   ;;  %s4405_s18 = sld [smem:[#allocation20_spill]]  ;;  %v3256_v3 = vmov 128.0   ;;  %v268_v4 = vld [vmem:[#allocation3 + $0x78] sm:$0xff] }
  0x26   :  { %3048 = vrcp.f32 %v3256_v3  ;;  %v267_v5 = vld [vmem:[#allocation3 + $0x70] sm:$0xff]  ;;  %269 = vmatpush.msra.mxu0 %v268_v4  ;;  %v266_v17 = vld [vmem:[#allocation3 + $0x68] sm:$0xff]  ;;  %v265_v18 = vld [vmem:[#allocation3 + $0x60] sm:$0xff]  ;;  %s4406_s19 = sld [smem:[#allocation24_spill]]  ;;  %vm1185_vm11 = vcmask 17408   ;;  %vm2683_vm13 = vcmask 1041409  }
  0x27   :  { %v264_v19 = vld [vmem:[#allocation3 + $0x58] sm:$0xff]  ;;  %v263_v20 = vld [vmem:[#allocation3 + $0x50] sm:$0xff]  ;;  %v262_v21 = vld [vmem:[#allocation3 + $0x48] sm:$0xff]  ;;  %s4407_s23 = sld [smem:[#allocation21_spill]]  ;;  %vm2685_vm14 = vcmask 1042434   ;;  %vm2687_vm15 = vcmask 1043459  }
  0x28   :  { %270 = vmatpush.msra.mxu0 %v267_v5  ;;  %v261_v22 = vld [vmem:[#allocation3 + $0x40] sm:$0xff]  ;;  %v260_v23 = vld [vmem:[#allocation3 + $0x38] sm:$0xff]  ;;  %v259_v24 = vld [vmem:[#allocation3 + $0x30] sm:$0xff]  ;;  %s4408_s6 = sld [smem:[#allocation22_spill]] }
  0x29   :  { %v258_v25 = vld [vmem:[#allocation3 + $0x28] sm:$0xff]  ;;  %v257_v26 = vld [vmem:[#allocation3 + $0x20] sm:$0xff]  ;;  %v256_v27 = vld [vmem:[#allocation3 + $0x18] sm:$0xff]  ;;  %s4409_s28 = sld [smem:[#allocation25_spill]] }
  0x2a   :  { %271 = vmatpush.msra.mxu0 %v266_v17  ;;  %v255_v28 = vld [vmem:[#allocation3 + $0x10] sm:$0xff]  ;;  %v254_v29 = vld [vmem:[#allocation3 + $0x8] sm:$0xff]  ;;  %v253_v30 = vld [vmem:[#allocation3] sm:$0xff] }
  0x2b   :  { %v166_v1 = vld [vmem:[%s4405_s18 + $0x4] sm:$0x3] }
  0x2c   :  { %v174_v2 = vsel %vm167_vm0, %v166_v1, 0.0  ;;  %v3049_v6 = vpop.eup %3048  ;;  %272 = vmatpush.msra.mxu0 %v265_v18  ;;  %v349_v31 = vld [vmem:[%s4406_s19 + $0x1e0] sm:$0xff]  ;;  %v350_v32 = vld [vmem:[%s4406_s19 + $0x1e8] sm:$0xff]  ;;  %v351_v33 = vld [vmem:[%s4406_s19 + $0x1f0] sm:$0xff] }
  0x2d   :  { %175 = vadd.xlane.f32.xlu0 %v174_v2  ;;  %v178_v7 = vmul.f32 128.0, %v3049_v6  ;;  %vm182_vm1 = vweird.f32 %v3049_v6  ;;  %363 = vmatpush.msra.mxu1 %v349_v31  ;;  %v352_v34 = vld [vmem:[%s4406_s19 + $0x1f8] sm:$0xff]  ;;  %v345_v35 = vld [vmem:[%s4406_s19 + $0x1c0] sm:$0xff]  ;;  %v346_v36 = vld [vmem:[%s4406_s19 + $0x1c8] sm:$0xff] }
  0x2e   :  { %273 = vmatpush.msra.mxu0 %v264_v19  ;;  %383 = vmatpush.msra.mxu2 %v350_v32  ;;  %v347_v37 = vld [vmem:[%s4406_s19 + $0x1d0] sm:$0xff]  ;;  %v348_v38 = vld [vmem:[%s4406_s19 + $0x1d8] sm:$0xff]  ;;  %v341_v39 = vld [vmem:[%s4406_s19 + $0x1a0] sm:$0xff] }
  0x2f   :  { %v179_v8 = vsub.f32 1.0, %v178_v7  ;;  %403 = vmatpush.msra.mxu3 %v351_v33  ;;  %364 = vmatpush.msra.mxu1 %v345_v35  ;;  %v342_v41 = vld [vmem:[%s4406_s19 + $0x1a8] sm:$0xff]  ;;  %v343_v42 = vld [vmem:[%s4406_s19 + $0x1b0] sm:$0xff]  ;;  %v344_v43 = vld [vmem:[%s4406_s19 + $0x1b8] sm:$0xff] }
  0x30   :  { %274 = vmatpush.msra.mxu0 %v263_v20  ;;  %384 = vmatpush.msra.mxu2 %v346_v36  ;;  %v337_v45 = vld [vmem:[%s4406_s19 + $0x180] sm:$0xff]  ;;  %v338_v46 = vld [vmem:[%s4406_s19 + $0x188] sm:$0xff]  ;;  %v339_v47 = vld [vmem:[%s4406_s19 + $0x190] sm:$0xff] }
  0x31   :  { %v180_v9 = vmul.f32 %v3049_v6, %v179_v8  ;;  %404 = vmatpush.msra.mxu3 %v347_v37  ;;  %365 = vmatpush.msra.mxu1 %v341_v39  ;;  %v340_v48 = vld [vmem:[%s4406_s19 + $0x198] sm:$0xff]  ;;  %v333_v50 = vld [vmem:[%s4406_s19 + $0x160] sm:$0xff]  ;;  %v334_v51 = vld [vmem:[%s4406_s19 + $0x168] sm:$0xff] }
  0x32   :  { %275 = vmatpush.msra.mxu0 %v262_v21  ;;  %385 = vmatpush.msra.mxu2 %v342_v41  ;;  %v335_v52 = vld [vmem:[%s4406_s19 + $0x170] sm:$0xff]  ;;  %v336_v53 = vld [vmem:[%s4406_s19 + $0x178] sm:$0xff]  ;;  %v329_v54 = vld [vmem:[%s4406_s19 + $0x140] sm:$0xff] }
  0x33   :  { %v181_v10 = vadd.f32 %v3049_v6, %v180_v9  ;;  %405 = vmatpush.msra.mxu3 %v343_v42  ;;  %366 = vmatpush.msra.mxu1 %v337_v45  ;;  %v330_v55 = vld [vmem:[%s4406_s19 + $0x148] sm:$0xff]  ;;  %v331_v56 = vld [vmem:[%s4406_s19 + $0x150] sm:$0xff]  ;;  %v332_v57 = vld [vmem:[%s4406_s19 + $0x158] sm:$0xff] }
  0x34   :  { %276 = vmatpush.msra.mxu0 %v261_v22  ;;  %386 = vmatpush.msra.mxu2 %v338_v46  ;;  %v325_v58 = vld [vmem:[%s4406_s19 + $0x120] sm:$0xff]  ;;  %v326_v59 = vld [vmem:[%s4406_s19 + $0x128] sm:$0xff]  ;;  %v327_v60 = vld [vmem:[%s4406_s19 + $0x130] sm:$0xff] }
  0x35   :  { %v3392_v11 = vsel %vm182_vm1, %v3049_v6, %v181_v10  ;;  %406 = vmatpush.msra.mxu3 %v339_v47  ;;  %367 = vmatpush.msra.mxu1 %v333_v50  ;;  %v328_v61 = vld [vmem:[%s4406_s19 + $0x138] sm:$0xff]  ;;  %v321_v62 = vld [vmem:[%s4406_s19 + $0x100] sm:$0xff]  ;;  %v322_v63 = vld [vmem:[%s4406_s19 + $0x108] sm:$0xff] }
  0x36   :  { %277 = vmatpush.msra.mxu0 %v260_v23  ;;  %387 = vmatpush.msra.mxu2 %v334_v51  ;;  %v323_v0 = vld [vmem:[%s4406_s19 + $0x110] sm:$0xff]  ;;  %v317_v3 = vld [vmem:[%s4406_s19 + $0xe0] sm:$0xff]  ;;  %v318_v4 = vld [vmem:[%s4406_s19 + $0xe8] sm:$0xff] }
  0x37   :  { %407 = vmatpush.msra.mxu3 %v335_v52  ;;  %368 = vmatpush.msra.mxu1 %v329_v54  ;;  %v319_v6 = vld [vmem:[%s4406_s19 + $0xf0] sm:$0xff]  ;;  %v320_v7 = vld [vmem:[%s4406_s19 + $0xf8] sm:$0xff]  ;;  %v313_v8 = vld [vmem:[%s4406_s19 + $0xc0] sm:$0xff] }
  0x38   :  { %278 = vmatpush.msra.mxu0 %v259_v24  ;;  %388 = vmatpush.msra.mxu2 %v330_v55  ;;  %v314_v9 = vld [vmem:[%s4406_s19 + $0xc8] sm:$0xff]  ;;  %v311_v18 = vld [vmem:[%s4406_s19 + $0xb0] sm:$0xff]  ;;  %v312_v19 = vld [vmem:[%s4406_s19 + $0xb8] sm:$0xff] }
  0x39   :  { %408 = vmatpush.msra.mxu3 %v331_v56  ;;  %369 = vmatpush.msra.mxu1 %v325_v58  ;;  %v305_v20 = vld [vmem:[%s4406_s19 + $0x80] sm:$0xff]  ;;  %v306_v21 = vld [vmem:[%s4406_s19 + $0x88] sm:$0xff]  ;;  %v307_v23 = vld [vmem:[%s4406_s19 + $0x90] sm:$0xff] }
  0x3a   :  { %279 = vmatpush.msra.mxu0 %v258_v25  ;;  %389 = vmatpush.msra.mxu2 %v326_v59  ;;  %v308_v24 = vld [vmem:[%s4406_s19 + $0x98] sm:$0xff]  ;;  %v301_v25 = vld [vmem:[%s4406_s19 + $0x60] sm:$0xff]  ;;  %v298_v32 = vld [vmem:[%s4406_s19 + $0x48] sm:$0xff] }
  0x3b   :  { %409 = vmatpush.msra.mxu3 %v327_v60  ;;  %370 = vmatpush.msra.mxu1 %v321_v62  ;;  %v297_v31 = vld [vmem:[%s4406_s19 + $0x40] sm:$0xff]  ;;  %v300_v35 = vld [vmem:[%s4406_s19 + $0x58] sm:$0xff]  ;;  %v294_v39 = vld [vmem:[%s4406_s19 + $0x28] sm:$0xff] }
  0x3c   :  { %280 = vmatpush.msra.mxu0 %v257_v26  ;;  %390 = vmatpush.msra.mxu2 %v322_v63  ;;  %v302_v26 = vld [vmem:[%s4406_s19 + $0x68] sm:$0xff]  ;;  %v3045_v37 = vld [vmem:[%s4408_s6] ss:$0 sm:$0xff]  ;;  %v291_v45 = vld [vmem:[%s4406_s19 + $0x10] sm:$0xff] }
  0x3d   :  { %410 = vmatpush.msra.mxu3 %v323_v0  ;;  %371 = vmatpush.msra.mxu1 %v317_v3  ;;  %v292_v46 = vld [vmem:[%s4406_s19 + $0x18] sm:$0xff]  ;;  %v507_v47 = vld [vmem:[#allocation6 + $0x1e0] sm:$0xff] }
  0x3e   :  { %281 = vmatpush.msra.mxu0 %v256_v27  ;;  %391 = vmatpush.msra.mxu2 %v318_v4  ;;  %v695_v50 = vld [vmem:[#allocation6 + $0x7c0] sm:$0xff] }
  0x3f   :  { %411 = vmatpush.msra.mxu3 %v319_v6  ;;  %372 = vmatpush.msra.mxu1 %v313_v8  ;;  %v499_v51 = vld [vmem:[#allocation6 + $0x1a0] sm:$0xff] }
  0x40   :  { %282 = vmatpush.msra.mxu0 %v255_v28  ;;  %392 = vmatpush.msra.mxu2 %v314_v9  ;;  %v3044_v28 = vld [vmem:[%s4407_s23] ss:$0 sm:$0xff]  ;;  %v691_v52 = vld [vmem:[#allocation6 + $0x7a0] sm:$0xff] }
  0x41   :  { %v635_v54 = vld [vmem:[#allocation6 + $0x5e0] sm:$0xff] }
  0x42   :  { %283 = vmatpush.msra.mxu0 %v254_v29  ;;  %v303_v29 = vld [vmem:[%s4406_s19 + $0x70] sm:$0xff]  ;;  %v567_v55 = vld [vmem:[#allocation6 + $0x3c0] sm:$0xff] }
  0x43   :  { %v495_v56 = vld [vmem:[#allocation6 + $0x180] sm:$0xff] }
  0x44   :  { %284 = vmatpush.msra.mxu0 %v253_v30  ;;  %v304_v30 = vld [vmem:[%s4406_s19 + $0x78] sm:$0xff]  ;;  %v631_v58 = vld [vmem:[#allocation6 + $0x5c0] sm:$0xff] }
  0x45   :  { %v563_v59 = vld [vmem:[#allocation6 + $0x3a0] sm:$0xff] }
  0x46   :  { %423 = vmatpush.msrb.mxu0 %v352_v34  ;;  %v299_v34 = vld [vmem:[%s4406_s19 + $0x50] sm:$0xff]  ;;  %v627_v60 = vld [vmem:[#allocation6 + $0x5a0] sm:$0xff] }
  0x47   :  { %v683_v62 = vld [vmem:[#allocation6 + $0x760] sm:$0xff] }
  0x48   :  { %424 = vmatpush.msrb.mxu0 %v348_v38  ;;  %v293_v38 = vld [vmem:[%s4406_s19 + $0x20] sm:$0xff] }
  0x49   :  { %v559_v63 = vld [vmem:[#allocation6 + $0x380] sm:$0xff] }
  0x4a   :  { %425 = vmatpush.msrb.mxu0 %v344_v43  ;;  %v289_v43 = vld [vmem:[%s4406_s19] sm:$0xff] }
  0x4b   :  { %v623_v0 = vld [vmem:[#allocation6 + $0x580] sm:$0xff] }
  0x4c   :  { %426 = vmatpush.msrb.mxu0 %v340_v48  ;;  %v699_v48 = vld [vmem:[#allocation6 + $0x7e0] sm:$0xff] }
  0x4d   :  { %v555_v3 = vld [vmem:[#allocation6 + $0x360] sm:$0xff] }
  0x4e   :  { %427 = vmatpush.msrb.mxu0 %v336_v53  ;;  %v571_v53 = vld [vmem:[#allocation6 + $0x3e0] sm:$0xff] }
  0x4f   :  { %v619_v4 = vld [vmem:[#allocation6 + $0x560] sm:$0xff] }
  0x50   :  { %428 = vmatpush.msrb.mxu0 %v332_v57  ;;  %v687_v57 = vld [vmem:[#allocation6 + $0x780] sm:$0xff] }
  0x51   :  { %v675_v6 = vld [vmem:[#allocation6 + $0x720] sm:$0xff] }
  0x52   :  { %429 = vmatpush.msrb.mxu0 %v328_v61  ;;  %v491_v61 = vld [vmem:[#allocation6 + $0x160] sm:$0xff] }
  0x53   :  { %v615_v8 = vld [vmem:[#allocation6 + $0x540] sm:$0xff] }
  0x54   :  { %v479_v9 = vld [vmem:[#allocation6 + $0x100] sm:$0xff] }
  0xa0   :  { %v176_v12 = vpop.xlane.xlu0 %175 }
  0xa1   :  { %v186_v13 = vmul.f32 %v3392_v11, %v176_v12  ;;  %v315_v12 = vld [vmem:[%s4406_s19 + $0xd0] sm:$0xff] }
  0xa2   :  { %412 = vmatpush.msra.mxu3 %v315_v12  ;;  %v547_v12 = vld [vmem:[#allocation6 + $0x320] sm:$0xff] }
  0xa3   :  { %v3395_v14 = vsub.f32 %v166_v1, %v186_v13  ;;  %v324_v1 = vld [vmem:[%s4406_s19 + $0x118] sm:$0xff] }
  0xa4   :  { %430 = vmatpush.msrb.mxu0 %v324_v1  ;;  %v316_v13 = vld [vmem:[%s4406_s19 + $0xd8] sm:$0xff]  ;;  %413 = vmatpush.msra.mxu3 %v311_v18  ;;  %v487_v1 = vld [vmem:[#allocation6 + $0x140] sm:$0xff] }
  0xa5   :  { %v192_v15 = vmul.f32 %v3395_v14, %v3395_v14  ;;  %v607_v18 = vld [vmem:[#allocation6 + $0x500] sm:$0xff] }
  0xa6   :  { %431 = vmatpush.msrb.mxu0 %v320_v7  ;;  %414 = vmatpush.msra.mxu3 %v307_v23  ;;  %v551_v7 = vld [vmem:[#allocation6 + $0x340] sm:$0xff] }
  0xa7   :  { %v199_v16 = vsel %vm167_vm0, %v192_v15, 0.0  ;;  %v309_v15 = vld [vmem:[%s4406_s19 + $0xa0] sm:$0xff] }
  0xa8   :  { %200 = vadd.xlane.f32.xlu0 %v199_v16  ;;  %v310_v16 = vld [vmem:[%s4406_s19 + $0xa8] sm:$0xff]  ;;  %432 = vmatpush.msrb.mxu0 %v316_v13 }
  0xa9   :  { %373 = vmatpush.msra.mxu1 %v309_v15  ;;  %393 = vmatpush.msra.mxu2 %v310_v16  ;;  %v611_v13 = vld [vmem:[#allocation6 + $0x520] sm:$0xff] }
  0xaa   :  { %433 = vmatpush.msrb.mxu0 %v312_v19  ;;  %415 = vmatpush.msra.mxu3 %v303_v29  ;;  %v475_v15 = vld [vmem:[#allocation6 + $0xe0] sm:$0xff] }
  0xab   :  { %374 = vmatpush.msra.mxu1 %v305_v20  ;;  %394 = vmatpush.msra.mxu2 %v306_v21  ;;  %v667_v16 = vld [vmem:[#allocation6 + $0x6e0] sm:$0xff] }
  0xac   :  { %434 = vmatpush.msrb.mxu0 %v308_v24  ;;  %416 = vmatpush.msra.mxu3 %v299_v34  ;;  %v471_v19 = vld [vmem:[#allocation6 + $0xc0] sm:$0xff] }
  0xad   :  { %375 = vmatpush.msra.mxu1 %v301_v25  ;;  %395 = vmatpush.msra.mxu2 %v302_v26  ;;  %v663_v20 = vld [vmem:[#allocation6 + $0x6c0] sm:$0xff] }
  0xae   :  { %435 = vmatpush.msrb.mxu0 %v304_v30  ;;  %v539_v21 = vld [vmem:[#allocation6 + $0x2e0] sm:$0xff] }
  0xaf   :  { %376 = vmatpush.msra.mxu1 %v297_v31  ;;  %396 = vmatpush.msra.mxu2 %v298_v32  ;;  %v467_v23 = vld [vmem:[#allocation6 + $0xa0] sm:$0xff] }
  0xb0   :  { %436 = vmatpush.msrb.mxu0 %v300_v35  ;;  %v659_v24 = vld [vmem:[#allocation6 + $0x6a0] sm:$0xff] }
  0xb1   :  { %377 = vmatpush.msra.mxu1 %v293_v38  ;;  %397 = vmatpush.msra.mxu2 %v294_v39  ;;  %v535_v25 = vld [vmem:[#allocation6 + $0x2c0] sm:$0xff] }
  0xb2   :  { %v599_v26 = vld [vmem:[#allocation6 + $0x4c0] sm:$0xff] }
  0xb3   :  { %378 = vmatpush.msra.mxu1 %v289_v43  ;;  %v531_v29 = vld [vmem:[#allocation6 + $0x2a0] sm:$0xff] }
  0xb4   :  { %v595_v30 = vld [vmem:[#allocation6 + $0x4a0] sm:$0xff] }
  0xb5   :  { %713 = vmatpush.msrb.mxu1 %v507_v47  ;;  %v459_v31 = vld [vmem:[#allocation6 + $0x60] sm:$0xff]  ;;  %v700_v47 = vld [vmem:[#allocation6 + $0x7e8] sm:$0xff] }
  0xb6   :  { %v651_v32 = vld [vmem:[#allocation6 + $0x660] sm:$0xff] }
  0xb7   :  { %v591_v34 = vld [vmem:[#allocation6 + $0x480] sm:$0xff] }
  0xb8   :  { %v455_v35 = vld [vmem:[#allocation6 + $0x40] sm:$0xff] }
  0xb9   :  { %v587_v38 = vld [vmem:[#allocation6 + $0x460] sm:$0xff] }
  0xba   :  { %v451_v39 = vld [vmem:[#allocation6 + $0x20] sm:$0xff] }
 0x11b   :  { %v201_v40 = vpop.xlane.xlu0 %200 }
 0x11c   :  { %v204_v44 = vmul.f32 %v201_v40, %v3392_v11  ;;  %v296_v40 = vld [vmem:[%s4406_s19 + $0x38] sm:$0xff] }
 0x11d   :  { %437 = vmatpush.msrb.mxu0 %v296_v40  ;;  %v519_v40 = vld [vmem:[#allocation6 + $0x240] sm:$0xff] }
 0x11e   :  { %v3449_v49 = vadd.f32 1e-05, %v204_v44  ;;  %v290_v44 = vld [vmem:[%s4406_s19 + $0x8] sm:$0xff] }
 0x11f   :  { %398 = vmatpush.msra.mxu2 %v290_v44  ;;  %438 = vmatpush.msrb.mxu0 %v292_v46  ;;  %v447_v44 = vld [vmem:[#allocation6] sm:$0xff]  ;;  %v508_v46 = vld [vmem:[#allocation6 + $0x1e8] sm:$0xff] }
 0x120   :  { %3050 = vrsqrt.f32 %v3449_v49  ;;  %vm234_vm3 = vweird.f32 %v3449_v49 }
 0x121   :  { %733 = vmatpush.msrb.mxu2 %v571_v53  ;;  %v575_v53 = vld [vmem:[#allocation6 + $0x400] sm:$0xff] }
 0x123   :  { %734 = vmatpush.msrb.mxu2 %v567_v55  ;;  %v692_v55 = vld [vmem:[#allocation6 + $0x7a8] sm:$0xff] }
 0x125   :  { %735 = vmatpush.msrb.mxu2 %v563_v59  ;;  %v688_v59 = vld [vmem:[#allocation6 + $0x788] sm:$0xff] }
 0x126   :  { %v3051_v2 = vpop.eup %3050 }
 0x127   :  { %v229_v5 = vmul.f32 %v3051_v2, %v3449_v49  ;;  %vm235_vm2 = vweird.f32 %v3051_v2  ;;  %v503_v49 = vld [vmem:[#allocation6 + $0x1c0] sm:$0xff]  ;;  %736 = vmatpush.msrb.mxu2 %v559_v63  ;;  %v684_v63 = vld [vmem:[#allocation6 + $0x768] sm:$0xff] }
 0x128   :  { %vm236_vm4 = vmor %vm234_vm3, %vm235_vm2  ;;  %714 = vmatpush.msrb.mxu1 %v503_v49  ;;  %v579_v49 = vld [vmem:[#allocation6 + $0x420] sm:$0xff] }
 0x129   :  { %v230_v10 = vmul.f32 %v3051_v2, %v229_v5  ;;  %v483_v5 = vld [vmem:[#allocation6 + $0x120] sm:$0xff]  ;;  %737 = vmatpush.msrb.mxu2 %v555_v3  ;;  %v680_v3 = vld [vmem:[#allocation6 + $0x748] sm:$0xff] }
 0x12a   :  { %715 = vmatpush.msrb.mxu1 %v499_v51  ;;  %v696_v51 = vld [vmem:[#allocation6 + $0x7c8] sm:$0xff] }
 0x12b   :  { %v231_v17 = vmul.f32 0.5, %v230_v10  ;;  %v671_v10 = vld [vmem:[#allocation6 + $0x700] sm:$0xff]  ;;  %738 = vmatpush.msrb.mxu2 %v551_v7  ;;  %v676_v7 = vld [vmem:[#allocation6 + $0x728] sm:$0xff] }
 0x12c   :  { %716 = vmatpush.msrb.mxu1 %v495_v56  ;;  %v572_v56 = vld [vmem:[#allocation6 + $0x3e8] sm:$0xff] }
 0x12d   :  { %v232_v22 = vsub.f32 1.5, %v231_v17  ;;  %v543_v17 = vld [vmem:[#allocation6 + $0x300] sm:$0xff]  ;;  %739 = vmatpush.msrb.mxu2 %v547_v12  ;;  %v672_v12 = vld [vmem:[#allocation6 + $0x708] sm:$0xff] }
 0x12e   :  { %717 = vmatpush.msrb.mxu1 %v491_v61  ;;  %v632_v61 = vld [vmem:[#allocation6 + $0x5c8] sm:$0xff] }
 0x12f   :  { %v233_v27 = vmul.f32 %v3051_v2, %v232_v22  ;;  %v603_v22 = vld [vmem:[#allocation6 + $0x4e0] sm:$0xff]  ;;  %740 = vmatpush.msrb.mxu2 %v543_v17  ;;  %v668_v17 = vld [vmem:[#allocation6 + $0x6e8] sm:$0xff] }
 0x130   :  { %718 = vmatpush.msrb.mxu1 %v487_v1  ;;  %v628_v1 = vld [vmem:[#allocation6 + $0x5a8] sm:$0xff] }
 0x131   :  { %v237_v33 = vsel %vm236_vm4, %v3051_v2, %v233_v27  ;;  %v679_v2 = vld [vmem:[#allocation6 + $0x740] sm:$0xff]  ;;  %741 = vmatpush.msrb.mxu2 %v539_v21  ;;  %v664_v21 = vld [vmem:[#allocation6 + $0x6c8] sm:$0xff] }
 0x132   :  { %v240_v36 = vmul.f32 %v237_v33, %v3395_v14  ;;  %v295_v14 = vld [vmem:[%s4406_s19 + $0x30] sm:$0xff]  ;;  %719 = vmatpush.msrb.mxu1 %v483_v5  ;;  %v463_v27 = vld [vmem:[#allocation6 + $0x80] sm:$0xff] }
 0x133   :  { %417 = vmatpush.msra.mxu3 %v295_v14  ;;  %742 = vmatpush.msrb.mxu2 %v535_v25  ;;  %v527_v33 = vld [vmem:[#allocation6 + $0x280] sm:$0xff]  ;;  %v624_v5 = vld [vmem:[#allocation6 + $0x588] sm:$0xff] }
 0x134   :  { %v246_v41 = vmul.f32 %v3044_v28, %v240_v36  ;;  %720 = vmatpush.msrb.mxu1 %v479_v9  ;;  %v655_v28 = vld [vmem:[#allocation6 + $0x680] sm:$0xff]  ;;  %v620_v9 = vld [vmem:[#allocation6 + $0x568] sm:$0xff] }
 0x135   :  { %418 = vmatpush.msra.mxu3 %v291_v45  ;;  %743 = vmatpush.msrb.mxu2 %v531_v29  ;;  %v647_v36 = vld [vmem:[#allocation6 + $0x640] sm:$0xff]  ;;  %v660_v25 = vld [vmem:[#allocation6 + $0x6a8] sm:$0xff] }
 0x136   :  { %v3594_v42 = vadd.f32 %v3045_v37, %v246_v41  ;;  %721 = vmatpush.msrb.mxu1 %v475_v15  ;;  %v523_v37 = vld [vmem:[#allocation6 + $0x260] sm:$0xff]  ;;  %v616_v15 = vld [vmem:[#allocation6 + $0x548] sm:$0xff] }
 0x137   :  { %753 = vmatpush.msrb.mxu3 %v635_v54  ;;  %744 = vmatpush.msrb.mxu2 %v527_v33  ;;  %v643_v14 = vld [vmem:[#allocation6 + $0x620] sm:$0xff]  ;;  %v500_v54 = vld [vmem:[#allocation6 + $0x1a8] sm:$0xff] }
 0x138   :  { %285 = vmatmul.f32.vlgmr.msra.gmra.mxu0 %v3594_v42  ;;  %722 = vmatpush.msrb.mxu1 %v471_v19  ;;  %v583_v41 = vld [vmem:[#allocation6 + $0x440] sm:$0xff]  ;;  %v612_v19 = vld [vmem:[#allocation6 + $0x528] sm:$0xff] }
 0x139   :  { %773 = vmatpush.msra.mxu0 %v699_v48  ;;  %754 = vmatpush.msrb.mxu3 %v631_v58  ;;  %v639_v45 = vld [vmem:[#allocation6 + $0x600] sm:$0xff]  ;;  %v496_v58 = vld [vmem:[#allocation6 + $0x188] sm:$0xff] }
 0x13a   :  { %723 = vmatpush.msrb.mxu1 %v467_v23  ;;  %745 = vmatpush.msrb.mxu2 %v523_v37  ;;  %v515_v48 = vld [vmem:[#allocation6 + $0x220] sm:$0xff]  ;;  %v608_v23 = vld [vmem:[#allocation6 + $0x508] sm:$0xff] }
 0x13b   :  { %774 = vmatpush.msra.mxu0 %v695_v50  ;;  %755 = vmatpush.msrb.mxu3 %v627_v60  ;;  %v504_v50 = vld [vmem:[#allocation6 + $0x1c8] sm:$0xff] }
 0x13c   :  { %724 = vmatpush.msrb.mxu1 %v463_v27  ;;  %746 = vmatpush.msrb.mxu2 %v519_v40  ;;  %v568_v60 = vld [vmem:[#allocation6 + $0x3c8] sm:$0xff] }
 0x13d   :  { %775 = vmatpush.msra.mxu0 %v691_v52  ;;  %756 = vmatpush.msrb.mxu3 %v623_v0  ;;  %v511_v52 = vld [vmem:[#allocation6 + $0x200] sm:$0xff]  ;;  %v564_v0 = vld [vmem:[#allocation6 + $0x3a8] sm:$0xff] }
 0x13e   :  { %725 = vmatpush.msrb.mxu1 %v459_v31  ;;  %747 = vmatpush.msrb.mxu2 %v515_v48  ;;  %v604_v27 = vld [vmem:[#allocation6 + $0x4e8] sm:$0xff] }
 0x13f   :  { %776 = vmatpush.msra.mxu0 %v687_v57  ;;  %757 = vmatpush.msrb.mxu3 %v619_v4  ;;  %v636_v57 = vld [vmem:[#allocation6 + $0x5e8] sm:$0xff] }
 0x140   :  { %726 = vmatpush.msrb.mxu1 %v455_v35  ;;  %748 = vmatpush.msrb.mxu2 %v511_v52  ;;  %v560_v4 = vld [vmem:[#allocation6 + $0x388] sm:$0xff] }
 0x141   :  { %777 = vmatpush.msra.mxu0 %v683_v62  ;;  %758 = vmatpush.msrb.mxu3 %v615_v8  ;;  %v492_v62 = vld [vmem:[#allocation6 + $0x168] sm:$0xff] }
 0x142   :  { %727 = vmatpush.msrb.mxu1 %v451_v39  ;;  %v556_v8 = vld [vmem:[#allocation6 + $0x368] sm:$0xff] }
 0x143   :  { %778 = vmatpush.msra.mxu0 %v679_v2  ;;  %759 = vmatpush.msrb.mxu3 %v611_v13  ;;  %v488_v2 = vld [vmem:[#allocation6 + $0x148] sm:$0xff] }
 0x144   :  { %728 = vmatpush.msrb.mxu1 %v447_v44  ;;  %v552_v13 = vld [vmem:[#allocation6 + $0x348] sm:$0xff] }
 0x145   :  { %779 = vmatpush.msra.mxu0 %v675_v6  ;;  %760 = vmatpush.msrb.mxu3 %v607_v18  ;;  %v484_v6 = vld [vmem:[#allocation6 + $0x128] sm:$0xff] }
 0x146   :  { %v548_v18 = vld [vmem:[#allocation6 + $0x328] sm:$0xff] }
 0x147   :  { %780 = vmatpush.msra.mxu0 %v671_v10  ;;  %761 = vmatpush.msrb.mxu3 %v603_v22  ;;  %v480_v10 = vld [vmem:[#allocation6 + $0x108] sm:$0xff] }
 0x148   :  { %v544_v22 = vld [vmem:[#allocation6 + $0x308] sm:$0xff] }
 0x149   :  { %781 = vmatpush.msra.mxu0 %v667_v16  ;;  %762 = vmatpush.msrb.mxu3 %v599_v26  ;;  %v476_v16 = vld [vmem:[#allocation6 + $0xe8] sm:$0xff] }
 0x14a   :  { %v540_v26 = vld [vmem:[#allocation6 + $0x2e8] sm:$0xff] }
 0x14b   :  { %782 = vmatpush.msra.mxu0 %v663_v20  ;;  %763 = vmatpush.msrb.mxu3 %v595_v30  ;;  %v472_v20 = vld [vmem:[#allocation6 + $0xc8] sm:$0xff] }
 0x14c   :  { %v656_v29 = vld [vmem:[#allocation6 + $0x688] sm:$0xff] }
 0x14d   :  { %783 = vmatpush.msra.mxu0 %v659_v24  ;;  %764 = vmatpush.msrb.mxu3 %v591_v34  ;;  %v468_v24 = vld [vmem:[#allocation6 + $0xa8] sm:$0xff] }
 0x14e   :  { %v536_v30 = vld [vmem:[#allocation6 + $0x2c8] sm:$0xff] }
 0x14f   :  { %784 = vmatpush.msra.mxu0 %v655_v28  ;;  %765 = vmatpush.msrb.mxu3 %v587_v38  ;;  %v464_v28 = vld [vmem:[#allocation6 + $0x88] sm:$0xff] }
 0x150   :  { %v600_v31 = vld [vmem:[#allocation6 + $0x4c8] sm:$0xff] }
 0x151   :  { %785 = vmatpush.msra.mxu0 %v651_v32  ;;  %766 = vmatpush.msrb.mxu3 %v583_v41  ;;  %v460_v32 = vld [vmem:[#allocation6 + $0x68] sm:$0xff] }
 0x152   :  { %v652_v33 = vld [vmem:[#allocation6 + $0x668] sm:$0xff] }
 0x153   :  { %786 = vmatpush.msra.mxu0 %v647_v36  ;;  %767 = vmatpush.msrb.mxu3 %v579_v49  ;;  %v456_v34 = vld [vmem:[#allocation6 + $0x48] sm:$0xff] }
 0x154   :  { %v532_v35 = vld [vmem:[#allocation6 + $0x2a8] sm:$0xff] }
 0x155   :  { %787 = vmatpush.msra.mxu0 %v643_v14  ;;  %768 = vmatpush.msrb.mxu3 %v575_v53  ;;  %v596_v36 = vld [vmem:[#allocation6 + $0x4a8] sm:$0xff]  ;;  %v353_v53 = vld [vmem:[%s4377_s5] sm:$0xf] }
 0x156   :  { %v648_v37 = vld [vmem:[#allocation6 + $0x648] sm:$0xff] }
 0x157   :  { %788 = vmatpush.msra.mxu0 %v639_v45  ;;  %v452_v38 = vld [vmem:[#allocation6 + $0x28] sm:$0xff] }
 0x158   :  { %v528_v39 = vld [vmem:[#allocation6 + $0x288] sm:$0xff] }
 0x159   :  { %v592_v14 = vld [vmem:[#allocation6 + $0x488] sm:$0xff] }
 0x15a   :  { %v644_v40 = vld [vmem:[#allocation6 + $0x628] sm:$0xff] }
 0x15b   :  { %v448_v41 = vld [vmem:[#allocation6 + $0x8] sm:$0xff] }
 0x15c   :  { %v524_v44 = vld [vmem:[#allocation6 + $0x268] sm:$0xff] }
 0x15d   :  { %v588_v45 = vld [vmem:[#allocation6 + $0x468] sm:$0xff] }
 0x15e   :  { %v584_v48 = vld [vmem:[#allocation6 + $0x448] sm:$0xff] }
 0x15f   :  { %v516_v49 = vld [vmem:[#allocation6 + $0x228] sm:$0xff] }
 0x160   :  { %v576_v52 = vld [vmem:[#allocation6 + $0x408] sm:$0xff] }
 0x1b5   :  { %v3609_v43 = vpop.f32.mrf.mxu0 }
 0x1b6   :  { %379 = vmatmul.f32.vlgmr.msra.gmra.mxu1 %v3609_v43  ;;  %399 = vmatmul.f32.vlgmr.msra.gmra.mxu2 %v3609_v43 }
 0x1b7   :  { %419 = vmatmul.f32.vlgmr.msra.gmra.mxu3 %v3609_v43  ;;  %439 = vmatmul.f32.vlgmr.msrb.gmra.mxu0 %v3609_v43 }
 0x1b8   :  { %793 = vmatpush.msra.mxu1 %v508_v46  ;;  %853 = vmatpush.msrb.mxu0 %v700_v47  ;;  %v640_v46 = vld [vmem:[#allocation6 + $0x608] sm:$0xff] }
 0x1b9   :  { %813 = vmatpush.msra.mxu2 %v572_v56  ;;  %833 = vmatpush.msra.mxu3 %v636_v57  ;;  %v520_v47 = vld [vmem:[#allocation6 + $0x248] sm:$0xff] }
 0x1ba   :  { %794 = vmatpush.msra.mxu1 %v504_v50  ;;  %854 = vmatpush.msrb.mxu0 %v696_v51  ;;  %v580_v50 = vld [vmem:[#allocation6 + $0x428] sm:$0xff] }
 0x1bb   :  { %814 = vmatpush.msra.mxu2 %v568_v60  ;;  %834 = vmatpush.msra.mxu3 %v632_v61  ;;  %v512_v51 = vld [vmem:[#allocation6 + $0x208] sm:$0xff]  ;;  %v509_v61 = vld [vmem:[#allocation6 + $0x1f0] sm:$0xff] }
 0x1bc   :  { %795 = vmatpush.msra.mxu1 %v500_v54  ;;  %855 = vmatpush.msrb.mxu0 %v692_v55  ;;  %v355_v54 = vperm.slane %v353_v53, 0  ;;  %v358_v55 = vperm.slane %v353_v53, 3 }
 0x1bd   :  { %815 = vmatpush.msra.mxu2 %v564_v0  ;;  %835 = vmatpush.msra.mxu3 %v628_v1  ;;  %v701_v0 = vld [vmem:[#allocation6 + $0x7f0] sm:$0xff]  ;;  %v357_v1 = vperm.slane %v353_v53, 2 }
 0x1be   :  { %796 = vmatpush.msra.mxu1 %v496_v58  ;;  %856 = vmatpush.msrb.mxu0 %v688_v59 }
 0x1bf   :  { %816 = vmatpush.msra.mxu2 %v560_v4  ;;  %836 = vmatpush.msra.mxu3 %v624_v5  ;;  %v697_v4 = vld [vmem:[#allocation6 + $0x7d0] sm:$0xff] }
 0x1c0   :  { %797 = vmatpush.msra.mxu1 %v492_v62  ;;  %857 = vmatpush.msrb.mxu0 %v684_v63  ;;  %v356_v62 = vperm.slane %v353_v53, 1  ;;  %v601_v53 = vld [vmem:[#allocation6 + $0x4d0] sm:$0xff] }
 0x1c1   :  { %817 = vmatpush.msra.mxu2 %v556_v8  ;;  %837 = vmatpush.msra.mxu3 %v620_v9  ;;  %v693_v9 = vld [vmem:[#allocation6 + $0x7b0] sm:$0xff] }
 0x1c2   :  { %798 = vmatpush.msra.mxu1 %v488_v2  ;;  %858 = vmatpush.msrb.mxu0 %v680_v3  ;;  %v505_v2 = vld [vmem:[#allocation6 + $0x1d0] sm:$0xff] }
 0x1c3   :  { %818 = vmatpush.msra.mxu2 %v552_v13  ;;  %838 = vmatpush.msra.mxu3 %v616_v15  ;;  %v573_v15 = vld [vmem:[#allocation6 + $0x3f0] sm:$0xff] }
 0x1c4   :  { %799 = vmatpush.msra.mxu1 %v484_v6  ;;  %859 = vmatpush.msrb.mxu0 %v676_v7  ;;  %v501_v7 = vld [vmem:[#allocation6 + $0x1b0] sm:$0xff] }
 0x1c5   :  { %819 = vmatpush.msra.mxu2 %v548_v18  ;;  %839 = vmatpush.msra.mxu3 %v612_v19  ;;  %v493_v18 = vld [vmem:[#allocation6 + $0x170] sm:$0xff] }
 0x1c6   :  { %800 = vmatpush.msra.mxu1 %v480_v10  ;;  %860 = vmatpush.msrb.mxu0 %v672_v12  ;;  %v497_v12 = vld [vmem:[#allocation6 + $0x190] sm:$0xff] }
 0x1c7   :  { %820 = vmatpush.msra.mxu2 %v544_v22  ;;  %840 = vmatpush.msra.mxu3 %v608_v23  ;;  %v569_v19 = vld [vmem:[#allocation6 + $0x3d0] sm:$0xff] }
 0x1c8   :  { %801 = vmatpush.msra.mxu1 %v476_v16  ;;  %861 = vmatpush.msrb.mxu0 %v668_v17  ;;  %v637_v16 = vld [vmem:[#allocation6 + $0x5f0] sm:$0xff] }
 0x1c9   :  { %821 = vmatpush.msra.mxu2 %v540_v26  ;;  %841 = vmatpush.msra.mxu3 %v604_v27  ;;  %v689_v17 = vld [vmem:[#allocation6 + $0x790] sm:$0xff] }
 0x1ca   :  { %802 = vmatpush.msra.mxu1 %v472_v20  ;;  %862 = vmatpush.msrb.mxu0 %v664_v21  ;;  %v633_v20 = vld [vmem:[#allocation6 + $0x5d0] sm:$0xff] }
 0x1cb   :  { %822 = vmatpush.msra.mxu2 %v536_v30  ;;  %842 = vmatpush.msra.mxu3 %v600_v31  ;;  %v685_v21 = vld [vmem:[#allocation6 + $0x770] sm:$0xff] }
 0x1cc   :  { %803 = vmatpush.msra.mxu1 %v468_v24  ;;  %863 = vmatpush.msrb.mxu0 %v660_v25  ;;  %v489_v22 = vld [vmem:[#allocation6 + $0x150] sm:$0xff] }
 0x1cd   :  { %823 = vmatpush.msra.mxu2 %v532_v35  ;;  %843 = vmatpush.msra.mxu3 %v596_v36  ;;  %v565_v23 = vld [vmem:[#allocation6 + $0x3b0] sm:$0xff] }
 0x1ce   :  { %804 = vmatpush.msra.mxu1 %v464_v28  ;;  %864 = vmatpush.msrb.mxu0 %v656_v29  ;;  %v629_v24 = vld [vmem:[#allocation6 + $0x5b0] sm:$0xff] }
 0x1cf   :  { %824 = vmatpush.msra.mxu2 %v528_v39  ;;  %844 = vmatpush.msra.mxu3 %v592_v14  ;;  %v681_v25 = vld [vmem:[#allocation6 + $0x750] sm:$0xff] }
 0x1d0   :  { %805 = vmatpush.msra.mxu1 %v460_v32  ;;  %865 = vmatpush.msrb.mxu0 %v652_v33  ;;  %v485_v26 = vld [vmem:[#allocation6 + $0x130] sm:$0xff] }
 0x1d1   :  { %825 = vmatpush.msra.mxu2 %v524_v44  ;;  %845 = vmatpush.msra.mxu3 %v588_v45  ;;  %v561_v27 = vld [vmem:[#allocation6 + $0x390] sm:$0xff] }
 0x1d2   :  { %806 = vmatpush.msra.mxu1 %v456_v34  ;;  %866 = vmatpush.msrb.mxu0 %v648_v37  ;;  %v625_v28 = vld [vmem:[#allocation6 + $0x590] sm:$0xff] }
 0x1d3   :  { %826 = vmatpush.msra.mxu2 %v520_v47  ;;  %846 = vmatpush.msra.mxu3 %v584_v48  ;;  %v677_v29 = vld [vmem:[#allocation6 + $0x730] sm:$0xff] }
 0x1d4   :  { %807 = vmatpush.msra.mxu1 %v452_v38  ;;  %867 = vmatpush.msrb.mxu0 %v644_v40  ;;  %v481_v30 = vld [vmem:[#allocation6 + $0x110] sm:$0xff] }
 0x1d5   :  { %827 = vmatpush.msra.mxu2 %v516_v49  ;;  %847 = vmatpush.msra.mxu3 %v580_v50  ;;  %v557_v31 = vld [vmem:[#allocation6 + $0x370] sm:$0xff] }
 0x1d6   :  { %808 = vmatpush.msra.mxu1 %v448_v41  ;;  %868 = vmatpush.msrb.mxu0 %v640_v46  ;;  %v621_v32 = vld [vmem:[#allocation6 + $0x570] sm:$0xff] }
 0x1d7   :  { %828 = vmatpush.msra.mxu2 %v512_v51  ;;  %848 = vmatpush.msra.mxu3 %v576_v52  ;;  %v673_v33 = vld [vmem:[#allocation6 + $0x710] sm:$0xff] }
 0x1d8   :  { %v477_v34 = vld [vmem:[#allocation6 + $0xf0] sm:$0xff] }
 0x1d9   :  { %v553_v35 = vld [vmem:[#allocation6 + $0x350] sm:$0xff] }
 0x1da   :  { %v617_v36 = vld [vmem:[#allocation6 + $0x550] sm:$0xff] }
 0x1db   :  { %v669_v37 = vld [vmem:[#allocation6 + $0x6f0] sm:$0xff] }
 0x1dc   :  { %v473_v38 = vld [vmem:[#allocation6 + $0xd0] sm:$0xff] }
 0x1dd   :  { %v549_v39 = vld [vmem:[#allocation6 + $0x330] sm:$0xff] }
 0x1de   :  { %v613_v14 = vld [vmem:[#allocation6 + $0x530] sm:$0xff] }
 0x1df   :  { %v665_v40 = vld [vmem:[#allocation6 + $0x6d0] sm:$0xff] }
 0x1e0   :  { %v469_v41 = vld [vmem:[#allocation6 + $0xb0] sm:$0xff] }
 0x1e1   :  { %v545_v44 = vld [vmem:[#allocation6 + $0x310] sm:$0xff] }
 0x1e2   :  { %v609_v45 = vld [vmem:[#allocation6 + $0x510] sm:$0xff] }
 0x1e3   :  { %v661_v46 = vld [vmem:[#allocation6 + $0x6b0] sm:$0xff] }
 0x1e4   :  { %v465_v47 = vld [vmem:[#allocation6 + $0x90] sm:$0xff] }
 0x1e5   :  { %v541_v48 = vld [vmem:[#allocation6 + $0x2f0] sm:$0xff] }
 0x1e6   :  { %v605_v49 = vld [vmem:[#allocation6 + $0x4f0] sm:$0xff] }
 0x1e7   :  { %v657_v50 = vld [vmem:[#allocation6 + $0x690] sm:$0xff] }
 0x1e8   :  { %v461_v51 = vld [vmem:[#allocation6 + $0x70] sm:$0xff] }
 0x1e9   :  { %v537_v52 = vld [vmem:[#allocation6 + $0x2d0] sm:$0xff] }
 0x233   :  { %v380_v56 = vpop.f32.mrf.mxu1 }
 0x234   :  { %v381_v57 = vadd.f32 %v380_v56, %v355_v54  ;;  %v440_v58 = vpop.f32.mrf.mxu0  ;;  %v653_v54 = vld [vmem:[#allocation6 + $0x670] sm:$0xff] }
 0x235   :  { %v441_v59 = vadd.f32 %v440_v58, %v358_v55  ;;  %v457_v55 = vld [vmem:[#allocation6 + $0x50] sm:$0xff] }
 0x236   :  { %v3618_v60 = vmax.f32 %v381_v57, 0.0  ;;  %v533_v56 = vld [vmem:[#allocation6 + $0x2b0] sm:$0xff] }
 0x237   :  { %v3620_v63 = vmax.f32 %v441_v59, 0.0  ;;  %v597_v57 = vld [vmem:[#allocation6 + $0x4b0] sm:$0xff] }
 0x238   :  { %729 = vmatmul.f32.vlgmr.msrb.gmra.mxu1 %v3618_v60  ;;  %v649_v58 = vld [vmem:[#allocation6 + $0x650] sm:$0xff] }
 0x239   :  { %789 = vmatmul.f32.vlgmr.msra.gmra.mxu0 %v3620_v63  ;;  %873 = vmatpush.msrb.mxu1 %v509_v61  ;;  %v400_v3 = vpop.f32.mrf.mxu2  ;;  %v453_v59 = vld [vmem:[#allocation6 + $0x30] sm:$0xff] }
 0x23a   :  { %933 = vmatpush.msra.mxu0 %v701_v0  ;;  %v401_v5 = vadd.f32 %v400_v3, %v356_v62  ;;  %v420_v6 = vpop.f32.mrf.mxu3  ;;  %v529_v61 = vld [vmem:[#allocation6 + $0x290] sm:$0xff] }
 0x23b   :  { %v421_v8 = vadd.f32 %v420_v6, %v357_v1  ;;  %874 = vmatpush.msrb.mxu1 %v505_v2  ;;  %v593_v62 = vld [vmem:[#allocation6 + $0x490] sm:$0xff]  ;;  %v702_v6 = vld [vmem:[#allocation6 + $0x7f8] sm:$0xff] }
 0x23c   :  { %v3624_v10 = vmax.f32 %v401_v5, 0.0  ;;  %934 = vmatpush.msra.mxu0 %v697_v4  ;;  %v645_v0 = vld [vmem:[#allocation6 + $0x630] sm:$0xff]  ;;  %v510_v5 = vld [vmem:[#allocation6 + $0x1f8] sm:$0xff] }
 0x23d   :  { %v3626_v13 = vmax.f32 %v421_v8, 0.0  ;;  %875 = vmatpush.msrb.mxu1 %v501_v7  ;;  %v449_v1 = vld [vmem:[#allocation6 + $0x10] sm:$0xff] }
 0x23e   :  { %935 = vmatpush.msra.mxu0 %v693_v9  ;;  %749 = vmatmul.f32.vlgmr.msrb.gmra.mxu2 %v3624_v10  ;;  %v525_v2 = vld [vmem:[#allocation6 + $0x270] sm:$0xff]  ;;  %v506_v9 = vld [vmem:[#allocation6 + $0x1d8] sm:$0xff] }
 0x23f   :  { %769 = vmatmul.f32.vlgmr.msrb.gmra.mxu3 %v3626_v13  ;;  %876 = vmatpush.msrb.mxu1 %v497_v12  ;;  %v589_v3 = vld [vmem:[#allocation6 + $0x470] sm:$0xff]  ;;  %v698_v12 = vld [vmem:[#allocation6 + $0x7d8] sm:$0xff] }
 0x240   :  { %893 = vmatpush.msrb.mxu2 %v573_v15  ;;  %913 = vmatpush.msrb.mxu3 %v637_v16  ;;  %v641_v4 = vld [vmem:[#allocation6 + $0x610] sm:$0xff] }
 0x241   :  { %936 = vmatpush.msra.mxu0 %v689_v17  ;;  %809 = vmatmul.f32.vlgmr.msra.gmra.mxu1 %v3618_v60  ;;  %v521_v7 = vld [vmem:[#allocation6 + $0x250] sm:$0xff]  ;;  %v502_v17 = vld [vmem:[#allocation6 + $0x1b8] sm:$0xff] }
 0x242   :  { %869 = vmatmul.f32.vlgmr.msrb.gmra.mxu0 %v3620_v63  ;;  %877 = vmatpush.msrb.mxu1 %v493_v18  ;;  %v585_v8 = vld [vmem:[#allocation6 + $0x450] sm:$0xff]  ;;  %v694_v18 = vld [vmem:[#allocation6 + $0x7b8] sm:$0xff] }
 0x243   :  { %894 = vmatpush.msrb.mxu2 %v569_v19  ;;  %914 = vmatpush.msrb.mxu3 %v633_v20  ;;  %v517_v15 = vld [vmem:[#allocation6 + $0x230] sm:$0xff] }
 0x244   :  { %937 = vmatpush.msra.mxu0 %v685_v21  ;;  %878 = vmatpush.msrb.mxu1 %v489_v22  ;;  %v581_v16 = vld [vmem:[#allocation6 + $0x430] sm:$0xff]  ;;  %v498_v21 = vld [vmem:[#allocation6 + $0x198] sm:$0xff] }
 0x245   :  { %895 = vmatpush.msrb.mxu2 %v565_v23  ;;  %915 = vmatpush.msrb.mxu3 %v629_v24  ;;  %v513_v19 = vld [vmem:[#allocation6 + $0x210] sm:$0xff]  ;;  %v574_v22 = vld [vmem:[#allocation6 + $0x3f8] sm:$0xff] }
 0x246   :  { %938 = vmatpush.msra.mxu0 %v681_v25  ;;  %879 = vmatpush.msrb.mxu1 %v485_v26  ;;  %v577_v20 = vld [vmem:[#allocation6 + $0x410] sm:$0xff]  ;;  %v638_v23 = vld [vmem:[#allocation6 + $0x5f8] sm:$0xff] }
 0x247   :  { %896 = vmatpush.msrb.mxu2 %v561_v27  ;;  %916 = vmatpush.msrb.mxu3 %v625_v28  ;;  %v690_v24 = vld [vmem:[#allocation6 + $0x798] sm:$0xff] }
 0x248   :  { %939 = vmatpush.msra.mxu0 %v677_v29  ;;  %829 = vmatmul.f32.vlgmr.msra.gmra.mxu2 %v3624_v10  ;;  %v494_v25 = vld [vmem:[#allocation6 + $0x178] sm:$0xff] }
 0x249   :  { %849 = vmatmul.f32.vlgmr.msra.gmra.mxu3 %v3626_v13  ;;  %880 = vmatpush.msrb.mxu1 %v481_v30  ;;  %v570_v26 = vld [vmem:[#allocation6 + $0x3d8] sm:$0xff] }
 0x24a   :  { %897 = vmatpush.msrb.mxu2 %v557_v31  ;;  %917 = vmatpush.msrb.mxu3 %v621_v32  ;;  %v634_v27 = vld [vmem:[#allocation6 + $0x5d8] sm:$0xff] }
 0x24b   :  { %940 = vmatpush.msra.mxu0 %v673_v33  ;;  %881 = vmatpush.msrb.mxu1 %v477_v34  ;;  %v686_v28 = vld [vmem:[#allocation6 + $0x778] sm:$0xff] }
 0x24c   :  { %898 = vmatpush.msrb.mxu2 %v553_v35  ;;  %918 = vmatpush.msrb.mxu3 %v617_v36  ;;  %v490_v29 = vld [vmem:[#allocation6 + $0x158] sm:$0xff] }
 0x24d   :  { %941 = vmatpush.msra.mxu0 %v669_v37  ;;  %882 = vmatpush.msrb.mxu1 %v473_v38  ;;  %v566_v30 = vld [vmem:[#allocation6 + $0x3b8] sm:$0xff] }
 0x24e   :  { %899 = vmatpush.msrb.mxu2 %v549_v39  ;;  %919 = vmatpush.msrb.mxu3 %v613_v14  ;;  %v630_v31 = vld [vmem:[#allocation6 + $0x5b8] sm:$0xff] }
 0x24f   :  { %942 = vmatpush.msra.mxu0 %v665_v40  ;;  %883 = vmatpush.msrb.mxu1 %v469_v41  ;;  %v682_v32 = vld [vmem:[#allocation6 + $0x758] sm:$0xff] }
 0x250   :  { %900 = vmatpush.msrb.mxu2 %v545_v44  ;;  %920 = vmatpush.msrb.mxu3 %v609_v45  ;;  %v486_v33 = vld [vmem:[#allocation6 + $0x138] sm:$0xff] }
 0x251   :  { %943 = vmatpush.msra.mxu0 %v661_v46  ;;  %884 = vmatpush.msrb.mxu1 %v465_v47  ;;  %v562_v34 = vld [vmem:[#allocation6 + $0x398] sm:$0xff] }
 0x252   :  { %901 = vmatpush.msrb.mxu2 %v541_v48  ;;  %921 = vmatpush.msrb.mxu3 %v605_v49  ;;  %v626_v35 = vld [vmem:[#allocation6 + $0x598] sm:$0xff] }
 0x253   :  { %944 = vmatpush.msra.mxu0 %v657_v50  ;;  %885 = vmatpush.msrb.mxu1 %v461_v51  ;;  %v678_v36 = vld [vmem:[#allocation6 + $0x738] sm:$0xff] }
 0x254   :  { %902 = vmatpush.msrb.mxu2 %v537_v52  ;;  %922 = vmatpush.msrb.mxu3 %v601_v53  ;;  %v482_v37 = vld [vmem:[#allocation6 + $0x118] sm:$0xff] }
 0x255   :  { %945 = vmatpush.msra.mxu0 %v653_v54  ;;  %886 = vmatpush.msrb.mxu1 %v457_v55  ;;  %v558_v38 = vld [vmem:[#allocation6 + $0x378] sm:$0xff] }
 0x256   :  { %903 = vmatpush.msrb.mxu2 %v533_v56  ;;  %923 = vmatpush.msrb.mxu3 %v597_v57  ;;  %v622_v39 = vld [vmem:[#allocation6 + $0x578] sm:$0xff] }
 0x257   :  { %946 = vmatpush.msra.mxu0 %v649_v58  ;;  %887 = vmatpush.msrb.mxu1 %v453_v59  ;;  %v674_v14 = vld [vmem:[#allocation6 + $0x718] sm:$0xff] }
 0x258   :  { %904 = vmatpush.msrb.mxu2 %v529_v61  ;;  %924 = vmatpush.msrb.mxu3 %v593_v62  ;;  %v478_v40 = vld [vmem:[#allocation6 + $0xf8] sm:$0xff] }
 0x259   :  { %947 = vmatpush.msra.mxu0 %v645_v0  ;;  %888 = vmatpush.msrb.mxu1 %v449_v1  ;;  %v554_v41 = vld [vmem:[#allocation6 + $0x358] sm:$0xff] }
 0x25a   :  { %905 = vmatpush.msrb.mxu2 %v525_v2  ;;  %925 = vmatpush.msrb.mxu3 %v589_v3  ;;  %v618_v44 = vld [vmem:[#allocation6 + $0x558] sm:$0xff] }
 0x25b   :  { %948 = vmatpush.msra.mxu0 %v641_v4  ;;  %889 = vmatmul.f32.vlgmr.msrb.gmra.mxu1 %v3618_v60  ;;  %v670_v45 = vld [vmem:[#allocation6 + $0x6f8] sm:$0xff] }
 0x25c   :  { %949 = vmatmul.f32.vlgmr.msra.gmra.mxu0 %v3620_v63  ;;  %953 = vmatpush.msra.mxu1 %v510_v5  ;;  %v474_v46 = vld [vmem:[#allocation6 + $0xd8] sm:$0xff] }
 0x25d   :  { %1013 = vmatpush.msrb.mxu0 %v702_v6  ;;  %906 = vmatpush.msrb.mxu2 %v521_v7  ;;  %v550_v47 = vld [vmem:[#allocation6 + $0x338] sm:$0xff] }
 0x25e   :  { %926 = vmatpush.msrb.mxu3 %v585_v8  ;;  %954 = vmatpush.msra.mxu1 %v506_v9  ;;  %v614_v48 = vld [vmem:[#allocation6 + $0x538] sm:$0xff] }
 0x25f   :  { %1014 = vmatpush.msrb.mxu0 %v698_v12  ;;  %907 = vmatpush.msrb.mxu2 %v517_v15  ;;  %v666_v49 = vld [vmem:[#allocation6 + $0x6d8] sm:$0xff] }
 0x260   :  { %927 = vmatpush.msrb.mxu3 %v581_v16  ;;  %955 = vmatpush.msra.mxu1 %v502_v17  ;;  %v470_v50 = vld [vmem:[#allocation6 + $0xb8] sm:$0xff] }
 0x261   :  { %1015 = vmatpush.msrb.mxu0 %v694_v18  ;;  %908 = vmatpush.msrb.mxu2 %v513_v19  ;;  %v546_v51 = vld [vmem:[#allocation6 + $0x318] sm:$0xff] }
 0x262   :  { %928 = vmatpush.msrb.mxu3 %v577_v20  ;;  %909 = vmatmul.f32.vlgmr.msrb.gmra.mxu2 %v3624_v10  ;;  %v610_v52 = vld [vmem:[#allocation6 + $0x518] sm:$0xff] }
 0x263   :  { %929 = vmatmul.f32.vlgmr.msrb.gmra.mxu3 %v3626_v13  ;;  %956 = vmatpush.msra.mxu1 %v498_v21  ;;  %v662_v53 = vld [vmem:[#allocation6 + $0x6b8] sm:$0xff]  ;;  %v1051_v21 = vld [vmem:[%s4380_s8 + $0x70] sm:$0xff] }
 0x264   :  { %973 = vmatpush.msra.mxu2 %v574_v22  ;;  %993 = vmatpush.msra.mxu3 %v638_v23  ;;  %v466_v54 = vld [vmem:[#allocation6 + $0x98] sm:$0xff] }
 0x265   :  { %1016 = vmatpush.msrb.mxu0 %v690_v24  ;;  %957 = vmatpush.msra.mxu1 %v494_v25  ;;  %v542_v55 = vld [vmem:[#allocation6 + $0x2f8] sm:$0xff] }
 0x266   :  { %974 = vmatpush.msra.mxu2 %v570_v26  ;;  %994 = vmatpush.msra.mxu3 %v634_v27  ;;  %v606_v56 = vld [vmem:[#allocation6 + $0x4f8] sm:$0xff]  ;;  %v1067_v26 = vld [vmem:[%s4380_s8 + $0xf0] sm:$0xff] }
 0x267   :  { %1017 = vmatpush.msrb.mxu0 %v686_v28  ;;  %958 = vmatpush.msra.mxu1 %v490_v29  ;;  %v658_v57 = vld [vmem:[#allocation6 + $0x698] sm:$0xff]  ;;  %v1046_v29 = vld [vmem:[%s4380_s8 + $0x48] sm:$0xff] }
 0x268   :  { %975 = vmatpush.msra.mxu2 %v566_v30  ;;  %995 = vmatpush.msra.mxu3 %v630_v31  ;;  %v462_v58 = vld [vmem:[#allocation6 + $0x78] sm:$0xff] }
 0x269   :  { %1018 = vmatpush.msrb.mxu0 %v682_v32  ;;  %959 = vmatpush.msra.mxu1 %v486_v33  ;;  %v538_v59 = vld [vmem:[#allocation6 + $0x2d8] sm:$0xff]  ;;  %v1063_v32 = vld [vmem:[%s4380_s8 + $0xd0] sm:$0xff] }
 0x26a   :  { %976 = vmatpush.msra.mxu2 %v562_v34  ;;  %996 = vmatpush.msra.mxu3 %v626_v35  ;;  %v602_v61 = vld [vmem:[#allocation6 + $0x4d8] sm:$0xff]  ;;  %v1062_v34 = vld [vmem:[%s4380_s8 + $0xc8] sm:$0xff]  ;;  %v1043_v35 = vld [vmem:[%s4380_s8 + $0x30] sm:$0xff] }
 0x26b   :  { %1019 = vmatpush.msrb.mxu0 %v678_v36  ;;  %960 = vmatpush.msra.mxu1 %v482_v37  ;;  %v654_v62 = vld [vmem:[#allocation6 + $0x678] sm:$0xff]  ;;  %v1042_v37 = vld [vmem:[%s4380_s8 + $0x28] sm:$0xff] }
 0x26c   :  { %977 = vmatpush.msra.mxu2 %v558_v38  ;;  %997 = vmatpush.msra.mxu3 %v622_v39  ;;  %v458_v0 = vld [vmem:[#allocation6 + $0x58] sm:$0xff] }
 0x26d   :  { %1020 = vmatpush.msrb.mxu0 %v674_v14  ;;  %961 = vmatpush.msra.mxu1 %v478_v40  ;;  %v534_v1 = vld [vmem:[#allocation6 + $0x2b8] sm:$0xff]  ;;  %v1059_v14 = vld [vmem:[%s4380_s8 + $0xb0] sm:$0xff] }
 0x26e   :  { %978 = vmatpush.msra.mxu2 %v554_v41  ;;  %998 = vmatpush.msra.mxu3 %v618_v44  ;;  %v598_v2 = vld [vmem:[#allocation6 + $0x4b8] sm:$0xff]  ;;  %v1058_v41 = vld [vmem:[%s4380_s8 + $0xa8] sm:$0xff]  ;;  %v1083_v44 = vld [vmem:[%s4380_s8 + $0x170] sm:$0xff] }
 0x26f   :  { %1021 = vmatpush.msrb.mxu0 %v670_v45  ;;  %962 = vmatpush.msra.mxu1 %v474_v46  ;;  %v650_v3 = vld [vmem:[#allocation6 + $0x658] sm:$0xff]  ;;  %v1039_v45 = vld [vmem:[%s4380_s8 + $0x10] sm:$0xff]  ;;  %v1082_v46 = vld [vmem:[%s4380_s8 + $0x168] sm:$0xff] }
 0x270   :  { %979 = vmatpush.msra.mxu2 %v550_v47  ;;  %999 = vmatpush.msra.mxu3 %v614_v48  ;;  %v454_v4 = vld [vmem:[#allocation6 + $0x38] sm:$0xff] }
 0x271   :  { %1022 = vmatpush.msrb.mxu0 %v666_v49  ;;  %963 = vmatpush.msra.mxu1 %v470_v50  ;;  %v530_v5 = vld [vmem:[#allocation6 + $0x298] sm:$0xff]  ;;  %v1038_v49 = vld [vmem:[%s4380_s8 + $0x8] sm:$0xff] }
 0x272   :  { %980 = vmatpush.msra.mxu2 %v546_v51  ;;  %1000 = vmatpush.msra.mxu3 %v610_v52  ;;  %v594_v6 = vld [vmem:[#allocation6 + $0x498] sm:$0xff] }
 0x273   :  { %1023 = vmatpush.msrb.mxu0 %v662_v53  ;;  %964 = vmatpush.msra.mxu1 %v466_v54  ;;  %v646_v7 = vld [vmem:[#allocation6 + $0x638] sm:$0xff]  ;;  %v1055_v54 = vld [vmem:[%s4380_s8 + $0x90] sm:$0xff] }
 0x274   :  { %981 = vmatpush.msra.mxu2 %v542_v55  ;;  %1001 = vmatpush.msra.mxu3 %v606_v56  ;;  %v450_v8 = vld [vmem:[#allocation6 + $0x18] sm:$0xff]  ;;  %v1054_v56 = vld [vmem:[%s4380_s8 + $0x88] sm:$0xff] }
 0x275   :  { %1024 = vmatpush.msrb.mxu0 %v658_v57  ;;  %965 = vmatpush.msra.mxu1 %v462_v58  ;;  %v526_v9 = vld [vmem:[#allocation6 + $0x278] sm:$0xff]  ;;  %v1079_v57 = vld [vmem:[%s4380_s8 + $0x150] sm:$0xff] }
 0x276   :  { %982 = vmatpush.msra.mxu2 %v538_v59  ;;  %1002 = vmatpush.msra.mxu3 %v602_v61  ;;  %v590_v12 = vld [vmem:[#allocation6 + $0x478] sm:$0xff]  ;;  %v1078_v61 = vld [vmem:[%s4380_s8 + $0x148] sm:$0xff] }
 0x277   :  { %1025 = vmatpush.msrb.mxu0 %v654_v62  ;;  %966 = vmatpush.msra.mxu1 %v458_v0  ;;  %v642_v15 = vld [vmem:[#allocation6 + $0x618] sm:$0xff]  ;;  %v1262_v62 = vld [vmem:[%s4382_s10 + $0x1e8] sm:$0xff] }
 0x278   :  { %983 = vmatpush.msra.mxu2 %v534_v1  ;;  %1003 = vmatpush.msra.mxu3 %v598_v2  ;;  %v522_v16 = vld [vmem:[#allocation6 + $0x258] sm:$0xff]  ;;  %v1258_v1 = vld [vmem:[%s4382_s10 + $0x1c8] sm:$0xff] }
 0x279   :  { %1026 = vmatpush.msrb.mxu0 %v650_v3  ;;  %967 = vmatpush.msra.mxu1 %v454_v4  ;;  %v586_v17 = vld [vmem:[#allocation6 + $0x458] sm:$0xff]  ;;  %v1254_v3 = vld [vmem:[%s4382_s10 + $0x1a8] sm:$0xff] }
 0x27a   :  { %984 = vmatpush.msra.mxu2 %v530_v5  ;;  %1004 = vmatpush.msra.mxu3 %v594_v6  ;;  %v1052_v18 = vld [vmem:[%s4380_s8 + $0x78] sm:$0xff]  ;;  %v1049_v25 = vld [vmem:[%s4380_s8 + $0x60] sm:$0xff] }
 0x27b   :  { %1027 = vmatpush.msrb.mxu0 %v646_v7  ;;  %968 = vmatpush.msra.mxu1 %v450_v8  ;;  %v518_v19 = vld [vmem:[#allocation6 + $0x238] sm:$0xff]  ;;  %v1250_v7 = vld [vmem:[%s4382_s10 + $0x188] sm:$0xff] }
 0x27c   :  { %985 = vmatpush.msra.mxu2 %v526_v9  ;;  %1005 = vmatpush.msra.mxu3 %v590_v12  ;;  %v582_v20 = vld [vmem:[#allocation6 + $0x438] sm:$0xff]  ;;  %v1246_v9 = vld [vmem:[%s4382_s10 + $0x168] sm:$0xff] }
 0x27d   :  { %1028 = vmatpush.msrb.mxu0 %v642_v15  ;;  %969 = vmatmul.f32.vlgmr.msra.gmra.mxu1 %v3618_v60  ;;  %v514_v22 = vld [vmem:[#allocation6 + $0x218] sm:$0xff]  ;;  %v1050_v60 = vld [vmem:[%s4380_s8 + $0x68] sm:$0xff]  ;;  %v1075_v15 = vld [vmem:[%s4380_s8 + $0x130] sm:$0xff] }
 0x27e   :  { %1029 = vmatmul.f32.vlgmr.msrb.gmra.mxu0 %v3620_v63  ;;  %986 = vmatpush.msra.mxu2 %v522_v16  ;;  %v578_v23 = vld [vmem:[#allocation6 + $0x418] sm:$0xff]  ;;  %v1242_v16 = vld [vmem:[%s4382_s10 + $0x148] sm:$0xff] }
 0x27f   :  { %1006 = vmatpush.msra.mxu3 %v586_v17  ;;  %1105 = vmatpush.msrb.mxu1 %v1052_v18  ;;  %v1068_v63 = vld [vmem:[%s4380_s8 + $0xf8] sm:$0xff]  ;;  %v1065_v28 = vld [vmem:[%s4380_s8 + $0xe0] sm:$0xff]  ;;  %v1074_v18 = vld [vmem:[%s4380_s8 + $0x128] sm:$0xff] }
 0x280   :  { %987 = vmatpush.msra.mxu2 %v518_v19  ;;  %v1084_v24 = vld [vmem:[%s4380_s8 + $0x178] sm:$0xff]  ;;  %v1045_v31 = vld [vmem:[%s4380_s8 + $0x40] sm:$0xff]  ;;  %v1238_v19 = vld [vmem:[%s4382_s10 + $0x128] sm:$0xff] }
 0x281   :  { %1007 = vmatpush.msra.mxu3 %v582_v20  ;;  %1106 = vmatpush.msrb.mxu1 %v1051_v21  ;;  %v1048_v27 = vld [vmem:[%s4380_s8 + $0x58] sm:$0xff]  ;;  %v1061_v36 = vld [vmem:[%s4380_s8 + $0xc0] sm:$0xff] }
 0x282   :  { %988 = vmatpush.msra.mxu2 %v514_v22  ;;  %v1064_v30 = vld [vmem:[%s4380_s8 + $0xd8] sm:$0xff]  ;;  %v1041_v39 = vld [vmem:[%s4380_s8 + $0x20] sm:$0xff] }
 0x283   :  { %1008 = vmatpush.msra.mxu3 %v578_v23  ;;  %989 = vmatmul.f32.vlgmr.msra.gmra.mxu2 %v3624_v10  ;;  %v1066_v10 = vld [vmem:[%s4380_s8 + $0xe8] sm:$0xff]  ;;  %v1044_v33 = vld [vmem:[%s4380_s8 + $0x38] sm:$0xff]  ;;  %v1057_v47 = vld [vmem:[%s4380_s8 + $0xa0] sm:$0xff] }
 0x284   :  { %1009 = vmatmul.f32.vlgmr.msra.gmra.mxu3 %v3626_v13  ;;  %1107 = vmatpush.msrb.mxu1 %v1050_v60  ;;  %v1047_v13 = vld [vmem:[%s4380_s8 + $0x50] sm:$0xff]  ;;  %v1060_v38 = vld [vmem:[%s4380_s8 + $0xb8] sm:$0xff]  ;;  %v1081_v48 = vld [vmem:[%s4380_s8 + $0x160] sm:$0xff] }
 0x285   :  { %1125 = vmatpush.msrb.mxu2 %v1068_v63  ;;  %1145 = vmatpush.msrb.mxu3 %v1084_v24  ;;  %v1040_v40 = vld [vmem:[%s4380_s8 + $0x18] sm:$0xff]  ;;  %v1037_v52 = vld [vmem:[%s4380_s8] sm:$0xff]  ;;  %v1234_v23 = vld [vmem:[%s4382_s10 + $0x108] sm:$0xff] }
 0x286   :  { %1108 = vmatpush.msrb.mxu1 %v1049_v25  ;;  %v1056_v50 = vld [vmem:[%s4380_s8 + $0x98] sm:$0xff]  ;;  %v1261_v53 = vld [vmem:[%s4382_s10 + $0x1e0] sm:$0xff]  ;;  %v1230_v24 = vld [vmem:[%s4382_s10 + $0xe8] sm:$0xff] }
 0x287   :  { %1126 = vmatpush.msrb.mxu2 %v1067_v26  ;;  %1146 = vmatpush.msrb.mxu3 %v1083_v44  ;;  %v1080_v51 = vld [vmem:[%s4380_s8 + $0x158] sm:$0xff]  ;;  %v1257_v55 = vld [vmem:[%s4382_s10 + $0x1c0] sm:$0xff]  ;;  %v1071_v25 = vld [vmem:[%s4380_s8 + $0x110] sm:$0xff] }
 0x288   :  { %1109 = vmatpush.msrb.mxu1 %v1048_v27  ;;  %v1253_v58 = vld [vmem:[%s4382_s10 + $0x1a0] sm:$0xff]  ;;  %v1076_v8 = vld [vmem:[%s4380_s8 + $0x138] sm:$0xff]  ;;  %v1226_v26 = vld [vmem:[%s4382_s10 + $0xc8] sm:$0xff] }
 0x289   :  { %1127 = vmatpush.msrb.mxu2 %v1066_v10  ;;  %1147 = vmatpush.msrb.mxu3 %v1082_v46  ;;  %v1053_v59 = vld [vmem:[%s4380_s8 + $0x80] sm:$0xff]  ;;  %v1072_v63 = vld [vmem:[%s4380_s8 + $0x118] sm:$0xff]  ;;  %v1070_v10 = vld [vmem:[%s4380_s8 + $0x108] sm:$0xff] }
 0x28a   :  { %1110 = vmatpush.msrb.mxu1 %v1047_v13  ;;  %v1249_v0 = vld [vmem:[%s4382_s10 + $0x180] sm:$0xff]  ;;  %v1222_v13 = vld [vmem:[%s4382_s10 + $0xa8] sm:$0xff] }
 0x28b   :  { %1128 = vmatpush.msrb.mxu2 %v1065_v28  ;;  %1148 = vmatpush.msrb.mxu3 %v1081_v48  ;;  %v1245_v2 = vld [vmem:[%s4382_s10 + $0x160] sm:$0xff]  ;;  %v1206_v46 = vld [vmem:[%s4382_s10 + $0x28] sm:$0xff]  ;;  %v1096_v48 = vld [vmem:[%s4380_s8 + $0x1d8] sm:$0xff] }
 0x28c   :  { %1111 = vmatpush.msrb.mxu1 %v1046_v29  ;;  %v1241_v4 = vld [vmem:[%s4382_s10 + $0x140] sm:$0xff] }
 0x28d   :  { %1129 = vmatpush.msrb.mxu2 %v1064_v30  ;;  %1149 = vmatpush.msrb.mxu3 %v1080_v51  ;;  %v1237_v5 = vld [vmem:[%s4382_s10 + $0x120] sm:$0xff]  ;;  %v1100_v30 = vld [vmem:[%s4380_s8 + $0x1f8] sm:$0xff] }
 0x28e   :  { %1112 = vmatpush.msrb.mxu1 %v1045_v31  ;;  %v1077_v6 = vld [vmem:[%s4380_s8 + $0x140] sm:$0xff]  ;;  %v1218_v31 = vld [vmem:[%s4382_s10 + $0x88] sm:$0xff]  ;;  %1165 = vmatpush.msra.mxu0 %v1100_v30  ;;  %v1260_v30 = vld [vmem:[%s4382_s10 + $0x1d8] sm:$0xff] }
 0x28f   :  { %1130 = vmatpush.msrb.mxu2 %v1063_v32  ;;  %1150 = vmatpush.msrb.mxu3 %v1079_v57  ;;  %v1233_v12 = vld [vmem:[%s4382_s10 + $0x100] sm:$0xff]  ;;  %v1263_v32 = vld [vmem:[%s4382_s10 + $0x1f0] sm:$0xff] }
 0x290   :  { %1113 = vmatpush.msrb.mxu1 %v1044_v33  ;;  %v1229_v17 = vld [vmem:[%s4382_s10 + $0xe0] sm:$0xff] }
 0x291   :  { %1131 = vmatpush.msrb.mxu2 %v1062_v34  ;;  %1151 = vmatpush.msrb.mxu3 %v1078_v61  ;;  %v1225_v20 = vld [vmem:[%s4382_s10 + $0xc0] sm:$0xff] }
 0x292   :  { %1114 = vmatpush.msrb.mxu1 %v1043_v35  ;;  %v1221_v21 = vld [vmem:[%s4382_s10 + $0xa0] sm:$0xff]  ;;  %v1214_v35 = vld [vmem:[%s4382_s10 + $0x68] sm:$0xff] }
 0x293   :  { %1132 = vmatpush.msrb.mxu2 %v1061_v36  ;;  %1152 = vmatpush.msrb.mxu3 %v1077_v6  ;;  %v1073_v22 = vld [vmem:[%s4380_s8 + $0x120] sm:$0xff]  ;;  %v1099_v36 = vld [vmem:[%s4380_s8 + $0x1f0] sm:$0xff] }
 0x294   :  { %1115 = vmatpush.msrb.mxu1 %v1042_v37  ;;  %v1217_v60 = vld [vmem:[%s4382_s10 + $0x80] sm:$0xff]  ;;  %v1259_v37 = vld [vmem:[%s4382_s10 + $0x1d0] sm:$0xff]  ;;  %1166 = vmatpush.msra.mxu0 %v1099_v36  ;;  %v1244_v36 = vld [vmem:[%s4382_s10 + $0x158] sm:$0xff] }
 0x295   :  { %1133 = vmatpush.msrb.mxu2 %v1060_v38  ;;  %1153 = vmatpush.msrb.mxu3 %v1076_v8  ;;  %v1213_v27 = vld [vmem:[%s4382_s10 + $0x60] sm:$0xff]  ;;  %v1231_v6 = vld [vmem:[%s4382_s10 + $0xf0] sm:$0xff] }
 0x296   :  { %1116 = vmatpush.msrb.mxu1 %v1041_v39  ;;  %v1209_v28 = vld [vmem:[%s4382_s10 + $0x40] sm:$0xff]  ;;  %v1098_v39 = vld [vmem:[%s4380_s8 + $0x1e8] sm:$0xff] }
 0x297   :  { %1134 = vmatpush.msrb.mxu2 %v1059_v14  ;;  %1154 = vmatpush.msrb.mxu3 %v1075_v15  ;;  %v1069_v29 = vld [vmem:[%s4380_s8 + $0x100] sm:$0xff]  ;;  %v1210_v14 = vld [vmem:[%s4382_s10 + $0x48] sm:$0xff] }
 0x298   :  { %1117 = vmatpush.msrb.mxu1 %v1040_v40  ;;  %v3873_v33 = vld [vmem:[%s4379_s7] sm:$0xf]  ;;  %v1255_v40 = vld [vmem:[%s4382_s10 + $0x1b0] sm:$0xff]  ;;  %1167 = vmatpush.msra.mxu0 %v1098_v39 }
 0x299   :  { %1135 = vmatpush.msrb.mxu2 %v1058_v41  ;;  %1155 = vmatpush.msrb.mxu3 %v1074_v18  ;;  %v1205_v34 = vld [vmem:[%s4382_s10 + $0x20] sm:$0xff]  ;;  %v705_v41 = vperm.slane %v3873_v33, 0 }
 0x29a   :  { %1118 = vmatpush.msrb.mxu1 %v1039_v45  ;;  %v1201_v38 = vld [vmem:[%s4382_s10] sm:$0xff] }
 0x29b   :  { %1136 = vmatpush.msrb.mxu2 %v1057_v47  ;;  %1156 = vmatpush.msrb.mxu3 %v1073_v22  ;;  %v1097_v44 = vld [vmem:[%s4380_s8 + $0x1e0] sm:$0xff]  ;;  %v1251_v47 = vld [vmem:[%s4382_s10 + $0x190] sm:$0xff] }
 0x29c   :  { %1119 = vmatpush.msrb.mxu1 %v1038_v49  ;;  %1168 = vmatpush.msra.mxu0 %v1097_v44  ;;  %v1202_v49 = vld [vmem:[%s4382_s10 + $0x8] sm:$0xff] }
 0x29d   :  { %1137 = vmatpush.msrb.mxu2 %v1056_v50  ;;  %1157 = vmatpush.msrb.mxu3 %v1072_v63  ;;  %v1247_v50 = vld [vmem:[%s4382_s10 + $0x170] sm:$0xff] }
 0x29e   :  { %1120 = vmatpush.msrb.mxu1 %v1037_v52  ;;  %v1095_v52 = vld [vmem:[%s4380_s8 + $0x1d0] sm:$0xff]  ;;  %1169 = vmatpush.msra.mxu0 %v1096_v48 }
 0x29f   :  { %1138 = vmatpush.msrb.mxu2 %v1055_v54  ;;  %1158 = vmatpush.msrb.mxu3 %v1071_v25  ;;  %v1243_v54 = vld [vmem:[%s4382_s10 + $0x150] sm:$0xff] }
 0x2a0   :  { %1275 = vmatpush.msra.mxu1 %v1261_v53  ;;  %1170 = vmatpush.msra.mxu0 %v1095_v52  ;;  %v1215_v63 = vld [vmem:[%s4382_s10 + $0x70] sm:$0xff]  ;;  %v1220_v52 = vld [vmem:[%s4382_s10 + $0x98] sm:$0xff] }
 0x2a1   :  { %1139 = vmatpush.msrb.mxu2 %v1054_v56  ;;  %1159 = vmatpush.msrb.mxu3 %v1070_v10  ;;  %v1094_v56 = vld [vmem:[%s4380_s8 + $0x1c8] sm:$0xff]  ;;  %v1207_v10 = vld [vmem:[%s4382_s10 + $0x30] sm:$0xff] }
 0x2a2   :  { %1276 = vmatpush.msra.mxu1 %v1257_v55  ;;  %1171 = vmatpush.msra.mxu0 %v1094_v56  ;;  %v1204_v56 = vld [vmem:[%s4382_s10 + $0x18] sm:$0xff] }
 0x2a3   :  { %1140 = vmatpush.msrb.mxu2 %v1053_v59  ;;  %1160 = vmatpush.msrb.mxu3 %v1069_v29  ;;  %v1264_v29 = vld [vmem:[%s4382_s10 + $0x1f8] sm:$0xff] }
 0x2a4   :  { %1277 = vmatpush.msra.mxu1 %v1253_v58  ;;  %v1239_v58 = vld [vmem:[%s4382_s10 + $0x130] sm:$0xff] }
 0x2a5   :  { %1295 = vmatpush.msra.mxu2 %v1262_v62  ;;  %1315 = vmatpush.msra.mxu3 %v1263_v32  ;;  %v706_v62 = vperm.slane %v3873_v33, 1  ;;  %v1252_v32 = vld [vmem:[%s4382_s10 + $0x198] sm:$0xff] }
 0x2a6   :  { %1278 = vmatpush.msra.mxu1 %v1249_v0 }
 0x2a7   :  { %1296 = vmatpush.msra.mxu2 %v1258_v1  ;;  %1316 = vmatpush.msra.mxu3 %v1259_v37 }
 0x2a8   :  { %1279 = vmatpush.msra.mxu1 %v1245_v2  ;;  %v1093_v2 = vld [vmem:[%s4380_s8 + $0x1c0] sm:$0xff] }
 0x2a9   :  { %1297 = vmatpush.msra.mxu2 %v1254_v3  ;;  %1317 = vmatpush.msra.mxu3 %v1255_v40  ;;  %v1235_v3 = vld [vmem:[%s4382_s10 + $0x110] sm:$0xff] }
 0x2aa   :  { %1280 = vmatpush.msra.mxu1 %v1241_v4  ;;  %1172 = vmatpush.msra.mxu0 %v1093_v2  ;;  %v1407_v2 = vld [vmem:[#allocation8 + $0x180] sm:$0xff] }
 0x2ab   :  { %1298 = vmatpush.msra.mxu2 %v1250_v7  ;;  %1318 = vmatpush.msra.mxu3 %v1251_v47 }
 0x2ac   :  { %1281 = vmatpush.msra.mxu1 %v1237_v5  ;;  %v1092_v5 = vld [vmem:[%s4380_s8 + $0x1b8] sm:$0xff] }
 0x2ad   :  { %1299 = vmatpush.msra.mxu2 %v1246_v9  ;;  %1319 = vmatpush.msra.mxu3 %v1247_v50  ;;  %v1091_v9 = vld [vmem:[%s4380_s8 + $0x1b0] sm:$0xff] }
 0x2ae   :  { %1282 = vmatpush.msra.mxu1 %v1233_v12  ;;  %1173 = vmatpush.msra.mxu0 %v1092_v5  ;;  %v1227_v12 = vld [vmem:[%s4382_s10 + $0xd0] sm:$0xff]  ;;  %v1471_v5 = vld [vmem:[#allocation8 + $0x380] sm:$0xff] }
 0x2af   :  { %1300 = vmatpush.msra.mxu2 %v1242_v16  ;;  %1320 = vmatpush.msra.mxu3 %v1243_v54  ;;  %v1090_v16 = vld [vmem:[%s4380_s8 + $0x1a8] sm:$0xff]  ;;  %v1212_v54 = vld [vmem:[%s4382_s10 + $0x58] sm:$0xff] }
 0x2b0   :  { %1283 = vmatpush.msra.mxu1 %v1229_v17  ;;  %1174 = vmatpush.msra.mxu0 %v1091_v9  ;;  %v1223_v17 = vld [vmem:[%s4382_s10 + $0xb0] sm:$0xff]  ;;  %v1395_v9 = vld [vmem:[#allocation8 + $0x120] sm:$0xff] }
 0x2b1   :  { %1301 = vmatpush.msra.mxu2 %v1238_v19  ;;  %1321 = vmatpush.msra.mxu3 %v1239_v58  ;;  %v1089_v19 = vld [vmem:[%s4380_s8 + $0x1a0] sm:$0xff] }
 0x2b2   :  { %1284 = vmatpush.msra.mxu1 %v1225_v20  ;;  %1175 = vmatpush.msra.mxu0 %v1090_v16  ;;  %v1419_v58 = vld [vmem:[#allocation8 + $0x1e0] sm:$0xff] }
 0x2b3   :  { %1302 = vmatpush.msra.mxu2 %v1234_v23  ;;  %1322 = vmatpush.msra.mxu3 %v1235_v3  ;;  %v1088_v23 = vld [vmem:[%s4380_s8 + $0x198] sm:$0xff]  ;;  %v1475_v3 = vld [vmem:[#allocation8 + $0x3a0] sm:$0xff] }
 0x2b4   :  { %1285 = vmatpush.msra.mxu1 %v1221_v21  ;;  %v1219_v21 = vld [vmem:[%s4382_s10 + $0x90] sm:$0xff]  ;;  %1176 = vmatpush.msra.mxu0 %v1089_v19  ;;  %v1463_v16 = vld [vmem:[#allocation8 + $0x340] sm:$0xff] }
 0x2b5   :  { %1303 = vmatpush.msra.mxu2 %v1230_v24  ;;  %v730_v45 = vpop.f32.mrf.mxu1  ;;  %1323 = vmatpush.msra.mxu3 %v1231_v6  ;;  %v1087_v24 = vld [vmem:[%s4380_s8 + $0x190] sm:$0xff]  ;;  %v1399_v6 = vld [vmem:[#allocation8 + $0x140] sm:$0xff] }
 0x2b6   :  { %1286 = vmatpush.msra.mxu1 %v1217_v60  ;;  %v731_v51 = vadd.f32 %v730_v45, %v705_v41  ;;  %v790_v61 = vpop.f32.mrf.mxu0  ;;  %1177 = vmatpush.msra.mxu0 %v1088_v23  ;;  %v1236_v41 = vld [vmem:[%s4382_s10 + $0x118] sm:$0xff]  ;;  %v1539_v19 = vld [vmem:[#allocation8 + $0x5a0] sm:$0xff] }
 0x2b7   :  { %1304 = vmatpush.msra.mxu2 %v1226_v26  ;;  %1324 = vmatpush.msra.mxu3 %v1227_v12  ;;  %v1211_v26 = vld [vmem:[%s4382_s10 + $0x50] sm:$0xff]  ;;  %v1547_v12 = vld [vmem:[#allocation8 + $0x5e0] sm:$0xff] }
 0x2b8   :  { %1287 = vmatpush.msra.mxu1 %v1213_v27  ;;  %v1086_v27 = vld [vmem:[%s4380_s8 + $0x188] sm:$0xff]  ;;  %1178 = vmatpush.msra.mxu0 %v1087_v24 }
 0x2b9   :  { %1305 = vmatpush.msra.mxu2 %v1222_v13  ;;  %1325 = vmatpush.msra.mxu3 %v1223_v17  ;;  %v1085_v13 = vld [vmem:[%s4380_s8 + $0x180] sm:$0xff] }
 0x2ba   :  { %1288 = vmatpush.msra.mxu1 %v1209_v28  ;;  %1179 = vmatpush.msra.mxu0 %v1086_v27  ;;  %v1203_v28 = vld [vmem:[%s4382_s10 + $0x10] sm:$0xff]  ;;  %v1543_v17 = vld [vmem:[#allocation8 + $0x5c0] sm:$0xff] }
 0x2bb   :  { %1306 = vmatpush.msra.mxu2 %v1218_v31  ;;  %1326 = vmatpush.msra.mxu3 %v1219_v21  ;;  %v1256_v31 = vld [vmem:[%s4382_s10 + $0x1b8] sm:$0xff]  ;;  %v1535_v23 = vld [vmem:[#allocation8 + $0x580] sm:$0xff] }
 0x2bc   :  { %1289 = vmatpush.msra.mxu1 %v1205_v34  ;;  %1180 = vmatpush.msra.mxu0 %v1085_v13  ;;  %v1248_v34 = vld [vmem:[%s4382_s10 + $0x178] sm:$0xff]  ;;  %v1383_v24 = vld [vmem:[#allocation8 + $0xc0] sm:$0xff] }
 0x2bd   :  { %1307 = vmatpush.msra.mxu2 %v1214_v35  ;;  %1327 = vmatpush.msra.mxu3 %v1215_v63  ;;  %v707_v35 = vperm.slane %v3873_v33, 2  ;;  %v1451_v27 = vld [vmem:[#allocation8 + $0x2e0] sm:$0xff] }
 0x2be   :  { %1290 = vmatpush.msra.mxu1 %v1201_v38  ;;  %v810_v1 = vpop.f32.mrf.mxu1  ;;  %1335 = vmatpush.msrb.mxu0 %v1264_v29  ;;  %v1240_v38 = vld [vmem:[%s4382_s10 + $0x138] sm:$0xff]  ;;  %v1379_v13 = vld [vmem:[#allocation8 + $0xa0] sm:$0xff] }
 0x2bf   :  { %1308 = vmatpush.msra.mxu2 %v1210_v14  ;;  %v811_v7 = vadd.f32 %v810_v1, %v706_v62  ;;  %v870_v22 = vpop.f32.mrf.mxu0  ;;  %1328 = vmatpush.msra.mxu3 %v1211_v26  ;;  %v1411_v62 = vld [vmem:[#allocation8 + $0x1a0] sm:$0xff] }
 0x2c0   :  { %1336 = vmatpush.msrb.mxu0 %v1260_v30  ;;  %v1479_v1 = vld [vmem:[#allocation8 + $0x3c0] sm:$0xff] }
 0x2c1   :  { %1309 = vmatpush.msra.mxu2 %v1206_v46  ;;  %v750_v53 = vpop.f32.mrf.mxu2  ;;  %1329 = vmatpush.msra.mxu3 %v1207_v10  ;;  %v1232_v46 = vld [vmem:[%s4382_s10 + $0xf8] sm:$0xff]  ;;  %v1447_v30 = vld [vmem:[#allocation8 + $0x2c0] sm:$0xff] }
 0x2c2   :  { %v751_v55 = vadd.f32 %v750_v53, %v731_v51  ;;  %v770_v57 = vpop.f32.mrf.mxu3  ;;  %1337 = vmatpush.msrb.mxu0 %v1256_v31  ;;  %v1224_v51 = vld [vmem:[%s4382_s10 + $0xb8] sm:$0xff] }
 0x2c3   :  { %1310 = vmatpush.msra.mxu2 %v1202_v49  ;;  %1330 = vmatpush.msra.mxu3 %v1203_v28  ;;  %v1228_v49 = vld [vmem:[%s4382_s10 + $0xd8] sm:$0xff]  ;;  %v1527_v28 = vld [vmem:[#allocation8 + $0x540] sm:$0xff] }
 0x2c4   :  { %v771_v59 = vadd.f32 %v770_v57, %v751_v55  ;;  %1338 = vmatpush.msrb.mxu0 %v1252_v32  ;;  %v1216_v53 = vld [vmem:[%s4382_s10 + $0x78] sm:$0xff]  ;;  %v4040_v57 = vld [vmem:[%s4405_s18] sm:$0x3] }
 0x2c5   :  { %v1208_v55 = vld [vmem:[%s4382_s10 + $0x38] sm:$0xff]  ;;  %v1375_v32 = vld [vmem:[#allocation8 + $0x80] sm:$0xff] }
 0x2c6   :  { %v791_v0 = vadd.f32 %v790_v61, %v771_v59  ;;  %1339 = vmatpush.msrb.mxu0 %v1248_v34  ;;  %v1415_v59 = vld [vmem:[#allocation8 + $0x1c0] sm:$0xff]  ;;  %v168_v61 = vsel %vm167_vm0, %v4040_v57, 0.0 }
 0x2c7   :  { %169 = vadd.xlane.f32.xlu1 %v168_v61  ;;  %v1443_v34 = vld [vmem:[#allocation8 + $0x2a0] sm:$0xff] }
 0x2c8   :  { %v1033_v4 = vmax.f32 %v791_v0, 0.0  ;;  %1340 = vmatpush.msrb.mxu0 %v1244_v36  ;;  %v1483_v0 = vld [vmem:[#allocation8 + $0x3e0] sm:$0xff] }
 0x2c9   :  { %v1371_v36 = vld [vmem:[#allocation8 + $0x60] sm:$0xff] }
 0x2ca   :  { %1121 = vmatmul.f32.vlgmr.msrb.gmra.mxu1 %v1033_v4  ;;  %1341 = vmatpush.msrb.mxu0 %v1240_v38  ;;  %v1403_v4 = vld [vmem:[#allocation8 + $0x160] sm:$0xff] }
 0x2cb   :  { %v830_v8 = vpop.f32.mrf.mxu2  ;;  %1625 = vmatpush.msrb.mxu1 %v1419_v58  ;;  %v1367_v38 = vld [vmem:[#allocation8 + $0x40] sm:$0xff]  ;;  %v1384_v58 = vld [vmem:[#allocation8 + $0xc8] sm:$0xff] }
 0x2cc   :  { %v831_v15 = vadd.f32 %v830_v8, %v811_v7  ;;  %v850_v18 = vpop.f32.mrf.mxu3  ;;  %1342 = vmatpush.msrb.mxu0 %v1236_v41  ;;  %v1467_v7 = vld [vmem:[#allocation8 + $0x360] sm:$0xff]  ;;  %v708_v8 = vperm.slane %v3873_v33, 3 }
 0x2cd   :  { %1626 = vmatpush.msrb.mxu1 %v1415_v59  ;;  %v1455_v33 = vld [vmem:[#allocation8 + $0x300] sm:$0xff]  ;;  %v1476_v59 = vld [vmem:[#allocation8 + $0x3a8] sm:$0xff] }
 0x2ce   :  { %v851_v20 = vadd.f32 %v850_v18, %v831_v15  ;;  %1343 = vmatpush.msrb.mxu0 %v1232_v46  ;;  %v1391_v18 = vld [vmem:[#allocation8 + $0x100] sm:$0xff]  ;;  %v1416_v46 = vld [vmem:[#allocation8 + $0x1c8] sm:$0xff] }
 0x2cf   :  { %1627 = vmatpush.msrb.mxu1 %v1411_v62  ;;  %v1359_v41 = vld [vmem:[#allocation8] sm:$0xff]  ;;  %v1380_v62 = vld [vmem:[#allocation8 + $0xa8] sm:$0xff] }
 0x2d0   :  { %v871_v60 = vadd.f32 %v870_v22, %v851_v20  ;;  %1344 = vmatpush.msrb.mxu0 %v1228_v49  ;;  %v1459_v20 = vld [vmem:[#allocation8 + $0x320] sm:$0xff]  ;;  %v1484_v49 = vld [vmem:[#allocation8 + $0x3e8] sm:$0xff] }
 0x2d1   :  { %1628 = vmatpush.msrb.mxu1 %v1407_v2  ;;  %v1387_v22 = vld [vmem:[#allocation8 + $0xe0] sm:$0xff]  ;;  %v1376_v2 = vld [vmem:[#allocation8 + $0x88] sm:$0xff] }
 0x2d2   :  { %v1034_v25 = vmax.f32 %v871_v60, 0.0  ;;  %1291 = vmatmul.f32.vlgmr.msra.gmra.mxu1 %v3609_v43  ;;  %1345 = vmatpush.msrb.mxu0 %v1224_v51  ;;  %v1480_v51 = vld [vmem:[#allocation8 + $0x3c8] sm:$0xff]  ;;  %v1519_v61 = vld [vmem:[#allocation8 + $0x500] sm:$0xff] }
 0x2d3   :  { %1629 = vmatpush.msrb.mxu1 %v1403_v4  ;;  %v1511_v4 = vld [vmem:[#allocation8 + $0x4c0] sm:$0xff] }
 0x2d4   :  { %1141 = vmatmul.f32.vlgmr.msrb.gmra.mxu2 %v1034_v25  ;;  %1346 = vmatpush.msrb.mxu0 %v1220_v52  ;;  %v1531_v25 = vld [vmem:[#allocation8 + $0x560] sm:$0xff]  ;;  %v1404_v52 = vld [vmem:[#allocation8 + $0x168] sm:$0xff] }
 0x2d5   :  { %1645 = vmatpush.msrb.mxu2 %v1483_v0  ;;  %1630 = vmatpush.msrb.mxu1 %v1399_v6  ;;  %v1472_v0 = vld [vmem:[#allocation8 + $0x388] sm:$0xff] }
 0x2d6   :  { %1347 = vmatpush.msrb.mxu0 %v1216_v53  ;;  %v1400_v53 = vld [vmem:[#allocation8 + $0x148] sm:$0xff] }
 0x2d7   :  { %1646 = vmatpush.msrb.mxu2 %v1479_v1  ;;  %1631 = vmatpush.msrb.mxu1 %v1395_v9  ;;  %v1515_v1 = vld [vmem:[#allocation8 + $0x4e0] sm:$0xff]  ;;  %v1464_v6 = vld [vmem:[#allocation8 + $0x348] sm:$0xff] }
 0x2d8   :  { %v890_v37 = vpop.f32.mrf.mxu1  ;;  %1348 = vmatpush.msrb.mxu0 %v1212_v54  ;;  %v1396_v54 = vld [vmem:[#allocation8 + $0x128] sm:$0xff] }
 0x2d9   :  { %v891_v39 = vadd.f32 %v890_v37, %v707_v35  ;;  %v950_v47 = vpop.f32.mrf.mxu0  ;;  %1647 = vmatpush.msrb.mxu2 %v1475_v3  ;;  %1632 = vmatpush.msrb.mxu1 %v1391_v18  ;;  %v1439_v37 = vld [vmem:[#allocation8 + $0x280] sm:$0xff]  ;;  %v1468_v3 = vld [vmem:[#allocation8 + $0x368] sm:$0xff] }
 0x2da   :  { %1349 = vmatpush.msrb.mxu0 %v1208_v55  ;;  %v1392_v55 = vld [vmem:[#allocation8 + $0x108] sm:$0xff] }
 0x2db   :  { %1648 = vmatpush.msrb.mxu2 %v1471_v5  ;;  %1633 = vmatpush.msrb.mxu1 %v1387_v22  ;;  %v1372_v5 = vld [vmem:[#allocation8 + $0x68] sm:$0xff] }
 0x2dc   :  { %1311 = vmatmul.f32.vlgmr.msra.gmra.mxu2 %v3609_v43  ;;  %1350 = vmatpush.msrb.mxu0 %v1204_v56  ;;  %v1523_v56 = vld [vmem:[#allocation8 + $0x520] sm:$0xff]  ;;  %v1460_v9 = vld [vmem:[#allocation8 + $0x328] sm:$0xff] }
 0x2dd   :  { %1649 = vmatpush.msrb.mxu2 %v1467_v7  ;;  %1634 = vmatpush.msrb.mxu1 %v1383_v24  ;;  %v1507_v7 = vld [vmem:[#allocation8 + $0x4a0] sm:$0xff]  ;;  %v1360_v18 = vld [vmem:[#allocation8 + $0x8] sm:$0xff] }
 0x2de   :  { %v1444_v24 = vld [vmem:[#allocation8 + $0x2a8] sm:$0xff] }
 0x2df   :  { %1650 = vmatpush.msrb.mxu2 %v1463_v16  ;;  %1635 = vmatpush.msrb.mxu1 %v1379_v13  ;;  %v1456_v16 = vld [vmem:[#allocation8 + $0x308] sm:$0xff] }
 0x2e0   :  { %v1548_v13 = vld [vmem:[#allocation8 + $0x5e8] sm:$0xff] }
 0x2e1   :  { %1651 = vmatpush.msrb.mxu2 %v1459_v20  ;;  %1636 = vmatpush.msrb.mxu1 %v1375_v32  ;;  %v1611_v20 = vld [vmem:[#allocation8 + $0x7e0] sm:$0xff] }
 0x2e2   :  { %v1591_v32 = vld [vmem:[#allocation8 + $0x740] sm:$0xff] }
 0x2e3   :  { %1652 = vmatpush.msrb.mxu2 %v1455_v33  ;;  %1637 = vmatpush.msrb.mxu1 %v1371_v36  ;;  %v1607_v33 = vld [vmem:[#allocation8 + $0x7c0] sm:$0xff] }
 0x2e4   :  { %v1587_v36 = vld [vmem:[#allocation8 + $0x720] sm:$0xff] }
 0x2e5   :  { %v910_v14 = vpop.f32.mrf.mxu2  ;;  %1653 = vmatpush.msrb.mxu2 %v1451_v27  ;;  %1638 = vmatpush.msrb.mxu1 %v1367_v38  ;;  %v1440_v27 = vld [vmem:[#allocation8 + $0x288] sm:$0xff] }
 0x2e6   :  { %v911_v40 = vadd.f32 %v910_v14, %v891_v39  ;;  %v930_v44 = vpop.f32.mrf.mxu3  ;;  %v1435_v39 = vld [vmem:[#allocation8 + $0x260] sm:$0xff]  ;;  %v1424_v38 = vld [vmem:[#allocation8 + $0x208] sm:$0xff] }
 0x2e7   :  { %1654 = vmatpush.msrb.mxu2 %v1447_v30  ;;  %v1363_v14 = vld [vmem:[#allocation8 + $0x20] sm:$0xff]  ;;  %v1544_v30 = vld [vmem:[#allocation8 + $0x5c8] sm:$0xff] }
 0x2e8   :  { %v931_v45 = vadd.f32 %v930_v44, %v911_v40  ;;  %v1431_v40 = vld [vmem:[#allocation8 + $0x240] sm:$0xff]  ;;  %1639 = vmatpush.msrb.mxu1 %v1363_v14  ;;  %v1420_v44 = vld [vmem:[#allocation8 + $0x1e8] sm:$0xff] }
 0x2e9   :  { %1655 = vmatpush.msrb.mxu2 %v1443_v34  ;;  %v1540_v34 = vld [vmem:[#allocation8 + $0x5a8] sm:$0xff] }
 0x2ea   :  { %v951_v48 = vadd.f32 %v950_v47, %v931_v45  ;;  %v1427_v45 = vld [vmem:[#allocation8 + $0x220] sm:$0xff]  ;;  %1640 = vmatpush.msrb.mxu1 %v1359_v41  ;;  %v1532_v14 = vld [vmem:[#allocation8 + $0x568] sm:$0xff] }
 0x2eb   :  { %1656 = vmatpush.msrb.mxu2 %v1439_v37  ;;  %v1423_v47 = vld [vmem:[#allocation8 + $0x200] sm:$0xff]  ;;  %v1536_v37 = vld [vmem:[#allocation8 + $0x588] sm:$0xff] }
 0x2ec   :  { %v1035_v50 = vmax.f32 %v951_v48, 0.0  ;;  %1705 = vmatpush.msra.mxu1 %v1420_v44  ;;  %v1412_v48 = vld [vmem:[#allocation8 + $0x1a8] sm:$0xff] }
 0x2ed   :  { %1657 = vmatpush.msrb.mxu2 %v1435_v39  ;;  %v1583_v39 = vld [vmem:[#allocation8 + $0x700] sm:$0xff]  ;;  %v1528_v44 = vld [vmem:[#allocation8 + $0x548] sm:$0xff] }
 0x2ee   :  { %1161 = vmatmul.f32.vlgmr.msrb.gmra.mxu3 %v1035_v50  ;;  %1706 = vmatpush.msra.mxu1 %v1416_v46  ;;  %v1408_v50 = vld [vmem:[#allocation8 + $0x188] sm:$0xff]  ;;  %v4056_v46 = vld [vmem:[%s4383_s11] sm:$0xf]  ;;  %s4410_s11 = sld [smem:[#allocation26_spill]] }
 0x2ef   :  { %1665 = vmatpush.msrb.mxu3 %v1547_v12  ;;  %1658 = vmatpush.msrb.mxu2 %v1431_v40  ;;  %v1503_v12 = vld [vmem:[#allocation8 + $0x480] sm:$0xff] }
 0x2f0   :  { %1707 = vmatpush.msra.mxu1 %v1412_v48  ;;  %v1579_v40 = vld [vmem:[#allocation8 + $0x6e0] sm:$0xff] }
 0x2f1   :  { %1666 = vmatpush.msrb.mxu3 %v1543_v17  ;;  %1659 = vmatpush.msrb.mxu2 %v1427_v45  ;;  %v1499_v17 = vld [vmem:[#allocation8 + $0x460] sm:$0xff] }
 0x2f2   :  { %1708 = vmatpush.msra.mxu1 %v1408_v50  ;;  %v1575_v45 = vld [vmem:[#allocation8 + $0x6c0] sm:$0xff]  ;;  %v1267_v50 = vperm.slane %v4056_v46, 0 }
 0x2f3   :  { %1667 = vmatpush.msrb.mxu3 %v1539_v19  ;;  %1660 = vmatpush.msrb.mxu2 %v1423_v47  ;;  %v1452_v19 = vld [vmem:[#allocation8 + $0x2e8] sm:$0xff]  ;;  %v1571_v48 = vld [vmem:[#allocation8 + $0x6a0] sm:$0xff] }
 0x2f4   :  { %1709 = vmatpush.msra.mxu1 %v1404_v52  ;;  %v1524_v47 = vld [vmem:[#allocation8 + $0x528] sm:$0xff] }
 0x2f5   :  { %1668 = vmatpush.msrb.mxu3 %v1535_v23  ;;  %1725 = vmatpush.msra.mxu2 %v1484_v49  ;;  %v1495_v23 = vld [vmem:[#allocation8 + $0x440] sm:$0xff]  ;;  %v1520_v49 = vld [vmem:[#allocation8 + $0x508] sm:$0xff] }
 0x2f6   :  { %1331 = vmatmul.f32.vlgmr.msra.gmra.mxu3 %v3609_v43  ;;  %1710 = vmatpush.msra.mxu1 %v1400_v53  ;;  %v1516_v52 = vld [vmem:[#allocation8 + $0x4e8] sm:$0xff] }
 0x2f7   :  { %1669 = vmatpush.msrb.mxu3 %v1531_v25  ;;  %1726 = vmatpush.msra.mxu2 %v1480_v51  ;;  %v1603_v25 = vld [vmem:[#allocation8 + $0x7a0] sm:$0xff] }
 0x2f8   :  { %1711 = vmatpush.msra.mxu1 %v1396_v54  ;;  %v1567_v51 = vld [vmem:[#allocation8 + $0x680] sm:$0xff] }
 0x2f9   :  { %1670 = vmatpush.msrb.mxu3 %v1527_v28  ;;  %1727 = vmatpush.msra.mxu2 %v1476_v59  ;;  %v1595_v28 = vld [vmem:[#allocation8 + $0x760] sm:$0xff]  ;;  %v1512_v59 = vld [vmem:[#allocation8 + $0x4c8] sm:$0xff] }
 0x2fa   :  { %v970_v15 = vpop.f32.mrf.mxu1  ;;  %1712 = vmatpush.msra.mxu1 %v1392_v55  ;;  %v3046_v55 = vld [vmem:[%s4381_s9] ss:$0 sm:$0xff]  ;;  %s2767_s9 = sshll.u32 %s4410_s11, 4  ;;  %s2768_s9 = int_to_ptr.hbm [resolvable:$true] %s2767_s9 }
 0x2fb   :  { %v971_v21 = vadd.f32 %v970_v15, %v708_v8  ;;  %v1030_v29 = vpop.f32.mrf.mxu0  ;;  %1671 = vmatpush.msrb.mxu3 %v1523_v56  ;;  %1728 = vmatpush.msra.mxu2 %v1472_v0  ;;  %v1368_v8 = vld [vmem:[#allocation8 + $0x48] sm:$0xff]  ;;  %v1421_v56 = vld [vmem:[#allocation8 + $0x1f0] sm:$0xff] }
 0x2fc   :  { %v1364_v15 = vld [vmem:[#allocation8 + $0x28] sm:$0xff]  ;;  %v1417_v0 = vld [vmem:[#allocation8 + $0x1d0] sm:$0xff] }
 0x2fd   :  { %1672 = vmatpush.msrb.mxu3 %v1519_v61  ;;  %1729 = vmatpush.msra.mxu2 %v1468_v3  ;;  %v1559_v61 = vld [vmem:[#allocation8 + $0x640] sm:$0xff] }
 0x2ff   :  { %1673 = vmatpush.msrb.mxu3 %v1515_v1  ;;  %1730 = vmatpush.msra.mxu2 %v1464_v6  ;;  %v1555_v1 = vld [vmem:[#allocation8 + $0x620] sm:$0xff] }
 0x301   :  { %1674 = vmatpush.msrb.mxu3 %v1511_v4  ;;  %1731 = vmatpush.msra.mxu2 %v1460_v9  ;;  %v1413_v4 = vld [vmem:[#allocation8 + $0x1b0] sm:$0xff] }
 0x303   :  { %1675 = vmatpush.msrb.mxu3 %v1507_v7  ;;  %1732 = vmatpush.msra.mxu2 %v1456_v16  ;;  %v1500_v7 = vld [vmem:[#allocation8 + $0x468] sm:$0xff] }
 0x304   :  { %v1496_v16 = vld [vmem:[#allocation8 + $0x448] sm:$0xff] }
 0x305   :  { %1676 = vmatpush.msrb.mxu3 %v1503_v12  ;;  %1733 = vmatpush.msra.mxu2 %v1452_v19  ;;  %v1409_v12 = vld [vmem:[#allocation8 + $0x190] sm:$0xff]  ;;  %v1608_v19 = vld [vmem:[#allocation8 + $0x7c8] sm:$0xff] }
 0x306   :  { %v990_v60 = vpop.f32.mrf.mxu2 }
 0x307   :  { %v991_v63 = vadd.f32 %v990_v60, %v971_v21  ;;  %v1010_v26 = vpop.f32.mrf.mxu3  ;;  %v4049_v21 = vld [vmem:[%s4405_s18 + $0x2] sm:$0x3]  ;;  %1677 = vmatpush.msrb.mxu3 %v1499_v17  ;;  %v1448_v60 = vld [vmem:[#allocation8 + $0x2c8] sm:$0xff]  ;;  %v1268_v17 = vperm.slane %v4056_v46, 1  ;;  %s3261_s18 = smov [#allocation14]  }
 0x308   :  { %v171_v22 = vsel %vm167_vm0, %v4049_v21, 0.0  ;;  %1734 = vmatpush.msra.mxu2 %v1448_v60  ;;  %v1488_v60 = vld [vmem:[#allocation8 + $0x408] sm:$0xff]  ;;  %s2765_s30 = sshll.u32 %s3261_s18, 4  ;;  %s2766_s30 = int_to_ptr.vmem [resolvable:$true] %s2765_s30 }
 0x309   :  { %v1011_v10 = vadd.f32 %v1010_v26, %v991_v63  ;;  %172 = vadd.xlane.f32.xlu1 %v171_v22  ;;  %1678 = vmatpush.msrb.mxu3 %v1495_v23  ;;  %v1491_v63 = vld [vmem:[#allocation8 + $0x420] sm:$0xff]  ;;  %v1604_v22 = vld [vmem:[#allocation8 + $0x7a8] sm:$0xff]  ;;  %v1397_v23 = vld [vmem:[#allocation8 + $0x130] sm:$0xff] }
 0x30a   :  { %v1487_v26 = vld [vmem:[#allocation8 + $0x400] sm:$0xff]  ;;  %1735 = vmatpush.msra.mxu2 %v1444_v24 }
 0x30b   :  { %v1031_v31 = vadd.f32 %v1030_v29, %v1011_v10  ;;  %1679 = vmatpush.msrb.mxu3 %v1491_v63  ;;  %v1599_v10 = vld [vmem:[#allocation8 + $0x780] sm:$0xff]  ;;  %v1436_v29 = vld [vmem:[#allocation8 + $0x268] sm:$0xff] }
 0x30c   :  { %1736 = vmatpush.msra.mxu2 %v1440_v27 }
 0x30d   :  { %v1036_v35 = vmax.f32 %v1031_v31, 0.0  ;;  %1680 = vmatpush.msrb.mxu3 %v1487_v26  ;;  %v1432_v31 = vld [vmem:[#allocation8 + $0x248] sm:$0xff] }
 0x30e   :  { %1737 = vmatpush.msra.mxu2 %v1436_v29  ;;  %v1596_v26 = vld [vmem:[#allocation8 + $0x768] sm:$0xff]  ;;  %v1481_v29 = vld [vmem:[#allocation8 + $0x3d0] sm:$0xff] }
 0x30f   :  { %1181 = vmatmul.f32.vlgmr.msra.gmra.mxu0 %v1036_v35  ;;  %1745 = vmatpush.msra.mxu3 %v1548_v13  ;;  %v1428_v35 = vld [vmem:[#allocation8 + $0x228] sm:$0xff]  ;;  %v1389_v13 = vld [vmem:[#allocation8 + $0xf0] sm:$0xff] }
 0x310   :  { %1685 = vmatpush.msra.mxu0 %v1611_v20  ;;  %1738 = vmatpush.msra.mxu2 %v1432_v31  ;;  %v1492_v20 = vld [vmem:[#allocation8 + $0x428] sm:$0xff] }
 0x311   :  { %1746 = vmatpush.msra.mxu3 %v1544_v30  ;;  %v1385_v30 = vld [vmem:[#allocation8 + $0xd0] sm:$0xff]  ;;  %v1588_v31 = vld [vmem:[#allocation8 + $0x728] sm:$0xff] }
 0x312   :  { %1686 = vmatpush.msra.mxu0 %v1607_v33  ;;  %1739 = vmatpush.msra.mxu2 %v1428_v35  ;;  %v1600_v33 = vld [vmem:[#allocation8 + $0x788] sm:$0xff] }
 0x313   :  { %1747 = vmatpush.msra.mxu3 %v1540_v34  ;;  %v1381_v34 = vld [vmem:[#allocation8 + $0xb0] sm:$0xff]  ;;  %v1584_v35 = vld [vmem:[#allocation8 + $0x708] sm:$0xff] }
 0x314   :  { %1687 = vmatpush.msra.mxu0 %v1603_v25  ;;  %1740 = vmatpush.msra.mxu2 %v1424_v38  ;;  %v1393_v25 = vld [vmem:[#allocation8 + $0x110] sm:$0xff]  ;;  %v1580_v38 = vld [vmem:[#allocation8 + $0x6e8] sm:$0xff] }
 0x315   :  { %1748 = vmatpush.msra.mxu3 %v1536_v37  ;;  %v1377_v37 = vld [vmem:[#allocation8 + $0x90] sm:$0xff] }
 0x316   :  { %1688 = vmatpush.msra.mxu0 %v1599_v10  ;;  %v1485_v10 = vld [vmem:[#allocation8 + $0x3f0] sm:$0xff] }
 0x317   :  { %1351 = vmatmul.f32.vlgmr.msrb.gmra.mxu0 %v3609_v43  ;;  %v1388_v43 = vld [vmem:[#allocation8 + $0xe8] sm:$0xff]  ;;  %1749 = vmatpush.msra.mxu3 %v1532_v14  ;;  %v1373_v14 = vld [vmem:[#allocation8 + $0x70] sm:$0xff] }
 0x318   :  { %1713 = vmatpush.msra.mxu1 %v1388_v43  ;;  %1689 = vmatpush.msra.mxu0 %v1595_v28  ;;  %v1592_v28 = vld [vmem:[#allocation8 + $0x748] sm:$0xff] }
 0x319   :  { %1750 = vmatpush.msra.mxu3 %v1528_v44  ;;  %v1576_v44 = vld [vmem:[#allocation8 + $0x6c8] sm:$0xff] }
 0x31a   :  { %1714 = vmatpush.msra.mxu1 %v1384_v58  ;;  %1690 = vmatpush.msra.mxu0 %v1591_v32  ;;  %v1563_v58 = vld [vmem:[#allocation8 + $0x660] sm:$0xff]  ;;  %v1477_v32 = vld [vmem:[#allocation8 + $0x3b0] sm:$0xff] }
 0x31b   :  { %1751 = vmatpush.msra.mxu3 %v1524_v47  ;;  %v1365_v47 = vld [vmem:[#allocation8 + $0x30] sm:$0xff] }
 0x31c   :  { %1715 = vmatpush.msra.mxu1 %v1380_v62  ;;  %1691 = vmatpush.msra.mxu0 %v1587_v36  ;;  %v1508_v62 = vld [vmem:[#allocation8 + $0x4a8] sm:$0xff]  ;;  %v1473_v36 = vld [vmem:[#allocation8 + $0x390] sm:$0xff] }
 0x31d   :  { %1752 = vmatpush.msra.mxu3 %v1520_v49  ;;  %v1457_v49 = vld [vmem:[#allocation8 + $0x310] sm:$0xff] }
 0x31e   :  { %1716 = vmatpush.msra.mxu1 %v1376_v2  ;;  %1692 = vmatpush.msra.mxu0 %v1583_v39  ;;  %v1504_v2 = vld [vmem:[#allocation8 + $0x488] sm:$0xff]  ;;  %v1469_v39 = vld [vmem:[#allocation8 + $0x370] sm:$0xff] }
 0x31f   :  { %1753 = vmatpush.msra.mxu3 %v1516_v52 }
 0x320   :  { %1717 = vmatpush.msra.mxu1 %v1372_v5  ;;  %1693 = vmatpush.msra.mxu0 %v1579_v40  ;;  %v1551_v5 = vld [vmem:[#allocation8 + $0x600] sm:$0xff]  ;;  %v1465_v40 = vld [vmem:[#allocation8 + $0x350] sm:$0xff] }
 0x321   :  { %1754 = vmatpush.msra.mxu3 %v1512_v59  ;;  %v1564_v59 = vld [vmem:[#allocation8 + $0x668] sm:$0xff] }
 0x322   :  { %1718 = vmatpush.msra.mxu1 %v1368_v8  ;;  %1694 = vmatpush.msra.mxu0 %v1575_v45  ;;  %v1612_v8 = vld [vmem:[#allocation8 + $0x7e8] sm:$0xff]  ;;  %v1461_v45 = vld [vmem:[#allocation8 + $0x330] sm:$0xff] }
 0x323   :  { %1755 = vmatpush.msra.mxu3 %v1508_v62  ;;  %v1418_v62 = vld [vmem:[#allocation8 + $0x1d8] sm:$0xff] }
 0x324   :  { %1719 = vmatpush.msra.mxu1 %v1364_v15  ;;  %1695 = vmatpush.msra.mxu0 %v1571_v48  ;;  %v1405_v15 = vld [vmem:[#allocation8 + $0x170] sm:$0xff]  ;;  %v1572_v48 = vld [vmem:[#allocation8 + $0x6a8] sm:$0xff] }
 0x325   :  { %1756 = vmatpush.msra.mxu3 %v1504_v2  ;;  %v1269_v2 = vperm.slane %v4056_v46, 2 }
 0x326   :  { %1720 = vmatpush.msra.mxu1 %v1360_v18  ;;  %1696 = vmatpush.msra.mxu0 %v1567_v51  ;;  %v1401_v18 = vld [vmem:[#allocation8 + $0x150] sm:$0xff]  ;;  %v1568_v51 = vld [vmem:[#allocation8 + $0x688] sm:$0xff] }
 0x327   :  { %1757 = vmatpush.msra.mxu3 %v1500_v7  ;;  %v1441_v7 = vld [vmem:[#allocation8 + $0x290] sm:$0xff] }
 0x328   :  { %1697 = vmatpush.msra.mxu0 %v1563_v58 }
 0x329   :  { %1758 = vmatpush.msra.mxu3 %v1496_v16  ;;  %v1437_v16 = vld [vmem:[#allocation8 + $0x270] sm:$0xff] }
 0x32a   :  { %1698 = vmatpush.msra.mxu0 %v1559_v61  ;;  %v1449_v61 = vld [vmem:[#allocation8 + $0x2d0] sm:$0xff] }
 0x32b   :  { %1759 = vmatpush.msra.mxu3 %v1492_v20  ;;  %v1433_v20 = vld [vmem:[#allocation8 + $0x250] sm:$0xff] }
 0x32c   :  { %1699 = vmatpush.msra.mxu0 %v1555_v1  ;;  %v1560_v1 = vld [vmem:[#allocation8 + $0x648] sm:$0xff] }
 0x32d   :  { %1760 = vmatpush.msra.mxu3 %v1488_v60  ;;  %v1429_v60 = vld [vmem:[#allocation8 + $0x230] sm:$0xff] }
 0x32e   :  { %1700 = vmatpush.msra.mxu0 %v1551_v5  ;;  %v1556_v5 = vld [vmem:[#allocation8 + $0x628] sm:$0xff] }
 0x330   :  { %1765 = vmatpush.msrb.mxu0 %v1612_v8  ;;  %v1410_v8 = vld [vmem:[#allocation8 + $0x198] sm:$0xff] }
 0x332   :  { %1766 = vmatpush.msrb.mxu0 %v1608_v19  ;;  %v1549_v19 = vld [vmem:[#allocation8 + $0x5f0] sm:$0xff] }
 0x334   :  { %1767 = vmatpush.msrb.mxu0 %v1604_v22  ;;  %v1402_v22 = vld [vmem:[#allocation8 + $0x158] sm:$0xff] }
 0x336   :  { %1768 = vmatpush.msrb.mxu0 %v1600_v33  ;;  %v1398_v33 = vld [vmem:[#allocation8 + $0x138] sm:$0xff] }
 0x338   :  { %1769 = vmatpush.msrb.mxu0 %v1596_v26  ;;  %v1537_v26 = vld [vmem:[#allocation8 + $0x590] sm:$0xff] }
 0x33a   :  { %1770 = vmatpush.msrb.mxu0 %v1592_v28  ;;  %v1533_v28 = vld [vmem:[#allocation8 + $0x570] sm:$0xff] }
 0x33c   :  { %1771 = vmatpush.msrb.mxu0 %v1588_v31  ;;  %v1529_v31 = vld [vmem:[#allocation8 + $0x550] sm:$0xff] }
 0x33e   :  { %1772 = vmatpush.msrb.mxu0 %v1584_v35  ;;  %v1525_v35 = vld [vmem:[#allocation8 + $0x530] sm:$0xff] }
 0x340   :  { %1773 = vmatpush.msrb.mxu0 %v1580_v38  ;;  %v1521_v38 = vld [vmem:[#allocation8 + $0x510] sm:$0xff] }
 0x342   :  { %1774 = vmatpush.msrb.mxu0 %v1576_v44  ;;  %v1466_v44 = vld [vmem:[#allocation8 + $0x358] sm:$0xff] }
 0x344   :  { %1775 = vmatpush.msrb.mxu0 %v1572_v48  ;;  %v1513_v48 = vld [vmem:[#allocation8 + $0x4d0] sm:$0xff] }
 0x346   :  { %1776 = vmatpush.msrb.mxu0 %v1568_v51  ;;  %v1509_v51 = vld [vmem:[#allocation8 + $0x4b0] sm:$0xff] }
 0x347   :  { %v1122_v41 = vpop.f32.mrf.mxu1 }
 0x348   :  { %v1123_v3 = vadd.f32 %v3046_v55, %v1122_v41  ;;  %v1369_v41 = vld [vmem:[#allocation8 + $0x50] sm:$0xff]  ;;  %1777 = vmatpush.msrb.mxu0 %v1564_v59 }
 0x349   :  { %v1453_v55 = vld [vmem:[#allocation8 + $0x2f0] sm:$0xff] }
 0x34a   :  { %1778 = vmatpush.msrb.mxu0 %v1560_v1  ;;  %v1501_v59 = vld [vmem:[#allocation8 + $0x470] sm:$0xff] }
 0x34b   :  { %v1497_v1 = vld [vmem:[#allocation8 + $0x450] sm:$0xff] }
 0x34c   :  { %1779 = vmatpush.msrb.mxu0 %v1556_v5  ;;  %v1609_v5 = vld [vmem:[#allocation8 + $0x7d0] sm:$0xff] }
 0x34f   :  { %v1292_v53 = vpop.f32.mrf.mxu1 }
 0x350   :  { %v1293_v54 = vadd.f32 %v1292_v53, %v1267_v50  ;;  %v1361_v50 = vld [vmem:[#allocation8 + $0x10] sm:$0xff]  ;;  %v170_v53 = vpop.xlane.xlu1 %169 }
 0x351   :  { %v184_v58 = vmul.f32 %v3392_v11, %v170_v53  ;;  %v1270_v53 = vperm.slane %v4056_v46, 3  ;;  %v1613_v46 = vld [vmem:[#allocation8 + $0x7f0] sm:$0xff] }
 0x352   :  { %v4062_v43 = vmax.f32 %v1293_v54, 0.0 }
 0x354   :  { %1641 = vmatmul.f32.vlgmr.msrb.gmra.mxu1 %v4062_v43 }
 0x355   :  { %1785 = vmatpush.msrb.mxu1 %v1421_v56  ;;  %v1422_v56 = vld [vmem:[#allocation8 + $0x1f8] sm:$0xff] }
 0x357   :  { %v1142_v6 = vpop.f32.mrf.mxu2  ;;  %1786 = vmatpush.msrb.mxu1 %v1417_v0  ;;  %v4079_v0 = vsub.f32 %v4040_v57, %v184_v58 }
 0x358   :  { %v4065_v9 = vadd.f32 %v1142_v6, %v1123_v3  ;;  %v1445_v3 = vld [vmem:[#allocation8 + $0x2b0] sm:$0xff] }
 0x359   :  { %1787 = vmatpush.msrb.mxu1 %v1413_v4  ;;  %v1414_v4 = vld [vmem:[#allocation8 + $0x1b8] sm:$0xff]  ;;  %v190_v6 = vmul.f32 %v4079_v0, %v4079_v0 }
 0x35b   :  { %1788 = vmatpush.msrb.mxu1 %v1409_v12  ;;  %v193_v57 = vsel %vm167_vm0, %v190_v6, 0.0  ;;  %v1442_v6 = vld [vmem:[#allocation8 + $0x298] sm:$0xff] }
 0x35c   :  { %1721 = vmatmul.f32.vlgmr.msra.gmra.mxu1 %v4062_v43  ;;  %194 = vadd.xlane.f32.xlu2 %v193_v57  ;;  %v1438_v57 = vld [vmem:[#allocation8 + $0x278] sm:$0xff] }
 0x35d   :  { %1789 = vmatpush.msrb.mxu1 %v1405_v15 }
 0x35f   :  { %v1312_v63 = vpop.f32.mrf.mxu2  ;;  %1790 = vmatpush.msrb.mxu1 %v1401_v18 }
 0x360   :  { %v1313_v24 = vadd.f32 %v1312_v63, %v1268_v17  ;;  %v1406_v17 = vld [vmem:[#allocation8 + $0x178] sm:$0xff]  ;;  %v1541_v63 = vld [vmem:[#allocation8 + $0x5b0] sm:$0xff] }
 0x361   :  { %1791 = vmatpush.msrb.mxu1 %v1397_v23  ;;  %v1545_v23 = vld [vmem:[#allocation8 + $0x5d0] sm:$0xff] }
 0x362   :  { %v4069_v27 = vmax.f32 %v1313_v24, 0.0  ;;  %v1425_v24 = vld [vmem:[#allocation8 + $0x210] sm:$0xff] }
 0x363   :  { %1792 = vmatpush.msrb.mxu1 %v1393_v25  ;;  %v1394_v25 = vld [vmem:[#allocation8 + $0x118] sm:$0xff] }
 0x364   :  { %1661 = vmatmul.f32.vlgmr.msrb.gmra.mxu2 %v4069_v27 }
 0x365   :  { %1805 = vmatpush.msrb.mxu2 %v1485_v10  ;;  %1793 = vmatpush.msrb.mxu1 %v1389_v13  ;;  %v1486_v10 = vld [vmem:[#allocation8 + $0x3f8] sm:$0xff] }
 0x366   :  { %v1390_v13 = vld [vmem:[#allocation8 + $0xf8] sm:$0xff] }
 0x367   :  { %1806 = vmatpush.msrb.mxu2 %v1481_v29  ;;  %1794 = vmatpush.msrb.mxu1 %v1385_v30  ;;  %v1482_v29 = vld [vmem:[#allocation8 + $0x3d8] sm:$0xff] }
 0x368   :  { %v1386_v30 = vld [vmem:[#allocation8 + $0xd8] sm:$0xff] }
 0x369   :  { %1807 = vmatpush.msrb.mxu2 %v1477_v32  ;;  %1795 = vmatpush.msrb.mxu1 %v1381_v34  ;;  %v1478_v32 = vld [vmem:[#allocation8 + $0x3b8] sm:$0xff] }
 0x36a   :  { %v1382_v34 = vld [vmem:[#allocation8 + $0xb8] sm:$0xff] }
 0x36b   :  { %1808 = vmatpush.msrb.mxu2 %v1473_v36  ;;  %1796 = vmatpush.msrb.mxu1 %v1377_v37  ;;  %v1474_v36 = vld [vmem:[#allocation8 + $0x398] sm:$0xff] }
 0x36c   :  { %1741 = vmatmul.f32.vlgmr.msra.gmra.mxu2 %v4069_v27  ;;  %v1378_v37 = vld [vmem:[#allocation8 + $0x98] sm:$0xff] }
 0x36d   :  { %1809 = vmatpush.msrb.mxu2 %v1469_v39  ;;  %1797 = vmatpush.msrb.mxu1 %v1373_v14  ;;  %v1470_v39 = vld [vmem:[#allocation8 + $0x378] sm:$0xff] }
 0x36e   :  { %v1374_v14 = vld [vmem:[#allocation8 + $0x78] sm:$0xff] }
 0x36f   :  { %1810 = vmatpush.msrb.mxu2 %v1465_v40  ;;  %1798 = vmatpush.msrb.mxu1 %v1369_v41  ;;  %v1517_v41 = vld [vmem:[#allocation8 + $0x4f0] sm:$0xff] }
 0x371   :  { %v1162_v52 = vpop.f32.mrf.mxu3  ;;  %1811 = vmatpush.msrb.mxu2 %v1461_v45  ;;  %1799 = vmatpush.msrb.mxu1 %v1365_v47  ;;  %v1370_v47 = vld [vmem:[#allocation8 + $0x58] sm:$0xff] }
 0x372   :  { %v4074_v54 = vadd.f32 %v1162_v52, %v4065_v9  ;;  %v1552_v9 = vld [vmem:[#allocation8 + $0x608] sm:$0xff]  ;;  %v1458_v52 = vld [vmem:[#allocation8 + $0x318] sm:$0xff] }
 0x373   :  { %1812 = vmatpush.msrb.mxu2 %v1457_v49  ;;  %1800 = vmatpush.msrb.mxu1 %v1361_v50  ;;  %v1462_v49 = vld [vmem:[#allocation8 + $0x338] sm:$0xff] }
 0x374   :  { %1801 = vmatmul.f32.vlgmr.msrb.gmra.mxu1 %v4062_v43  ;;  %1780 = vmatpush.msrb.mxu0 %v1552_v9  ;;  %v1366_v50 = vld [vmem:[#allocation8 + $0x38] sm:$0xff]  ;;  %v1601_v9 = vld [vmem:[#allocation8 + $0x790] sm:$0xff] }
 0x375   :  { %1813 = vmatpush.msrb.mxu2 %v1453_v55  ;;  %1865 = vmatpush.msra.mxu1 %v1422_v56  ;;  %v1362_v55 = vld [vmem:[#allocation8 + $0x18] sm:$0xff]  ;;  %v1505_v56 = vld [vmem:[#allocation8 + $0x490] sm:$0xff] }
 0x377   :  { %1814 = vmatpush.msrb.mxu2 %v1449_v61  ;;  %1866 = vmatpush.msra.mxu1 %v1418_v62  ;;  %v1450_v61 = vld [vmem:[#allocation8 + $0x2d8] sm:$0xff] }
 0x379   :  { %v1332_v12 = vpop.f32.mrf.mxu3  ;;  %1815 = vmatpush.msrb.mxu2 %v1445_v3  ;;  %1867 = vmatpush.msra.mxu1 %v1414_v4  ;;  %v1446_v3 = vld [vmem:[#allocation8 + $0x2b8] sm:$0xff]  ;;  %v1493_v4 = vld [vmem:[#allocation8 + $0x430] sm:$0xff] }
 0x37a   :  { %v1333_v15 = vadd.f32 %v1332_v12, %v1269_v2  ;;  %v1546_v12 = vld [vmem:[#allocation8 + $0x5d8] sm:$0xff] }
 0x37b   :  { %1816 = vmatpush.msrb.mxu2 %v1441_v7  ;;  %1868 = vmatpush.msra.mxu1 %v1410_v8  ;;  %v1489_v7 = vld [vmem:[#allocation8 + $0x410] sm:$0xff] }
 0x37c   :  { %v4085_v18 = vmax.f32 %v1333_v15, 0.0  ;;  %v1605_v8 = vld [vmem:[#allocation8 + $0x7b0] sm:$0xff] }
 0x37d   :  { %1817 = vmatpush.msrb.mxu2 %v1437_v16  ;;  %1869 = vmatpush.msra.mxu1 %v1406_v17  ;;  %v1597_v15 = vld [vmem:[#allocation8 + $0x770] sm:$0xff]  ;;  %v1434_v16 = vld [vmem:[#allocation8 + $0x258] sm:$0xff] }
 0x37e   :  { %1681 = vmatmul.f32.vlgmr.msrb.gmra.mxu3 %v4085_v18  ;;  %v1542_v17 = vld [vmem:[#allocation8 + $0x5b8] sm:$0xff] }
 0x37f   :  { %1825 = vmatpush.msrb.mxu3 %v1549_v19  ;;  %1818 = vmatpush.msrb.mxu2 %v1433_v20  ;;  %v1593_v19 = vld [vmem:[#allocation8 + $0x750] sm:$0xff]  ;;  %v1430_v20 = vld [vmem:[#allocation8 + $0x238] sm:$0xff] }
 0x380   :  { %1870 = vmatpush.msra.mxu1 %v1402_v22  ;;  %v1538_v22 = vld [vmem:[#allocation8 + $0x598] sm:$0xff] }
 0x381   :  { %1826 = vmatpush.msrb.mxu3 %v1545_v23  ;;  %1819 = vmatpush.msrb.mxu2 %v1429_v60  ;;  %v1589_v23 = vld [vmem:[#allocation8 + $0x730] sm:$0xff]  ;;  %v1426_v60 = vld [vmem:[#allocation8 + $0x218] sm:$0xff] }
 0x382   :  { %1871 = vmatpush.msra.mxu1 %v1398_v33  ;;  %v1534_v33 = vld [vmem:[#allocation8 + $0x578] sm:$0xff] }
 0x383   :  { %1827 = vmatpush.msrb.mxu3 %v1541_v63  ;;  %1820 = vmatpush.msrb.mxu2 %v1425_v24  ;;  %v1585_v63 = vld [vmem:[#allocation8 + $0x710] sm:$0xff]  ;;  %v1530_v24 = vld [vmem:[#allocation8 + $0x558] sm:$0xff] }
 0x384   :  { %1821 = vmatmul.f32.vlgmr.msrb.gmra.mxu2 %v4069_v27  ;;  %1872 = vmatpush.msra.mxu1 %v1394_v25  ;;  %v1581_v25 = vld [vmem:[#allocation8 + $0x6f0] sm:$0xff] }
 0x385   :  { %1828 = vmatpush.msrb.mxu3 %v1537_v26  ;;  %1885 = vmatpush.msra.mxu2 %v1486_v10  ;;  %v1526_v26 = vld [vmem:[#allocation8 + $0x538] sm:$0xff]  ;;  %v1577_v10 = vld [vmem:[#allocation8 + $0x6d0] sm:$0xff] }
 0x386   :  { %1761 = vmatmul.f32.vlgmr.msra.gmra.mxu3 %v4085_v18  ;;  %1873 = vmatpush.msra.mxu1 %v1390_v13  ;;  %v1522_v13 = vld [vmem:[#allocation8 + $0x518] sm:$0xff] }
 0x387   :  { %1829 = vmatpush.msrb.mxu3 %v1533_v28  ;;  %1886 = vmatpush.msra.mxu2 %v1482_v29  ;;  %v1573_v28 = vld [vmem:[#allocation8 + $0x6b0] sm:$0xff]  ;;  %v173_v29 = vpop.xlane.xlu1 %172 }
 0x388   :  { %1874 = vmatpush.msra.mxu1 %v1386_v30  ;;  %v1518_v30 = vld [vmem:[#allocation8 + $0x4f8] sm:$0xff] }
 0x389   :  { %1830 = vmatpush.msrb.mxu3 %v1529_v31  ;;  %1887 = vmatpush.msra.mxu2 %v1478_v32  ;;  %v185_v31 = vmul.f32 %v3392_v11, %v173_v29  ;;  %v1569_v32 = vld [vmem:[#allocation8 + $0x690] sm:$0xff]  ;;  %v2975_v29 = vld [vmem:[#allocation9 + $0x18] sm:$0xff] }
 0x38a   :  { %1875 = vmatpush.msra.mxu1 %v1382_v34  ;;  %v1514_v34 = vld [vmem:[#allocation8 + $0x4d8] sm:$0xff] }
 0x38b   :  { %1831 = vmatpush.msrb.mxu3 %v1525_v35  ;;  %1888 = vmatpush.msra.mxu2 %v1474_v36  ;;  %v1565_v35 = vld [vmem:[#allocation8 + $0x670] sm:$0xff]  ;;  %v1510_v36 = vld [vmem:[#allocation8 + $0x4b8] sm:$0xff] }
 0x38c   :  { %v1182_v40 = vpop.f32.mrf.mxu0  ;;  %1876 = vmatpush.msra.mxu1 %v1378_v37 }
 0x38d   :  { %v4091_v45 = vadd.f32 %v1182_v40, %v4074_v54  ;;  %1832 = vmatpush.msrb.mxu3 %v1521_v38  ;;  %1889 = vmatpush.msra.mxu2 %v1470_v39  ;;  %v1454_v54 = vld [vmem:[#allocation8 + $0x2f8] sm:$0xff]  ;;  %v1561_v38 = vld [vmem:[#allocation8 + $0x650] sm:$0xff] }
 0x38e   :  { %1877 = vmatpush.msra.mxu1 %v1374_v14  ;;  %v1506_v39 = vld [vmem:[#allocation8 + $0x498] sm:$0xff]  ;;  %v1557_v40 = vld [vmem:[#allocation8 + $0x630] sm:$0xff] }
 0x38f   :  { %1833 = vmatpush.msrb.mxu3 %v1517_v41  ;;  %1890 = vmatpush.msra.mxu2 %v1466_v44  ;;  %v1502_v41 = vld [vmem:[#allocation8 + $0x478] sm:$0xff] }
 0x390   :  { %1878 = vmatpush.msra.mxu1 %v1370_v47  ;;  %v1498_v44 = vld [vmem:[#allocation8 + $0x458] sm:$0xff] }
 0x391   :  { %1834 = vmatpush.msrb.mxu3 %v1513_v48  ;;  %1891 = vmatpush.msra.mxu2 %v1462_v49  ;;  %v1614_v47 = vld [vmem:[#allocation8 + $0x7f8] sm:$0xff] }
 0x392   :  { %1879 = vmatpush.msra.mxu1 %v1366_v50  ;;  %v1494_v48 = vld [vmem:[#allocation8 + $0x438] sm:$0xff] }
 0x393   :  { %1835 = vmatpush.msrb.mxu3 %v1509_v51  ;;  %1892 = vmatpush.msra.mxu2 %v1458_v52  ;;  %v1610_v49 = vld [vmem:[#allocation8 + $0x7d8] sm:$0xff]  ;;  %v1963_v52 = vld [vmem:[%s4386_s14 + $0x70] sm:$0xff] }
 0x394   :  { %v1352_v58 = vpop.f32.mrf.mxu0  ;;  %1880 = vmatpush.msra.mxu1 %v1362_v55  ;;  %v1964_v50 = vld [vmem:[%s4386_s14 + $0x78] sm:$0xff]  ;;  %v1962_v55 = vld [vmem:[%s4386_s14 + $0x68] sm:$0xff] }
 0x395   :  { %v1353_v62 = vadd.f32 %v1352_v58, %v1270_v53  ;;  %1836 = vmatpush.msrb.mxu3 %v1505_v56  ;;  %1893 = vmatpush.msra.mxu2 %v1454_v54  ;;  %v1490_v51 = vld [vmem:[#allocation8 + $0x418] sm:$0xff] }
 0x396   :  { %1881 = vmatmul.f32.vlgmr.msra.gmra.mxu1 %v4062_v43  ;;  %v1550_v43 = vld [vmem:[#allocation8 + $0x5f8] sm:$0xff] }
 0x397   :  { %v4095_v2 = vmax.f32 %v1353_v62, 0.0  ;;  %1837 = vmatpush.msrb.mxu3 %v1501_v59  ;;  %1894 = vmatpush.msra.mxu2 %v1450_v61  ;;  %v1606_v53 = vld [vmem:[#allocation8 + $0x7b8] sm:$0xff]  ;;  %v1959_v62 = vld [vmem:[%s4386_s14 + $0x50] sm:$0xff] }
 0x398   :  { %2017 = vmatpush.msrb.mxu1 %v1964_v50  ;;  %v1602_v56 = vld [vmem:[#allocation8 + $0x798] sm:$0xff]  ;;  %v1967_v50 = vld [vmem:[%s4386_s14 + $0x90] sm:$0xff] }
 0x399   :  { %1701 = vmatmul.f32.vlgmr.msra.gmra.mxu0 %v4095_v2  ;;  %1838 = vmatpush.msrb.mxu3 %v1497_v1  ;;  %v1961_v54 = vld [vmem:[%s4386_s14 + $0x60] sm:$0xff]  ;;  %v1960_v59 = vld [vmem:[%s4386_s14 + $0x58] sm:$0xff] }
 0x39a   :  { %1845 = vmatpush.msra.mxu0 %v1613_v46  ;;  %1895 = vmatpush.msra.mxu2 %v1446_v3  ;;  %v1598_v58 = vld [vmem:[#allocation8 + $0x778] sm:$0xff] }
 0x39b   :  { %1839 = vmatpush.msrb.mxu3 %v1493_v4  ;;  %2018 = vmatpush.msrb.mxu1 %v1963_v52  ;;  %v1594_v61 = vld [vmem:[#allocation8 + $0x758] sm:$0xff]  ;;  %v1994_v52 = vld [vmem:[%s4386_s14 + $0x168] sm:$0xff] }
 0x39c   :  { %1846 = vmatpush.msra.mxu0 %v1609_v5  ;;  %1896 = vmatpush.msra.mxu2 %v1442_v6  ;;  %v1590_v1 = vld [vmem:[#allocation8 + $0x738] sm:$0xff] }
 0x39d   :  { %1840 = vmatpush.msrb.mxu3 %v1489_v7  ;;  %2019 = vmatpush.msrb.mxu1 %v1962_v55  ;;  %v1586_v46 = vld [vmem:[#allocation8 + $0x718] sm:$0xff]  ;;  %v1955_v7 = vld [vmem:[%s4386_s14 + $0x30] sm:$0xff] }
 0x39e   :  { %1847 = vmatpush.msra.mxu0 %v1605_v8  ;;  %1841 = vmatmul.f32.vlgmr.msrb.gmra.mxu3 %v4085_v18  ;;  %v1582_v3 = vld [vmem:[#allocation8 + $0x6f8] sm:$0xff] }
 0x39f   :  { %1905 = vmatpush.msra.mxu3 %v1550_v43  ;;  %1897 = vmatpush.msra.mxu2 %v1438_v57  ;;  %v1957_v4 = vld [vmem:[%s4386_s14 + $0x40] sm:$0xff]  ;;  %v1956_v5 = vld [vmem:[%s4386_s14 + $0x38] sm:$0xff]  ;;  %v1954_v43 = vld [vmem:[%s4386_s14 + $0x28] sm:$0xff] }
 0x3a0   :  { %1848 = vmatpush.msra.mxu0 %v1601_v9  ;;  %2020 = vmatpush.msrb.mxu1 %v1961_v54  ;;  %v1578_v6 = vld [vmem:[#allocation8 + $0x6d8] sm:$0xff] }
 0x3a1   :  { %1781 = vmatmul.f32.vlgmr.msrb.gmra.mxu0 %v4095_v2  ;;  %1906 = vmatpush.msra.mxu3 %v1546_v12  ;;  %v1574_v8 = vld [vmem:[#allocation8 + $0x6b8] sm:$0xff] }
 0x3a2   :  { %1849 = vmatpush.msra.mxu0 %v1597_v15  ;;  %1898 = vmatpush.msra.mxu2 %v1434_v16  ;;  %v1570_v57 = vld [vmem:[#allocation8 + $0x698] sm:$0xff] }
 0x3a3   :  { %1907 = vmatpush.msra.mxu3 %v1542_v17  ;;  %2021 = vmatpush.msrb.mxu1 %v1960_v59  ;;  %v1566_v9 = vld [vmem:[#allocation8 + $0x678] sm:$0xff]  ;;  %v1951_v17 = vld [vmem:[%s4386_s14 + $0x10] sm:$0xff] }
 0x3a4   :  { %1850 = vmatpush.msra.mxu0 %v1593_v19  ;;  %1899 = vmatpush.msra.mxu2 %v1430_v20  ;;  %v1953_v12 = vld [vmem:[%s4386_s14 + $0x20] sm:$0xff]  ;;  %v1952_v16 = vld [vmem:[%s4386_s14 + $0x18] sm:$0xff]  ;;  %v1950_v20 = vld [vmem:[%s4386_s14 + $0x8] sm:$0xff] }
 0x3a5   :  { %1908 = vmatpush.msra.mxu3 %v1538_v22  ;;  %2022 = vmatpush.msrb.mxu1 %v1959_v62  ;;  %v1562_v15 = vld [vmem:[#allocation8 + $0x658] sm:$0xff]  ;;  %v1991_v59 = vld [vmem:[%s4386_s14 + $0x150] sm:$0xff] }
 0x3a6   :  { %1851 = vmatpush.msra.mxu0 %v1589_v23  ;;  %1900 = vmatpush.msra.mxu2 %v1426_v60  ;;  %v1558_v19 = vld [vmem:[#allocation8 + $0x638] sm:$0xff] }
 0x3a7   :  { %1901 = vmatmul.f32.vlgmr.msra.gmra.mxu2 %v4069_v27  ;;  %1909 = vmatpush.msra.mxu3 %v1534_v33  ;;  %v4103_v27 = vsub.f32 %v4049_v21, %v185_v31  ;;  %v1553_v21 = vld [vmem:[#allocation8 + $0x610] sm:$0xff]  ;;  %v1554_v22 = vld [vmem:[#allocation8 + $0x618] sm:$0xff] }
 0x3a8   :  { %1852 = vmatpush.msra.mxu0 %v1585_v63  ;;  %v1949_v23 = vld [vmem:[%s4386_s14] sm:$0xff]  ;;  %v2978_v33 = vld [vmem:[#allocation9 + $0x30] sm:$0xff] }
 0x3a9   :  { %1910 = vmatpush.msra.mxu3 %v1530_v24  ;;  %v191_v37 = vmul.f32 %v4103_v27, %v4103_v27  ;;  %v2979_v60 = vld [vmem:[#allocation9 + $0x38] sm:$0xff]  ;;  %v1979_v24 = vld [vmem:[%s4386_s14 + $0xf0] sm:$0xff] }
 0x3aa   :  { %1853 = vmatpush.msra.mxu0 %v1581_v25  ;;  %v1980_v63 = vld [vmem:[%s4386_s14 + $0xf8] sm:$0xff]  ;;  %v2977_v25 = vld [vmem:[#allocation9 + $0x28] sm:$0xff]  ;;  %v1993_v55 = vld [vmem:[%s4386_s14 + $0x160] sm:$0xff] }
 0x3ab   :  { %1911 = vmatpush.msra.mxu3 %v1526_v26  ;;  %v196_v14 = vsel %vm167_vm0, %v191_v37, 0.0  ;;  %2037 = vmatpush.msrb.mxu2 %v1980_v63  ;;  %v1978_v26 = vld [vmem:[%s4386_s14 + $0xe8] sm:$0xff]  ;;  %v2974_v31 = vld [vmem:[#allocation9 + $0x10] sm:$0xff]  ;;  %v4261_v63 = vld [vmem:[%s4407_s23] ss:$0 sm:$0xff] }
 0x3ac   :  { %1854 = vmatpush.msra.mxu0 %v1577_v10  ;;  %197 = vadd.xlane.f32.xlu2 %v196_v14  ;;  %v1977_v10 = vld [vmem:[%s4386_s14 + $0xe0] sm:$0xff]  ;;  %v1972_v37 = vld [vmem:[%s4386_s14 + $0xb8] sm:$0xff] }
 0x3ad   :  { %1912 = vmatpush.msra.mxu3 %v1522_v13  ;;  %2038 = vmatpush.msrb.mxu2 %v1979_v24  ;;  %v1976_v13 = vld [vmem:[%s4386_s14 + $0xd8] sm:$0xff] }
 0x3ae   :  { %1855 = vmatpush.msra.mxu0 %v1573_v28  ;;  %v1975_v28 = vld [vmem:[%s4386_s14 + $0xd0] sm:$0xff]  ;;  %v1992_v54 = vld [vmem:[%s4386_s14 + $0x158] sm:$0xff] }
 0x3af   :  { %1913 = vmatpush.msra.mxu3 %v1518_v30  ;;  %2039 = vmatpush.msrb.mxu2 %v1978_v26  ;;  %v1974_v30 = vld [vmem:[%s4386_s14 + $0xc8] sm:$0xff] }
 0x3b0   :  { %1856 = vmatpush.msra.mxu0 %v1569_v32  ;;  %v1982_v26 = vld [vmem:[%s4386_s14 + $0x108] sm:$0xff] }
 0x3b1   :  { %1914 = vmatpush.msra.mxu3 %v1514_v34  ;;  %2040 = vmatpush.msrb.mxu2 %v1977_v10 }
 0x3b2   :  { %1857 = vmatpush.msra.mxu0 %v1565_v35  ;;  %v1973_v35 = vld [vmem:[%s4386_s14 + $0xc0] sm:$0xff] }
 0x3b3   :  { %1915 = vmatpush.msra.mxu3 %v1510_v36  ;;  %2041 = vmatpush.msrb.mxu2 %v1976_v13  ;;  %v1981_v13 = vld [vmem:[%s4386_s14 + $0x100] sm:$0xff] }
 0x3b4   :  { %1858 = vmatpush.msra.mxu0 %v1561_v38  ;;  %v2973_v38 = vld [vmem:[#allocation9 + $0x8] sm:$0xff] }
 0x3b5   :  { %1916 = vmatpush.msra.mxu3 %v1506_v39  ;;  %2042 = vmatpush.msrb.mxu2 %v1975_v28  ;;  %v1971_v39 = vld [vmem:[%s4386_s14 + $0xb0] sm:$0xff] }
 0x3b6   :  { %1859 = vmatpush.msra.mxu0 %v1557_v40  ;;  %v1970_v40 = vld [vmem:[%s4386_s14 + $0xa8] sm:$0xff] }
 0x3b7   :  { %1917 = vmatpush.msra.mxu3 %v1502_v41  ;;  %2043 = vmatpush.msrb.mxu2 %v1974_v30  ;;  %v1969_v41 = vld [vmem:[%s4386_s14 + $0xa0] sm:$0xff] }
 0x3b8   :  { %1860 = vmatpush.msra.mxu0 %v1553_v21  ;;  %v2972_v21 = vld [vmem:[#allocation9] sm:$0xff]  ;;  %v4273_v30 = vld [vmem:[%s4408_s6] ss:$0 sm:$0xff] }
 0x3b9   :  { %1861 = vmatmul.f32.vlgmr.msra.gmra.mxu0 %v4095_v2  ;;  %1918 = vmatpush.msra.mxu3 %v1498_v44  ;;  %v1996_v44 = vld [vmem:[%s4386_s14 + $0x178] sm:$0xff] }
 0x3ba   :  { %1925 = vmatpush.msrb.mxu0 %v1614_v47  ;;  %2044 = vmatpush.msrb.mxu2 %v1973_v35  ;;  %v3010_v35 = vld [vmem:[#allocation9 + $0xb0] sm:$0xff] }
 0x3bb   :  { %1919 = vmatpush.msra.mxu3 %v1494_v48  ;;  %v1968_v48 = vld [vmem:[%s4386_s14 + $0x98] sm:$0xff] }
 0x3bc   :  { %1926 = vmatpush.msrb.mxu0 %v1610_v49  ;;  %2045 = vmatpush.msrb.mxu2 %v1972_v37  ;;  %v1995_v49 = vld [vmem:[%s4386_s14 + $0x170] sm:$0xff]  ;;  %v2010_v37 = vld [vmem:[%s4386_s14 + $0x1e8] sm:$0xff] }
 0x3bd   :  { %1920 = vmatpush.msra.mxu3 %v1490_v51 }
 0x3be   :  { %1927 = vmatpush.msrb.mxu0 %v1606_v53  ;;  %1921 = vmatmul.f32.vlgmr.msra.gmra.mxu3 %v4085_v18  ;;  %v1958_v18 = vld [vmem:[%s4386_s14 + $0x48] sm:$0xff] }
 0x3bf   :  { %2023 = vmatpush.msrb.mxu1 %v1958_v18  ;;  %2046 = vmatpush.msrb.mxu2 %v1971_v39  ;;  %v1966_v53 = vld [vmem:[%s4386_s14 + $0x88] sm:$0xff]  ;;  %v4235_v18 = vld [vmem:[%s4385_s13] sm:$0xf] }
 0x3c0   :  { %1928 = vmatpush.msrb.mxu0 %v1602_v56  ;;  %2057 = vmatpush.msrb.mxu3 %v1996_v44  ;;  %v1965_v56 = vld [vmem:[%s4386_s14 + $0x80] sm:$0xff] }
 0x3c1   :  { %2024 = vmatpush.msrb.mxu1 %v1957_v4  ;;  %2047 = vmatpush.msrb.mxu2 %v1970_v40  ;;  %v2009_v40 = vld [vmem:[%s4386_s14 + $0x1e0] sm:$0xff] }
 0x3c2   :  { %1929 = vmatpush.msrb.mxu0 %v1598_v58  ;;  %2058 = vmatpush.msrb.mxu3 %v1995_v49  ;;  %v2995_v44 = vld [vmem:[#allocation9 + $0x78] sm:$0xff]  ;;  %v3008_v49 = vld [vmem:[#allocation9 + $0xa0] sm:$0xff] }
 0x3c3   :  { %2025 = vmatpush.msrb.mxu1 %v1956_v5  ;;  %2048 = vmatpush.msrb.mxu2 %v1969_v41  ;;  %v1987_v5 = vld [vmem:[%s4386_s14 + $0x130] sm:$0xff] }
 0x3c4   :  { %1930 = vmatpush.msrb.mxu0 %v1594_v61  ;;  %2059 = vmatpush.msrb.mxu3 %v1994_v52  ;;  %v1990_v61 = vld [vmem:[%s4386_s14 + $0x148] sm:$0xff] }
 0x3c5   :  { %2026 = vmatpush.msrb.mxu1 %v1955_v7  ;;  %2049 = vmatpush.msrb.mxu2 %v1968_v48  ;;  %v3009_v41 = vld [vmem:[#allocation9 + $0xa8] sm:$0xff] }
 0x3c6   :  { %1931 = vmatpush.msrb.mxu0 %v1590_v1  ;;  %2060 = vmatpush.msrb.mxu3 %v1993_v55  ;;  %v1989_v1 = vld [vmem:[%s4386_s14 + $0x140] sm:$0xff]  ;;  %v2007_v48 = vld [vmem:[%s4386_s14 + $0x1d0] sm:$0xff] }
 0x3c7   :  { %2027 = vmatpush.msrb.mxu1 %v1954_v43  ;;  %2050 = vmatpush.msrb.mxu2 %v1967_v50  ;;  %v2006_v50 = vld [vmem:[%s4386_s14 + $0x1c8] sm:$0xff] }
 0x3c8   :  { %1932 = vmatpush.msrb.mxu0 %v1586_v46  ;;  %2061 = vmatpush.msrb.mxu3 %v1992_v54  ;;  %v1988_v46 = vld [vmem:[%s4386_s14 + $0x138] sm:$0xff] }
 0x3c9   :  { %2028 = vmatpush.msrb.mxu1 %v1953_v12  ;;  %2051 = vmatpush.msrb.mxu2 %v1966_v53  ;;  %v2005_v53 = vld [vmem:[%s4386_s14 + $0x1c0] sm:$0xff]  ;;  %v2004_v54 = vld [vmem:[%s4386_s14 + $0x1b8] sm:$0xff] }
 0x3ca   :  { %1933 = vmatpush.msrb.mxu0 %v1582_v3  ;;  %2062 = vmatpush.msrb.mxu3 %v1991_v59  ;;  %v2993_v59 = vld [vmem:[#allocation9 + $0x68] sm:$0xff] }
 0x3cb   :  { %2029 = vmatpush.msrb.mxu1 %v1952_v16  ;;  %2052 = vmatpush.msrb.mxu2 %v1965_v56  ;;  %v3007_v56 = vld [vmem:[#allocation9 + $0x98] sm:$0xff] }
 0x3cc   :  { %1934 = vmatpush.msrb.mxu0 %v1578_v6  ;;  %2063 = vmatpush.msrb.mxu3 %v1990_v61  ;;  %v1617_v6 = vperm.slane %v4235_v18, 0  ;;  %v2003_v61 = vld [vmem:[%s4386_s14 + $0x1b0] sm:$0xff] }
 0x3cd   :  { %2030 = vmatpush.msrb.mxu1 %v1951_v17 }
 0x3ce   :  { %1935 = vmatpush.msrb.mxu0 %v1574_v8  ;;  %2064 = vmatpush.msrb.mxu3 %v1989_v1  ;;  %v1986_v8 = vld [vmem:[%s4386_s14 + $0x128] sm:$0xff] }
 0x3cf   :  { %2031 = vmatpush.msrb.mxu1 %v1950_v20  ;;  %v195_v32 = vpop.xlane.xlu2 %194  ;;  %v2002_v1 = vld [vmem:[%s4386_s14 + $0x1a8] sm:$0xff] }
 0x3d0   :  { %1936 = vmatpush.msrb.mxu0 %v1570_v57  ;;  %v202_v34 = vmul.f32 %v195_v32, %v3392_v11  ;;  %2065 = vmatpush.msrb.mxu3 %v1988_v46  ;;  %v2012_v32 = vld [vmem:[%s4386_s14 + $0x1f8] sm:$0xff]  ;;  %v2992_v46 = vld [vmem:[#allocation9 + $0x60] sm:$0xff] }
 0x3d1   :  { %2032 = vmatpush.msrb.mxu1 %v1949_v23  ;;  %v1642_v3 = vpop.f32.mrf.mxu1 }
 0x3d2   :  { %1937 = vmatpush.msrb.mxu0 %v1566_v9  ;;  %v205_v36 = vadd.f32 1e-05, %v202_v34  ;;  %2066 = vmatpush.msrb.mxu3 %v1987_v5  ;;  %v1985_v9 = vld [vmem:[%s4386_s14 + $0x120] sm:$0xff]  ;;  %v1643_v12 = vadd.f32 %v1642_v3, %v1617_v6  ;;  %v2011_v34 = vld [vmem:[%s4386_s14 + $0x1f0] sm:$0xff] }
 0x3d3   :  { %2170 = vmatpush.bf16.msra.mxu1 %v2979_v60  ;;  %v1983_v60 = vld [vmem:[%s4386_s14 + $0x110] sm:$0xff] }
 0x3d4   :  { %1938 = vmatpush.msrb.mxu0 %v1562_v15  ;;  %3052 = vrsqrt.f32 %v205_v36  ;;  %vm214_vm5 = vweird.f32 %v205_v36  ;;  %2067 = vmatpush.msrb.mxu3 %v1986_v8  ;;  %v1984_v15 = vld [vmem:[%s4386_s14 + $0x118] sm:$0xff]  ;;  %v3005_v6 = vld [vmem:[#allocation9 + $0x88] sm:$0xff] }
 0x3d6   :  { %1939 = vmatpush.msrb.mxu0 %v1558_v19  ;;  %2068 = vmatpush.msrb.mxu3 %v1985_v9  ;;  %v1618_v19 = vperm.slane %v4235_v18, 1 }
 0x3d7   :  { %2171 = vmatpush.bf16.msra.mxu1 %v2978_v33 }
 0x3d8   :  { %1940 = vmatpush.msrb.mxu0 %v1554_v22  ;;  %2069 = vmatpush.msrb.mxu3 %v1984_v15 }
 0x3d9   :  { %1941 = vmatmul.f32.vlgmr.msrb.gmra.mxu0 %v4095_v2  ;;  %v2976_v2 = vld [vmem:[#allocation9 + $0x20] sm:$0xff]  ;;  %v1722_v22 = vpop.f32.mrf.mxu1 }
 0x3da   :  { %v3053_v14 = vpop.eup %3052  ;;  %2070 = vmatpush.msrb.mxu3 %v1983_v60  ;;  %2077 = vmatpush.msra.mxu0 %v2012_v32  ;;  %v2988_v32 = vld [vmem:[#allocation9 + $0x40] sm:$0xff] }
 0x3db   :  { %2172 = vmatpush.bf16.msra.mxu1 %v2977_v25  ;;  %v209_v47 = vmul.f32 %v3053_v14, %v205_v36  ;;  %vm215_vm6 = vweird.f32 %v3053_v14  ;;  %v3011_v25 = vld [vmem:[#allocation9 + $0xb8] sm:$0xff] }
 0x3dc   :  { %vm216_vm7 = vmor %vm214_vm5, %vm215_vm6  ;;  %2071 = vmatpush.msrb.mxu3 %v1982_v26  ;;  %2078 = vmatpush.msra.mxu0 %v2011_v34 }
 0x3dd   :  { %v210_v51 = vmul.f32 %v3053_v14, %v209_v47  ;;  %v2008_v47 = vld [vmem:[%s4386_s14 + $0x1d8] sm:$0xff] }
 0x3de   :  { %2072 = vmatpush.msrb.mxu3 %v1981_v13  ;;  %2079 = vmatpush.msra.mxu0 %v2010_v37 }
 0x3df   :  { %2173 = vmatpush.bf16.msra.mxu1 %v2976_v2  ;;  %v211_v58 = vmul.f32 0.5, %v210_v51  ;;  %v1723_v2 = vadd.f32 %v1722_v22, %v1618_v19  ;;  %v2994_v51 = vld [vmem:[#allocation9 + $0x70] sm:$0xff] }
 0x3e0   :  { %2080 = vmatpush.msra.mxu0 %v2009_v40  ;;  %2342 = vmatpush.bf16.msra.mxu3 %v2995_v44  ;;  %v2990_v22 = vld [vmem:[#allocation9 + $0x50] sm:$0xff] }
 0x3e1   :  { %v212_v62 = vsub.f32 1.5, %v211_v58 }
 0x3e2   :  { %2081 = vmatpush.msra.mxu0 %v2008_v47 }
 0x3e3   :  { %2174 = vmatpush.bf16.msra.mxu1 %v2975_v29  ;;  %v213_v4 = vmul.f32 %v3053_v14, %v212_v62  ;;  %v3006_v62 = vld [vmem:[#allocation9 + $0x90] sm:$0xff] }
 0x3e4   :  { %2082 = vmatpush.msra.mxu0 %v2007_v48  ;;  %2343 = vmatpush.bf16.msra.mxu3 %v2994_v51  ;;  %v2980_v51 = vld [vmem:[#allocation11] sm:$0xff] }
 0x3e5   :  { %v217_v57 = vsel %vm216_vm7, %v3053_v14, %v213_v4  ;;  %v2001_v4 = vld [vmem:[%s4386_s14 + $0x1a0] sm:$0xff]  ;;  %vm2758_vm7 = vcmask 25600  }
 0x3e6   :  { %v238_v17 = vmul.f32 %v217_v57, %v4079_v0  ;;  %2083 = vmatpush.msra.mxu0 %v2006_v50  ;;  %v2991_v57 = vld [vmem:[#allocation9 + $0x58] sm:$0xff]  ;;  %v2981_v50 = vld [vmem:[#allocation11 + $0x8] sm:$0xff] }
 0x3e7   :  { %2175 = vmatpush.bf16.msra.mxu1 %v2974_v31  ;;  %v1662_v7 = vpop.f32.mrf.mxu2 }
 0x3e8   :  { %v1663_v16 = vadd.f32 %v1662_v7, %v1643_v12  ;;  %v244_v24 = vmul.f32 %v4261_v63, %v238_v17  ;;  %2084 = vmatpush.msra.mxu0 %v2005_v53  ;;  %2344 = vmatpush.bf16.msra.mxu3 %v2993_v59  ;;  %v3017_v53 = vld [vmem:[#allocation11 + $0xa8] sm:$0xff]  ;;  %v3015_v59 = vld [vmem:[#allocation11 + $0x98] sm:$0xff] }
 0x3ea   :  { %v250_v31 = vadd.f32 %v4273_v30, %v244_v24  ;;  %2085 = vmatpush.msra.mxu0 %v2004_v54  ;;  %v1998_v24 = vld [vmem:[%s4386_s14 + $0x188] sm:$0xff] }
 0x3eb   :  { %2176 = vmatpush.bf16.msra.mxu1 %v2973_v38 }
 0x3ec   :  { %v2105_v14 = vpack.c.bf16 %v250_v31, %v250_v31  ;;  %2086 = vmatpush.msra.mxu0 %v2003_v61  ;;  %2345 = vmatpush.bf16.msra.mxu3 %v2992_v46  ;;  %v3014_v61 = vld [vmem:[#allocation11 + $0x90] sm:$0xff]  ;;  %v3012_v46 = vld [vmem:[#allocation11 + $0x80] sm:$0xff] }
 0x3ee   :  { %2087 = vmatpush.msra.mxu0 %v2002_v1  ;;  %v3002_v1 = vld [vmem:[#allocation11 + $0x70] sm:$0xff] }
 0x3ef   :  { %2177 = vmatpush.bf16.msra.mxu1 %v2972_v21  ;;  %v1742_v0 = vpop.f32.mrf.mxu2 }
 0x3f0   :  { %v1743_v29 = vadd.f32 %v1742_v0, %v1723_v2  ;;  %2088 = vmatpush.msra.mxu0 %v2001_v4  ;;  %2346 = vmatpush.bf16.msra.mxu3 %v2991_v57  ;;  %v1997_v2 = vld [vmem:[%s4386_s14 + $0x180] sm:$0xff]  ;;  %v2534_v4 = vld [vmem:[#allocation12 + $0x10] sm:$0xff] }
 0x3f1   :  { %v1802_v3 = vpop.f32.mrf.mxu1  ;;  %v2998_v57 = vld [vmem:[#allocation11 + $0x50] sm:$0xff] }
 0x3f4   :  { %2347 = vmatpush.bf16.msra.mxu3 %v2990_v22  ;;  %v3257_v22 = vmov 2  }
 0x3f5   :  { %3040 = vset.pattern.permute.xlu2 %v3257_v22 }
 0x401   :  { %v1682_v43 = vpop.f32.mrf.mxu3 }
 0x402   :  { %v1683_v20 = vadd.f32 %v1682_v43, %v1663_v16  ;;  %v2000_v43 = vld [vmem:[%s4386_s14 + $0x198] sm:$0xff]  ;;  %v3004_v16 = vld [vmem:[#allocation9 + $0x80] sm:$0xff] }
 0x403   :  { %2089 = vmatpush.msra.mxu0 %v2000_v43 }
 0x407   :  { %v1822_v5 = vpop.f32.mrf.mxu2 }
 0x409   :  { %v1762_v28 = vpop.f32.mrf.mxu3 }
 0x40a   :  { %v1763_v36 = vadd.f32 %v1762_v28, %v1743_v29  ;;  %v2987_v28 = vld [vmem:[#allocation11 + $0x38] sm:$0xff] }
 0x40b   :  { %2256 = vmatpush.bf16.msra.mxu2 %v2987_v28 }
 0x413   :  { %v1882_v40 = vpop.f32.mrf.mxu1 }
 0x416   :  { %v1702_v23 = vpop.f32.mrf.mxu0 }
 0x417   :  { %v1703_v33 = vadd.f32 %v1702_v23, %v1683_v20  ;;  %v1999_v20 = vld [vmem:[%s4386_s14 + $0x190] sm:$0xff] }
 0x418   :  { %2090 = vmatpush.msra.mxu0 %v1999_v20 }
 0x419   :  { %v1945_v10 = vmax.f32 %v1703_v33, 0.0 }
 0x41a   :  { %2091 = vmatpush.msra.mxu0 %v1998_v24  ;;  %v3260_v24 = vmov 2.0  }
 0x41b   :  { %2033 = vmatmul.f32.vlgmr.msrb.gmra.mxu1 %v1945_v10  ;;  %v2989_v10 = vld [vmem:[#allocation9 + $0x48] sm:$0xff] }
 0x41c   :  { %2514 = vmatpush.bf16.msrb.mxu1 %v3011_v25  ;;  %v2448_v25 = vpack.c.bf16 %v3594_v42, %v3594_v42  ;;  %2092 = vmatpush.msra.mxu0 %v1997_v2  ;;  %v2986_v42 = vld [vmem:[#allocation11 + $0x30] sm:$0xff] }
 0x41d   :  { %2348 = vmatpush.bf16.msra.mxu3 %v2989_v10  ;;  %2257 = vmatpush.bf16.msra.mxu2 %v2986_v42 }
 0x41e   :  { %v1782_v38 = vpop.f32.mrf.mxu0 }
 0x41f   :  { %v1783_v39 = vadd.f32 %v1782_v38, %v1763_v36  ;;  %v198_v52 = vpop.xlane.xlu2 %197  ;;  %v2985_v36 = vld [vmem:[#allocation11 + $0x28] sm:$0xff]  ;;  %v2984_v38 = vld [vmem:[#allocation11 + $0x20] sm:$0xff] }
 0x420   :  { %2515 = vmatpush.bf16.msrb.mxu1 %v3010_v35  ;;  %v203_v55 = vmul.f32 %v198_v52, %v3392_v11  ;;  %v1619_v11 = vperm.slane %v4235_v18, 2  ;;  %v3019_v52 = vld [vmem:[#allocation11 + $0xb8] sm:$0xff] }
 0x421   :  { %v1946_v21 = vmax.f32 %v1783_v39, 0.0  ;;  %v1842_v9 = vpop.f32.mrf.mxu3  ;;  %2349 = vmatpush.bf16.msra.mxu3 %v2988_v32  ;;  %2258 = vmatpush.bf16.msra.mxu2 %v2985_v36  ;;  %v2983_v39 = vld [vmem:[#allocation11 + $0x18] sm:$0xff] }
 0x422   :  { %v206_v58 = vadd.f32 1e-05, %v203_v55  ;;  %v1803_v8 = vadd.f32 %v1802_v3, %v1619_v11  ;;  %v2190_v55 = vld [vmem:[#allocation12] sm:$0xff]  ;;  %v3013_v11 = vld [vmem:[#allocation11 + $0x88] sm:$0xff] }
 0x423   :  { %2053 = vmatmul.f32.vlgmr.msrb.gmra.mxu2 %v1946_v21  ;;  %2178 = vmatmul.bf16.vlgmr.msra.gmra.mxu1 %v2105_v14  ;;  %v1620_v14 = vperm.slane %v4235_v18, 3  ;;  %v3018_v18 = vld [vmem:[#allocation11 + $0xb0] sm:$0xff]  ;;  %v2191_v54 = vpack.c.bf16 %v2190_v55, %v2190_v55  ;;  %v3001_v3 = vld [vmem:[#allocation11 + $0x68] sm:$0xff] }
 0x424   :  { %2516 = vmatpush.bf16.msrb.mxu1 %v3009_v41  ;;  %3054 = vrsqrt.f32 %v206_v58  ;;  %v1823_v15 = vadd.f32 %v1822_v5, %v1803_v8  ;;  %vm224_vm8 = vweird.f32 %v206_v58  ;;  %v2535_v5 = vpack.c.bf16 %v2534_v4, %v2534_v4  ;;  %v2999_v8 = vld [vmem:[#allocation11 + $0x58] sm:$0xff] }
 0x425   :  { %2259 = vmatpush.bf16.msra.mxu2 %v2984_v38  ;;  %v1883_v21 = vadd.f32 %v1882_v40, %v1620_v14  ;;  %3056 = vrcp.f32 %v3260_v24 }
 0x426   :  { %v1843_v19 = vadd.f32 %v1842_v9, %v1823_v15  ;;  %v2997_v9 = vld [vmem:[#allocation11 + $0x48] sm:$0xff] }
 0x427   :  { %v2362_v15 = vld [vmem:[#allocation12 + $0x8] sm:$0xff] }
 0x428   :  { %2517 = vmatpush.bf16.msrb.mxu1 %v3008_v49 }
 0x429   :  { %2260 = vmatpush.bf16.msra.mxu2 %v2983_v39 }
 0x42a   :  { %v3055_v7 = vpop.eup %3054  ;;  %v1902_v41 = vpop.f32.mrf.mxu2 }
 0x42b   :  { %v219_v12 = vmul.f32 %v3055_v7, %v206_v58  ;;  %vm225_vm9 = vweird.f32 %v3055_v7  ;;  %v1903_v44 = vadd.f32 %v1902_v41, %v1883_v21  ;;  %v3003_v58 = vld [vmem:[#allocation11 + $0x78] sm:$0xff]  ;;  %v3057_v10 = vpop.eup %3056 }
 0x42c   :  { %2518 = vmatpush.bf16.msrb.mxu1 %v3007_v56  ;;  %vm226_vm10 = vmor %vm224_vm8, %vm225_vm9  ;;  %v3016_v56 = vld [vmem:[#allocation11 + $0xa0] sm:$0xff]  ;;  %2429 = vmatpush.bf16.msrb.mxu0 %v3003_v58  ;;  %vm1198_vm12 = vweird.f32 %v3057_v10 }
 0x42d   :  { %v220_v17 = vmul.f32 %v3055_v7, %v219_v12  ;;  %v2996_v12 = vld [vmem:[#allocation11 + $0x40] sm:$0xff] }
 0x42f   :  { %v221_v60 = vmul.f32 0.5, %v220_v17 }
 0x430   :  { %2519 = vmatpush.bf16.msrb.mxu1 %v3006_v62  ;;  %2430 = vmatpush.bf16.msrb.mxu0 %v3002_v1 }
 0x431   :  { %v222_v0 = vsub.f32 1.5, %v221_v60  ;;  %v3259_v60 = vmov 0  }
 0x432   :  { %3038 = vset.pattern.permute.xlu0 %v3259_v60 }
 0x433   :  { %v223_v13 = vmul.f32 %v3055_v7, %v222_v0  ;;  %v3047_v0 = vld [vmem:[%s4409_s28] ss:$0 sm:$0xff] }
 0x434   :  { %2520 = vmatpush.bf16.msrb.mxu1 %v3005_v6  ;;  %2431 = vmatpush.bf16.msrb.mxu0 %v3001_v3 }
 0x435   :  { %v227_v29 = vsel %vm226_vm10, %v3055_v7, %v223_v13  ;;  %v3000_v7 = vld [vmem:[#allocation11 + $0x60] sm:$0xff]  ;;  %v1186_v13 = vsel %vm1185_vm11, %v4091_v45, 0.0 }
 0x436   :  { %v1862_v23 = vpop.f32.mrf.mxu0  ;;  %v239_v31 = vmul.f32 %v227_v29, %v4103_v27  ;;  %v2982_v27 = vld [vmem:[#allocation11 + $0x10] sm:$0xff]  ;;  %v1187_v32 = vrot.slane %v1186_v13, 4 }
 0x437   :  { %v1863_v33 = vadd.f32 %v1862_v23, %v1843_v19  ;;  %2261 = vmatpush.bf16.msra.mxu2 %v2982_v27  ;;  %v3258_v23 = vmov 1  }
 0x438   :  { %2521 = vmatpush.bf16.msrb.mxu1 %v3004_v16  ;;  %v245_v34 = vmul.f32 %v4261_v63, %v239_v31  ;;  %2432 = vmatpush.bf16.msrb.mxu0 %v3000_v7  ;;  %v2363_v16 = vpack.c.bf16 %v2362_v15, %v2362_v15  ;;  %v1194_v31 = vmul.f32 2.0, %v3057_v10 }
 0x439   :  { %v1947_v26 = vmax.f32 %v1863_v33, 0.0  ;;  %3039 = vset.pattern.permute.xlu1 %v3258_v23 }
 0x43a   :  { %v251_v35 = vadd.f32 %v4273_v30, %v245_v34  ;;  %v1195_v36 = vsub.f32 1.0, %v1194_v31 }
 0x43b   :  { %2073 = vmatmul.f32.vlgmr.msrb.gmra.mxu3 %v1947_v26  ;;  %2522 = vmatmul.bf16.vlgmr.msrb.gmra.mxu1 %v2448_v25 }
 0x43c   :  { %v2276_v37 = vpack.c.bf16 %v251_v35, %v251_v35  ;;  %2262 = vmatpush.bf16.msra.mxu2 %v2981_v50  ;;  %2433 = vmatpush.bf16.msrb.mxu0 %v2999_v8  ;;  %v1196_v14 = vmul.f32 %v3057_v10, %v1195_v36 }
 0x43e   :  { %v1197_v21 = vadd.f32 %v3057_v10, %v1196_v14 }
 0x440   :  { %2263 = vmatpush.bf16.msra.mxu2 %v2980_v51  ;;  %2434 = vmatpush.bf16.msrb.mxu0 %v2998_v57 }
 0x441   :  { %v1922_v63 = vpop.f32.mrf.mxu3 }
 0x442   :  { %v1923_v47 = vadd.f32 %v1922_v63, %v1903_v44 }
 0x443   :  { %2350 = vmatmul.bf16.vlgmr.msra.gmra.mxu3 %v2276_v37  ;;  %2264 = vmatmul.bf16.vlgmr.msra.gmra.mxu2 %v2191_v54  ;;  %v1188_v37 = vadd.f32 %v1187_v32, %v1186_v13 }
 0x444   :  { %2601 = vmatpush.bf16.msrb.mxu2 %v3019_v52  ;;  %2435 = vmatpush.bf16.msrb.mxu0 %v2997_v9 }
 0x445   :  { %v1189_v27 = vrot.slane %v1188_v37, 2 }
 0x447   :  { %v1190_v63 = vadd.f32 %v1189_v27, %v1188_v37 }
 0x448   :  { %2602 = vmatpush.bf16.msrb.mxu2 %v3018_v18  ;;  %2436 = vmatpush.bf16.msrb.mxu0 %v2996_v12 }
 0x44c   :  { %2603 = vmatpush.bf16.msrb.mxu2 %v3017_v53 }
 0x450   :  { %2604 = vmatpush.bf16.msrb.mxu2 %v3016_v56 }
 0x454   :  { %2605 = vmatpush.bf16.msrb.mxu2 %v3015_v59 }
 0x456   :  { %v1942_v30 = vpop.f32.mrf.mxu0 }
 0x457   :  { %v1943_v48 = vadd.f32 %v1942_v30, %v1923_v47  ;;  %v4342_v47 = vsel %vm1198_vm12, %v3057_v10, %v1197_v21  ;;  %v1191_v30 = vrot.slane %v1190_v63, 1 }
 0x458   :  { %2606 = vmatpush.bf16.msrb.mxu2 %v3014_v61 }
 0x459   :  { %v1948_v49 = vmax.f32 %v1943_v48, 0.0 }
 0x45b   :  { %2093 = vmatmul.f32.vlgmr.msra.gmra.mxu0 %v1948_v49  ;;  %v1192_v49 = vadd.f32 %v1191_v30, %v1190_v63 }
 0x45c   :  { %2607 = vmatpush.bf16.msrb.mxu2 %v3013_v11 }
 0x45d   :  { %v1200_v50 = vmul.f32 %v4342_v47, %v1192_v49 }
 0x460   :  { %2608 = vmatpush.bf16.msrb.mxu2 %v3012_v46 }
 0x463   :  { %2609 = vmatmul.bf16.vlgmr.msrb.gmra.mxu2 %v2535_v5  ;;  %2437 = vmatmul.bf16.vlgmr.msrb.gmra.mxu0 %v2363_v16 }
 0x498   :  { %v2034_v62 = vpop.f32.mrf.mxu1 }
 0x499   :  { %v2035_v2 = vadd.f32 %v3047_v0, %v2034_v62 }
 0x4a0   :  { %v4332_v6 = vpop.f32.mrf.mxu1 }
 0x4a6   :  { %v2054_v26 = vpop.f32.mrf.mxu2 }
 0x4a7   :  { %v2055_v28 = vadd.f32 %v2054_v26, %v2035_v2 }
 0x4a8   :  { %v2181_v43 = vpop.f32.mrf.mxu1 }
 0x4b8   :  { %v4334_v17 = vpop.f32.mrf.mxu1 }
 0x4be   :  { %v2074_v19 = vpop.f32.mrf.mxu3 }
 0x4bf   :  { %v2075_v29 = vadd.f32 %v2074_v19, %v2055_v28 }
 0x4c0   :  { %v2525_v20 = vpop.f32.mrf.mxu1 }
 0x4c6   :  { %v4336_v33 = vpop.f32.mrf.mxu3  ;;  %v2265_v51 = vpop.f32.mrf.mxu2 }
 0x4ce   :  { %v2353_v25 = vpop.f32.mrf.mxu3  ;;  %v2267_v52 = vpop.f32.mrf.mxu2 }
 0x4d8   :  { %v2094_v42 = vpop.f32.mrf.mxu0 }
 0x4d9   :  { %v2095_v34 = vadd.f32 %v2094_v42, %v2075_v29 }
 0x4db   :  { %v2097_v35 = vsel %vm1185_vm11, %v2095_v34, 0.0 }
 0x4dc   :  { %v2098_v38 = vrot.slane %v2097_v35, 4 }
 0x4de   :  { %v2099_v39 = vadd.f32 %v2098_v38, %v2097_v35 }
 0x4e0   :  { %v2100_v40 = vrot.slane %v2099_v39, 2  ;;  %v2438_v55 = vpop.f32.mrf.mxu0 }
 0x4e2   :  { %v2101_v41 = vadd.f32 %v2100_v40, %v2099_v39 }
 0x4e4   :  { %v2102_v44 = vrot.slane %v2101_v41, 1 }
 0x4e6   :  { %v2103_v45 = vadd.f32 %v2102_v44, %v2101_v41  ;;  %v2610_v18 = vpop.f32.mrf.mxu2 }
 0x4e8   :  { %v2104_v48 = vmul.f32 %v2103_v45, %v4342_v47  ;;  %v2440_v56 = vpop.f32.mrf.mxu0 }
 0x4ea   :  { %2615 = vperm.xlu2 %3040, %v2104_v48   ;;  %2443 = vperm.xlu1 %3039, %v2104_v48  }
 0x4eb   :  { %2271 = vperm.xlu0 %3038, %v2104_v48  }
 0x4ee   :  { %v2612_v53 = vpop.f32.mrf.mxu2 }
 0x4f2   :  { %3041 = vset.pattern.permute.xlu2 %v3259_v60  ;;  %2356 = vperm.xlu1 %3039, %v1200_v50  }
 0x4f3   :  { %2185 = vperm.xlu2 %3041, %v1200_v50  }
 0x4fb   :  { %3042 = vset.pattern.permute.xlu2 %v3257_v22 }
 0x4fc   :  { %2528 = vperm.xlu2 %3042, %v1200_v50  }
 0x504   :  { %3043 = vset.pattern.permute.xlu2 %v3259_v60 }
 0x544   :  { %v2616_v54 = vpop.permute.xlu2 %2615 }
 0x545   :  { %v2618_v1 = vmul.f32 %v2616_v54, %v2610_v18 }
 0x54d   :  { %v2186_v58 = vpop.permute.xlu2 %2185 }
 0x54e   :  { %v2188_v15 = vmul.f32 %v2186_v58, %v4332_v6  ;;  %v2717_v58 = vld [vmem:[#allocation2] sm:$0x1] }
 0x556   :  { %v2529_v57 = vpop.permute.xlu2 %2528 }
 0x557   :  { %v2531_v0 = vmul.f32 %v2529_v57, %v4334_v17 }
 0x55c   :  { %v2444_v59 = vpop.permute.xlu1 %2443 }
 0x55d   :  { %v2446_v61 = vmul.f32 %v2444_v59, %v2438_v55  ;;  %v2272_v62 = vpop.permute.xlu0 %2271  ;;  %v2718_v59 = vmul.f32 1.442695, %v2717_v58 }
 0x55e   :  { %v2274_v11 = vmul.f32 %v2272_v62, %v2265_v51 }
 0x560   :  { %v2447_v46 = vadd.f32 %v2446_v61, %v2274_v11 }
 0x562   :  { %v2619_v3 = vadd.f32 %v2618_v1, %v2447_v46 }
 0x564   :  { %v2621_v4 = vrot.slane %v2619_v3, 2  ;;  %v2622_v5 = vrot.slane %v2619_v3, 4  ;;  %v2623_v7 = vrot.slane %v2619_v3, 6  ;;  %v2627_v8 = vsel %vm167_vm0, %v2619_v3, 0.0  ;;  %v2357_v43 = vpop.permute.xlu1 %2356 }
 0x565   :  { %v2628_v9 = vrot.slane %v2627_v8, 4  ;;  %v2359_v12 = vmul.f32 %v2357_v43, %v4336_v33 }
 0x566   :  { %v2634_v16 = vsel %vm167_vm0, %v2621_v4, 0.0  ;;  %v2641_v19 = vsel %vm167_vm0, %v2622_v5, 0.0  ;;  %v2648_v20 = vsel %vm167_vm0, %v2623_v7, 0.0 }
 0x567   :  { %v2629_v22 = vadd.f32 %v2628_v9, %v2627_v8  ;;  %v2635_v23 = vrot.slane %v2634_v16, 4  ;;  %v2642_v60 = vrot.slane %v2641_v19, 4  ;;  %v2649_v24 = vrot.slane %v2648_v20, 4 }
 0x568   :  { %v2360_v25 = vadd.f32 %v2359_v12, %v2188_v15 }
 0x569   :  { %v2630_v26 = vrot.slane %v2629_v22, 2  ;;  %v2636_v2 = vadd.f32 %v2635_v23, %v2634_v16  ;;  %v2643_v10 = vadd.f32 %v2642_v60, %v2641_v19  ;;  %v2650_v13 = vadd.f32 %v2649_v24, %v2648_v20 }
 0x56a   :  { %v4353_v33 = vadd.f32 %v2531_v0, %v2360_v25 }
 0x56b   :  { %v2631_v6 = vadd.f32 %v2630_v26, %v2629_v22  ;;  %v2637_v28 = vrot.slane %v2636_v2, 2  ;;  %v2644_v29 = vrot.slane %v2643_v10, 2  ;;  %v2651_v31 = vrot.slane %v2650_v13, 2 }
 0x56c   :  { %v2659_v32 = vmul.f32 %v4353_v33, %v4353_v33 }
 0x56d   :  { %v2632_v42 = vrot.slane %v2631_v6, 1  ;;  %v2638_v34 = vadd.f32 %v2637_v28, %v2636_v2  ;;  %v2645_v35 = vadd.f32 %v2644_v29, %v2643_v10  ;;  %v2652_v36 = vadd.f32 %v2651_v31, %v2650_v13 }
 0x56e   :  { %v2660_v17 = vsel %vm167_vm0, %v2659_v32, 0.0  ;;  %vm2690_vm0 = vcmask 1043456  }
 0x56f   :  { %2661 = vadd.xlane.f32.xlu0 %v2660_v17  ;;  %v2633_v37 = vadd.f32 %v2632_v42, %v2631_v6  ;;  %v2639_v38 = vrot.slane %v2638_v34, 1  ;;  %v2646_v39 = vrot.slane %v2645_v35, 1  ;;  %v2653_v14 = vrot.slane %v2652_v36, 1 }
 0x571   :  { %v2640_v27 = vadd.f32 %v2639_v38, %v2638_v34  ;;  %v2647_v40 = vadd.f32 %v2646_v39, %v2645_v35  ;;  %v2654_v41 = vadd.f32 %v2653_v14, %v2652_v36  ;;  %v2655_v21 = vmul.f32 %v2633_v37, %v4342_v47 }
 0x573   :  { %v2656_v63 = vmul.f32 %v2640_v27, %v4342_v47  ;;  %v2657_v44 = vmul.f32 %v2647_v40, %v4342_v47  ;;  %v2658_v45 = vmul.f32 %v2654_v41, %v4342_v47  ;;  %v2675_v30 = vmul.f32 %v2655_v21, %v2655_v21 }
 0x575   :  { %v2676_v48 = vmul.f32 %v2656_v63, %v2656_v63  ;;  %v2677_v49 = vmul.f32 %v2657_v44, %v2657_v44  ;;  %v2678_v50 = vmul.f32 %v2658_v45, %v2658_v45 }
 0x577   :  { %v2684_v51 = vsel %vm2683_vm13, %v2676_v48, %v2675_v30 }
 0x578   :  { %v2686_v52 = vsel %vm2685_vm14, %v2677_v49, %v2684_v51 }
 0x579   :  { %v2688_v18 = vsel %vm2687_vm15, %v2678_v50, %v2686_v52 }
 0x57a   :  { %v2691_v53 = vsel %vm2690_vm0, %v2688_v18, 0.0 }
 0x57b   :  { %2692 = vadd.xlane.f32.xlu1 %v2691_v53 }
 0x5e2   :  { %v2662_v55 = vpop.xlane.xlu0 %2661 }
 0x5e3   :  { %v2663_v56 = vadd.f32 1e-12, %v2662_v55 }
 0x5e5   :  { %3058 = vrsqrt.f32 %v2663_v56  ;;  %vm2670_vm5 = vweird.f32 %v2663_v56 }
 0x5eb   :  { %v3059_v61 = vpop.eup %3058 }
 0x5ec   :  { %v2665_v62 = vmul.f32 %v3059_v61, %v2663_v56  ;;  %vm2671_vm4 = vweird.f32 %v3059_v61 }
 0x5ed   :  { %vm2672_vm6 = vmor %vm2670_vm5, %vm2671_vm4 }
 0x5ee   :  { %v2693_v47 = vpop.xlane.xlu1 %2692  ;;  %v2666_v4 = vmul.f32 %v3059_v61, %v2665_v62 }
 0x5ef   :  { %v2694_v54 = vadd.f32 1e-12, %v2693_v47 }
 0x5f0   :  { %v2667_v8 = vmul.f32 0.5, %v2666_v4 }
 0x5f1   :  { %3060 = vrsqrt.f32 %v2694_v54  ;;  %vm2701_vm2 = vweird.f32 %v2694_v54 }
 0x5f2   :  { %3062 = vpow2.f32 %v2718_v59  ;;  %v2668_v9 = vsub.f32 1.5, %v2667_v8 }
 0x5f4   :  { %v2669_v60 = vmul.f32 %v3059_v61, %v2668_v9 }
 0x5f6   :  { %v2673_v10 = vsel %vm2672_vm6, %v3059_v61, %v2669_v60 }
 0x5f7   :  { %v3061_v11 = vpop.eup %3060  ;;  %v2674_v28 = vmul.f32 %v2673_v10, %v4353_v33 }
 0x5f8   :  { %v3063_v1 = vpop.eup %3062  ;;  %v2696_v46 = vmul.f32 %v3061_v11, %v2694_v54  ;;  %vm2702_vm1 = vweird.f32 %v3061_v11 }
 0x5f9   :  { %v2752_v3 = vperm.slane %v3063_v1, 0  ;;  %vm2703_vm3 = vmor %vm2701_vm2, %vm2702_vm1 }
 0x5fa   :  { %v2697_v5 = vmul.f32 %v3061_v11, %v2696_v46 }
 0x5fb   :  { %2754 = vperm.xlu2 %3043, %v2752_v3  }
 0x5fc   :  { %v2698_v7 = vmul.f32 0.5, %v2697_v5 }
 0x5fe   :  { %v2699_v43 = vsub.f32 1.5, %v2698_v7 }
 0x600   :  { %v2700_v57 = vmul.f32 %v3061_v11, %v2699_v43 }
 0x602   :  { %v2704_v12 = vsel %vm2703_vm3, %v3061_v11, %v2700_v57 }
 0x603   :  { %v2706_v15 = vrot.slane %v2704_v12, 1  ;;  %v2707_v16 = vrot.slane %v2704_v12, 2  ;;  %v2708_v19 = vrot.slane %v2704_v12, 3  ;;  %v2713_v24 = vmul.f32 %v2704_v12, %v2655_v21 }
 0x605   :  { %v2714_v20 = vmul.f32 %v2706_v15, %v2656_v63  ;;  %v2715_v22 = vmul.f32 %v2707_v16, %v2657_v44  ;;  %v2716_v23 = vmul.f32 %v2708_v19, %v2658_v45 }
 0x607   :  { %v2724_v0 = vrot.slane %v2714_v20, 7  ;;  %v2726_v25 = vrot.slane %v2715_v22, 6  ;;  %v2728_v2 = vrot.slane %v2716_v23, 5 }
 0x609   :  { %v2725_v26 = vsel %vm2683_vm13, %v2724_v0, %v2713_v24 }
 0x60a   :  { %v2727_v13 = vsel %vm2685_vm14, %v2726_v25, %v2725_v26 }
 0x60b   :  { %v2729_v6 = vsel %vm2687_vm15, %v2728_v2, %v2727_v13 }
 0x60c   :  { %2746 = vmatpush.xpose.msrb.mxu3 %v2729_v6 }
 0x60f   :  { %2747 = vmatmul.f32.vlgmr.msrb.gmra.mxu3 %v2674_v28 }
 0x655   :  { %v2755_v29 = vpop.permute.xlu2 %2754 }
 0x692   :  { %v2748_v31 = vpop.f32.mrf.mxu3 }
 0x693   :  { %v2757_v32 = vmul.f32 %v2755_v29, %v2748_v31 }
 0x695   :  { %2759 = vst.msk [vmem:[#allocation14] sm:$0x3] %vm2758_vm7, %v2757_v32 }
 0x696   :  { %2770 = dma.vmem_to_hbm [thread:$0]  %s2766_s30, 32, %s2768_s9, [#allocation5]  }
 0x697   :  { %3242 = dma.done.wait [#allocation5], 32  }
 0x698   :  { %3243 = vsyncadd [#allocation5], 4294967264 }
 0x699   :  { %2775 = vsyncpa [#allocation4], 1 }
 0x69a   :  { %2776 = vsyncpa [#allocation7], 1 }
 0x69b   :  { %2777 = vsyncpa [#allocation10], 1 }
 0x69c   :  { %2778 = vsyncpa [#allocation13], 1 }
 0x69d   :  { %2779 = vsyncpa [#allocation5], 1 }

</bundles_post_ra>
